<compile_context>
chip_gen: v7x
topology: tpu7x:2x2x1
jax: 0.10.0
libtpu: 0.0.40
codegen_flags: <defaults>
</compile_context>

<pallas_src>
import math
import functools

import jax
import jax.numpy as jnp
from jax.experimental import pallas as pl
from jax.experimental.pallas import tpu as pltpu


# ----------------------------------------------------------------------------
# In-kernel helper: one GraphConv (+ normalize) [+ ReLU] [+ training-mode BN]
# ----------------------------------------------------------------------------
def _gcn_layer(h, adj, w, b, apply_act, apply_bn):
    B, N, Din = h.shape
    Dout = w.shape[1]
    # y = adj @ h   (batched matmul, MXU)
    y = jnp.einsum("bij,bjd->bid", adj, h, preferred_element_type=jnp.float32)
    # y = y @ W + bias  -- flattened so the MXU sees one [B*N,Din]x[Din,Dout] push
    y = jnp.dot(y.reshape(B * N, Din), w,
                preferred_element_type=jnp.float32).reshape(B, N, Dout) + b
    # F.normalize(y, p=2, dim=2): v / max(||v||_2, 1e-12)
    #   == v * rsqrt(max(sum(v^2), 1e-24))   (single EUP rsqrt, clamp inside sqrt)
    sumsq = jnp.sum(y * y, axis=2, keepdims=True)
    y = y * jax.lax.rsqrt(jnp.maximum(sumsq, 1e-24))
    if apply_act:
        y = jnp.maximum(y, 0.0)
    if apply_bn:
        # Fresh BatchNorm1d(N) in training mode: per-node stats over (batch, feat),
        # gamma=1, beta=0, eps=1e-5, biased variance.
        inv_cnt = 1.0 / float(B * Dout)
        mean = jnp.sum(jnp.sum(y, axis=2, keepdims=True),
                       axis=0, keepdims=True) * inv_cnt          # [1, N, 1]
        d = y - mean
        var = jnp.sum(jnp.sum(d * d, axis=2, keepdims=True),
                      axis=0, keepdims=True) * inv_cnt
        y = d * jax.lax.rsqrt(var + 1e-5)
    return y


# ----------------------------------------------------------------------------
# Fused forward kernel: GCN stack + concat + Set2Set recurrence + pred layers
# ----------------------------------------------------------------------------
def fused_forward_kernel(*refs, num_blocks, p_real, p_pad):
    (x_ref, adj_ref, w1_ref, b1_ref) = refs[0:4]
    wb_refs = refs[4:4 + num_blocks]
    bb_refs = refs[4 + num_blocks:4 + 2 * num_blocks]
    (wl_ref, bl_ref,
     wlstm_ref, blstm_ref,
     wpred_ref, bpred_ref,
     wfin_ref, bfin_ref,
     out_ref) = refs[4 + 2 * num_blocks:]

    x = x_ref[...]            # [B, N, Din]
    adj = adj_ref[...]        # [B, N, N]   (loaded once, reused by every layer)
    B, N, _ = x.shape
    Pp = p_pad

    # --- GCN stack: conv_first (relu+bn), conv_block (relu+bn), conv_last ---
    h = _gcn_layer(x, adj, w1_ref[...], b1_ref[...], True, True)
    h_all = [h]
    for i in range(num_blocks):
        h = _gcn_layer(h, adj, wb_refs[i][...], bb_refs[i][...], True, True)
        h_all.append(h)
    h_last = _gcn_layer(h, adj, wl_ref[...], bl_ref[...], False, False)
    h_all.append(h_last)
    if p_pad > p_real:
        # Lane-pad the embedding to Pp=multiple of 128 so every downstream slice /
        # matmul in the recurrence is tile-aligned.  Pad lanes are exactly zero.
        h_all.append(jnp.zeros((B, N, p_pad - p_real), jnp.float32))
    emb = jnp.concatenate(h_all, axis=2)                    # [B, N, Pp], stays in VMEM

    # --- Set2Set: N processing steps, fused single-matmul LSTM + MXU attention ---
    # Weight/bias loads hoisted once before the loop (closure captures, not refs).
    w_lstm = wlstm_ref[...]                                 # [2Pp, 4Pp] (w_hh folded)
    gate_bias = jnp.broadcast_to(blstm_ref[...], (B, 4 * Pp))   # hoisted broadcast
    w_pred = wpred_ref[...]                                 # [2Pp, Pp]
    b_pred = bpred_ref[...]                                 # [1, Pp]
    w_fin = wfin_ref[...]                                   # [Pp, L]
    b_fin = bfin_ref[...]                                   # [1, L]

    h0 = jnp.zeros((B, Pp), jnp.float32)                    # LSTM hidden == q
    c0 = jnp.zeros((B, Pp), jnp.float32)
    r0 = jnp.zeros((B, Pp), jnp.float32)                    # read vector

    def step(_, carry):
        h_t, c_t, r_t = carry
        # q_star = [q, r] -> single fused gate matmul (one MXU push per step).
        qstar = jnp.concatenate([h_t, r_t], axis=1)          # [B, 2Pp] lane-aligned
        gates = jnp.dot(qstar, w_lstm,
                        preferred_element_type=jnp.float32) + gate_bias   # [B, 4Pp]
        # 128-lane-aligned gate slices (gate order i, f, g, o).
        i_g = jax.nn.sigmoid(gates[:, 0 * Pp:1 * Pp])
        f_g = jax.nn.sigmoid(gates[:, 1 * Pp:2 * Pp])
        g_g = jnp.tanh(gates[:, 2 * Pp:3 * Pp])
        o_g = jax.nn.sigmoid(gates[:, 3 * Pp:4 * Pp])
        c_n = f_g * c_t + i_g * g_g
        h_n = o_g * jnp.tanh(c_n)                            # q_t  (pad lanes stay 0)
        # attention over nodes on the MXU: e = emb . q ; softmax over N ; read r
        e = jnp.einsum("bnp,bmp->bnm", emb, h_n[:, None, :],
                       preferred_element_type=jnp.float32)[:, :, 0]       # [B, N]
        e = e - jnp.max(e, axis=1, keepdims=True)
        a = jnp.exp(e)
        a = a * pl.reciprocal(jnp.sum(a, axis=1, keepdims=True), approx=True)
        r_n = jnp.einsum("bmn,bnp->bmp", a[:, None, :], emb,
                         preferred_element_type=jnp.float32)[:, 0, :]     # [B, Pp]
        return (h_n, c_n, r_n)

    h_t, c_t, r_t = jax.lax.fori_loop(0, N, step, (h0, c0, r0), unroll=True)

    # Set2Set output: ReLU(Linear(q_star)) with q_star = [h, r]  (fused [2Pp,Pp] matmul)
    qstar = jnp.concatenate([h_t, r_t], axis=1)
    s2s = jnp.maximum(
        jnp.dot(qstar, w_pred, preferred_element_type=jnp.float32) + b_pred, 0.0)
    # pred_model: Linear(P -> label_dim)
    out_ref[...] = (jnp.dot(s2s, w_fin, preferred_element_type=jnp.float32) + b_fin)


def gcn_set2set_encoder_forward(x, adj, params):
    num_blocks = len(params["w_block"])
    B, N, _ = x.shape
    L = params["w_fin"].shape[1]
    p_pad = params["w_lstm"].shape[1] // 4
    p_real = (params["w_first"].shape[1]
              + sum(int(w.shape[1]) for w in params["w_block"])
              + params["w_last"].shape[1])

    inputs = [x, adj, params["w_first"], params["b_first"]]
    inputs += list(params["w_block"])
    inputs += list(params["b_block"])
    inputs += [params["w_last"], params["b_last"],
               params["w_lstm"], params["b_lstm"],
               params["w_pred"], params["b_pred"],
               params["w_fin"], params["b_fin"]]

    kernel = functools.partial(fused_forward_kernel, num_blocks=num_blocks,
                               p_real=p_real, p_pad=p_pad)
    return pl.pallas_call(
        kernel,
        out_shape=jax.ShapeDtypeStruct((B, L), jnp.float32),
        in_specs=[pl.BlockSpec(memory_space=pltpu.MemorySpace.VMEM)] * len(inputs),
        out_specs=pl.BlockSpec(memory_space=pltpu.MemorySpace.VMEM),
        compiler_params=pltpu.CompilerParams(vmem_limit_bytes=32 * 1024 * 1024),
    )(*inputs)


# ----------------------------------------------------------------------------
# Parameter initialization (deterministic, matching shapes from __init__)
# ----------------------------------------------------------------------------
def xavier_uniform(key, shape, gain):
    fan_in, fan_out = shape
    a = gain * math.sqrt(6.0 / (fan_in + fan_out))
    return jax.random.uniform(key, shape, jnp.float32, -a, a)


def uniform_pm(key, shape, bound):
    return jax.random.uniform(key, shape, jnp.float32, -bound, bound)


if __name__ == "__main__":
    # Small shapes consistent with the module
    B, N = 2, 16
    input_dim, hidden_dim, embedding_dim, label_dim, num_layers = 8, 16, 16, 4, 3
    P = hidden_dim * (num_layers - 1) + embedding_dim          # pred_input_dim = 48
    Pp = ((P + 127) // 128) * 128                              # lane-padded P = 128

    key = jax.random.PRNGKey(0)
    ks = jax.random.split(key, 16)
    gain = math.sqrt(2.0)  # calculate_gain('relu')

    params = {}
    params["w_first"] = xavier_uniform(ks[0], (input_dim, hidden_dim), gain)
    params["b_first"] = jnp.zeros((1, hidden_dim), jnp.float32)
    params["w_block"] = [xavier_uniform(ks[1 + i], (hidden_dim, hidden_dim), gain)
                         for i in range(num_layers - 2)]
    params["b_block"] = [jnp.zeros((1, hidden_dim), jnp.float32)
                         for _ in range(num_layers - 2)]
    params["w_last"] = xavier_uniform(ks[3], (hidden_dim, embedding_dim), gain)
    params["b_last"] = jnp.zeros((1, embedding_dim), jnp.float32)

    # Set2Set LSTM: input size 2P, hidden size P, gate order (i, f, g, o).
    kb = 1.0 / math.sqrt(P)
    w_ih = uniform_pm(ks[4], (4 * P, 2 * P), kb)
    w_hh = uniform_pm(ks[5], (4 * P, P), kb)
    b_ih = uniform_pm(ks[6], (4 * P,), kb)
    b_hh = uniform_pm(ks[7], (4 * P,), kb)
    w_ih_g = w_ih.reshape(4, P, 2 * P)                 # per-gate [P_out, 2P_in]
    w_hh_g = w_hh.reshape(4, P, P)                     # per-gate [P_out, P_in]
    b_g = (b_ih + b_hh).reshape(4, P)
    # Fused + lane-padded gate weights: q_star's first half IS h_{t-1}, so fold
    # w_ih[:, :P] and w_hh; gate g occupies columns [g*Pp, g*Pp+P) (pad lanes zero).
    w_lstm = jnp.zeros((2 * Pp, 4 * Pp), jnp.float32)
    b_lstm = jnp.zeros((1, 4 * Pp), jnp.float32)
    for g in range(4):
        w_lstm = w_lstm.at[0:P, g * Pp:g * Pp + P].set((w_ih_g[g, :, :P] + w_hh_g[g]).T)
        w_lstm = w_lstm.at[Pp:Pp + P, g * Pp:g * Pp + P].set(w_ih_g[g, :, P:].T)
        b_lstm = b_lstm.at[0, g * Pp:g * Pp + P].set(b_g[g])
    params["w_lstm"] = w_lstm
    params["b_lstm"] = b_lstm

    # Set2Set.pred: Linear(2P -> P), fused over [h, r] and lane-padded.
    kp = 1.0 / math.sqrt(2 * P)
    w_pred_t = uniform_pm(ks[8], (P, 2 * P), kp)       # torch layout [out, in]
    b_pred_t = uniform_pm(ks[9], (P,), kp)
    w_pred = jnp.zeros((2 * Pp, Pp), jnp.float32)
    w_pred = w_pred.at[0:P, 0:P].set(w_pred_t[:, :P].T)
    w_pred = w_pred.at[Pp:Pp + P, 0:P].set(w_pred_t[:, P:].T)
    params["w_pred"] = w_pred
    params["b_pred"] = jnp.zeros((1, Pp), jnp.float32).at[0, 0:P].set(b_pred_t)

    # pred_model: Linear(P -> label_dim), rows lane-padded (pad rows zero).
    kf = 1.0 / math.sqrt(P)
    w_fin_t = uniform_pm(ks[10], (label_dim, P), kf)
    b_fin_t = uniform_pm(ks[11], (label_dim,), kf)
    params["w_fin"] = jnp.zeros((Pp, label_dim), jnp.float32).at[0:P, :].set(w_fin_t.T)
    params["b_fin"] = b_fin_t.reshape(1, label_dim)

    # Inputs
    x = jax.random.normal(ks[12], (B, N, input_dim), jnp.float32)
    adj_raw = jax.random.uniform(ks[13], (B, N, N), jnp.float32)
    adj = 0.5 * (adj_raw + jnp.transpose(adj_raw, (0, 2, 1)))

    ypred = gcn_set2set_encoder_forward(x, adj, params)
    jax.block_until_ready(ypred)
    assert ypred.shape == (B, label_dim)
    print("KERNEL_OK")
</pallas_src>

<mosaic_0001>
module attributes {stable_mosaic.version = 11 : i64} {
  func.func @fused_forward_kernel(%arg0: memref<2x16x8xf32, #tpu.memory_space<vmem>>, %arg1: memref<2x16x16xf32, #tpu.memory_space<vmem>>, %arg2: memref<8x16xf32, #tpu.memory_space<vmem>>, %arg3: memref<1x16xf32, #tpu.memory_space<vmem>>, %arg4: memref<16x16xf32, #tpu.memory_space<vmem>>, %arg5: memref<1x16xf32, #tpu.memory_space<vmem>>, %arg6: memref<16x16xf32, #tpu.memory_space<vmem>>, %arg7: memref<1x16xf32, #tpu.memory_space<vmem>>, %arg8: memref<256x512xf32, #tpu.memory_space<vmem>>, %arg9: memref<1x512xf32, #tpu.memory_space<vmem>>, %arg10: memref<256x128xf32, #tpu.memory_space<vmem>>, %arg11: memref<1x128xf32, #tpu.memory_space<vmem>>, %arg12: memref<128x4xf32, #tpu.memory_space<vmem>>, %arg13: memref<1x4xf32, #tpu.memory_space<vmem>>, %arg14: memref<2x4xf32, #tpu.memory_space<vmem>>) attributes {dimension_semantics = [], scalar_prefetch = 0 : i64, scratch_operands = 0 : i64, tpu.core_type = #tpu.core_type<tc>} {
    %c0 = arith.constant 0 : index
    %c0_0 = arith.constant 0 : index
    %c0_1 = arith.constant 0 : index
    %0 = vector.load %arg0[%c0, %c0_0, %c0_1] : memref<2x16x8xf32, #tpu.memory_space<vmem>>, vector<2x16x8xf32>
    %c0_2 = arith.constant 0 : index
    %c0_3 = arith.constant 0 : index
    %c0_4 = arith.constant 0 : index
    %1 = vector.load %arg1[%c0_2, %c0_3, %c0_4] : memref<2x16x16xf32, #tpu.memory_space<vmem>>, vector<2x16x16xf32>
    %c0_5 = arith.constant 0 : index
    %c0_6 = arith.constant 0 : index
    %2 = vector.load %arg2[%c0_5, %c0_6] : memref<8x16xf32, #tpu.memory_space<vmem>>, vector<8x16xf32>
    %c0_7 = arith.constant 0 : index
    %c0_8 = arith.constant 0 : index
    %3 = vector.load %arg3[%c0_7, %c0_8] : memref<1x16xf32, #tpu.memory_space<vmem>>, vector<1x16xf32>
    "tpu.trace_start"() <{level = 10 : i32, message = "bij,bjd->bid"}> : () -> ()
    %cst = arith.constant dense<0.000000e+00> : vector<2x16x8xf32>
    %4 = tpu.matmul %1, %0, %cst {dimension_numbers = #tpu.dot_dimension_numbers<[2], [1], [1], [2], [0, 0, 0, 1, 1, 2], [0], [0]>} : vector<2x16x16xf32>, vector<2x16x8xf32>, vector<2x16x8xf32> -> vector<2x16x8xf32>
    "tpu.trace_stop"() : () -> ()
    %5 = vector.shape_cast %4 : vector<2x16x8xf32> to vector<32x8xf32>
    %cst_9 = arith.constant dense<0.000000e+00> : vector<32x16xf32>
    %6 = tpu.matmul %5, %2, %cst_9 {dimension_numbers = #tpu.dot_dimension_numbers<[1], [0], [0], [1], [0, 0, 1, 1], [], []>} : vector<32x8xf32>, vector<8x16xf32>, vector<32x16xf32> -> vector<32x16xf32>
    %7 = vector.shape_cast %6 : vector<32x16xf32> to vector<2x16x16xf32>
    %8 = vector.shape_cast %3 : vector<1x16xf32> to vector<1x1x16xf32>
    %9 = vector.broadcast %8 : vector<1x1x16xf32> to vector<2x16x16xf32>
    %10 = arith.addf %7, %9 : vector<2x16x16xf32>
    %11 = arith.mulf %10, %10 : vector<2x16x16xf32>
    %cst_10 = arith.constant dense<0.000000e+00> : vector<2x16xf32>
    %12 = vector.multi_reduction <add>, %11, %cst_10 [2] : vector<2x16x16xf32> to vector<2x16xf32>
    %13 = vector.shape_cast %12 : vector<2x16xf32> to vector<2x16x1xf32>
    %cst_11 = arith.constant 1.000000e-24 : f32
    %14 = vector.broadcast %cst_11 : f32 to vector<2x16x1xf32>
    %15 = arith.maximumf %13, %14 : vector<2x16x1xf32>
    %16 = math.rsqrt %15 : vector<2x16x1xf32>
    %17 = vector.broadcast %16 : vector<2x16x1xf32> to vector<2x16x16xf32>
    %18 = arith.mulf %10, %17 : vector<2x16x16xf32>
    %cst_12 = arith.constant 0.000000e+00 : f32
    %19 = vector.broadcast %cst_12 : f32 to vector<2x16x16xf32>
    %20 = arith.maximumf %18, %19 : vector<2x16x16xf32>
    %cst_13 = arith.constant dense<0.000000e+00> : vector<2x16xf32>
    %21 = vector.multi_reduction <add>, %20, %cst_13 [2] : vector<2x16x16xf32> to vector<2x16xf32>
    %22 = vector.shape_cast %21 : vector<2x16xf32> to vector<2x16x1xf32>
    %cst_14 = arith.constant dense<0.000000e+00> : vector<16x1xf32>
    %23 = vector.multi_reduction <add>, %22, %cst_14 [0] : vector<2x16x1xf32> to vector<16x1xf32>
    %24 = vector.shape_cast %23 : vector<16x1xf32> to vector<1x16x1xf32>
    %cst_15 = arith.constant 3.125000e-02 : f32
    %25 = vector.broadcast %cst_15 : f32 to vector<1x16x1xf32>
    %26 = arith.mulf %24, %25 : vector<1x16x1xf32>
    %27 = vector.broadcast %26 : vector<1x16x1xf32> to vector<2x16x16xf32>
    %28 = arith.subf %20, %27 : vector<2x16x16xf32>
    %29 = arith.mulf %28, %28 : vector<2x16x16xf32>
    %cst_16 = arith.constant dense<0.000000e+00> : vector<2x16xf32>
    %30 = vector.multi_reduction <add>, %29, %cst_16 [2] : vector<2x16x16xf32> to vector<2x16xf32>
    %31 = vector.shape_cast %30 : vector<2x16xf32> to vector<2x16x1xf32>
    %cst_17 = arith.constant dense<0.000000e+00> : vector<16x1xf32>
    %32 = vector.multi_reduction <add>, %31, %cst_17 [0] : vector<2x16x1xf32> to vector<16x1xf32>
    %33 = vector.shape_cast %32 : vector<16x1xf32> to vector<1x16x1xf32>
    %cst_18 = arith.constant 3.125000e-02 : f32
    %34 = vector.broadcast %cst_18 : f32 to vector<1x16x1xf32>
    %35 = arith.mulf %33, %34 : vector<1x16x1xf32>
    %cst_19 = arith.constant 9.99999974E-6 : f32
    %36 = vector.broadcast %cst_19 : f32 to vector<1x16x1xf32>
    %37 = arith.addf %35, %36 : vector<1x16x1xf32>
    %38 = math.rsqrt %37 : vector<1x16x1xf32>
    %39 = vector.broadcast %38 : vector<1x16x1xf32> to vector<2x16x16xf32>
    %40 = arith.mulf %28, %39 : vector<2x16x16xf32>
    %c0_20 = arith.constant 0 : index
    %c0_21 = arith.constant 0 : index
    %41 = vector.load %arg4[%c0_20, %c0_21] : memref<16x16xf32, #tpu.memory_space<vmem>>, vector<16x16xf32>
    %c0_22 = arith.constant 0 : index
    %c0_23 = arith.constant 0 : index
    %42 = vector.load %arg5[%c0_22, %c0_23] : memref<1x16xf32, #tpu.memory_space<vmem>>, vector<1x16xf32>
    "tpu.trace_start"() <{level = 10 : i32, message = "bij,bjd->bid"}> : () -> ()
    %cst_24 = arith.constant dense<0.000000e+00> : vector<2x16x16xf32>
    %43 = tpu.matmul %1, %40, %cst_24 {dimension_numbers = #tpu.dot_dimension_numbers<[2], [1], [1], [2], [0, 0, 0, 1, 1, 2], [0], [0]>} : vector<2x16x16xf32>, vector<2x16x16xf32>, vector<2x16x16xf32> -> vector<2x16x16xf32>
    "tpu.trace_stop"() : () -> ()
    %44 = vector.shape_cast %43 : vector<2x16x16xf32> to vector<32x16xf32>
    %cst_25 = arith.constant dense<0.000000e+00> : vector<32x16xf32>
    %45 = tpu.matmul %44, %41, %cst_25 {dimension_numbers = #tpu.dot_dimension_numbers<[1], [0], [0], [1], [0, 0, 1, 1], [], []>} : vector<32x16xf32>, vector<16x16xf32>, vector<32x16xf32> -> vector<32x16xf32>
    %46 = vector.shape_cast %45 : vector<32x16xf32> to vector<2x16x16xf32>
    %47 = vector.shape_cast %42 : vector<1x16xf32> to vector<1x1x16xf32>
    %48 = vector.broadcast %47 : vector<1x1x16xf32> to vector<2x16x16xf32>
    %49 = arith.addf %46, %48 : vector<2x16x16xf32>
    %50 = arith.mulf %49, %49 : vector<2x16x16xf32>
    %cst_26 = arith.constant dense<0.000000e+00> : vector<2x16xf32>
    %51 = vector.multi_reduction <add>, %50, %cst_26 [2] : vector<2x16x16xf32> to vector<2x16xf32>
    %52 = vector.shape_cast %51 : vector<2x16xf32> to vector<2x16x1xf32>
    %cst_27 = arith.constant 1.000000e-24 : f32
    %53 = vector.broadcast %cst_27 : f32 to vector<2x16x1xf32>
    %54 = arith.maximumf %52, %53 : vector<2x16x1xf32>
    %55 = math.rsqrt %54 : vector<2x16x1xf32>
    %56 = vector.broadcast %55 : vector<2x16x1xf32> to vector<2x16x16xf32>
    %57 = arith.mulf %49, %56 : vector<2x16x16xf32>
    %cst_28 = arith.constant 0.000000e+00 : f32
    %58 = vector.broadcast %cst_28 : f32 to vector<2x16x16xf32>
    %59 = arith.maximumf %57, %58 : vector<2x16x16xf32>
    %cst_29 = arith.constant dense<0.000000e+00> : vector<2x16xf32>
    %60 = vector.multi_reduction <add>, %59, %cst_29 [2] : vector<2x16x16xf32> to vector<2x16xf32>
    %61 = vector.shape_cast %60 : vector<2x16xf32> to vector<2x16x1xf32>
    %cst_30 = arith.constant dense<0.000000e+00> : vector<16x1xf32>
    %62 = vector.multi_reduction <add>, %61, %cst_30 [0] : vector<2x16x1xf32> to vector<16x1xf32>
    %63 = vector.shape_cast %62 : vector<16x1xf32> to vector<1x16x1xf32>
    %cst_31 = arith.constant 3.125000e-02 : f32
    %64 = vector.broadcast %cst_31 : f32 to vector<1x16x1xf32>
    %65 = arith.mulf %63, %64 : vector<1x16x1xf32>
    %66 = vector.broadcast %65 : vector<1x16x1xf32> to vector<2x16x16xf32>
    %67 = arith.subf %59, %66 : vector<2x16x16xf32>
    %68 = arith.mulf %67, %67 : vector<2x16x16xf32>
    %cst_32 = arith.constant dense<0.000000e+00> : vector<2x16xf32>
    %69 = vector.multi_reduction <add>, %68, %cst_32 [2] : vector<2x16x16xf32> to vector<2x16xf32>
    %70 = vector.shape_cast %69 : vector<2x16xf32> to vector<2x16x1xf32>
    %cst_33 = arith.constant dense<0.000000e+00> : vector<16x1xf32>
    %71 = vector.multi_reduction <add>, %70, %cst_33 [0] : vector<2x16x1xf32> to vector<16x1xf32>
    %72 = vector.shape_cast %71 : vector<16x1xf32> to vector<1x16x1xf32>
    %cst_34 = arith.constant 3.125000e-02 : f32
    %73 = vector.broadcast %cst_34 : f32 to vector<1x16x1xf32>
    %74 = arith.mulf %72, %73 : vector<1x16x1xf32>
    %cst_35 = arith.constant 9.99999974E-6 : f32
    %75 = vector.broadcast %cst_35 : f32 to vector<1x16x1xf32>
    %76 = arith.addf %74, %75 : vector<1x16x1xf32>
    %77 = math.rsqrt %76 : vector<1x16x1xf32>
    %78 = vector.broadcast %77 : vector<1x16x1xf32> to vector<2x16x16xf32>
    %79 = arith.mulf %67, %78 : vector<2x16x16xf32>
    %c0_36 = arith.constant 0 : index
    %c0_37 = arith.constant 0 : index
    %80 = vector.load %arg6[%c0_36, %c0_37] : memref<16x16xf32, #tpu.memory_space<vmem>>, vector<16x16xf32>
    %c0_38 = arith.constant 0 : index
    %c0_39 = arith.constant 0 : index
    %81 = vector.load %arg7[%c0_38, %c0_39] : memref<1x16xf32, #tpu.memory_space<vmem>>, vector<1x16xf32>
    "tpu.trace_start"() <{level = 10 : i32, message = "bij,bjd->bid"}> : () -> ()
    %cst_40 = arith.constant dense<0.000000e+00> : vector<2x16x16xf32>
    %82 = tpu.matmul %1, %79, %cst_40 {dimension_numbers = #tpu.dot_dimension_numbers<[2], [1], [1], [2], [0, 0, 0, 1, 1, 2], [0], [0]>} : vector<2x16x16xf32>, vector<2x16x16xf32>, vector<2x16x16xf32> -> vector<2x16x16xf32>
    "tpu.trace_stop"() : () -> ()
    %83 = vector.shape_cast %82 : vector<2x16x16xf32> to vector<32x16xf32>
    %cst_41 = arith.constant dense<0.000000e+00> : vector<32x16xf32>
    %84 = tpu.matmul %83, %80, %cst_41 {dimension_numbers = #tpu.dot_dimension_numbers<[1], [0], [0], [1], [0, 0, 1, 1], [], []>} : vector<32x16xf32>, vector<16x16xf32>, vector<32x16xf32> -> vector<32x16xf32>
    %85 = vector.shape_cast %84 : vector<32x16xf32> to vector<2x16x16xf32>
    %86 = vector.shape_cast %81 : vector<1x16xf32> to vector<1x1x16xf32>
    %87 = vector.broadcast %86 : vector<1x1x16xf32> to vector<2x16x16xf32>
    %88 = arith.addf %85, %87 : vector<2x16x16xf32>
    %89 = arith.mulf %88, %88 : vector<2x16x16xf32>
    %cst_42 = arith.constant dense<0.000000e+00> : vector<2x16xf32>
    %90 = vector.multi_reduction <add>, %89, %cst_42 [2] : vector<2x16x16xf32> to vector<2x16xf32>
    %91 = vector.shape_cast %90 : vector<2x16xf32> to vector<2x16x1xf32>
    %cst_43 = arith.constant 1.000000e-24 : f32
    %92 = vector.broadcast %cst_43 : f32 to vector<2x16x1xf32>
    %93 = arith.maximumf %91, %92 : vector<2x16x1xf32>
    %94 = math.rsqrt %93 : vector<2x16x1xf32>
    %95 = vector.broadcast %94 : vector<2x16x1xf32> to vector<2x16x16xf32>
    %96 = arith.mulf %88, %95 : vector<2x16x16xf32>
    %cst_44 = arith.constant 0.000000e+00 : f32
    %97 = vector.broadcast %cst_44 : f32 to vector<2x16x80xf32>
    %98 = tpu.concatenate %40, %79, %96, %97 in 2 : vector<2x16x16xf32>, vector<2x16x16xf32>, vector<2x16x16xf32>, vector<2x16x80xf32> -> vector<2x16x128xf32>
    %c0_45 = arith.constant 0 : index
    %c0_46 = arith.constant 0 : index
    %99 = vector.load %arg8[%c0_45, %c0_46] : memref<256x512xf32, #tpu.memory_space<vmem>>, vector<256x512xf32>
    %c0_47 = arith.constant 0 : index
    %c0_48 = arith.constant 0 : index
    %100 = vector.load %arg9[%c0_47, %c0_48] : memref<1x512xf32, #tpu.memory_space<vmem>>, vector<1x512xf32>
    %101 = vector.shape_cast %100 : vector<1x512xf32> to vector<1x512xf32>
    %102 = vector.broadcast %101 : vector<1x512xf32> to vector<2x512xf32>
    %c0_49 = arith.constant 0 : index
    %c0_50 = arith.constant 0 : index
    %103 = vector.load %arg10[%c0_49, %c0_50] : memref<256x128xf32, #tpu.memory_space<vmem>>, vector<256x128xf32>
    %c0_51 = arith.constant 0 : index
    %c0_52 = arith.constant 0 : index
    %104 = vector.load %arg11[%c0_51, %c0_52] : memref<1x128xf32, #tpu.memory_space<vmem>>, vector<1x128xf32>
    %c0_53 = arith.constant 0 : index
    %c0_54 = arith.constant 0 : index
    %105 = vector.load %arg12[%c0_53, %c0_54] : memref<128x4xf32, #tpu.memory_space<vmem>>, vector<128x4xf32>
    %c0_55 = arith.constant 0 : index
    %c0_56 = arith.constant 0 : index
    %106 = vector.load %arg13[%c0_55, %c0_56] : memref<1x4xf32, #tpu.memory_space<vmem>>, vector<1x4xf32>
    %cst_57 = arith.constant 0.000000e+00 : f32
    %107 = vector.broadcast %cst_57 : f32 to vector<2x128xf32>
    %cst_58 = arith.constant 0.000000e+00 : f32
    %108 = vector.broadcast %cst_58 : f32 to vector<2x128xf32>
    %cst_59 = arith.constant 0.000000e+00 : f32
    %109 = vector.broadcast %cst_59 : f32 to vector<2x128xf32>
    %c0_i32 = arith.constant 0 : i32
    %110 = tpu.concatenate %107, %109 in 1 : vector<2x128xf32>, vector<2x128xf32> -> vector<2x256xf32>
    %cst_60 = arith.constant dense<0.000000e+00> : vector<2x512xf32>
    %111 = tpu.matmul %110, %99, %cst_60 {dimension_numbers = #tpu.dot_dimension_numbers<[1], [0], [0], [1], [0, 0, 1, 1], [], []>} : vector<2x256xf32>, vector<256x512xf32>, vector<2x512xf32> -> vector<2x512xf32>
    %112 = arith.addf %111, %102 : vector<2x512xf32>
    %113 = vector.extract_strided_slice %112 {offsets = [0, 0], sizes = [2, 128], strides = [1, 1]} : vector<2x512xf32> to vector<2x128xf32>
    %114 = arith.negf %113 : vector<2x128xf32>
    %115 = math.exp %114 : vector<2x128xf32>
    %cst_61 = arith.constant 1.000000e+00 : f32
    %116 = vector.broadcast %cst_61 : f32 to vector<2x128xf32>
    %117 = arith.addf %116, %115 : vector<2x128xf32>
    %118 = arith.divf %116, %117 : vector<2x128xf32>
    %119 = vector.extract_strided_slice %112 {offsets = [0, 128], sizes = [2, 128], strides = [1, 1]} : vector<2x512xf32> to vector<2x128xf32>
    %120 = arith.negf %119 : vector<2x128xf32>
    %121 = math.exp %120 : vector<2x128xf32>
    %cst_62 = arith.constant 1.000000e+00 : f32
    %122 = vector.broadcast %cst_62 : f32 to vector<2x128xf32>
    %123 = arith.addf %122, %121 : vector<2x128xf32>
    %124 = arith.divf %122, %123 : vector<2x128xf32>
    %125 = vector.extract_strided_slice %112 {offsets = [0, 256], sizes = [2, 128], strides = [1, 1]} : vector<2x512xf32> to vector<2x128xf32>
    %126 = math.tanh %125 : vector<2x128xf32>
    %127 = vector.extract_strided_slice %112 {offsets = [0, 384], sizes = [2, 128], strides = [1, 1]} : vector<2x512xf32> to vector<2x128xf32>
    %128 = arith.negf %127 : vector<2x128xf32>
    %129 = math.exp %128 : vector<2x128xf32>
    %cst_63 = arith.constant 1.000000e+00 : f32
    %130 = vector.broadcast %cst_63 : f32 to vector<2x128xf32>
    %131 = arith.addf %130, %129 : vector<2x128xf32>
    %132 = arith.divf %130, %131 : vector<2x128xf32>
    %133 = arith.mulf %124, %108 : vector<2x128xf32>
    %134 = arith.mulf %118, %126 : vector<2x128xf32>
    %135 = arith.addf %133, %134 : vector<2x128xf32>
    %136 = math.tanh %135 : vector<2x128xf32>
    %137 = arith.mulf %132, %136 : vector<2x128xf32>
    %138 = vector.shape_cast %137 : vector<2x128xf32> to vector<2x1x128xf32>
    "tpu.trace_start"() <{level = 10 : i32, message = "bnp,bmp->bnm"}> : () -> ()
    %cst_64 = arith.constant dense<0.000000e+00> : vector<2x16x1xf32>
    %139 = tpu.matmul %98, %138, %cst_64 {dimension_numbers = #tpu.dot_dimension_numbers<[2], [2], [1], [1], [0, 0, 0, 1, 1, 1], [0], [0]>} : vector<2x16x128xf32>, vector<2x1x128xf32>, vector<2x16x1xf32> -> vector<2x16x1xf32>
    "tpu.trace_stop"() : () -> ()
    %140 = vector.shape_cast %139 : vector<2x16x1xf32> to vector<2x16xf32>
    %cst_65 = arith.constant dense<0xFF800000> : vector<2xf32>
    %141 = vector.multi_reduction <maximumf>, %140, %cst_65 [1] : vector<2x16xf32> to vector<2xf32>
    %142 = vector.shape_cast %141 : vector<2xf32> to vector<2x1xf32>
    %143 = vector.broadcast %142 : vector<2x1xf32> to vector<2x16xf32>
    %144 = arith.subf %140, %143 : vector<2x16xf32>
    %145 = math.exp %144 : vector<2x16xf32>
    %cst_66 = arith.constant dense<0.000000e+00> : vector<2xf32>
    %146 = vector.multi_reduction <add>, %145, %cst_66 [1] : vector<2x16xf32> to vector<2xf32>
    %147 = vector.shape_cast %146 : vector<2xf32> to vector<2x1xf32>
    %148 = tpu.reciprocal %147 {approx = true} : vector<2x1xf32> -> vector<2x1xf32>
    %149 = vector.broadcast %148 : vector<2x1xf32> to vector<2x16xf32>
    %150 = arith.mulf %145, %149 : vector<2x16xf32>
    %151 = vector.shape_cast %150 : vector<2x16xf32> to vector<2x1x16xf32>
    "tpu.trace_start"() <{level = 10 : i32, message = "bmn,bnp->bmp"}> : () -> ()
    %cst_67 = arith.constant dense<0.000000e+00> : vector<2x1x128xf32>
    %152 = tpu.matmul %151, %98, %cst_67 {dimension_numbers = #tpu.dot_dimension_numbers<[2], [1], [1], [2], [0, 0, 0, 1, 1, 2], [0], [0]>} : vector<2x1x16xf32>, vector<2x16x128xf32>, vector<2x1x128xf32> -> vector<2x1x128xf32>
    "tpu.trace_stop"() : () -> ()
    %153 = vector.shape_cast %152 : vector<2x1x128xf32> to vector<2x128xf32>
    %c1_i32 = arith.constant 1 : i32
    %154 = tpu.concatenate %137, %153 in 1 : vector<2x128xf32>, vector<2x128xf32> -> vector<2x256xf32>
    %cst_68 = arith.constant dense<0.000000e+00> : vector<2x512xf32>
    %155 = tpu.matmul %154, %99, %cst_68 {dimension_numbers = #tpu.dot_dimension_numbers<[1], [0], [0], [1], [0, 0, 1, 1], [], []>} : vector<2x256xf32>, vector<256x512xf32>, vector<2x512xf32> -> vector<2x512xf32>
    %156 = arith.addf %155, %102 : vector<2x512xf32>
    %157 = vector.extract_strided_slice %156 {offsets = [0, 0], sizes = [2, 128], strides = [1, 1]} : vector<2x512xf32> to vector<2x128xf32>
    %158 = arith.negf %157 : vector<2x128xf32>
    %159 = math.exp %158 : vector<2x128xf32>
    %cst_69 = arith.constant 1.000000e+00 : f32
    %160 = vector.broadcast %cst_69 : f32 to vector<2x128xf32>
    %161 = arith.addf %160, %159 : vector<2x128xf32>
    %162 = arith.divf %160, %161 : vector<2x128xf32>
    %163 = vector.extract_strided_slice %156 {offsets = [0, 128], sizes = [2, 128], strides = [1, 1]} : vector<2x512xf32> to vector<2x128xf32>
    %164 = arith.negf %163 : vector<2x128xf32>
    %165 = math.exp %164 : vector<2x128xf32>
    %cst_70 = arith.constant 1.000000e+00 : f32
    %166 = vector.broadcast %cst_70 : f32 to vector<2x128xf32>
    %167 = arith.addf %166, %165 : vector<2x128xf32>
    %168 = arith.divf %166, %167 : vector<2x128xf32>
    %169 = vector.extract_strided_slice %156 {offsets = [0, 256], sizes = [2, 128], strides = [1, 1]} : vector<2x512xf32> to vector<2x128xf32>
    %170 = math.tanh %169 : vector<2x128xf32>
    %171 = vector.extract_strided_slice %156 {offsets = [0, 384], sizes = [2, 128], strides = [1, 1]} : vector<2x512xf32> to vector<2x128xf32>
    %172 = arith.negf %171 : vector<2x128xf32>
    %173 = math.exp %172 : vector<2x128xf32>
    %cst_71 = arith.constant 1.000000e+00 : f32
    %174 = vector.broadcast %cst_71 : f32 to vector<2x128xf32>
    %175 = arith.addf %174, %173 : vector<2x128xf32>
    %176 = arith.divf %174, %175 : vector<2x128xf32>
    %177 = arith.mulf %168, %135 : vector<2x128xf32>
    %178 = arith.mulf %162, %170 : vector<2x128xf32>
    %179 = arith.addf %177, %178 : vector<2x128xf32>
    %180 = math.tanh %179 : vector<2x128xf32>
    %181 = arith.mulf %176, %180 : vector<2x128xf32>
    %182 = vector.shape_cast %181 : vector<2x128xf32> to vector<2x1x128xf32>
    "tpu.trace_start"() <{level = 10 : i32, message = "bnp,bmp->bnm"}> : () -> ()
    %cst_72 = arith.constant dense<0.000000e+00> : vector<2x16x1xf32>
    %183 = tpu.matmul %98, %182, %cst_72 {dimension_numbers = #tpu.dot_dimension_numbers<[2], [2], [1], [1], [0, 0, 0, 1, 1, 1], [0], [0]>} : vector<2x16x128xf32>, vector<2x1x128xf32>, vector<2x16x1xf32> -> vector<2x16x1xf32>
    "tpu.trace_stop"() : () -> ()
    %184 = vector.shape_cast %183 : vector<2x16x1xf32> to vector<2x16xf32>
    %cst_73 = arith.constant dense<0xFF800000> : vector<2xf32>
    %185 = vector.multi_reduction <maximumf>, %184, %cst_73 [1] : vector<2x16xf32> to vector<2xf32>
    %186 = vector.shape_cast %185 : vector<2xf32> to vector<2x1xf32>
    %187 = vector.broadcast %186 : vector<2x1xf32> to vector<2x16xf32>
    %188 = arith.subf %184, %187 : vector<2x16xf32>
    %189 = math.exp %188 : vector<2x16xf32>
    %cst_74 = arith.constant dense<0.000000e+00> : vector<2xf32>
    %190 = vector.multi_reduction <add>, %189, %cst_74 [1] : vector<2x16xf32> to vector<2xf32>
    %191 = vector.shape_cast %190 : vector<2xf32> to vector<2x1xf32>
    %192 = tpu.reciprocal %191 {approx = true} : vector<2x1xf32> -> vector<2x1xf32>
    %193 = vector.broadcast %192 : vector<2x1xf32> to vector<2x16xf32>
    %194 = arith.mulf %189, %193 : vector<2x16xf32>
    %195 = vector.shape_cast %194 : vector<2x16xf32> to vector<2x1x16xf32>
    "tpu.trace_start"() <{level = 10 : i32, message = "bmn,bnp->bmp"}> : () -> ()
    %cst_75 = arith.constant dense<0.000000e+00> : vector<2x1x128xf32>
    %196 = tpu.matmul %195, %98, %cst_75 {dimension_numbers = #tpu.dot_dimension_numbers<[2], [1], [1], [2], [0, 0, 0, 1, 1, 2], [0], [0]>} : vector<2x1x16xf32>, vector<2x16x128xf32>, vector<2x1x128xf32> -> vector<2x1x128xf32>
    "tpu.trace_stop"() : () -> ()
    %197 = vector.shape_cast %196 : vector<2x1x128xf32> to vector<2x128xf32>
    %c2_i32 = arith.constant 2 : i32
    %198 = tpu.concatenate %181, %197 in 1 : vector<2x128xf32>, vector<2x128xf32> -> vector<2x256xf32>
    %cst_76 = arith.constant dense<0.000000e+00> : vector<2x512xf32>
    %199 = tpu.matmul %198, %99, %cst_76 {dimension_numbers = #tpu.dot_dimension_numbers<[1], [0], [0], [1], [0, 0, 1, 1], [], []>} : vector<2x256xf32>, vector<256x512xf32>, vector<2x512xf32> -> vector<2x512xf32>
    %200 = arith.addf %199, %102 : vector<2x512xf32>
    %201 = vector.extract_strided_slice %200 {offsets = [0, 0], sizes = [2, 128], strides = [1, 1]} : vector<2x512xf32> to vector<2x128xf32>
    %202 = arith.negf %201 : vector<2x128xf32>
    %203 = math.exp %202 : vector<2x128xf32>
    %cst_77 = arith.constant 1.000000e+00 : f32
    %204 = vector.broadcast %cst_77 : f32 to vector<2x128xf32>
    %205 = arith.addf %204, %203 : vector<2x128xf32>
    %206 = arith.divf %204, %205 : vector<2x128xf32>
    %207 = vector.extract_strided_slice %200 {offsets = [0, 128], sizes = [2, 128], strides = [1, 1]} : vector<2x512xf32> to vector<2x128xf32>
    %208 = arith.negf %207 : vector<2x128xf32>
    %209 = math.exp %208 : vector<2x128xf32>
    %cst_78 = arith.constant 1.000000e+00 : f32
    %210 = vector.broadcast %cst_78 : f32 to vector<2x128xf32>
    %211 = arith.addf %210, %209 : vector<2x128xf32>
    %212 = arith.divf %210, %211 : vector<2x128xf32>
    %213 = vector.extract_strided_slice %200 {offsets = [0, 256], sizes = [2, 128], strides = [1, 1]} : vector<2x512xf32> to vector<2x128xf32>
    %214 = math.tanh %213 : vector<2x128xf32>
    %215 = vector.extract_strided_slice %200 {offsets = [0, 384], sizes = [2, 128], strides = [1, 1]} : vector<2x512xf32> to vector<2x128xf32>
    %216 = arith.negf %215 : vector<2x128xf32>
    %217 = math.exp %216 : vector<2x128xf32>
    %cst_79 = arith.constant 1.000000e+00 : f32
    %218 = vector.broadcast %cst_79 : f32 to vector<2x128xf32>
    %219 = arith.addf %218, %217 : vector<2x128xf32>
    %220 = arith.divf %218, %219 : vector<2x128xf32>
    %221 = arith.mulf %212, %179 : vector<2x128xf32>
    %222 = arith.mulf %206, %214 : vector<2x128xf32>
    %223 = arith.addf %221, %222 : vector<2x128xf32>
    %224 = math.tanh %223 : vector<2x128xf32>
    %225 = arith.mulf %220, %224 : vector<2x128xf32>
    %226 = vector.shape_cast %225 : vector<2x128xf32> to vector<2x1x128xf32>
    "tpu.trace_start"() <{level = 10 : i32, message = "bnp,bmp->bnm"}> : () -> ()
    %cst_80 = arith.constant dense<0.000000e+00> : vector<2x16x1xf32>
    %227 = tpu.matmul %98, %226, %cst_80 {dimension_numbers = #tpu.dot_dimension_numbers<[2], [2], [1], [1], [0, 0, 0, 1, 1, 1], [0], [0]>} : vector<2x16x128xf32>, vector<2x1x128xf32>, vector<2x16x1xf32> -> vector<2x16x1xf32>
    "tpu.trace_stop"() : () -> ()
    %228 = vector.shape_cast %227 : vector<2x16x1xf32> to vector<2x16xf32>
    %cst_81 = arith.constant dense<0xFF800000> : vector<2xf32>
    %229 = vector.multi_reduction <maximumf>, %228, %cst_81 [1] : vector<2x16xf32> to vector<2xf32>
    %230 = vector.shape_cast %229 : vector<2xf32> to vector<2x1xf32>
    %231 = vector.broadcast %230 : vector<2x1xf32> to vector<2x16xf32>
    %232 = arith.subf %228, %231 : vector<2x16xf32>
    %233 = math.exp %232 : vector<2x16xf32>
    %cst_82 = arith.constant dense<0.000000e+00> : vector<2xf32>
    %234 = vector.multi_reduction <add>, %233, %cst_82 [1] : vector<2x16xf32> to vector<2xf32>
    %235 = vector.shape_cast %234 : vector<2xf32> to vector<2x1xf32>
    %236 = tpu.reciprocal %235 {approx = true} : vector<2x1xf32> -> vector<2x1xf32>
    %237 = vector.broadcast %236 : vector<2x1xf32> to vector<2x16xf32>
    %238 = arith.mulf %233, %237 : vector<2x16xf32>
    %239 = vector.shape_cast %238 : vector<2x16xf32> to vector<2x1x16xf32>
    "tpu.trace_start"() <{level = 10 : i32, message = "bmn,bnp->bmp"}> : () -> ()
    %cst_83 = arith.constant dense<0.000000e+00> : vector<2x1x128xf32>
    %240 = tpu.matmul %239, %98, %cst_83 {dimension_numbers = #tpu.dot_dimension_numbers<[2], [1], [1], [2], [0, 0, 0, 1, 1, 2], [0], [0]>} : vector<2x1x16xf32>, vector<2x16x128xf32>, vector<2x1x128xf32> -> vector<2x1x128xf32>
    "tpu.trace_stop"() : () -> ()
    %241 = vector.shape_cast %240 : vector<2x1x128xf32> to vector<2x128xf32>
    %c3_i32 = arith.constant 3 : i32
    %242 = tpu.concatenate %225, %241 in 1 : vector<2x128xf32>, vector<2x128xf32> -> vector<2x256xf32>
    %cst_84 = arith.constant dense<0.000000e+00> : vector<2x512xf32>
    %243 = tpu.matmul %242, %99, %cst_84 {dimension_numbers = #tpu.dot_dimension_numbers<[1], [0], [0], [1], [0, 0, 1, 1], [], []>} : vector<2x256xf32>, vector<256x512xf32>, vector<2x512xf32> -> vector<2x512xf32>
    %244 = arith.addf %243, %102 : vector<2x512xf32>
    %245 = vector.extract_strided_slice %244 {offsets = [0, 0], sizes = [2, 128], strides = [1, 1]} : vector<2x512xf32> to vector<2x128xf32>
    %246 = arith.negf %245 : vector<2x128xf32>
    %247 = math.exp %246 : vector<2x128xf32>
    %cst_85 = arith.constant 1.000000e+00 : f32
    %248 = vector.broadcast %cst_85 : f32 to vector<2x128xf32>
    %249 = arith.addf %248, %247 : vector<2x128xf32>
    %250 = arith.divf %248, %249 : vector<2x128xf32>
    %251 = vector.extract_strided_slice %244 {offsets = [0, 128], sizes = [2, 128], strides = [1, 1]} : vector<2x512xf32> to vector<2x128xf32>
    %252 = arith.negf %251 : vector<2x128xf32>
    %253 = math.exp %252 : vector<2x128xf32>
    %cst_86 = arith.constant 1.000000e+00 : f32
    %254 = vector.broadcast %cst_86 : f32 to vector<2x128xf32>
    %255 = arith.addf %254, %253 : vector<2x128xf32>
    %256 = arith.divf %254, %255 : vector<2x128xf32>
    %257 = vector.extract_strided_slice %244 {offsets = [0, 256], sizes = [2, 128], strides = [1, 1]} : vector<2x512xf32> to vector<2x128xf32>
    %258 = math.tanh %257 : vector<2x128xf32>
    %259 = vector.extract_strided_slice %244 {offsets = [0, 384], sizes = [2, 128], strides = [1, 1]} : vector<2x512xf32> to vector<2x128xf32>
    %260 = arith.negf %259 : vector<2x128xf32>
    %261 = math.exp %260 : vector<2x128xf32>
    %cst_87 = arith.constant 1.000000e+00 : f32
    %262 = vector.broadcast %cst_87 : f32 to vector<2x128xf32>
    %263 = arith.addf %262, %261 : vector<2x128xf32>
    %264 = arith.divf %262, %263 : vector<2x128xf32>
    %265 = arith.mulf %256, %223 : vector<2x128xf32>
    %266 = arith.mulf %250, %258 : vector<2x128xf32>
    %267 = arith.addf %265, %266 : vector<2x128xf32>
    %268 = math.tanh %267 : vector<2x128xf32>
    %269 = arith.mulf %264, %268 : vector<2x128xf32>
    %270 = vector.shape_cast %269 : vector<2x128xf32> to vector<2x1x128xf32>
    "tpu.trace_start"() <{level = 10 : i32, message = "bnp,bmp->bnm"}> : () -> ()
    %cst_88 = arith.constant dense<0.000000e+00> : vector<2x16x1xf32>
    %271 = tpu.matmul %98, %270, %cst_88 {dimension_numbers = #tpu.dot_dimension_numbers<[2], [2], [1], [1], [0, 0, 0, 1, 1, 1], [0], [0]>} : vector<2x16x128xf32>, vector<2x1x128xf32>, vector<2x16x1xf32> -> vector<2x16x1xf32>
    "tpu.trace_stop"() : () -> ()
    %272 = vector.shape_cast %271 : vector<2x16x1xf32> to vector<2x16xf32>
    %cst_89 = arith.constant dense<0xFF800000> : vector<2xf32>
    %273 = vector.multi_reduction <maximumf>, %272, %cst_89 [1] : vector<2x16xf32> to vector<2xf32>
    %274 = vector.shape_cast %273 : vector<2xf32> to vector<2x1xf32>
    %275 = vector.broadcast %274 : vector<2x1xf32> to vector<2x16xf32>
    %276 = arith.subf %272, %275 : vector<2x16xf32>
    %277 = math.exp %276 : vector<2x16xf32>
    %cst_90 = arith.constant dense<0.000000e+00> : vector<2xf32>
    %278 = vector.multi_reduction <add>, %277, %cst_90 [1] : vector<2x16xf32> to vector<2xf32>
    %279 = vector.shape_cast %278 : vector<2xf32> to vector<2x1xf32>
    %280 = tpu.reciprocal %279 {approx = true} : vector<2x1xf32> -> vector<2x1xf32>
    %281 = vector.broadcast %280 : vector<2x1xf32> to vector<2x16xf32>
    %282 = arith.mulf %277, %281 : vector<2x16xf32>
    %283 = vector.shape_cast %282 : vector<2x16xf32> to vector<2x1x16xf32>
    "tpu.trace_start"() <{level = 10 : i32, message = "bmn,bnp->bmp"}> : () -> ()
    %cst_91 = arith.constant dense<0.000000e+00> : vector<2x1x128xf32>
    %284 = tpu.matmul %283, %98, %cst_91 {dimension_numbers = #tpu.dot_dimension_numbers<[2], [1], [1], [2], [0, 0, 0, 1, 1, 2], [0], [0]>} : vector<2x1x16xf32>, vector<2x16x128xf32>, vector<2x1x128xf32> -> vector<2x1x128xf32>
    "tpu.trace_stop"() : () -> ()
    %285 = vector.shape_cast %284 : vector<2x1x128xf32> to vector<2x128xf32>
    %c4_i32 = arith.constant 4 : i32
    %286 = tpu.concatenate %269, %285 in 1 : vector<2x128xf32>, vector<2x128xf32> -> vector<2x256xf32>
    %cst_92 = arith.constant dense<0.000000e+00> : vector<2x512xf32>
    %287 = tpu.matmul %286, %99, %cst_92 {dimension_numbers = #tpu.dot_dimension_numbers<[1], [0], [0], [1], [0, 0, 1, 1], [], []>} : vector<2x256xf32>, vector<256x512xf32>, vector<2x512xf32> -> vector<2x512xf32>
    %288 = arith.addf %287, %102 : vector<2x512xf32>
    %289 = vector.extract_strided_slice %288 {offsets = [0, 0], sizes = [2, 128], strides = [1, 1]} : vector<2x512xf32> to vector<2x128xf32>
    %290 = arith.negf %289 : vector<2x128xf32>
    %291 = math.exp %290 : vector<2x128xf32>
    %cst_93 = arith.constant 1.000000e+00 : f32
    %292 = vector.broadcast %cst_93 : f32 to vector<2x128xf32>
    %293 = arith.addf %292, %291 : vector<2x128xf32>
    %294 = arith.divf %292, %293 : vector<2x128xf32>
    %295 = vector.extract_strided_slice %288 {offsets = [0, 128], sizes = [2, 128], strides = [1, 1]} : vector<2x512xf32> to vector<2x128xf32>
    %296 = arith.negf %295 : vector<2x128xf32>
    %297 = math.exp %296 : vector<2x128xf32>
    %cst_94 = arith.constant 1.000000e+00 : f32
    %298 = vector.broadcast %cst_94 : f32 to vector<2x128xf32>
    %299 = arith.addf %298, %297 : vector<2x128xf32>
    %300 = arith.divf %298, %299 : vector<2x128xf32>
    %301 = vector.extract_strided_slice %288 {offsets = [0, 256], sizes = [2, 128], strides = [1, 1]} : vector<2x512xf32> to vector<2x128xf32>
    %302 = math.tanh %301 : vector<2x128xf32>
    %303 = vector.extract_strided_slice %288 {offsets = [0, 384], sizes = [2, 128], strides = [1, 1]} : vector<2x512xf32> to vector<2x128xf32>
    %304 = arith.negf %303 : vector<2x128xf32>
    %305 = math.exp %304 : vector<2x128xf32>
    %cst_95 = arith.constant 1.000000e+00 : f32
    %306 = vector.broadcast %cst_95 : f32 to vector<2x128xf32>
    %307 = arith.addf %306, %305 : vector<2x128xf32>
    %308 = arith.divf %306, %307 : vector<2x128xf32>
    %309 = arith.mulf %300, %267 : vector<2x128xf32>
    %310 = arith.mulf %294, %302 : vector<2x128xf32>
    %311 = arith.addf %309, %310 : vector<2x128xf32>
    %312 = math.tanh %311 : vector<2x128xf32>
    %313 = arith.mulf %308, %312 : vector<2x128xf32>
    %314 = vector.shape_cast %313 : vector<2x128xf32> to vector<2x1x128xf32>
    "tpu.trace_start"() <{level = 10 : i32, message = "bnp,bmp->bnm"}> : () -> ()
    %cst_96 = arith.constant dense<0.000000e+00> : vector<2x16x1xf32>
    %315 = tpu.matmul %98, %314, %cst_96 {dimension_numbers = #tpu.dot_dimension_numbers<[2], [2], [1], [1], [0, 0, 0, 1, 1, 1], [0], [0]>} : vector<2x16x128xf32>, vector<2x1x128xf32>, vector<2x16x1xf32> -> vector<2x16x1xf32>
    "tpu.trace_stop"() : () -> ()
    %316 = vector.shape_cast %315 : vector<2x16x1xf32> to vector<2x16xf32>
    %cst_97 = arith.constant dense<0xFF800000> : vector<2xf32>
    %317 = vector.multi_reduction <maximumf>, %316, %cst_97 [1] : vector<2x16xf32> to vector<2xf32>
    %318 = vector.shape_cast %317 : vector<2xf32> to vector<2x1xf32>
    %319 = vector.broadcast %318 : vector<2x1xf32> to vector<2x16xf32>
    %320 = arith.subf %316, %319 : vector<2x16xf32>
    %321 = math.exp %320 : vector<2x16xf32>
    %cst_98 = arith.constant dense<0.000000e+00> : vector<2xf32>
    %322 = vector.multi_reduction <add>, %321, %cst_98 [1] : vector<2x16xf32> to vector<2xf32>
    %323 = vector.shape_cast %322 : vector<2xf32> to vector<2x1xf32>
    %324 = tpu.reciprocal %323 {approx = true} : vector<2x1xf32> -> vector<2x1xf32>
    %325 = vector.broadcast %324 : vector<2x1xf32> to vector<2x16xf32>
    %326 = arith.mulf %321, %325 : vector<2x16xf32>
    %327 = vector.shape_cast %326 : vector<2x16xf32> to vector<2x1x16xf32>
    "tpu.trace_start"() <{level = 10 : i32, message = "bmn,bnp->bmp"}> : () -> ()
    %cst_99 = arith.constant dense<0.000000e+00> : vector<2x1x128xf32>
    %328 = tpu.matmul %327, %98, %cst_99 {dimension_numbers = #tpu.dot_dimension_numbers<[2], [1], [1], [2], [0, 0, 0, 1, 1, 2], [0], [0]>} : vector<2x1x16xf32>, vector<2x16x128xf32>, vector<2x1x128xf32> -> vector<2x1x128xf32>
    "tpu.trace_stop"() : () -> ()
    %329 = vector.shape_cast %328 : vector<2x1x128xf32> to vector<2x128xf32>
    %c5_i32 = arith.constant 5 : i32
    %330 = tpu.concatenate %313, %329 in 1 : vector<2x128xf32>, vector<2x128xf32> -> vector<2x256xf32>
    %cst_100 = arith.constant dense<0.000000e+00> : vector<2x512xf32>
    %331 = tpu.matmul %330, %99, %cst_100 {dimension_numbers = #tpu.dot_dimension_numbers<[1], [0], [0], [1], [0, 0, 1, 1], [], []>} : vector<2x256xf32>, vector<256x512xf32>, vector<2x512xf32> -> vector<2x512xf32>
    %332 = arith.addf %331, %102 : vector<2x512xf32>
    %333 = vector.extract_strided_slice %332 {offsets = [0, 0], sizes = [2, 128], strides = [1, 1]} : vector<2x512xf32> to vector<2x128xf32>
    %334 = arith.negf %333 : vector<2x128xf32>
    %335 = math.exp %334 : vector<2x128xf32>
    %cst_101 = arith.constant 1.000000e+00 : f32
    %336 = vector.broadcast %cst_101 : f32 to vector<2x128xf32>
    %337 = arith.addf %336, %335 : vector<2x128xf32>
    %338 = arith.divf %336, %337 : vector<2x128xf32>
    %339 = vector.extract_strided_slice %332 {offsets = [0, 128], sizes = [2, 128], strides = [1, 1]} : vector<2x512xf32> to vector<2x128xf32>
    %340 = arith.negf %339 : vector<2x128xf32>
    %341 = math.exp %340 : vector<2x128xf32>
    %cst_102 = arith.constant 1.000000e+00 : f32
    %342 = vector.broadcast %cst_102 : f32 to vector<2x128xf32>
    %343 = arith.addf %342, %341 : vector<2x128xf32>
    %344 = arith.divf %342, %343 : vector<2x128xf32>
    %345 = vector.extract_strided_slice %332 {offsets = [0, 256], sizes = [2, 128], strides = [1, 1]} : vector<2x512xf32> to vector<2x128xf32>
    %346 = math.tanh %345 : vector<2x128xf32>
    %347 = vector.extract_strided_slice %332 {offsets = [0, 384], sizes = [2, 128], strides = [1, 1]} : vector<2x512xf32> to vector<2x128xf32>
    %348 = arith.negf %347 : vector<2x128xf32>
    %349 = math.exp %348 : vector<2x128xf32>
    %cst_103 = arith.constant 1.000000e+00 : f32
    %350 = vector.broadcast %cst_103 : f32 to vector<2x128xf32>
    %351 = arith.addf %350, %349 : vector<2x128xf32>
    %352 = arith.divf %350, %351 : vector<2x128xf32>
    %353 = arith.mulf %344, %311 : vector<2x128xf32>
    %354 = arith.mulf %338, %346 : vector<2x128xf32>
    %355 = arith.addf %353, %354 : vector<2x128xf32>
    %356 = math.tanh %355 : vector<2x128xf32>
    %357 = arith.mulf %352, %356 : vector<2x128xf32>
    %358 = vector.shape_cast %357 : vector<2x128xf32> to vector<2x1x128xf32>
    "tpu.trace_start"() <{level = 10 : i32, message = "bnp,bmp->bnm"}> : () -> ()
    %cst_104 = arith.constant dense<0.000000e+00> : vector<2x16x1xf32>
    %359 = tpu.matmul %98, %358, %cst_104 {dimension_numbers = #tpu.dot_dimension_numbers<[2], [2], [1], [1], [0, 0, 0, 1, 1, 1], [0], [0]>} : vector<2x16x128xf32>, vector<2x1x128xf32>, vector<2x16x1xf32> -> vector<2x16x1xf32>
    "tpu.trace_stop"() : () -> ()
    %360 = vector.shape_cast %359 : vector<2x16x1xf32> to vector<2x16xf32>
    %cst_105 = arith.constant dense<0xFF800000> : vector<2xf32>
    %361 = vector.multi_reduction <maximumf>, %360, %cst_105 [1] : vector<2x16xf32> to vector<2xf32>
    %362 = vector.shape_cast %361 : vector<2xf32> to vector<2x1xf32>
    %363 = vector.broadcast %362 : vector<2x1xf32> to vector<2x16xf32>
    %364 = arith.subf %360, %363 : vector<2x16xf32>
    %365 = math.exp %364 : vector<2x16xf32>
    %cst_106 = arith.constant dense<0.000000e+00> : vector<2xf32>
    %366 = vector.multi_reduction <add>, %365, %cst_106 [1] : vector<2x16xf32> to vector<2xf32>
    %367 = vector.shape_cast %366 : vector<2xf32> to vector<2x1xf32>
    %368 = tpu.reciprocal %367 {approx = true} : vector<2x1xf32> -> vector<2x1xf32>
    %369 = vector.broadcast %368 : vector<2x1xf32> to vector<2x16xf32>
    %370 = arith.mulf %365, %369 : vector<2x16xf32>
    %371 = vector.shape_cast %370 : vector<2x16xf32> to vector<2x1x16xf32>
    "tpu.trace_start"() <{level = 10 : i32, message = "bmn,bnp->bmp"}> : () -> ()
    %cst_107 = arith.constant dense<0.000000e+00> : vector<2x1x128xf32>
    %372 = tpu.matmul %371, %98, %cst_107 {dimension_numbers = #tpu.dot_dimension_numbers<[2], [1], [1], [2], [0, 0, 0, 1, 1, 2], [0], [0]>} : vector<2x1x16xf32>, vector<2x16x128xf32>, vector<2x1x128xf32> -> vector<2x1x128xf32>
    "tpu.trace_stop"() : () -> ()
    %373 = vector.shape_cast %372 : vector<2x1x128xf32> to vector<2x128xf32>
    %c6_i32 = arith.constant 6 : i32
    %374 = tpu.concatenate %357, %373 in 1 : vector<2x128xf32>, vector<2x128xf32> -> vector<2x256xf32>
    %cst_108 = arith.constant dense<0.000000e+00> : vector<2x512xf32>
    %375 = tpu.matmul %374, %99, %cst_108 {dimension_numbers = #tpu.dot_dimension_numbers<[1], [0], [0], [1], [0, 0, 1, 1], [], []>} : vector<2x256xf32>, vector<256x512xf32>, vector<2x512xf32> -> vector<2x512xf32>
    %376 = arith.addf %375, %102 : vector<2x512xf32>
    %377 = vector.extract_strided_slice %376 {offsets = [0, 0], sizes = [2, 128], strides = [1, 1]} : vector<2x512xf32> to vector<2x128xf32>
    %378 = arith.negf %377 : vector<2x128xf32>
    %379 = math.exp %378 : vector<2x128xf32>
    %cst_109 = arith.constant 1.000000e+00 : f32
    %380 = vector.broadcast %cst_109 : f32 to vector<2x128xf32>
    %381 = arith.addf %380, %379 : vector<2x128xf32>
    %382 = arith.divf %380, %381 : vector<2x128xf32>
    %383 = vector.extract_strided_slice %376 {offsets = [0, 128], sizes = [2, 128], strides = [1, 1]} : vector<2x512xf32> to vector<2x128xf32>
    %384 = arith.negf %383 : vector<2x128xf32>
    %385 = math.exp %384 : vector<2x128xf32>
    %cst_110 = arith.constant 1.000000e+00 : f32
    %386 = vector.broadcast %cst_110 : f32 to vector<2x128xf32>
    %387 = arith.addf %386, %385 : vector<2x128xf32>
    %388 = arith.divf %386, %387 : vector<2x128xf32>
    %389 = vector.extract_strided_slice %376 {offsets = [0, 256], sizes = [2, 128], strides = [1, 1]} : vector<2x512xf32> to vector<2x128xf32>
    %390 = math.tanh %389 : vector<2x128xf32>
    %391 = vector.extract_strided_slice %376 {offsets = [0, 384], sizes = [2, 128], strides = [1, 1]} : vector<2x512xf32> to vector<2x128xf32>
    %392 = arith.negf %391 : vector<2x128xf32>
    %393 = math.exp %392 : vector<2x128xf32>
    %cst_111 = arith.constant 1.000000e+00 : f32
    %394 = vector.broadcast %cst_111 : f32 to vector<2x128xf32>
    %395 = arith.addf %394, %393 : vector<2x128xf32>
    %396 = arith.divf %394, %395 : vector<2x128xf32>
    %397 = arith.mulf %388, %355 : vector<2x128xf32>
    %398 = arith.mulf %382, %390 : vector<2x128xf32>
    %399 = arith.addf %397, %398 : vector<2x128xf32>
    %400 = math.tanh %399 : vector<2x128xf32>
    %401 = arith.mulf %396, %400 : vector<2x128xf32>
    %402 = vector.shape_cast %401 : vector<2x128xf32> to vector<2x1x128xf32>
    "tpu.trace_start"() <{level = 10 : i32, message = "bnp,bmp->bnm"}> : () -> ()
    %cst_112 = arith.constant dense<0.000000e+00> : vector<2x16x1xf32>
    %403 = tpu.matmul %98, %402, %cst_112 {dimension_numbers = #tpu.dot_dimension_numbers<[2], [2], [1], [1], [0, 0, 0, 1, 1, 1], [0], [0]>} : vector<2x16x128xf32>, vector<2x1x128xf32>, vector<2x16x1xf32> -> vector<2x16x1xf32>
    "tpu.trace_stop"() : () -> ()
    %404 = vector.shape_cast %403 : vector<2x16x1xf32> to vector<2x16xf32>
    %cst_113 = arith.constant dense<0xFF800000> : vector<2xf32>
    %405 = vector.multi_reduction <maximumf>, %404, %cst_113 [1] : vector<2x16xf32> to vector<2xf32>
    %406 = vector.shape_cast %405 : vector<2xf32> to vector<2x1xf32>
    %407 = vector.broadcast %406 : vector<2x1xf32> to vector<2x16xf32>
    %408 = arith.subf %404, %407 : vector<2x16xf32>
    %409 = math.exp %408 : vector<2x16xf32>
    %cst_114 = arith.constant dense<0.000000e+00> : vector<2xf32>
    %410 = vector.multi_reduction <add>, %409, %cst_114 [1] : vector<2x16xf32> to vector<2xf32>
    %411 = vector.shape_cast %410 : vector<2xf32> to vector<2x1xf32>
    %412 = tpu.reciprocal %411 {approx = true} : vector<2x1xf32> -> vector<2x1xf32>
    %413 = vector.broadcast %412 : vector<2x1xf32> to vector<2x16xf32>
    %414 = arith.mulf %409, %413 : vector<2x16xf32>
    %415 = vector.shape_cast %414 : vector<2x16xf32> to vector<2x1x16xf32>
    "tpu.trace_start"() <{level = 10 : i32, message = "bmn,bnp->bmp"}> : () -> ()
    %cst_115 = arith.constant dense<0.000000e+00> : vector<2x1x128xf32>
    %416 = tpu.matmul %415, %98, %cst_115 {dimension_numbers = #tpu.dot_dimension_numbers<[2], [1], [1], [2], [0, 0, 0, 1, 1, 2], [0], [0]>} : vector<2x1x16xf32>, vector<2x16x128xf32>, vector<2x1x128xf32> -> vector<2x1x128xf32>
    "tpu.trace_stop"() : () -> ()
    %417 = vector.shape_cast %416 : vector<2x1x128xf32> to vector<2x128xf32>
    %c7_i32 = arith.constant 7 : i32
    %418 = tpu.concatenate %401, %417 in 1 : vector<2x128xf32>, vector<2x128xf32> -> vector<2x256xf32>
    %cst_116 = arith.constant dense<0.000000e+00> : vector<2x512xf32>
    %419 = tpu.matmul %418, %99, %cst_116 {dimension_numbers = #tpu.dot_dimension_numbers<[1], [0], [0], [1], [0, 0, 1, 1], [], []>} : vector<2x256xf32>, vector<256x512xf32>, vector<2x512xf32> -> vector<2x512xf32>
    %420 = arith.addf %419, %102 : vector<2x512xf32>
    %421 = vector.extract_strided_slice %420 {offsets = [0, 0], sizes = [2, 128], strides = [1, 1]} : vector<2x512xf32> to vector<2x128xf32>
    %422 = arith.negf %421 : vector<2x128xf32>
    %423 = math.exp %422 : vector<2x128xf32>
    %cst_117 = arith.constant 1.000000e+00 : f32
    %424 = vector.broadcast %cst_117 : f32 to vector<2x128xf32>
    %425 = arith.addf %424, %423 : vector<2x128xf32>
    %426 = arith.divf %424, %425 : vector<2x128xf32>
    %427 = vector.extract_strided_slice %420 {offsets = [0, 128], sizes = [2, 128], strides = [1, 1]} : vector<2x512xf32> to vector<2x128xf32>
    %428 = arith.negf %427 : vector<2x128xf32>
    %429 = math.exp %428 : vector<2x128xf32>
    %cst_118 = arith.constant 1.000000e+00 : f32
    %430 = vector.broadcast %cst_118 : f32 to vector<2x128xf32>
    %431 = arith.addf %430, %429 : vector<2x128xf32>
    %432 = arith.divf %430, %431 : vector<2x128xf32>
    %433 = vector.extract_strided_slice %420 {offsets = [0, 256], sizes = [2, 128], strides = [1, 1]} : vector<2x512xf32> to vector<2x128xf32>
    %434 = math.tanh %433 : vector<2x128xf32>
    %435 = vector.extract_strided_slice %420 {offsets = [0, 384], sizes = [2, 128], strides = [1, 1]} : vector<2x512xf32> to vector<2x128xf32>
    %436 = arith.negf %435 : vector<2x128xf32>
    %437 = math.exp %436 : vector<2x128xf32>
    %cst_119 = arith.constant 1.000000e+00 : f32
    %438 = vector.broadcast %cst_119 : f32 to vector<2x128xf32>
    %439 = arith.addf %438, %437 : vector<2x128xf32>
    %440 = arith.divf %438, %439 : vector<2x128xf32>
    %441 = arith.mulf %432, %399 : vector<2x128xf32>
    %442 = arith.mulf %426, %434 : vector<2x128xf32>
    %443 = arith.addf %441, %442 : vector<2x128xf32>
    %444 = math.tanh %443 : vector<2x128xf32>
    %445 = arith.mulf %440, %444 : vector<2x128xf32>
    %446 = vector.shape_cast %445 : vector<2x128xf32> to vector<2x1x128xf32>
    "tpu.trace_start"() <{level = 10 : i32, message = "bnp,bmp->bnm"}> : () -> ()
    %cst_120 = arith.constant dense<0.000000e+00> : vector<2x16x1xf32>
    %447 = tpu.matmul %98, %446, %cst_120 {dimension_numbers = #tpu.dot_dimension_numbers<[2], [2], [1], [1], [0, 0, 0, 1, 1, 1], [0], [0]>} : vector<2x16x128xf32>, vector<2x1x128xf32>, vector<2x16x1xf32> -> vector<2x16x1xf32>
    "tpu.trace_stop"() : () -> ()
    %448 = vector.shape_cast %447 : vector<2x16x1xf32> to vector<2x16xf32>
    %cst_121 = arith.constant dense<0xFF800000> : vector<2xf32>
    %449 = vector.multi_reduction <maximumf>, %448, %cst_121 [1] : vector<2x16xf32> to vector<2xf32>
    %450 = vector.shape_cast %449 : vector<2xf32> to vector<2x1xf32>
    %451 = vector.broadcast %450 : vector<2x1xf32> to vector<2x16xf32>
    %452 = arith.subf %448, %451 : vector<2x16xf32>
    %453 = math.exp %452 : vector<2x16xf32>
    %cst_122 = arith.constant dense<0.000000e+00> : vector<2xf32>
    %454 = vector.multi_reduction <add>, %453, %cst_122 [1] : vector<2x16xf32> to vector<2xf32>
    %455 = vector.shape_cast %454 : vector<2xf32> to vector<2x1xf32>
    %456 = tpu.reciprocal %455 {approx = true} : vector<2x1xf32> -> vector<2x1xf32>
    %457 = vector.broadcast %456 : vector<2x1xf32> to vector<2x16xf32>
    %458 = arith.mulf %453, %457 : vector<2x16xf32>
    %459 = vector.shape_cast %458 : vector<2x16xf32> to vector<2x1x16xf32>
    "tpu.trace_start"() <{level = 10 : i32, message = "bmn,bnp->bmp"}> : () -> ()
    %cst_123 = arith.constant dense<0.000000e+00> : vector<2x1x128xf32>
    %460 = tpu.matmul %459, %98, %cst_123 {dimension_numbers = #tpu.dot_dimension_numbers<[2], [1], [1], [2], [0, 0, 0, 1, 1, 2], [0], [0]>} : vector<2x1x16xf32>, vector<2x16x128xf32>, vector<2x1x128xf32> -> vector<2x1x128xf32>
    "tpu.trace_stop"() : () -> ()
    %461 = vector.shape_cast %460 : vector<2x1x128xf32> to vector<2x128xf32>
    %c8_i32 = arith.constant 8 : i32
    %462 = tpu.concatenate %445, %461 in 1 : vector<2x128xf32>, vector<2x128xf32> -> vector<2x256xf32>
    %cst_124 = arith.constant dense<0.000000e+00> : vector<2x512xf32>
    %463 = tpu.matmul %462, %99, %cst_124 {dimension_numbers = #tpu.dot_dimension_numbers<[1], [0], [0], [1], [0, 0, 1, 1], [], []>} : vector<2x256xf32>, vector<256x512xf32>, vector<2x512xf32> -> vector<2x512xf32>
    %464 = arith.addf %463, %102 : vector<2x512xf32>
    %465 = vector.extract_strided_slice %464 {offsets = [0, 0], sizes = [2, 128], strides = [1, 1]} : vector<2x512xf32> to vector<2x128xf32>
    %466 = arith.negf %465 : vector<2x128xf32>
    %467 = math.exp %466 : vector<2x128xf32>
    %cst_125 = arith.constant 1.000000e+00 : f32
    %468 = vector.broadcast %cst_125 : f32 to vector<2x128xf32>
    %469 = arith.addf %468, %467 : vector<2x128xf32>
    %470 = arith.divf %468, %469 : vector<2x128xf32>
    %471 = vector.extract_strided_slice %464 {offsets = [0, 128], sizes = [2, 128], strides = [1, 1]} : vector<2x512xf32> to vector<2x128xf32>
    %472 = arith.negf %471 : vector<2x128xf32>
    %473 = math.exp %472 : vector<2x128xf32>
    %cst_126 = arith.constant 1.000000e+00 : f32
    %474 = vector.broadcast %cst_126 : f32 to vector<2x128xf32>
    %475 = arith.addf %474, %473 : vector<2x128xf32>
    %476 = arith.divf %474, %475 : vector<2x128xf32>
    %477 = vector.extract_strided_slice %464 {offsets = [0, 256], sizes = [2, 128], strides = [1, 1]} : vector<2x512xf32> to vector<2x128xf32>
    %478 = math.tanh %477 : vector<2x128xf32>
    %479 = vector.extract_strided_slice %464 {offsets = [0, 384], sizes = [2, 128], strides = [1, 1]} : vector<2x512xf32> to vector<2x128xf32>
    %480 = arith.negf %479 : vector<2x128xf32>
    %481 = math.exp %480 : vector<2x128xf32>
    %cst_127 = arith.constant 1.000000e+00 : f32
    %482 = vector.broadcast %cst_127 : f32 to vector<2x128xf32>
    %483 = arith.addf %482, %481 : vector<2x128xf32>
    %484 = arith.divf %482, %483 : vector<2x128xf32>
    %485 = arith.mulf %476, %443 : vector<2x128xf32>
    %486 = arith.mulf %470, %478 : vector<2x128xf32>
    %487 = arith.addf %485, %486 : vector<2x128xf32>
    %488 = math.tanh %487 : vector<2x128xf32>
    %489 = arith.mulf %484, %488 : vector<2x128xf32>
    %490 = vector.shape_cast %489 : vector<2x128xf32> to vector<2x1x128xf32>
    "tpu.trace_start"() <{level = 10 : i32, message = "bnp,bmp->bnm"}> : () -> ()
    %cst_128 = arith.constant dense<0.000000e+00> : vector<2x16x1xf32>
    %491 = tpu.matmul %98, %490, %cst_128 {dimension_numbers = #tpu.dot_dimension_numbers<[2], [2], [1], [1], [0, 0, 0, 1, 1, 1], [0], [0]>} : vector<2x16x128xf32>, vector<2x1x128xf32>, vector<2x16x1xf32> -> vector<2x16x1xf32>
    "tpu.trace_stop"() : () -> ()
    %492 = vector.shape_cast %491 : vector<2x16x1xf32> to vector<2x16xf32>
    %cst_129 = arith.constant dense<0xFF800000> : vector<2xf32>
    %493 = vector.multi_reduction <maximumf>, %492, %cst_129 [1] : vector<2x16xf32> to vector<2xf32>
    %494 = vector.shape_cast %493 : vector<2xf32> to vector<2x1xf32>
    %495 = vector.broadcast %494 : vector<2x1xf32> to vector<2x16xf32>
    %496 = arith.subf %492, %495 : vector<2x16xf32>
    %497 = math.exp %496 : vector<2x16xf32>
    %cst_130 = arith.constant dense<0.000000e+00> : vector<2xf32>
    %498 = vector.multi_reduction <add>, %497, %cst_130 [1] : vector<2x16xf32> to vector<2xf32>
    %499 = vector.shape_cast %498 : vector<2xf32> to vector<2x1xf32>
    %500 = tpu.reciprocal %499 {approx = true} : vector<2x1xf32> -> vector<2x1xf32>
    %501 = vector.broadcast %500 : vector<2x1xf32> to vector<2x16xf32>
    %502 = arith.mulf %497, %501 : vector<2x16xf32>
    %503 = vector.shape_cast %502 : vector<2x16xf32> to vector<2x1x16xf32>
    "tpu.trace_start"() <{level = 10 : i32, message = "bmn,bnp->bmp"}> : () -> ()
    %cst_131 = arith.constant dense<0.000000e+00> : vector<2x1x128xf32>
    %504 = tpu.matmul %503, %98, %cst_131 {dimension_numbers = #tpu.dot_dimension_numbers<[2], [1], [1], [2], [0, 0, 0, 1, 1, 2], [0], [0]>} : vector<2x1x16xf32>, vector<2x16x128xf32>, vector<2x1x128xf32> -> vector<2x1x128xf32>
    "tpu.trace_stop"() : () -> ()
    %505 = vector.shape_cast %504 : vector<2x1x128xf32> to vector<2x128xf32>
    %c9_i32 = arith.constant 9 : i32
    %506 = tpu.concatenate %489, %505 in 1 : vector<2x128xf32>, vector<2x128xf32> -> vector<2x256xf32>
    %cst_132 = arith.constant dense<0.000000e+00> : vector<2x512xf32>
    %507 = tpu.matmul %506, %99, %cst_132 {dimension_numbers = #tpu.dot_dimension_numbers<[1], [0], [0], [1], [0, 0, 1, 1], [], []>} : vector<2x256xf32>, vector<256x512xf32>, vector<2x512xf32> -> vector<2x512xf32>
    %508 = arith.addf %507, %102 : vector<2x512xf32>
    %509 = vector.extract_strided_slice %508 {offsets = [0, 0], sizes = [2, 128], strides = [1, 1]} : vector<2x512xf32> to vector<2x128xf32>
    %510 = arith.negf %509 : vector<2x128xf32>
    %511 = math.exp %510 : vector<2x128xf32>
    %cst_133 = arith.constant 1.000000e+00 : f32
    %512 = vector.broadcast %cst_133 : f32 to vector<2x128xf32>
    %513 = arith.addf %512, %511 : vector<2x128xf32>
    %514 = arith.divf %512, %513 : vector<2x128xf32>
    %515 = vector.extract_strided_slice %508 {offsets = [0, 128], sizes = [2, 128], strides = [1, 1]} : vector<2x512xf32> to vector<2x128xf32>
    %516 = arith.negf %515 : vector<2x128xf32>
    %517 = math.exp %516 : vector<2x128xf32>
    %cst_134 = arith.constant 1.000000e+00 : f32
    %518 = vector.broadcast %cst_134 : f32 to vector<2x128xf32>
    %519 = arith.addf %518, %517 : vector<2x128xf32>
    %520 = arith.divf %518, %519 : vector<2x128xf32>
    %521 = vector.extract_strided_slice %508 {offsets = [0, 256], sizes = [2, 128], strides = [1, 1]} : vector<2x512xf32> to vector<2x128xf32>
    %522 = math.tanh %521 : vector<2x128xf32>
    %523 = vector.extract_strided_slice %508 {offsets = [0, 384], sizes = [2, 128], strides = [1, 1]} : vector<2x512xf32> to vector<2x128xf32>
    %524 = arith.negf %523 : vector<2x128xf32>
    %525 = math.exp %524 : vector<2x128xf32>
    %cst_135 = arith.constant 1.000000e+00 : f32
    %526 = vector.broadcast %cst_135 : f32 to vector<2x128xf32>
    %527 = arith.addf %526, %525 : vector<2x128xf32>
    %528 = arith.divf %526, %527 : vector<2x128xf32>
    %529 = arith.mulf %520, %487 : vector<2x128xf32>
    %530 = arith.mulf %514, %522 : vector<2x128xf32>
    %531 = arith.addf %529, %530 : vector<2x128xf32>
    %532 = math.tanh %531 : vector<2x128xf32>
    %533 = arith.mulf %528, %532 : vector<2x128xf32>
    %534 = vector.shape_cast %533 : vector<2x128xf32> to vector<2x1x128xf32>
    "tpu.trace_start"() <{level = 10 : i32, message = "bnp,bmp->bnm"}> : () -> ()
    %cst_136 = arith.constant dense<0.000000e+00> : vector<2x16x1xf32>
    %535 = tpu.matmul %98, %534, %cst_136 {dimension_numbers = #tpu.dot_dimension_numbers<[2], [2], [1], [1], [0, 0, 0, 1, 1, 1], [0], [0]>} : vector<2x16x128xf32>, vector<2x1x128xf32>, vector<2x16x1xf32> -> vector<2x16x1xf32>
    "tpu.trace_stop"() : () -> ()
    %536 = vector.shape_cast %535 : vector<2x16x1xf32> to vector<2x16xf32>
    %cst_137 = arith.constant dense<0xFF800000> : vector<2xf32>
    %537 = vector.multi_reduction <maximumf>, %536, %cst_137 [1] : vector<2x16xf32> to vector<2xf32>
    %538 = vector.shape_cast %537 : vector<2xf32> to vector<2x1xf32>
    %539 = vector.broadcast %538 : vector<2x1xf32> to vector<2x16xf32>
    %540 = arith.subf %536, %539 : vector<2x16xf32>
    %541 = math.exp %540 : vector<2x16xf32>
    %cst_138 = arith.constant dense<0.000000e+00> : vector<2xf32>
    %542 = vector.multi_reduction <add>, %541, %cst_138 [1] : vector<2x16xf32> to vector<2xf32>
    %543 = vector.shape_cast %542 : vector<2xf32> to vector<2x1xf32>
    %544 = tpu.reciprocal %543 {approx = true} : vector<2x1xf32> -> vector<2x1xf32>
    %545 = vector.broadcast %544 : vector<2x1xf32> to vector<2x16xf32>
    %546 = arith.mulf %541, %545 : vector<2x16xf32>
    %547 = vector.shape_cast %546 : vector<2x16xf32> to vector<2x1x16xf32>
    "tpu.trace_start"() <{level = 10 : i32, message = "bmn,bnp->bmp"}> : () -> ()
    %cst_139 = arith.constant dense<0.000000e+00> : vector<2x1x128xf32>
    %548 = tpu.matmul %547, %98, %cst_139 {dimension_numbers = #tpu.dot_dimension_numbers<[2], [1], [1], [2], [0, 0, 0, 1, 1, 2], [0], [0]>} : vector<2x1x16xf32>, vector<2x16x128xf32>, vector<2x1x128xf32> -> vector<2x1x128xf32>
    "tpu.trace_stop"() : () -> ()
    %549 = vector.shape_cast %548 : vector<2x1x128xf32> to vector<2x128xf32>
    %c10_i32 = arith.constant 10 : i32
    %550 = tpu.concatenate %533, %549 in 1 : vector<2x128xf32>, vector<2x128xf32> -> vector<2x256xf32>
    %cst_140 = arith.constant dense<0.000000e+00> : vector<2x512xf32>
    %551 = tpu.matmul %550, %99, %cst_140 {dimension_numbers = #tpu.dot_dimension_numbers<[1], [0], [0], [1], [0, 0, 1, 1], [], []>} : vector<2x256xf32>, vector<256x512xf32>, vector<2x512xf32> -> vector<2x512xf32>
    %552 = arith.addf %551, %102 : vector<2x512xf32>
    %553 = vector.extract_strided_slice %552 {offsets = [0, 0], sizes = [2, 128], strides = [1, 1]} : vector<2x512xf32> to vector<2x128xf32>
    %554 = arith.negf %553 : vector<2x128xf32>
    %555 = math.exp %554 : vector<2x128xf32>
    %cst_141 = arith.constant 1.000000e+00 : f32
    %556 = vector.broadcast %cst_141 : f32 to vector<2x128xf32>
    %557 = arith.addf %556, %555 : vector<2x128xf32>
    %558 = arith.divf %556, %557 : vector<2x128xf32>
    %559 = vector.extract_strided_slice %552 {offsets = [0, 128], sizes = [2, 128], strides = [1, 1]} : vector<2x512xf32> to vector<2x128xf32>
    %560 = arith.negf %559 : vector<2x128xf32>
    %561 = math.exp %560 : vector<2x128xf32>
    %cst_142 = arith.constant 1.000000e+00 : f32
    %562 = vector.broadcast %cst_142 : f32 to vector<2x128xf32>
    %563 = arith.addf %562, %561 : vector<2x128xf32>
    %564 = arith.divf %562, %563 : vector<2x128xf32>
    %565 = vector.extract_strided_slice %552 {offsets = [0, 256], sizes = [2, 128], strides = [1, 1]} : vector<2x512xf32> to vector<2x128xf32>
    %566 = math.tanh %565 : vector<2x128xf32>
    %567 = vector.extract_strided_slice %552 {offsets = [0, 384], sizes = [2, 128], strides = [1, 1]} : vector<2x512xf32> to vector<2x128xf32>
    %568 = arith.negf %567 : vector<2x128xf32>
    %569 = math.exp %568 : vector<2x128xf32>
    %cst_143 = arith.constant 1.000000e+00 : f32
    %570 = vector.broadcast %cst_143 : f32 to vector<2x128xf32>
    %571 = arith.addf %570, %569 : vector<2x128xf32>
    %572 = arith.divf %570, %571 : vector<2x128xf32>
    %573 = arith.mulf %564, %531 : vector<2x128xf32>
    %574 = arith.mulf %558, %566 : vector<2x128xf32>
    %575 = arith.addf %573, %574 : vector<2x128xf32>
    %576 = math.tanh %575 : vector<2x128xf32>
    %577 = arith.mulf %572, %576 : vector<2x128xf32>
    %578 = vector.shape_cast %577 : vector<2x128xf32> to vector<2x1x128xf32>
    "tpu.trace_start"() <{level = 10 : i32, message = "bnp,bmp->bnm"}> : () -> ()
    %cst_144 = arith.constant dense<0.000000e+00> : vector<2x16x1xf32>
    %579 = tpu.matmul %98, %578, %cst_144 {dimension_numbers = #tpu.dot_dimension_numbers<[2], [2], [1], [1], [0, 0, 0, 1, 1, 1], [0], [0]>} : vector<2x16x128xf32>, vector<2x1x128xf32>, vector<2x16x1xf32> -> vector<2x16x1xf32>
    "tpu.trace_stop"() : () -> ()
    %580 = vector.shape_cast %579 : vector<2x16x1xf32> to vector<2x16xf32>
    %cst_145 = arith.constant dense<0xFF800000> : vector<2xf32>
    %581 = vector.multi_reduction <maximumf>, %580, %cst_145 [1] : vector<2x16xf32> to vector<2xf32>
    %582 = vector.shape_cast %581 : vector<2xf32> to vector<2x1xf32>
    %583 = vector.broadcast %582 : vector<2x1xf32> to vector<2x16xf32>
    %584 = arith.subf %580, %583 : vector<2x16xf32>
    %585 = math.exp %584 : vector<2x16xf32>
    %cst_146 = arith.constant dense<0.000000e+00> : vector<2xf32>
    %586 = vector.multi_reduction <add>, %585, %cst_146 [1] : vector<2x16xf32> to vector<2xf32>
    %587 = vector.shape_cast %586 : vector<2xf32> to vector<2x1xf32>
    %588 = tpu.reciprocal %587 {approx = true} : vector<2x1xf32> -> vector<2x1xf32>
    %589 = vector.broadcast %588 : vector<2x1xf32> to vector<2x16xf32>
    %590 = arith.mulf %585, %589 : vector<2x16xf32>
    %591 = vector.shape_cast %590 : vector<2x16xf32> to vector<2x1x16xf32>
    "tpu.trace_start"() <{level = 10 : i32, message = "bmn,bnp->bmp"}> : () -> ()
    %cst_147 = arith.constant dense<0.000000e+00> : vector<2x1x128xf32>
    %592 = tpu.matmul %591, %98, %cst_147 {dimension_numbers = #tpu.dot_dimension_numbers<[2], [1], [1], [2], [0, 0, 0, 1, 1, 2], [0], [0]>} : vector<2x1x16xf32>, vector<2x16x128xf32>, vector<2x1x128xf32> -> vector<2x1x128xf32>
    "tpu.trace_stop"() : () -> ()
    %593 = vector.shape_cast %592 : vector<2x1x128xf32> to vector<2x128xf32>
    %c11_i32 = arith.constant 11 : i32
    %594 = tpu.concatenate %577, %593 in 1 : vector<2x128xf32>, vector<2x128xf32> -> vector<2x256xf32>
    %cst_148 = arith.constant dense<0.000000e+00> : vector<2x512xf32>
    %595 = tpu.matmul %594, %99, %cst_148 {dimension_numbers = #tpu.dot_dimension_numbers<[1], [0], [0], [1], [0, 0, 1, 1], [], []>} : vector<2x256xf32>, vector<256x512xf32>, vector<2x512xf32> -> vector<2x512xf32>
    %596 = arith.addf %595, %102 : vector<2x512xf32>
    %597 = vector.extract_strided_slice %596 {offsets = [0, 0], sizes = [2, 128], strides = [1, 1]} : vector<2x512xf32> to vector<2x128xf32>
    %598 = arith.negf %597 : vector<2x128xf32>
    %599 = math.exp %598 : vector<2x128xf32>
    %cst_149 = arith.constant 1.000000e+00 : f32
    %600 = vector.broadcast %cst_149 : f32 to vector<2x128xf32>
    %601 = arith.addf %600, %599 : vector<2x128xf32>
    %602 = arith.divf %600, %601 : vector<2x128xf32>
    %603 = vector.extract_strided_slice %596 {offsets = [0, 128], sizes = [2, 128], strides = [1, 1]} : vector<2x512xf32> to vector<2x128xf32>
    %604 = arith.negf %603 : vector<2x128xf32>
    %605 = math.exp %604 : vector<2x128xf32>
    %cst_150 = arith.constant 1.000000e+00 : f32
    %606 = vector.broadcast %cst_150 : f32 to vector<2x128xf32>
    %607 = arith.addf %606, %605 : vector<2x128xf32>
    %608 = arith.divf %606, %607 : vector<2x128xf32>
    %609 = vector.extract_strided_slice %596 {offsets = [0, 256], sizes = [2, 128], strides = [1, 1]} : vector<2x512xf32> to vector<2x128xf32>
    %610 = math.tanh %609 : vector<2x128xf32>
    %611 = vector.extract_strided_slice %596 {offsets = [0, 384], sizes = [2, 128], strides = [1, 1]} : vector<2x512xf32> to vector<2x128xf32>
    %612 = arith.negf %611 : vector<2x128xf32>
    %613 = math.exp %612 : vector<2x128xf32>
    %cst_151 = arith.constant 1.000000e+00 : f32
    %614 = vector.broadcast %cst_151 : f32 to vector<2x128xf32>
    %615 = arith.addf %614, %613 : vector<2x128xf32>
    %616 = arith.divf %614, %615 : vector<2x128xf32>
    %617 = arith.mulf %608, %575 : vector<2x128xf32>
    %618 = arith.mulf %602, %610 : vector<2x128xf32>
    %619 = arith.addf %617, %618 : vector<2x128xf32>
    %620 = math.tanh %619 : vector<2x128xf32>
    %621 = arith.mulf %616, %620 : vector<2x128xf32>
    %622 = vector.shape_cast %621 : vector<2x128xf32> to vector<2x1x128xf32>
    "tpu.trace_start"() <{level = 10 : i32, message = "bnp,bmp->bnm"}> : () -> ()
    %cst_152 = arith.constant dense<0.000000e+00> : vector<2x16x1xf32>
    %623 = tpu.matmul %98, %622, %cst_152 {dimension_numbers = #tpu.dot_dimension_numbers<[2], [2], [1], [1], [0, 0, 0, 1, 1, 1], [0], [0]>} : vector<2x16x128xf32>, vector<2x1x128xf32>, vector<2x16x1xf32> -> vector<2x16x1xf32>
    "tpu.trace_stop"() : () -> ()
    %624 = vector.shape_cast %623 : vector<2x16x1xf32> to vector<2x16xf32>
    %cst_153 = arith.constant dense<0xFF800000> : vector<2xf32>
    %625 = vector.multi_reduction <maximumf>, %624, %cst_153 [1] : vector<2x16xf32> to vector<2xf32>
    %626 = vector.shape_cast %625 : vector<2xf32> to vector<2x1xf32>
    %627 = vector.broadcast %626 : vector<2x1xf32> to vector<2x16xf32>
    %628 = arith.subf %624, %627 : vector<2x16xf32>
    %629 = math.exp %628 : vector<2x16xf32>
    %cst_154 = arith.constant dense<0.000000e+00> : vector<2xf32>
    %630 = vector.multi_reduction <add>, %629, %cst_154 [1] : vector<2x16xf32> to vector<2xf32>
    %631 = vector.shape_cast %630 : vector<2xf32> to vector<2x1xf32>
    %632 = tpu.reciprocal %631 {approx = true} : vector<2x1xf32> -> vector<2x1xf32>
    %633 = vector.broadcast %632 : vector<2x1xf32> to vector<2x16xf32>
    %634 = arith.mulf %629, %633 : vector<2x16xf32>
    %635 = vector.shape_cast %634 : vector<2x16xf32> to vector<2x1x16xf32>
    "tpu.trace_start"() <{level = 10 : i32, message = "bmn,bnp->bmp"}> : () -> ()
    %cst_155 = arith.constant dense<0.000000e+00> : vector<2x1x128xf32>
    %636 = tpu.matmul %635, %98, %cst_155 {dimension_numbers = #tpu.dot_dimension_numbers<[2], [1], [1], [2], [0, 0, 0, 1, 1, 2], [0], [0]>} : vector<2x1x16xf32>, vector<2x16x128xf32>, vector<2x1x128xf32> -> vector<2x1x128xf32>
    "tpu.trace_stop"() : () -> ()
    %637 = vector.shape_cast %636 : vector<2x1x128xf32> to vector<2x128xf32>
    %c12_i32 = arith.constant 12 : i32
    %638 = tpu.concatenate %621, %637 in 1 : vector<2x128xf32>, vector<2x128xf32> -> vector<2x256xf32>
    %cst_156 = arith.constant dense<0.000000e+00> : vector<2x512xf32>
    %639 = tpu.matmul %638, %99, %cst_156 {dimension_numbers = #tpu.dot_dimension_numbers<[1], [0], [0], [1], [0, 0, 1, 1], [], []>} : vector<2x256xf32>, vector<256x512xf32>, vector<2x512xf32> -> vector<2x512xf32>
    %640 = arith.addf %639, %102 : vector<2x512xf32>
    %641 = vector.extract_strided_slice %640 {offsets = [0, 0], sizes = [2, 128], strides = [1, 1]} : vector<2x512xf32> to vector<2x128xf32>
    %642 = arith.negf %641 : vector<2x128xf32>
    %643 = math.exp %642 : vector<2x128xf32>
    %cst_157 = arith.constant 1.000000e+00 : f32
    %644 = vector.broadcast %cst_157 : f32 to vector<2x128xf32>
    %645 = arith.addf %644, %643 : vector<2x128xf32>
    %646 = arith.divf %644, %645 : vector<2x128xf32>
    %647 = vector.extract_strided_slice %640 {offsets = [0, 128], sizes = [2, 128], strides = [1, 1]} : vector<2x512xf32> to vector<2x128xf32>
    %648 = arith.negf %647 : vector<2x128xf32>
    %649 = math.exp %648 : vector<2x128xf32>
    %cst_158 = arith.constant 1.000000e+00 : f32
    %650 = vector.broadcast %cst_158 : f32 to vector<2x128xf32>
    %651 = arith.addf %650, %649 : vector<2x128xf32>
    %652 = arith.divf %650, %651 : vector<2x128xf32>
    %653 = vector.extract_strided_slice %640 {offsets = [0, 256], sizes = [2, 128], strides = [1, 1]} : vector<2x512xf32> to vector<2x128xf32>
    %654 = math.tanh %653 : vector<2x128xf32>
    %655 = vector.extract_strided_slice %640 {offsets = [0, 384], sizes = [2, 128], strides = [1, 1]} : vector<2x512xf32> to vector<2x128xf32>
    %656 = arith.negf %655 : vector<2x128xf32>
    %657 = math.exp %656 : vector<2x128xf32>
    %cst_159 = arith.constant 1.000000e+00 : f32
    %658 = vector.broadcast %cst_159 : f32 to vector<2x128xf32>
    %659 = arith.addf %658, %657 : vector<2x128xf32>
    %660 = arith.divf %658, %659 : vector<2x128xf32>
    %661 = arith.mulf %652, %619 : vector<2x128xf32>
    %662 = arith.mulf %646, %654 : vector<2x128xf32>
    %663 = arith.addf %661, %662 : vector<2x128xf32>
    %664 = math.tanh %663 : vector<2x128xf32>
    %665 = arith.mulf %660, %664 : vector<2x128xf32>
    %666 = vector.shape_cast %665 : vector<2x128xf32> to vector<2x1x128xf32>
    "tpu.trace_start"() <{level = 10 : i32, message = "bnp,bmp->bnm"}> : () -> ()
    %cst_160 = arith.constant dense<0.000000e+00> : vector<2x16x1xf32>
    %667 = tpu.matmul %98, %666, %cst_160 {dimension_numbers = #tpu.dot_dimension_numbers<[2], [2], [1], [1], [0, 0, 0, 1, 1, 1], [0], [0]>} : vector<2x16x128xf32>, vector<2x1x128xf32>, vector<2x16x1xf32> -> vector<2x16x1xf32>
    "tpu.trace_stop"() : () -> ()
    %668 = vector.shape_cast %667 : vector<2x16x1xf32> to vector<2x16xf32>
    %cst_161 = arith.constant dense<0xFF800000> : vector<2xf32>
    %669 = vector.multi_reduction <maximumf>, %668, %cst_161 [1] : vector<2x16xf32> to vector<2xf32>
    %670 = vector.shape_cast %669 : vector<2xf32> to vector<2x1xf32>
    %671 = vector.broadcast %670 : vector<2x1xf32> to vector<2x16xf32>
    %672 = arith.subf %668, %671 : vector<2x16xf32>
    %673 = math.exp %672 : vector<2x16xf32>
    %cst_162 = arith.constant dense<0.000000e+00> : vector<2xf32>
    %674 = vector.multi_reduction <add>, %673, %cst_162 [1] : vector<2x16xf32> to vector<2xf32>
    %675 = vector.shape_cast %674 : vector<2xf32> to vector<2x1xf32>
    %676 = tpu.reciprocal %675 {approx = true} : vector<2x1xf32> -> vector<2x1xf32>
    %677 = vector.broadcast %676 : vector<2x1xf32> to vector<2x16xf32>
    %678 = arith.mulf %673, %677 : vector<2x16xf32>
    %679 = vector.shape_cast %678 : vector<2x16xf32> to vector<2x1x16xf32>
    "tpu.trace_start"() <{level = 10 : i32, message = "bmn,bnp->bmp"}> : () -> ()
    %cst_163 = arith.constant dense<0.000000e+00> : vector<2x1x128xf32>
    %680 = tpu.matmul %679, %98, %cst_163 {dimension_numbers = #tpu.dot_dimension_numbers<[2], [1], [1], [2], [0, 0, 0, 1, 1, 2], [0], [0]>} : vector<2x1x16xf32>, vector<2x16x128xf32>, vector<2x1x128xf32> -> vector<2x1x128xf32>
    "tpu.trace_stop"() : () -> ()
    %681 = vector.shape_cast %680 : vector<2x1x128xf32> to vector<2x128xf32>
    %c13_i32 = arith.constant 13 : i32
    %682 = tpu.concatenate %665, %681 in 1 : vector<2x128xf32>, vector<2x128xf32> -> vector<2x256xf32>
    %cst_164 = arith.constant dense<0.000000e+00> : vector<2x512xf32>
    %683 = tpu.matmul %682, %99, %cst_164 {dimension_numbers = #tpu.dot_dimension_numbers<[1], [0], [0], [1], [0, 0, 1, 1], [], []>} : vector<2x256xf32>, vector<256x512xf32>, vector<2x512xf32> -> vector<2x512xf32>
    %684 = arith.addf %683, %102 : vector<2x512xf32>
    %685 = vector.extract_strided_slice %684 {offsets = [0, 0], sizes = [2, 128], strides = [1, 1]} : vector<2x512xf32> to vector<2x128xf32>
    %686 = arith.negf %685 : vector<2x128xf32>
    %687 = math.exp %686 : vector<2x128xf32>
    %cst_165 = arith.constant 1.000000e+00 : f32
    %688 = vector.broadcast %cst_165 : f32 to vector<2x128xf32>
    %689 = arith.addf %688, %687 : vector<2x128xf32>
    %690 = arith.divf %688, %689 : vector<2x128xf32>
    %691 = vector.extract_strided_slice %684 {offsets = [0, 128], sizes = [2, 128], strides = [1, 1]} : vector<2x512xf32> to vector<2x128xf32>
    %692 = arith.negf %691 : vector<2x128xf32>
    %693 = math.exp %692 : vector<2x128xf32>
    %cst_166 = arith.constant 1.000000e+00 : f32
    %694 = vector.broadcast %cst_166 : f32 to vector<2x128xf32>
    %695 = arith.addf %694, %693 : vector<2x128xf32>
    %696 = arith.divf %694, %695 : vector<2x128xf32>
    %697 = vector.extract_strided_slice %684 {offsets = [0, 256], sizes = [2, 128], strides = [1, 1]} : vector<2x512xf32> to vector<2x128xf32>
    %698 = math.tanh %697 : vector<2x128xf32>
    %699 = vector.extract_strided_slice %684 {offsets = [0, 384], sizes = [2, 128], strides = [1, 1]} : vector<2x512xf32> to vector<2x128xf32>
    %700 = arith.negf %699 : vector<2x128xf32>
    %701 = math.exp %700 : vector<2x128xf32>
    %cst_167 = arith.constant 1.000000e+00 : f32
    %702 = vector.broadcast %cst_167 : f32 to vector<2x128xf32>
    %703 = arith.addf %702, %701 : vector<2x128xf32>
    %704 = arith.divf %702, %703 : vector<2x128xf32>
    %705 = arith.mulf %696, %663 : vector<2x128xf32>
    %706 = arith.mulf %690, %698 : vector<2x128xf32>
    %707 = arith.addf %705, %706 : vector<2x128xf32>
    %708 = math.tanh %707 : vector<2x128xf32>
    %709 = arith.mulf %704, %708 : vector<2x128xf32>
    %710 = vector.shape_cast %709 : vector<2x128xf32> to vector<2x1x128xf32>
    "tpu.trace_start"() <{level = 10 : i32, message = "bnp,bmp->bnm"}> : () -> ()
    %cst_168 = arith.constant dense<0.000000e+00> : vector<2x16x1xf32>
    %711 = tpu.matmul %98, %710, %cst_168 {dimension_numbers = #tpu.dot_dimension_numbers<[2], [2], [1], [1], [0, 0, 0, 1, 1, 1], [0], [0]>} : vector<2x16x128xf32>, vector<2x1x128xf32>, vector<2x16x1xf32> -> vector<2x16x1xf32>
    "tpu.trace_stop"() : () -> ()
    %712 = vector.shape_cast %711 : vector<2x16x1xf32> to vector<2x16xf32>
    %cst_169 = arith.constant dense<0xFF800000> : vector<2xf32>
    %713 = vector.multi_reduction <maximumf>, %712, %cst_169 [1] : vector<2x16xf32> to vector<2xf32>
    %714 = vector.shape_cast %713 : vector<2xf32> to vector<2x1xf32>
    %715 = vector.broadcast %714 : vector<2x1xf32> to vector<2x16xf32>
    %716 = arith.subf %712, %715 : vector<2x16xf32>
    %717 = math.exp %716 : vector<2x16xf32>
    %cst_170 = arith.constant dense<0.000000e+00> : vector<2xf32>
    %718 = vector.multi_reduction <add>, %717, %cst_170 [1] : vector<2x16xf32> to vector<2xf32>
    %719 = vector.shape_cast %718 : vector<2xf32> to vector<2x1xf32>
    %720 = tpu.reciprocal %719 {approx = true} : vector<2x1xf32> -> vector<2x1xf32>
    %721 = vector.broadcast %720 : vector<2x1xf32> to vector<2x16xf32>
    %722 = arith.mulf %717, %721 : vector<2x16xf32>
    %723 = vector.shape_cast %722 : vector<2x16xf32> to vector<2x1x16xf32>
    "tpu.trace_start"() <{level = 10 : i32, message = "bmn,bnp->bmp"}> : () -> ()
    %cst_171 = arith.constant dense<0.000000e+00> : vector<2x1x128xf32>
    %724 = tpu.matmul %723, %98, %cst_171 {dimension_numbers = #tpu.dot_dimension_numbers<[2], [1], [1], [2], [0, 0, 0, 1, 1, 2], [0], [0]>} : vector<2x1x16xf32>, vector<2x16x128xf32>, vector<2x1x128xf32> -> vector<2x1x128xf32>
    "tpu.trace_stop"() : () -> ()
    %725 = vector.shape_cast %724 : vector<2x1x128xf32> to vector<2x128xf32>
    %c14_i32 = arith.constant 14 : i32
    %726 = tpu.concatenate %709, %725 in 1 : vector<2x128xf32>, vector<2x128xf32> -> vector<2x256xf32>
    %cst_172 = arith.constant dense<0.000000e+00> : vector<2x512xf32>
    %727 = tpu.matmul %726, %99, %cst_172 {dimension_numbers = #tpu.dot_dimension_numbers<[1], [0], [0], [1], [0, 0, 1, 1], [], []>} : vector<2x256xf32>, vector<256x512xf32>, vector<2x512xf32> -> vector<2x512xf32>
    %728 = arith.addf %727, %102 : vector<2x512xf32>
    %729 = vector.extract_strided_slice %728 {offsets = [0, 0], sizes = [2, 128], strides = [1, 1]} : vector<2x512xf32> to vector<2x128xf32>
    %730 = arith.negf %729 : vector<2x128xf32>
    %731 = math.exp %730 : vector<2x128xf32>
    %cst_173 = arith.constant 1.000000e+00 : f32
    %732 = vector.broadcast %cst_173 : f32 to vector<2x128xf32>
    %733 = arith.addf %732, %731 : vector<2x128xf32>
    %734 = arith.divf %732, %733 : vector<2x128xf32>
    %735 = vector.extract_strided_slice %728 {offsets = [0, 128], sizes = [2, 128], strides = [1, 1]} : vector<2x512xf32> to vector<2x128xf32>
    %736 = arith.negf %735 : vector<2x128xf32>
    %737 = math.exp %736 : vector<2x128xf32>
    %cst_174 = arith.constant 1.000000e+00 : f32
    %738 = vector.broadcast %cst_174 : f32 to vector<2x128xf32>
    %739 = arith.addf %738, %737 : vector<2x128xf32>
    %740 = arith.divf %738, %739 : vector<2x128xf32>
    %741 = vector.extract_strided_slice %728 {offsets = [0, 256], sizes = [2, 128], strides = [1, 1]} : vector<2x512xf32> to vector<2x128xf32>
    %742 = math.tanh %741 : vector<2x128xf32>
    %743 = vector.extract_strided_slice %728 {offsets = [0, 384], sizes = [2, 128], strides = [1, 1]} : vector<2x512xf32> to vector<2x128xf32>
    %744 = arith.negf %743 : vector<2x128xf32>
    %745 = math.exp %744 : vector<2x128xf32>
    %cst_175 = arith.constant 1.000000e+00 : f32
    %746 = vector.broadcast %cst_175 : f32 to vector<2x128xf32>
    %747 = arith.addf %746, %745 : vector<2x128xf32>
    %748 = arith.divf %746, %747 : vector<2x128xf32>
    %749 = arith.mulf %740, %707 : vector<2x128xf32>
    %750 = arith.mulf %734, %742 : vector<2x128xf32>
    %751 = arith.addf %749, %750 : vector<2x128xf32>
    %752 = math.tanh %751 : vector<2x128xf32>
    %753 = arith.mulf %748, %752 : vector<2x128xf32>
    %754 = vector.shape_cast %753 : vector<2x128xf32> to vector<2x1x128xf32>
    "tpu.trace_start"() <{level = 10 : i32, message = "bnp,bmp->bnm"}> : () -> ()
    %cst_176 = arith.constant dense<0.000000e+00> : vector<2x16x1xf32>
    %755 = tpu.matmul %98, %754, %cst_176 {dimension_numbers = #tpu.dot_dimension_numbers<[2], [2], [1], [1], [0, 0, 0, 1, 1, 1], [0], [0]>} : vector<2x16x128xf32>, vector<2x1x128xf32>, vector<2x16x1xf32> -> vector<2x16x1xf32>
    "tpu.trace_stop"() : () -> ()
    %756 = vector.shape_cast %755 : vector<2x16x1xf32> to vector<2x16xf32>
    %cst_177 = arith.constant dense<0xFF800000> : vector<2xf32>
    %757 = vector.multi_reduction <maximumf>, %756, %cst_177 [1] : vector<2x16xf32> to vector<2xf32>
    %758 = vector.shape_cast %757 : vector<2xf32> to vector<2x1xf32>
    %759 = vector.broadcast %758 : vector<2x1xf32> to vector<2x16xf32>
    %760 = arith.subf %756, %759 : vector<2x16xf32>
    %761 = math.exp %760 : vector<2x16xf32>
    %cst_178 = arith.constant dense<0.000000e+00> : vector<2xf32>
    %762 = vector.multi_reduction <add>, %761, %cst_178 [1] : vector<2x16xf32> to vector<2xf32>
    %763 = vector.shape_cast %762 : vector<2xf32> to vector<2x1xf32>
    %764 = tpu.reciprocal %763 {approx = true} : vector<2x1xf32> -> vector<2x1xf32>
    %765 = vector.broadcast %764 : vector<2x1xf32> to vector<2x16xf32>
    %766 = arith.mulf %761, %765 : vector<2x16xf32>
    %767 = vector.shape_cast %766 : vector<2x16xf32> to vector<2x1x16xf32>
    "tpu.trace_start"() <{level = 10 : i32, message = "bmn,bnp->bmp"}> : () -> ()
    %cst_179 = arith.constant dense<0.000000e+00> : vector<2x1x128xf32>
    %768 = tpu.matmul %767, %98, %cst_179 {dimension_numbers = #tpu.dot_dimension_numbers<[2], [1], [1], [2], [0, 0, 0, 1, 1, 2], [0], [0]>} : vector<2x1x16xf32>, vector<2x16x128xf32>, vector<2x1x128xf32> -> vector<2x1x128xf32>
    "tpu.trace_stop"() : () -> ()
    %769 = vector.shape_cast %768 : vector<2x1x128xf32> to vector<2x128xf32>
    %c15_i32 = arith.constant 15 : i32
    %770 = tpu.concatenate %753, %769 in 1 : vector<2x128xf32>, vector<2x128xf32> -> vector<2x256xf32>
    %cst_180 = arith.constant dense<0.000000e+00> : vector<2x512xf32>
    %771 = tpu.matmul %770, %99, %cst_180 {dimension_numbers = #tpu.dot_dimension_numbers<[1], [0], [0], [1], [0, 0, 1, 1], [], []>} : vector<2x256xf32>, vector<256x512xf32>, vector<2x512xf32> -> vector<2x512xf32>
    %772 = arith.addf %771, %102 : vector<2x512xf32>
    %773 = vector.extract_strided_slice %772 {offsets = [0, 0], sizes = [2, 128], strides = [1, 1]} : vector<2x512xf32> to vector<2x128xf32>
    %774 = arith.negf %773 : vector<2x128xf32>
    %775 = math.exp %774 : vector<2x128xf32>
    %cst_181 = arith.constant 1.000000e+00 : f32
    %776 = vector.broadcast %cst_181 : f32 to vector<2x128xf32>
    %777 = arith.addf %776, %775 : vector<2x128xf32>
    %778 = arith.divf %776, %777 : vector<2x128xf32>
    %779 = vector.extract_strided_slice %772 {offsets = [0, 128], sizes = [2, 128], strides = [1, 1]} : vector<2x512xf32> to vector<2x128xf32>
    %780 = arith.negf %779 : vector<2x128xf32>
    %781 = math.exp %780 : vector<2x128xf32>
    %cst_182 = arith.constant 1.000000e+00 : f32
    %782 = vector.broadcast %cst_182 : f32 to vector<2x128xf32>
    %783 = arith.addf %782, %781 : vector<2x128xf32>
    %784 = arith.divf %782, %783 : vector<2x128xf32>
    %785 = vector.extract_strided_slice %772 {offsets = [0, 256], sizes = [2, 128], strides = [1, 1]} : vector<2x512xf32> to vector<2x128xf32>
    %786 = math.tanh %785 : vector<2x128xf32>
    %787 = vector.extract_strided_slice %772 {offsets = [0, 384], sizes = [2, 128], strides = [1, 1]} : vector<2x512xf32> to vector<2x128xf32>
    %788 = arith.negf %787 : vector<2x128xf32>
    %789 = math.exp %788 : vector<2x128xf32>
    %cst_183 = arith.constant 1.000000e+00 : f32
    %790 = vector.broadcast %cst_183 : f32 to vector<2x128xf32>
    %791 = arith.addf %790, %789 : vector<2x128xf32>
    %792 = arith.divf %790, %791 : vector<2x128xf32>
    %793 = arith.mulf %784, %751 : vector<2x128xf32>
    %794 = arith.mulf %778, %786 : vector<2x128xf32>
    %795 = arith.addf %793, %794 : vector<2x128xf32>
    %796 = math.tanh %795 : vector<2x128xf32>
    %797 = arith.mulf %792, %796 : vector<2x128xf32>
    %798 = vector.shape_cast %797 : vector<2x128xf32> to vector<2x1x128xf32>
    "tpu.trace_start"() <{level = 10 : i32, message = "bnp,bmp->bnm"}> : () -> ()
    %cst_184 = arith.constant dense<0.000000e+00> : vector<2x16x1xf32>
    %799 = tpu.matmul %98, %798, %cst_184 {dimension_numbers = #tpu.dot_dimension_numbers<[2], [2], [1], [1], [0, 0, 0, 1, 1, 1], [0], [0]>} : vector<2x16x128xf32>, vector<2x1x128xf32>, vector<2x16x1xf32> -> vector<2x16x1xf32>
    "tpu.trace_stop"() : () -> ()
    %800 = vector.shape_cast %799 : vector<2x16x1xf32> to vector<2x16xf32>
    %cst_185 = arith.constant dense<0xFF800000> : vector<2xf32>
    %801 = vector.multi_reduction <maximumf>, %800, %cst_185 [1] : vector<2x16xf32> to vector<2xf32>
    %802 = vector.shape_cast %801 : vector<2xf32> to vector<2x1xf32>
    %803 = vector.broadcast %802 : vector<2x1xf32> to vector<2x16xf32>
    %804 = arith.subf %800, %803 : vector<2x16xf32>
    %805 = math.exp %804 : vector<2x16xf32>
    %cst_186 = arith.constant dense<0.000000e+00> : vector<2xf32>
    %806 = vector.multi_reduction <add>, %805, %cst_186 [1] : vector<2x16xf32> to vector<2xf32>
    %807 = vector.shape_cast %806 : vector<2xf32> to vector<2x1xf32>
    %808 = tpu.reciprocal %807 {approx = true} : vector<2x1xf32> -> vector<2x1xf32>
    %809 = vector.broadcast %808 : vector<2x1xf32> to vector<2x16xf32>
    %810 = arith.mulf %805, %809 : vector<2x16xf32>
    %811 = vector.shape_cast %810 : vector<2x16xf32> to vector<2x1x16xf32>
    "tpu.trace_start"() <{level = 10 : i32, message = "bmn,bnp->bmp"}> : () -> ()
    %cst_187 = arith.constant dense<0.000000e+00> : vector<2x1x128xf32>
    %812 = tpu.matmul %811, %98, %cst_187 {dimension_numbers = #tpu.dot_dimension_numbers<[2], [1], [1], [2], [0, 0, 0, 1, 1, 2], [0], [0]>} : vector<2x1x16xf32>, vector<2x16x128xf32>, vector<2x1x128xf32> -> vector<2x1x128xf32>
    "tpu.trace_stop"() : () -> ()
    %813 = vector.shape_cast %812 : vector<2x1x128xf32> to vector<2x128xf32>
    %814 = tpu.concatenate %797, %813 in 1 : vector<2x128xf32>, vector<2x128xf32> -> vector<2x256xf32>
    %cst_188 = arith.constant dense<0.000000e+00> : vector<2x128xf32>
    %815 = tpu.matmul %814, %103, %cst_188 {dimension_numbers = #tpu.dot_dimension_numbers<[1], [0], [0], [1], [0, 0, 1, 1], [], []>} : vector<2x256xf32>, vector<256x128xf32>, vector<2x128xf32> -> vector<2x128xf32>
    %816 = vector.broadcast %104 : vector<1x128xf32> to vector<2x128xf32>
    %817 = arith.addf %815, %816 : vector<2x128xf32>
    %cst_189 = arith.constant 0.000000e+00 : f32
    %818 = vector.broadcast %cst_189 : f32 to vector<2x128xf32>
    %819 = arith.maximumf %817, %818 : vector<2x128xf32>
    %cst_190 = arith.constant dense<0.000000e+00> : vector<2x4xf32>
    %820 = tpu.matmul %819, %105, %cst_190 {dimension_numbers = #tpu.dot_dimension_numbers<[1], [0], [0], [1], [0, 0, 1, 1], [], []>} : vector<2x128xf32>, vector<128x4xf32>, vector<2x4xf32> -> vector<2x4xf32>
    %821 = vector.broadcast %106 : vector<1x4xf32> to vector<2x4xf32>
    %822 = arith.addf %820, %821 : vector<2x4xf32>
    %c0_191 = arith.constant 0 : index
    %c0_192 = arith.constant 0 : index
    %823 = vector.load %arg14[%c0_191, %c0_192] : memref<2x4xf32, #tpu.memory_space<vmem>>, vector<2x4xf32>
    tpu.vector_store %arg14[%c0_191, %c0_192], %822 {strides = array<i32>} : memref<2x4xf32, #tpu.memory_space<vmem>>, vector<2x4xf32>,
    return
  }
}

</mosaic_0001>

<bundles_post_ra>
// kernel: tpu_custom_call.1
= control target key start
LH: loop header
LB: loop body
LE: loop exit
PB: predicated region body
PF: predicated region fallthrough
CT: control target
= control target key end

     0   :  { %19 = vsyncpa [#allocation3], 0  ;;  %s15738_s0 = inlined_call_operand.vmem [shape: f32[2,16,8], index: 0, kind: input, shape index: {}]   ;;  %s15739_s1 = inlined_call_operand.vmem [shape: f32[2,16,16], index: 1, kind: input, shape index: {}]   ;;  %s15740_s2 = inlined_call_operand.vmem [shape: f32[8,16], index: 2, kind: input, shape index: {}]   ;;  %s15741_s3 = inlined_call_operand.vmem [shape: f32[1,16], index: 3, kind: input, shape index: {}]   ;;  %s15742_s4 = inlined_call_operand.vmem [shape: f32[16,16], index: 4, kind: input, shape index: {}]   ;;  %s15743_s5 = inlined_call_operand.vmem [shape: f32[1,16], index: 5, kind: input, shape index: {}]   ;;  %s15744_s6 = inlined_call_operand.vmem [shape: f32[16,16], index: 6, kind: input, shape index: {}]   ;;  %s15745_s7 = inlined_call_operand.vmem [shape: f32[1,16], index: 7, kind: input, shape index: {}]   ;;  %s15746_s8 = inlined_call_operand.hbm [shape: f32[256,512], index: 8, kind: input, shape index: {}]   ;;  %s15747_s9 = inlined_call_operand.vmem [shape: f32[1,512], index: 9, kind: input, shape index: {}]   ;;  %s15748_s10 = inlined_call_operand.hbm [shape: f32[256,128], index: 10, kind: input, shape index: {}]   ;;  %s15749_s11 = inlined_call_operand.vmem [shape: f32[1,128], index: 11, kind: input, shape index: {}]   ;;  %s15750_s12 = inlined_call_operand.vmem [shape: f32[128,4], index: 12, kind: input, shape index: {}]   ;;  %s15751_s13 = inlined_call_operand.vmem [shape: f32[1,4], index: 13, kind: input, shape index: {}]   ;;  %s15752_s14 = inlined_call_operand.hbm [shape: f32[2,4], index: 14, kind: output, shape index: {}]  }
   0x1   :  { %20 = vsyncpa [#allocation6], 0 }
   0x2   :  { %21 = vsyncpa [#allocation4], 0  ;;  %s13154_s29 = smov [#allocation2]   ;;  %s13082_s17 = scalar_lea.hbm %s15746_s8, 16384 }
   0x3   :  { %s43_s30 = sshll.u32 %s13154_s29, 4  ;;  %p13083_p0 = scmp.ne.s32.totalorder %s15746_s8, %s13082_s17  ;;  %s44_s30 = int_to_ptr.vmem [resolvable:$true] %s43_s30 }
   0x4   :  { %p13086_p1 = scmp.lt.u32.totalorder %s13082_s17, %s15746_s8 }
   0x6   :  { %p13088_p2 = pnand %p13086_p1, %p13083_p0 }
   0x8   :  { %13091 = shalt.err (!%p13088_p2)
}
   0x9   :  { %s13092_s22 = scalar_lea.vmem %s44_s30, 16384  ;;  %p13097_p4 = scmp.lt.s32.totalorder %s44_s30, %s44_s30 }
   0xa   :  { %p13093_p3 = scmp.ne.s32.totalorder %s44_s30, %s13092_s22  ;;  %p13098_p5 = scmp.lt.s32.totalorder %s13092_s22, %s13092_s22 }
   0xc   :  { %p13099_p6 = por %p13098_p5, %p13097_p4 }
   0xe   :  { %p13100_p7 = pnand %p13099_p6, %p13093_p3 }
  0x10   :  { %13103 = shalt.err (!%p13100_p7)
}
  0x11   :  { %s13155_s23 = smov 512   ;;  %s13156_s24 = smov 32  }
  0x12   :  { %49 = dma.hbm_to_vmem [thread:$0]  %s15746_s8, 16384, %s44_s30, [#allocation3], %s13155_s23, %s13155_s23, %s13156_s24  }
  0x13   :  { %s13157_s27 = smov [#allocation5]   ;;  %s13104_s16 = scalar_lea.hbm %s15748_s10, 4096 }
  0x14   :  { %s57_s28 = sshll.u32 %s13157_s27, 4  ;;  %p13105_p8 = scmp.ne.s32.totalorder %s15748_s10, %s13104_s16  ;;  %s58_s28 = int_to_ptr.vmem [resolvable:$true] %s57_s28 }
  0x15   :  { %p13108_p9 = scmp.lt.u32.totalorder %s13104_s16, %s15748_s10 }
  0x17   :  { %p13110_p10 = pnand %p13108_p9, %p13105_p8 }
  0x19   :  { %13113 = shalt.err (!%p13110_p10)
}
  0x1a   :  { %s13114_s21 = scalar_lea.vmem %s58_s28, 4096  ;;  %p13119_p12 = scmp.lt.s32.totalorder %s58_s28, %s58_s28 }
  0x1b   :  { %p13115_p11 = scmp.ne.s32.totalorder %s58_s28, %s13114_s21  ;;  %p13120_p13 = scmp.lt.s32.totalorder %s13114_s21, %s13114_s21 }
  0x1d   :  { %p13121_p0 = por %p13120_p13, %p13119_p12 }
  0x1f   :  { %p13122_p1 = pnand %p13121_p0, %p13115_p11 }
  0x21   :  { %13125 = shalt.err (!%p13122_p1)
}
  0x22   :  { %s13158_s8 = smov 128   ;;  %s13159_s30 = smov 8  }
  0x23   :  { %63 = dma.hbm_to_vmem [thread:$0]  %s15748_s10, 4096, %s58_s28, [#allocation6], %s13158_s8, %s13158_s8, %s13159_s30  }
  0x24   :  { %13148 = dma.done.wait [#allocation3], 16384  }
  0x25   :  { %13149 = vsyncadd [#allocation3], 4294950912 }
  0x26   :  { %13150 = dma.done.wait [#allocation6], 4096  }
  0x27   :  { %13151 = vsyncadd [#allocation6], 4294963200  ;;  %vm86_vm0 = vcmask 130048   ;;  %v76_v0 = vld [vmem:[%s15738_s0] sm:$0xff]  ;;  %v77_v1 = vld [vmem:[%s15738_s0 + $0x8] sm:$0xff]  ;;  %vm249_vm1 = vcmask 64512  }
  0x28   :  { %v13276_v2 = vld [vmem:[%s15739_s1] sm:$0xff]  ;;  %v10355_v3 = vpack.c.bf16 %v77_v1, %v76_v0  ;;  %v78_v4 = vld [vmem:[%s15738_s0 + $0x10] sm:$0xff]  ;;  %v79_v5 = vld [vmem:[%s15738_s0 + $0x18] sm:$0xff]  ;;  %vm1101_vm2 = vcmask 261120   ;;  %vm1106_vm3 = vcmask 392192   ;;  %vm1549_vm5 = vcmask 130112  }
  0x29   :  { %10030 = vmatprep.mubr.msk.f32.mxu0 %vm86_vm0, %v13276_v2  ;;  %v10359_v6 = vpack.c.bf16 %v79_v5, %v78_v4  ;;  %v13289_v7 = vld [vmem:[%s15739_s1 + $0x10] sm:$0xff]  ;;  %v84_v8 = vld [vmem:[%s15740_s2] sm:$0xff]  ;;  %v13299_v9 = vld [vmem:[%s15739_s1 + $0x8] sm:$0xff]  ;;  %vm1560_vm6 = vcmask 1041409   ;;  %vm1563_vm7 = vcmask 123904   ;;  %vm13165_vm8 = vmmov 0  }
  0x2a   :  { %10356 = vmatprep.subr.bf16.mxu0 %v10355_v3  ;;  %10037 = vmatprep.mubr.msk.f32.mxu1 %vm86_vm0, %v13289_v7  ;;  %v13304_v10 = vld [vmem:[%s15739_s1 + $0x18] sm:$0xff]  ;;  %v9672_v15 = vld [vmem:[%s15741_s3] ss:$0 sm:$0xff]  ;;  %vm13680_vm4 = vmpackc.low %vm1106_vm3, %vm1106_vm3  ;;  %s13166_s23 = smov [#allocation7]   ;;  %vm9646_vm9 = vcmask 25600  }
  0x2b   :  { %10358 = vmatpush3.bf16.msra.mxu0 %v10355_v3  ;;  %10360 = vmatprep.subr.bf16.mxu1 %v10359_v6  ;;  %s9654_s1 = sshll.u32 %s13166_s23, 4  ;;  %s9655_s1 = int_to_ptr.vmem [resolvable:$true] %s9654_s1 }
  0x2c   :  { %10362 = vmatpush3.bf16.msra.mxu1 %v10359_v6  ;;  %10040 = vmatprep.subr.mxu0 %v84_v8  ;;  %p13131_p3 = scmp.lt.s32.totalorder %s9655_s1, %s9655_s1 }
  0x2e   :  { %10031 = vmatmul.mubr.msk.f32.vlgmr.msra.gmra.mrb[0].mxu0 %vm86_vm0, %v13299_v9 }
  0x2f   :  { %10038 = vmatmul.mubr.msk.f32.vlgmr.msra.gmra.mrb[0].mxu1 %vm86_vm0, %v13304_v10  ;;  %10041 = vmatpush3.msra.mxu0 %v84_v8 }
  0x30   :  { %10052 = vmatprep.mubr.msk.f32.mxu1 %vm86_vm0, %v13276_v2 }
 0x101   :  { %v10032_v11 = vpop.f32.mrb[0].mxu0 }
 0x102   :  { %v159_v12 = vpop.f32.mrb[1].mxu0  ;;  %v10039_v13 = vpop.f32.mrb[0].mxu1 }
 0x103   :  { %10042 = vmatprep.mubr.msk.f32.mxu0 %vm249_vm1, %v159_v12  ;;  %v240_v14 = vpop.f32.mrb[1].mxu1 }
 0x104   :  { %10043 = vmatmul.mubr.msk.f32.vlgmr.msra.gmra.mrb[2].mxu0 %vm249_vm1, %v10032_v11 }
 0x105   :  { %10045 = vmatprep.mubr.msk.f32.mxu0 %vm249_vm1, %v240_v14 }
 0x108   :  { %10046 = vmatmul.mubr.msk.f32.gmra.mrb[4].mxu0 %vm249_vm1, %v10039_v13 }
 0x1d7   :  { %v10044_v16 = vpop.f32.mrb[2].mxu0 }
 0x1d8   :  { %v328_v17 = vpop.f32.mrb[3].mxu0  ;;  %v354_v18 = vadd.f32 %v10044_v16, %v9672_v15  ;;  %v437_v16 = vld [vmem:[%s15742_s4] sm:$0xff] }
 0x1d9   :  { %v353_v19 = vadd.f32 %v9672_v15, %v328_v17  ;;  %v438_v17 = vld [vmem:[%s15742_s4 + $0x8] sm:$0xff] }
 0x1da   :  { %v358_v26 = vmul.f32 %v354_v18, %v354_v18 }
 0x1db   :  { %v10047_v20 = vpop.f32.mrb[4].mxu0  ;;  %v357_v21 = vmul.f32 %v353_v19, %v353_v19 }
 0x1dc   :  { %v338_v22 = vpop.f32.mrb[5].mxu0  ;;  %v356_v23 = vadd.f32 %v10047_v20, %v9672_v15  ;;  %v364_v28 = vsel %vm86_vm0, %v358_v26, 0.0 }
 0x1dd   :  { %v355_v24 = vadd.f32 %v9672_v15, %v338_v22  ;;  %v361_v25 = vsel %vm86_vm0, %v357_v21, 0.0 }
 0x1de   :  { %362 = vadd.xlane.f32.xlu0 %v361_v25  ;;  %v360_v30 = vmul.f32 %v356_v23, %v356_v23 }
 0x1df   :  { %v359_v27 = vmul.f32 %v355_v24, %v355_v24 }
 0x1e0   :  { %v370_v31 = vsel %vm86_vm0, %v360_v30, 0.0 }
 0x1e1   :  { %v367_v29 = vsel %vm86_vm0, %v359_v27, 0.0 }
 0x1e2   :  { %365 = vadd.xlane.f32.xlu0 %v364_v28  ;;  %368 = vadd.xlane.f32.xlu1 %v367_v29 }
 0x1e6   :  { %371 = vadd.xlane.f32.xlu1 %v370_v31 }
 0x26b   :  { %v363_v32 = vpop.xlane.xlu0 %362 }
 0x26c   :  { %v373_v33 = vmax.f32 %v363_v32, 1e-24 }
 0x26e   :  { %12634 = vrsqrt.f32 %v373_v33 }
 0x26f   :  { %v366_v34 = vpop.xlane.xlu0 %365  ;;  %v369_v35 = vpop.xlane.xlu1 %368 }
 0x270   :  { %v374_v36 = vmax.f32 %v366_v34, 1e-24  ;;  %v375_v37 = vmax.f32 %v369_v35, 1e-24 }
 0x272   :  { %12636 = vrsqrt.f32 %v374_v36 }
 0x273   :  { %12638 = vrsqrt.f32 %v375_v37  ;;  %v372_v38 = vpop.xlane.xlu1 %371 }
 0x274   :  { %v376_v39 = vmax.f32 %v372_v38, 1e-24 }
 0x276   :  { %12640 = vrsqrt.f32 %v376_v39 }
 0x278   :  { %v12635_v40 = vpop.eup %12634 }
 0x279   :  { %v381_v41 = vmul.f32 %v12635_v40, %v353_v19 }
 0x27b   :  { %v385_v42 = vmax.f32 %v381_v41, 0.0  ;;  %v9681_v41 = vld [vmem:[%s15743_s5] ss:$0 sm:$0xff] }
 0x27c   :  { %v12637_v43 = vpop.eup %12636 }
 0x27d   :  { %v12639_v44 = vpop.eup %12638  ;;  %v389_v45 = vsel %vm86_vm0, %v385_v42, 0.0  ;;  %v382_v46 = vmul.f32 %v12637_v43, %v354_v18  ;;  %v10371_v18 = vpack.c.bf16 %v438_v17, %v437_v16 }
 0x27e   :  { %390 = vadd.xlane.f32.xlu0 %v389_v45  ;;  %v383_v47 = vmul.f32 %v12639_v44, %v355_v24 }
 0x27f   :  { %v386_v48 = vmax.f32 %v382_v46, 0.0  ;;  %10372 = vmatprep.subr.bf16.mxu0 %v10371_v18 }
 0x280   :  { %v12641_v49 = vpop.eup %12640  ;;  %v387_v50 = vmax.f32 %v383_v47, 0.0  ;;  %10374 = vmatpush3.bf16.msra.mxu0 %v10371_v18 }
 0x281   :  { %v392_v51 = vsel %vm86_vm0, %v386_v48, 0.0  ;;  %v384_v52 = vmul.f32 %v12641_v49, %v356_v23 }
 0x282   :  { %393 = vadd.xlane.f32.xlu1 %v392_v51  ;;  %v395_v53 = vsel %vm86_vm0, %v387_v50, 0.0 }
 0x283   :  { %396 = vadd.xlane.f32.xlu0 %v395_v53  ;;  %v388_v54 = vmax.f32 %v384_v52, 0.0 }
 0x285   :  { %v398_v55 = vsel %vm86_vm0, %v388_v54, 0.0 }
 0x286   :  { %399 = vadd.xlane.f32.xlu1 %v398_v55 }
 0x30b   :  { %v391_v56 = vpop.xlane.xlu0 %390 }
 0x30f   :  { %v394_v57 = vpop.xlane.xlu1 %393 }
 0x310   :  { %v397_v58 = vpop.xlane.xlu0 %396 }
 0x311   :  { %v401_v59 = vadd.f32 %v397_v58, %v391_v56 }
 0x313   :  { %v403_v60 = vmul.f32 0.03125, %v401_v59  ;;  %v400_v61 = vpop.xlane.xlu1 %399 }
 0x314   :  { %v402_v62 = vadd.f32 %v400_v61, %v394_v57 }
 0x315   :  { %v405_v63 = vsub.f32 %v385_v42, %v403_v60  ;;  %v407_v0 = vsub.f32 %v387_v50, %v403_v60 }
 0x316   :  { %v404_v1 = vmul.f32 0.03125, %v402_v62 }
 0x317   :  { %v409_v3 = vmul.f32 %v405_v63, %v405_v63  ;;  %v411_v8 = vmul.f32 %v407_v0, %v407_v0 }
 0x318   :  { %v406_v4 = vsub.f32 %v386_v48, %v404_v1  ;;  %v408_v5 = vsub.f32 %v388_v54, %v404_v1 }
 0x319   :  { %v413_v6 = vsel %vm86_vm0, %v409_v3, 0.0  ;;  %v419_v14 = vsel %vm86_vm0, %v411_v8, 0.0 }
 0x31a   :  { %414 = vadd.xlane.f32.xlu0 %v413_v6  ;;  %v410_v11 = vmul.f32 %v406_v4, %v406_v4  ;;  %v412_v13 = vmul.f32 %v408_v5, %v408_v5 }
 0x31c   :  { %v416_v12 = vsel %vm86_vm0, %v410_v11, 0.0  ;;  %v422_v15 = vsel %vm86_vm0, %v412_v13, 0.0 }
 0x31d   :  { %417 = vadd.xlane.f32.xlu1 %v416_v12 }
 0x31e   :  { %420 = vadd.xlane.f32.xlu0 %v419_v14 }
 0x321   :  { %423 = vadd.xlane.f32.xlu1 %v422_v15 }
 0x3a7   :  { %v415_v19 = vpop.xlane.xlu0 %414 }
 0x3aa   :  { %v418_v20 = vpop.xlane.xlu1 %417 }
 0x3ab   :  { %v421_v21 = vpop.xlane.xlu0 %420 }
 0x3ac   :  { %v425_v22 = vadd.f32 %v421_v21, %v415_v19 }
 0x3ae   :  { %v427_v23 = vmul.f32 0.03125, %v425_v22  ;;  %v424_v24 = vpop.xlane.xlu1 %423 }
 0x3af   :  { %v426_v25 = vadd.f32 %v424_v24, %v418_v20 }
 0x3b0   :  { %v429_v26 = vadd.f32 1e-05, %v427_v23 }
 0x3b1   :  { %v428_v27 = vmul.f32 0.03125, %v426_v25 }
 0x3b2   :  { %12642 = vrsqrt.f32 %v429_v26 }
 0x3b3   :  { %v430_v28 = vadd.f32 1e-05, %v428_v27 }
 0x3b5   :  { %12644 = vrsqrt.f32 %v430_v28 }
 0x3bc   :  { %v12643_v29 = vpop.eup %12642 }
 0x3bd   :  { %v13333_v31 = vmul.f32 %v12643_v29, %v405_v63  ;;  %v13341_v35 = vmul.f32 %v12643_v29, %v407_v0 }
 0x3bf   :  { %v12645_v30 = vpop.eup %12644 }
 0x3c0   :  { %v13335_v32 = vmul.f32 %v12645_v30, %v406_v4  ;;  %v13337_v33 = vmul.f32 %v12645_v30, %v408_v5 }
 0x3c2   :  { %v10363_v34 = vpack.c.bf16 %v13335_v32, %v13333_v31  ;;  %v10367_v36 = vpack.c.bf16 %v13337_v33, %v13341_v35 }
 0x3c4   :  { %10364 = vmatprep.subr.bf16.mxu1 %v10363_v34 }
 0x3c5   :  { %10366 = vmatpush3.bf16.msra.mxu1 %v10363_v34 }
 0x3c6   :  { %10368 = vmatprep.subr.bf16.mxu1 %v10367_v36 }
 0x3c8   :  { %10053 = vmatmul.mubr.msk.f32.vlgmr.msra.gmra.mrb[2].mxu1 %vm86_vm0, %v13299_v9 }
 0x3c9   :  { %10370 = vmatpush3.bf16.msra.mxu1 %v10367_v36  ;;  %10059 = vmatprep.mubr.msk.f32.mxu1 %vm86_vm0, %v13289_v7 }
 0x3cc   :  { %10060 = vmatmul.mubr.msk.f32.vlgmr.msra.gmra.mrb[4].mxu1 %vm86_vm0, %v13304_v10 }
 0x3cd   :  { %10076 = vmatprep.mubr.msk.f32.mxu1 %vm86_vm0, %v13276_v2 }
 0x49b   :  { %v10054_v37 = vpop.f32.mrb[2].mxu1 }
 0x49c   :  { %v506_v38 = vpop.f32.mrb[3].mxu1 }
 0x49d   :  { %10066 = vmatprep.mubr.msk.f32.mxu0 %vm86_vm0, %v506_v38 }
 0x49e   :  { %10067 = vmatmul.mubr.msk.f32.vlgmr.msra.gmra.mrb[6].mxu0 %vm86_vm0, %v10054_v37 }
 0x49f   :  { %v10061_v39 = vpop.f32.mrb[4].mxu1 }
 0x4a0   :  { %v581_v40 = vpop.f32.mrb[5].mxu1 }
 0x4a1   :  { %10069 = vmatprep.mubr.msk.f32.mxu0 %vm86_vm0, %v581_v40 }
 0x4a2   :  { %10070 = vmatmul.mubr.msk.f32.gmra.mrb[8].mxu0 %vm86_vm0, %v10061_v39 }
 0x571   :  { %v10068_v42 = vpop.f32.mrb[6].mxu0 }
 0x572   :  { %v694_v43 = vadd.f32 %v10068_v42, %v9681_v41  ;;  %v668_v44 = vpop.f32.mrb[7].mxu0 }
 0x573   :  { %v693_v2 = vadd.f32 %v9681_v41, %v668_v44 }
 0x574   :  { %v698_v45 = vmul.f32 %v694_v43, %v694_v43 }
 0x575   :  { %v10071_v46 = vpop.f32.mrb[8].mxu0  ;;  %v697_v47 = vmul.f32 %v693_v2, %v693_v2 }
 0x576   :  { %v696_v48 = vadd.f32 %v10071_v46, %v9681_v41  ;;  %v678_v49 = vpop.f32.mrb[9].mxu0  ;;  %v704_v50 = vsel %vm86_vm0, %v698_v45, 0.0  ;;  %v778_v45 = vld [vmem:[%s15744_s6 + $0x8] sm:$0xff] }
 0x577   :  { %v695_v51 = vadd.f32 %v9681_v41, %v678_v49  ;;  %705 = vadd.xlane.f32.xlu1 %v704_v50  ;;  %v701_v52 = vsel %vm86_vm0, %v697_v47, 0.0 }
 0x578   :  { %702 = vadd.xlane.f32.xlu0 %v701_v52  ;;  %v700_v53 = vmul.f32 %v696_v48, %v696_v48 }
 0x579   :  { %v699_v54 = vmul.f32 %v695_v51, %v695_v51 }
 0x57a   :  { %v710_v55 = vsel %vm86_vm0, %v700_v53, 0.0 }
 0x57b   :  { %711 = vadd.xlane.f32.xlu1 %v710_v55  ;;  %v707_v56 = vsel %vm86_vm0, %v699_v54, 0.0 }
 0x57c   :  { %708 = vadd.xlane.f32.xlu0 %v707_v56 }
 0x604   :  { %v706_v57 = vpop.xlane.xlu1 %705 }
 0x605   :  { %v714_v58 = vmax.f32 %v706_v57, 1e-24  ;;  %v703_v59 = vpop.xlane.xlu0 %702 }
 0x606   :  { %v713_v60 = vmax.f32 %v703_v59, 1e-24 }
 0x607   :  { %12646 = vrsqrt.f32 %v714_v58 }
 0x608   :  { %12648 = vrsqrt.f32 %v713_v60  ;;  %v712_v61 = vpop.xlane.xlu1 %711 }
 0x609   :  { %v716_v62 = vmax.f32 %v712_v61, 1e-24  ;;  %v709_v63 = vpop.xlane.xlu0 %708 }
 0x60a   :  { %v715_v0 = vmax.f32 %v709_v63, 1e-24 }
 0x60b   :  { %12650 = vrsqrt.f32 %v716_v62 }
 0x60c   :  { %12652 = vrsqrt.f32 %v715_v0 }
 0x611   :  { %v12647_v1 = vpop.eup %12646 }
 0x612   :  { %v12649_v3 = vpop.eup %12648  ;;  %v722_v4 = vmul.f32 %v12647_v1, %v694_v43  ;;  %v1112_v1 = vld [vmem:[#allocation2 + $0x8] sm:$0xff] }
 0x613   :  { %v721_v5 = vmul.f32 %v12649_v3, %v693_v2  ;;  %v777_v2 = vld [vmem:[%s15744_s6] sm:$0xff]  ;;  %v1116_v3 = vld [vmem:[#allocation2 + $0x28] sm:$0xff] }
 0x614   :  { %v726_v6 = vmax.f32 %v722_v4, 0.0  ;;  %v10383_v46 = vpack.c.bf16 %v778_v45, %v777_v2  ;;  %v1111_v4 = vld [vmem:[#allocation2] sm:$0xff]  ;;  %v1164_v2 = vld [vmem:[#allocation2 + $0x1a8] sm:$0xff] }
 0x615   :  { %v12651_v8 = vpop.eup %12650  ;;  %v725_v11 = vmax.f32 %v721_v5, 0.0  ;;  %v13396_v5 = vpack.c.bf16 %v1116_v3, %v1112_v1  ;;  %v1184_v1 = vld [vmem:[#allocation2 + $0x248] sm:$0xff] }
 0x616   :  { %v12653_v12 = vpop.eup %12652  ;;  %v732_v13 = vsel %vm86_vm0, %v726_v6, 0.0  ;;  %v724_v14 = vmul.f32 %v12651_v8, %v696_v48  ;;  %10384 = vmatprep.subr.bf16.mxu0 %v10383_v46  ;;  %v1120_v8 = vld [vmem:[#allocation2 + $0x48] sm:$0xff] }
 0x617   :  { %733 = vadd.xlane.f32.xlu1 %v732_v13  ;;  %v729_v15 = vsel %vm86_vm0, %v725_v11, 0.0  ;;  %v723_v16 = vmul.f32 %v12653_v12, %v695_v51  ;;  %10386 = vmatpush3.bf16.msra.mxu0 %v10383_v46  ;;  %15944 = vst [vmem:[#allocation11_spill] sm:$0xff] %v13396_v5  ;;  %v1188_v3 = vld [vmem:[#allocation2 + $0x268] sm:$0xff] }
 0x618   :  { %730 = vadd.xlane.f32.xlu0 %v729_v15  ;;  %v728_v17 = vmax.f32 %v724_v14, 0.0  ;;  %v1123_v14 = vld [vmem:[#allocation2 + $0x60] sm:$0xff]  ;;  %v1128_v15 = vld [vmem:[#allocation2 + $0x88] sm:$0xff] }
 0x619   :  { %v727_v18 = vmax.f32 %v723_v16, 0.0  ;;  %v1127_v16 = vld [vmem:[#allocation2 + $0x80] sm:$0xff] }
 0x61a   :  { %v738_v19 = vsel %vm86_vm0, %v728_v17, 0.0 }
 0x61b   :  { %739 = vadd.xlane.f32.xlu1 %v738_v19  ;;  %v735_v20 = vsel %vm86_vm0, %v727_v18, 0.0  ;;  %v1114_v19 = vld [vmem:[#allocation2 + $0x18] sm:$0xff] }
 0x61c   :  { %736 = vadd.xlane.f32.xlu0 %v735_v20  ;;  %v1118_v20 = vld [vmem:[#allocation2 + $0x38] sm:$0xff] }
 0x6a4   :  { %v734_v21 = vpop.xlane.xlu1 %733 }
 0x6a5   :  { %v731_v22 = vpop.xlane.xlu0 %730 }
 0x6a8   :  { %v740_v23 = vpop.xlane.xlu1 %739 }
 0x6a9   :  { %v742_v24 = vadd.f32 %v740_v23, %v734_v21  ;;  %v737_v25 = vpop.xlane.xlu0 %736  ;;  %v1136_v21 = vld [vmem:[#allocation2 + $0xc8] sm:$0xff]  ;;  %v13409_v23 = vpack.c.bf16 %v1118_v20, %v1114_v19 }
 0x6aa   :  { %v741_v26 = vadd.f32 %v737_v25, %v731_v22  ;;  %v1140_v22 = vld [vmem:[#allocation2 + $0xe8] sm:$0xff] }
 0x6ab   :  { %v744_v27 = vmul.f32 0.03125, %v742_v24  ;;  %15945 = vst [vmem:[#allocation12_spill] sm:$0xff] %v13409_v23  ;;  %10452 = vmatprep.subr.bf16.mxu0 %v13409_v23  ;;  %v13416_v25 = vpack.c.bf16 %v1140_v22, %v1136_v21  ;;  %v1200_v19 = vld [vmem:[#allocation2 + $0x2c8] sm:$0xff] }
 0x6ac   :  { %v743_v28 = vmul.f32 0.03125, %v741_v26  ;;  %v1135_v26 = vld [vmem:[#allocation2 + $0xc0] sm:$0xff]  ;;  %v1204_v20 = vld [vmem:[#allocation2 + $0x2e8] sm:$0xff] }
 0x6ad   :  { %v746_v29 = vsub.f32 %v726_v6, %v744_v27  ;;  %v748_v30 = vsub.f32 %v728_v17, %v744_v27  ;;  %v1115_v6 = vld [vmem:[#allocation2 + $0x20] sm:$0xff]  ;;  %v13464_v22 = vpack.c.bf16 %v1204_v20, %v1200_v19  ;;  %v1145_v20 = vld [vmem:[#allocation2 + $0x110] sm:$0xff] }
 0x6ae   :  { %v745_v34 = vsub.f32 %v725_v11, %v743_v28  ;;  %v747_v36 = vsub.f32 %v727_v18, %v743_v28  ;;  %v1124_v11 = vld [vmem:[#allocation2 + $0x68] sm:$0xff]  ;;  %v13398_v12 = vpack.c.bf16 %v1115_v6, %v1111_v4  ;;  %v1131_v18 = vld [vmem:[#allocation2 + $0xa0] sm:$0xff]  ;;  %v13452_v6 = vpack.c.bf16 %v1188_v3, %v1184_v1  ;;  %v1142_v1 = vld [vmem:[#allocation2 + $0xf8] sm:$0xff] }
 0x6af   :  { %v750_v37 = vmul.f32 %v746_v29, %v746_v29  ;;  %v752_v40 = vmul.f32 %v748_v30, %v748_v30  ;;  %v13400_v13 = vpack.c.bf16 %v1124_v11, %v1120_v8  ;;  %v13412_v24 = vpack.c.bf16 %v1131_v18, %v1127_v16  ;;  %v1139_v27 = vld [vmem:[#allocation2 + $0xe0] sm:$0xff]  ;;  %v1144_v28 = vld [vmem:[#allocation2 + $0x108] sm:$0xff]  ;;  %15953 = vst [vmem:[#allocation20_spill] sm:$0xff] %v13464_v22 }
 0x6b0   :  { %v749_v38 = vmul.f32 %v745_v34, %v745_v34  ;;  %v751_v42 = vmul.f32 %v747_v36, %v747_v36  ;;  %15949 = vst [vmem:[#allocation16_spill] sm:$0xff] %v13452_v6  ;;  %v1183_v8 = vld [vmem:[#allocation2 + $0x240] sm:$0xff] }
 0x6b1   :  { %v756_v39 = vsel %vm86_vm0, %v750_v37, 0.0  ;;  %v762_v43 = vsel %vm86_vm0, %v752_v40, 0.0  ;;  %v1147_v37 = vld [vmem:[#allocation2 + $0x120] sm:$0xff] }
 0x6b2   :  { %757 = vadd.xlane.f32.xlu1 %v756_v39  ;;  %v753_v41 = vsel %vm86_vm0, %v749_v38, 0.0  ;;  %v759_v44 = vsel %vm86_vm0, %v751_v42, 0.0  ;;  %v1152_v38 = vld [vmem:[#allocation2 + $0x148] sm:$0xff]  ;;  %v1151_v42 = vld [vmem:[#allocation2 + $0x140] sm:$0xff] }
 0x6b3   :  { %754 = vadd.xlane.f32.xlu0 %v753_v41  ;;  %v1156_v39 = vld [vmem:[#allocation2 + $0x168] sm:$0xff]  ;;  %v1187_v11 = vld [vmem:[#allocation2 + $0x260] sm:$0xff] }
 0x6b4   :  { %v13428_v41 = vpack.c.bf16 %v1156_v39, %v1152_v38  ;;  %v1191_v16 = vld [vmem:[#allocation2 + $0x280] sm:$0xff]  ;;  %v1126_v38 = vld [vmem:[#allocation2 + $0x78] sm:$0xff] }
 0x6b5   :  { %v1195_v18 = vld [vmem:[#allocation2 + $0x2a0] sm:$0xff] }
 0x6b6   :  { %763 = vadd.xlane.f32.xlu1 %v762_v43  ;;  %v1155_v43 = vld [vmem:[#allocation2 + $0x160] sm:$0xff]  ;;  %v13461_v21 = vpack.c.bf16 %v1195_v18, %v1191_v16  ;;  %v1150_v16 = vld [vmem:[#allocation2 + $0x138] sm:$0xff] }
 0x6b7   :  { %760 = vadd.xlane.f32.xlu0 %v759_v44  ;;  %v1160_v44 = vld [vmem:[#allocation2 + $0x188] sm:$0xff]  ;;  %v13431_v45 = vpack.c.bf16 %v1155_v43, %v1151_v42 }
 0x6b8   :  { %v13434_v46 = vpack.c.bf16 %v1164_v2, %v1160_v44  ;;  %15952 = vst [vmem:[#allocation19_spill] sm:$0xff] %v13461_v21  ;;  %v1121_v2 = vld [vmem:[#allocation2 + $0x50] sm:$0xff] }
 0x73f   :  { %v758_v47 = vpop.xlane.xlu1 %757 }
 0x740   :  { %v755_v48 = vpop.xlane.xlu0 %754 }
 0x743   :  { %v764_v49 = vpop.xlane.xlu1 %763 }
 0x744   :  { %v766_v50 = vadd.f32 %v764_v49, %v758_v47  ;;  %v761_v51 = vpop.xlane.xlu0 %760  ;;  %v1159_v47 = vld [vmem:[#allocation2 + $0x180] sm:$0xff]  ;;  %v1168_v49 = vld [vmem:[#allocation2 + $0x1c8] sm:$0xff] }
 0x745   :  { %v765_v52 = vadd.f32 %v761_v51, %v755_v48  ;;  %v1163_v48 = vld [vmem:[#allocation2 + $0x1a0] sm:$0xff] }
 0x746   :  { %v768_v53 = vmul.f32 0.03125, %v766_v50  ;;  %v1172_v50 = vld [vmem:[#allocation2 + $0x1e8] sm:$0xff]  ;;  %v13437_v51 = vpack.c.bf16 %v1163_v48, %v1159_v47  ;;  %v1125_v47 = vld [vmem:[#allocation2 + $0x70] sm:$0xff]  ;;  %v1130_v48 = vld [vmem:[#allocation2 + $0x98] sm:$0xff] }
 0x747   :  { %v767_v54 = vmul.f32 0.03125, %v765_v52  ;;  %v13440_v52 = vpack.c.bf16 %v1172_v50, %v1168_v49  ;;  %v1134_v49 = vld [vmem:[#allocation2 + $0xb8] sm:$0xff] }
 0x748   :  { %v770_v55 = vadd.f32 1e-05, %v768_v53  ;;  %v1167_v53 = vld [vmem:[#allocation2 + $0x1c0] sm:$0xff] }
 0x749   :  { %v769_v56 = vadd.f32 1e-05, %v767_v54  ;;  %v1171_v54 = vld [vmem:[#allocation2 + $0x1e0] sm:$0xff] }
 0x74a   :  { %12654 = vrsqrt.f32 %v770_v55  ;;  %v1176_v55 = vld [vmem:[#allocation2 + $0x208] sm:$0xff] }
 0x74b   :  { %12656 = vrsqrt.f32 %v769_v56  ;;  %v1180_v56 = vld [vmem:[#allocation2 + $0x228] sm:$0xff] }
 0x754   :  { %v12655_v57 = vpop.eup %12654 }
 0x755   :  { %v12657_v58 = vpop.eup %12656  ;;  %v13378_v59 = vmul.f32 %v12655_v57, %v746_v29  ;;  %v13384_v62 = vmul.f32 %v12655_v57, %v748_v30  ;;  %v1148_v29 = vld [vmem:[#allocation2 + $0x128] sm:$0xff]  ;;  %v13419_v30 = vpack.c.bf16 %v1139_v27, %v1135_v26  ;;  %v13443_v57 = vpack.c.bf16 %v1171_v54, %v1167_v53  ;;  %v1199_v26 = vld [vmem:[#allocation2 + $0x2c0] sm:$0xff] }
 0x756   :  { %v13380_v60 = vmul.f32 %v12657_v58, %v745_v34  ;;  %v13382_v61 = vmul.f32 %v12657_v58, %v747_v36  ;;  %v13422_v34 = vpack.c.bf16 %v1148_v29, %v1144_v28  ;;  %v1143_v36 = vld [vmem:[#allocation2 + $0x100] sm:$0xff]  ;;  %v13446_v58 = vpack.c.bf16 %v1180_v56, %v1176_v55  ;;  %v1113_v29 = vld [vmem:[#allocation2 + $0x10] sm:$0xff] }
 0x757   :  { %v13425_v40 = vpack.c.bf16 %v1147_v37, %v1143_v36  ;;  %15946 = vst [vmem:[#allocation13_spill] sm:$0xff] %v13443_v57  ;;  %v1203_v27 = vld [vmem:[#allocation2 + $0x2e0] sm:$0xff]  ;;  %v1117_v36 = vld [vmem:[#allocation2 + $0x30] sm:$0xff]  ;;  %v1122_v37 = vld [vmem:[#allocation2 + $0x58] sm:$0xff]  ;;  %v13478_v53 = vpack.c.bf16 %v1125_v47, %v1121_v2  ;;  %v13481_v55 = vpack.c.bf16 %v1134_v49, %v1130_v48 }
 0x758   :  { %v10375_v63 = vpack.c.bf16 %v13378_v59, %v13380_v60  ;;  %v10379_v0 = vpack.c.bf16 %v13384_v62, %v13382_v61  ;;  %15947 = vst [vmem:[#allocation14_spill] sm:$0xff] %v13446_v58  ;;  %v13467_v28 = vpack.c.bf16 %v1203_v27, %v1199_v26  ;;  %v13471_v42 = vpack.c.bf16 %v1117_v36, %v1113_v29  ;;  %v1129_v56 = vld [vmem:[#allocation2 + $0x90] sm:$0xff]  ;;  %v1154_v27 = vld [vmem:[#allocation2 + $0x158] sm:$0xff] }
 0x759   :  { %v13473_v44 = vpack.c.bf16 %v1126_v38, %v1122_v37  ;;  %v1149_v26 = vld [vmem:[#allocation2 + $0x130] sm:$0xff]  ;;  %v1158_v29 = vld [vmem:[#allocation2 + $0x178] sm:$0xff] }
 0x75a   :  { %10376 = vmatprep.subr.bf16.mxu1 %v10375_v63  ;;  %15954 = vst [vmem:[#allocation21_spill] sm:$0xff] %v13467_v28  ;;  %v13498_v36 = vpack.c.bf16 %v1149_v26, %v1145_v20  ;;  %v13501_v37 = vpack.c.bf16 %v1158_v29, %v1154_v27  ;;  %v1153_v38 = vld [vmem:[#allocation2 + $0x150] sm:$0xff]  ;;  %v1166_v2 = vld [vmem:[#allocation2 + $0x1b8] sm:$0xff]  ;;  %v1208_v26 = vld [vmem:[#allocation2 + $0x308] sm:$0xff] }
 0x75b   :  { %10378 = vmatpush3.bf16.msra.mxu1 %v10375_v63  ;;  %v1175_v63 = vld [vmem:[#allocation2 + $0x200] sm:$0xff]  ;;  %v1161_v49 = vld [vmem:[#allocation2 + $0x190] sm:$0xff]  ;;  %v1212_v27 = vld [vmem:[#allocation2 + $0x328] sm:$0xff] }
 0x75c   :  { %10380 = vmatprep.subr.bf16.mxu1 %v10379_v0  ;;  %v1177_v29 = vld [vmem:[#allocation2 + $0x210] sm:$0xff] }
 0x75e   :  { %10077 = vmatmul.mubr.msk.f32.vlgmr.msra.gmra.mrb[6].mxu1 %vm86_vm0, %v13299_v9  ;;  %v1119_v9 = vld [vmem:[#allocation2 + $0x40] sm:$0xff] }
 0x75f   :  { %10382 = vmatpush3.bf16.msra.mxu1 %v10379_v0  ;;  %10083 = vmatprep.mubr.msk.f32.mxu1 %vm86_vm0, %v13289_v7  ;;  %v1132_v7 = vld [vmem:[#allocation2 + $0xa8] sm:$0xff]  ;;  %v1179_v0 = vld [vmem:[#allocation2 + $0x220] sm:$0xff] }
 0x760   :  { %10388 = vmatprep.subr.bf16.mxu1 %v13396_v5  ;;  %v13407_v17 = vpack.c.bf16 %v1132_v7, %v1128_v15  ;;  %v13449_v4 = vpack.c.bf16 %v1179_v0, %v1175_v63  ;;  %v13455_v15 = vpack.c.bf16 %v1187_v11, %v1183_v8  ;;  %v1133_v63 = vld [vmem:[#allocation2 + $0xb0] sm:$0xff]  ;;  %v1138_v0 = vld [vmem:[#allocation2 + $0xd8] sm:$0xff] }
 0x761   :  { %v13486_v3 = vpack.c.bf16 %v1133_v63, %v1129_v56  ;;  %v13489_v8 = vpack.c.bf16 %v1142_v1, %v1138_v0  ;;  %v1137_v11 = vld [vmem:[#allocation2 + $0xd0] sm:$0xff]  ;;  %v1174_v56 = vld [vmem:[#allocation2 + $0x1f8] sm:$0xff] }
 0x762   :  { %10084 = vmatmul.mubr.msk.f32.vlgmr.msra.gmra.mrb[8].mxu1 %vm86_vm0, %v13304_v10  ;;  %v13404_v10 = vpack.c.bf16 %v1123_v14, %v1119_v9  ;;  %15948 = vst [vmem:[#allocation15_spill] sm:$0xff] %v13449_v4  ;;  %v1192_v9 = vld [vmem:[#allocation2 + $0x288] sm:$0xff]  ;;  %15950 = vst [vmem:[#allocation17_spill] sm:$0xff] %v13455_v15  ;;  %v1169_v1 = vld [vmem:[#allocation2 + $0x1d0] sm:$0xff] }
 0x763   :  { %10390 = vmatpush1.bf16.msra.mxu1 %v13398_v12  ;;  %v1196_v14 = vld [vmem:[#allocation2 + $0x2a8] sm:$0xff] }
 0x764   :  { %10392 = vmatprep.subr.bf16.mxu1 %v13400_v13  ;;  %v13458_v7 = vpack.c.bf16 %v1196_v14, %v1192_v9  ;;  %v1141_v9 = vld [vmem:[#allocation2 + $0xf0] sm:$0xff]  ;;  %v1146_v14 = vld [vmem:[#allocation2 + $0x118] sm:$0xff] }
 0x765   :  { %v13492_v18 = vpack.c.bf16 %v1141_v9, %v1137_v11  ;;  %v13495_v19 = vpack.c.bf16 %v1150_v16, %v1146_v14  ;;  %v1173_v11 = vld [vmem:[#allocation2 + $0x1f0] sm:$0xff]  ;;  %v1178_v9 = vld [vmem:[#allocation2 + $0x218] sm:$0xff] }
 0x766   :  { %15951 = vst [vmem:[#allocation18_spill] sm:$0xff] %v13458_v7  ;;  %v1182_v14 = vld [vmem:[#allocation2 + $0x238] sm:$0xff]  ;;  %v13516_v16 = vpack.c.bf16 %v1173_v11, %v1169_v1  ;;  %v1216_v11 = vld [vmem:[#allocation2 + $0x348] sm:$0xff] }
 0x767   :  { %10394 = vmatpush1.bf16.msra.mxu1 %v13404_v10  ;;  %v13519_v20 = vpack.c.bf16 %v1182_v14, %v1178_v9  ;;  %v1220_v9 = vld [vmem:[#allocation2 + $0x368] sm:$0xff]  ;;  %v1185_v14 = vld [vmem:[#allocation2 + $0x250] sm:$0xff] }
 0x768   :  { %10396 = vmatprep.subr.bf16.mxu1 %v13407_v17 }
 0x76b   :  { %10398 = vmatpush1.bf16.msra.mxu1 %v13412_v24 }
 0x76c   :  { %10400 = vmatprep.subr.bf16.mxu1 %v13416_v25 }
 0x76f   :  { %10402 = vmatpush1.bf16.msra.mxu1 %v13419_v30 }
 0x770   :  { %10404 = vmatprep.subr.bf16.mxu1 %v13422_v34 }
 0x773   :  { %10406 = vmatpush1.bf16.msra.mxu1 %v13425_v40 }
 0x774   :  { %10408 = vmatprep.subr.bf16.mxu1 %v13428_v41 }
 0x777   :  { %10410 = vmatpush1.bf16.msra.mxu1 %v13431_v45 }
 0x778   :  { %10412 = vmatprep.subr.bf16.mxu1 %v13434_v46 }
 0x77b   :  { %10414 = vmatpush1.bf16.msra.mxu1 %v13437_v51 }
 0x77c   :  { %10416 = vmatprep.subr.bf16.mxu1 %v13440_v52 }
 0x77f   :  { %10418 = vmatpush1.bf16.msra.mxu1 %v13443_v57 }
 0x780   :  { %10420 = vmatprep.subr.bf16.mxu1 %v13446_v58 }
 0x783   :  { %10422 = vmatpush1.bf16.msra.mxu1 %v13449_v4 }
 0x784   :  { %10424 = vmatprep.subr.bf16.mxu1 %v13452_v6  ;;  %v1222_v6 = vld [vmem:[#allocation2 + $0x378] sm:$0xff] }
 0x787   :  { %10426 = vmatpush1.bf16.msra.mxu1 %v13455_v15 }
 0x788   :  { %10428 = vmatprep.subr.bf16.mxu1 %v13458_v7  ;;  %v1205_v7 = vld [vmem:[#allocation2 + $0x2f0] sm:$0xff] }
 0x78b   :  { %10430 = vmatpush1.bf16.msra.mxu1 %v13461_v21 }
 0x78c   :  { %10432 = vmatprep.subr.bf16.mxu1 %v13464_v22  ;;  %v1197_v22 = vld [vmem:[#allocation2 + $0x2b0] sm:$0xff] }
 0x78f   :  { %10434 = vmatpush1.bf16.msra.mxu1 %v13467_v28 }
 0x831   :  { %v10078_v39 = vpop.f32.mrb[6].mxu1 }
 0x832   :  { %v846_v43 = vpop.f32.mrb[7].mxu1 }
 0x833   :  { %10090 = vmatprep.mubr.msk.f32.mxu0 %vm86_vm0, %v846_v43  ;;  %v1162_v43 = vld [vmem:[#allocation2 + $0x198] sm:$0xff] }
 0x834   :  { %10091 = vmatmul.mubr.msk.f32.vlgmr.msra.gmra.mrb[10].mxu0 %vm86_vm0, %v10078_v39  ;;  %v1157_v39 = vld [vmem:[#allocation2 + $0x170] sm:$0xff]  ;;  %v13507_v48 = vpack.c.bf16 %v1166_v2, %v1162_v43  ;;  %v1207_v43 = vld [vmem:[#allocation2 + $0x300] sm:$0xff] }
 0x835   :  { %v10085_v50 = vpop.f32.mrb[8].mxu1  ;;  %10454 = vmatpush1.bf16.msra.mxu0 %v13471_v42  ;;  %v13504_v47 = vpack.c.bf16 %v1157_v39, %v1153_v38  ;;  %v13523_v38 = vpack.c.bf16 %v1212_v27, %v1208_v26  ;;  %v1181_v39 = vld [vmem:[#allocation2 + $0x230] sm:$0xff]  ;;  %v1211_v2 = vld [vmem:[#allocation2 + $0x320] sm:$0xff]  ;;  %v13534_v26 = vpack.c.bf16 %v1220_v9, %v1216_v11  ;;  %v1228_v11 = vld [vmem:[#allocation2 + $0x3a8] sm:$0xff] }
 0x836   :  { %v921_v54 = vpop.f32.mrb[9].mxu1  ;;  %10456 = vmatprep.subr.bf16.mxu0 %v13473_v44  ;;  %v1189_v27 = vld [vmem:[#allocation2 + $0x270] sm:$0xff] }
 0x837   :  { %10093 = vmatprep.mubr.msk.f32.mxu0 %vm86_vm0, %v921_v54  ;;  %v1170_v54 = vld [vmem:[#allocation2 + $0x1d8] sm:$0xff]  ;;  %15955 = vst [vmem:[#allocation22_spill] sm:$0xff] %v13523_v38  ;;  %10436 = vmatprep.subr.bf16.mxu1 %v13523_v38  ;;  %15957 = vst [vmem:[#allocation24_spill] sm:$0xff] %v13534_v26  ;;  %v1193_v9 = vld [vmem:[#allocation2 + $0x290] sm:$0xff] }
 0x838   :  { %10094 = vmatmul.mubr.msk.f32.gmra.mrb[12].mxu0 %vm86_vm0, %v10085_v50  ;;  %v1165_v50 = vld [vmem:[#allocation2 + $0x1b0] sm:$0xff]  ;;  %v13513_v0 = vpack.c.bf16 %v1174_v56, %v1170_v54  ;;  %v1186_v54 = vld [vmem:[#allocation2 + $0x258] sm:$0xff] }
 0x839   :  { %10458 = vmatpush1.bf16.msra.mxu0 %v13478_v53  ;;  %v13510_v63 = vpack.c.bf16 %v1165_v50, %v1161_v49  ;;  %v13525_v49 = vpack.c.bf16 %v1181_v39, %v1177_v29  ;;  %v13527_v50 = vpack.c.bf16 %v1211_v2, %v1207_v43  ;;  %v1190_v56 = vld [vmem:[#allocation2 + $0x278] sm:$0xff]  ;;  %v1215_v29 = vld [vmem:[#allocation2 + $0x340] sm:$0xff]  ;;  %v13537_v43 = vpack.c.bf16 %v1189_v27, %v1185_v14 }
 0x83a   :  { %10460 = vmatprep.subr.bf16.mxu0 %v13481_v55  ;;  %v13532_v1 = vpack.c.bf16 %v1190_v56, %v1186_v54  ;;  %v1219_v39 = vld [vmem:[#allocation2 + $0x360] sm:$0xff]  ;;  %v1194_v38 = vld [vmem:[#allocation2 + $0x298] sm:$0xff]  ;;  %v1224_v56 = vld [vmem:[#allocation2 + $0x388] sm:$0xff] }
 0x83b   :  { %15956 = vst [vmem:[#allocation23_spill] sm:$0xff] %v13527_v50  ;;  %10438 = vmatpush1.bf16.msra.mxu1 %v13527_v50  ;;  %15958 = vst [vmem:[#allocation25_spill] sm:$0xff] %v13537_v43  ;;  %v13539_v2 = vpack.c.bf16 %v1219_v39, %v1215_v29  ;;  %v1198_v50 = vld [vmem:[#allocation2 + $0x2b8] sm:$0xff]  ;;  %v13546_v28 = vpack.c.bf16 %v1228_v11, %v1224_v56  ;;  %v1223_v14 = vld [vmem:[#allocation2 + $0x380] sm:$0xff]  ;;  %v13549_v29 = vpack.c.bf16 %v1197_v22, %v1193_v9 }
 0x83c   :  { %10440 = vmatprep.subr.bf16.mxu1 %v13534_v26  ;;  %v13544_v54 = vpack.c.bf16 %v1198_v50, %v1194_v38  ;;  %v1227_v27 = vld [vmem:[#allocation2 + $0x3a0] sm:$0xff]  ;;  %v1202_v26 = vld [vmem:[#allocation2 + $0x2d8] sm:$0xff]  ;;  %v1232_v50 = vld [vmem:[#allocation2 + $0x3c8] sm:$0xff] }
 0x83d   :  { %10462 = vmatpush1.bf16.msra.mxu0 %v13486_v3  ;;  %15959 = vst [vmem:[#allocation26_spill] sm:$0xff] %v13539_v2  ;;  %15961 = vst [vmem:[#allocation28_spill] sm:$0xff] %v13546_v28  ;;  %v13551_v39 = vpack.c.bf16 %v1227_v27, %v1223_v14  ;;  %v1236_v56 = vld [vmem:[#allocation2 + $0x3e8] sm:$0xff]  ;;  %v1201_v11 = vld [vmem:[#allocation2 + $0x2d0] sm:$0xff] }
 0x83e   :  { %10464 = vmatprep.subr.bf16.mxu0 %v13489_v8  ;;  %15960 = vst [vmem:[#allocation27_spill] sm:$0xff] %v13544_v54  ;;  %15962 = vst [vmem:[#allocation29_spill] sm:$0xff] %v13549_v29  ;;  %v13558_v21 = vpack.c.bf16 %v1236_v56, %v1232_v50  ;;  %v1231_v22 = vld [vmem:[#allocation2 + $0x3c0] sm:$0xff]  ;;  %v13561_v14 = vpack.c.bf16 %v1205_v7, %v1201_v11  ;;  %v1213_v50 = vld [vmem:[#allocation2 + $0x330] sm:$0xff] }
 0x83f   :  { %10442 = vmatpush1.bf16.msra.mxu1 %v13539_v2  ;;  %15963 = vst [vmem:[#allocation30_spill] sm:$0xff] %v13551_v39  ;;  %v1206_v2 = vld [vmem:[#allocation2 + $0x2f8] sm:$0xff]  ;;  %v1235_v9 = vld [vmem:[#allocation2 + $0x3e0] sm:$0xff] }
 0x840   :  { %10444 = vmatprep.subr.bf16.mxu1 %v13546_v28  ;;  %v13556_v38 = vpack.c.bf16 %v1206_v2, %v1202_v26  ;;  %15965 = vst [vmem:[#allocation32_spill] sm:$0xff] %v13558_v21  ;;  %15966 = vst [vmem:[#allocation33_spill] sm:$0xff] %v13561_v14  ;;  %v13563_v27 = vpack.c.bf16 %v1235_v9, %v1231_v22  ;;  %v15789_v28 = vmov 0.0   ;;  %v1214_v26 = vld [vmem:[#allocation2 + $0x338] sm:$0xff]  ;;  %v1209_v2 = vld [vmem:[#allocation2 + $0x310] sm:$0xff] }
 0x841   :  { %10466 = vmatpush1.bf16.msra.mxu0 %v13492_v18  ;;  %1375 = vmatprep.mubr.f32.mxu1 %v15789_v28  ;;  %v1218_v56 = vld [vmem:[#allocation2 + $0x358] sm:$0xff]  ;;  %v13572_v7 = vpack.c.bf16 %v1213_v50, %v1209_v2  ;;  %v1217_v22 = vld [vmem:[#allocation2 + $0x350] sm:$0xff] }
 0x842   :  { %10468 = vmatprep.subr.bf16.mxu0 %v13495_v19  ;;  %15964 = vst [vmem:[#allocation31_spill] sm:$0xff] %v13556_v38  ;;  %15967 = vst [vmem:[#allocation34_spill] sm:$0xff] %v13563_v27  ;;  %1446 = vmatprep.mubr.f32.mxu0 %v15789_v28  ;;  %v13575_v11 = vpack.c.bf16 %v1222_v6, %v1218_v56  ;;  %v1221_v9 = vld [vmem:[#allocation2 + $0x370] sm:$0xff] }
 0x843   :  { %10446 = vmatpush1.bf16.msra.mxu1 %v13551_v39  ;;  %v1210_v39 = vld [vmem:[#allocation2 + $0x318] sm:$0xff]  ;;  %15969 = vst [vmem:[#allocation36_spill] sm:$0xff] %v13572_v7  ;;  %v1225_v2 = vld [vmem:[#allocation2 + $0x390] sm:$0xff] }
 0x844   :  { %10448 = vmatprep.subr.bf16.mxu1 %v13558_v21  ;;  %v13567_v15 = vpack.c.bf16 %v1214_v26, %v1210_v39  ;;  %15970 = vst [vmem:[#allocation37_spill] sm:$0xff] %v13575_v11  ;;  %v1226_v21 = vld [vmem:[#allocation2 + $0x398] sm:$0xff]  ;;  %v13579_v26 = vpack.c.bf16 %v1221_v9, %v1217_v22  ;;  %v1229_v50 = vld [vmem:[#allocation2 + $0x3b0] sm:$0xff] }
 0x845   :  { %10470 = vmatpush1.bf16.msra.mxu0 %v13498_v36  ;;  %v1230_v39 = vld [vmem:[#allocation2 + $0x3b8] sm:$0xff]  ;;  %v13585_v6 = vpack.c.bf16 %v1229_v50, %v1225_v2  ;;  %v1233_v22 = vld [vmem:[#allocation2 + $0x3d0] sm:$0xff] }
 0x846   :  { %10472 = vmatprep.subr.bf16.mxu0 %v13501_v37  ;;  %15968 = vst [vmem:[#allocation35_spill] sm:$0xff] %v13567_v15  ;;  %15971 = vst [vmem:[#allocation38_spill] sm:$0xff] %v13579_v26  ;;  %v1237_v9 = vld [vmem:[#allocation2 + $0x3f0] sm:$0xff] }
 0x847   :  { %10450 = vmatpush1.bf16.msra.mxu1 %v13563_v27  ;;  %v1234_v27 = vld [vmem:[#allocation2 + $0x3d8] sm:$0xff]  ;;  %15973 = vst [vmem:[#allocation40_spill] sm:$0xff] %v13585_v6 }
 0x849   :  { %10474 = vmatpush1.bf16.msra.mxu0 %v13504_v47 }
 0x84a   :  { %10476 = vmatprep.subr.bf16.mxu0 %v13507_v48  ;;  %1376 = vmatmul.mubr.f32.vlgmr.msra.gmra.mrb[10].mxu1 %v15789_v28 }
 0x84d   :  { %10478 = vmatpush1.bf16.msra.mxu0 %v13510_v63 }
 0x84e   :  { %10480 = vmatprep.subr.bf16.mxu0 %v13513_v0 }
 0x851   :  { %10482 = vmatpush1.bf16.msra.mxu0 %v13516_v16 }
 0x852   :  { %10484 = vmatprep.subr.bf16.mxu0 %v13519_v20 }
 0x855   :  { %10486 = vmatpush1.bf16.msra.mxu0 %v13525_v49 }
 0x856   :  { %10488 = vmatprep.subr.bf16.mxu0 %v13532_v1 }
 0x859   :  { %10490 = vmatpush1.bf16.msra.mxu0 %v13537_v43 }
 0x85a   :  { %10492 = vmatprep.subr.bf16.mxu0 %v13544_v54 }
 0x85d   :  { %10494 = vmatpush1.bf16.msra.mxu0 %v13549_v29 }
 0x85e   :  { %10496 = vmatprep.subr.bf16.mxu0 %v13556_v38 }
 0x861   :  { %10498 = vmatpush1.bf16.msra.mxu0 %v13561_v14  ;;  %v13582_v14 = vpack.c.bf16 %v1230_v39, %v1226_v21  ;;  %v13592_v21 = vpack.c.bf16 %v1237_v9, %v1233_v22  ;;  %v9690_v39 = vld [vmem:[%s15745_s7] ss:$0 sm:$0xff]  ;;  %s13161_s7 = smov 16  }
 0x862   :  { %10500 = vmatprep.subr.bf16.mxu0 %v13567_v15  ;;  %v1238_v15 = vld [vmem:[#allocation2 + $0x3f8] sm:$0xff] }
 0x863   :  { %15972 = vst [vmem:[#allocation39_spill] sm:$0xff] %v13582_v14  ;;  %v13588_v56 = vpack.c.bf16 %v1238_v15, %v1234_v27  ;;  %15975 = vst [vmem:[#allocation42_spill] sm:$0xff] %v13592_v21 }
 0x865   :  { %10502 = vmatpush1.bf16.msra.mxu0 %v13572_v7  ;;  %15974 = vst [vmem:[#allocation41_spill] sm:$0xff] %v13588_v56 }
 0x866   :  { %10504 = vmatprep.subr.bf16.mxu0 %v13575_v11 }
 0x869   :  { %10506 = vmatpush1.bf16.msra.mxu0 %v13579_v26 }
 0x86a   :  { %10508 = vmatprep.subr.bf16.mxu0 %v13582_v14 }
 0x86d   :  { %10510 = vmatpush1.bf16.msra.mxu0 %v13585_v6 }
 0x86e   :  { %10512 = vmatprep.subr.bf16.mxu0 %v13588_v56 }
 0x871   :  { %10514 = vmatpush1.bf16.msra.mxu0 %v13592_v21 }
 0x874   :  { %1447 = vmatmul.mubr.f32.vlgmr.msra.gmra.mrb[14].mxu0 %v15789_v28 }
 0x907   :  { %v10092_v2 = vpop.f32.mrb[10].mxu0 }
 0x908   :  { %v13599_v50 = vadd.f32 %v10092_v2, %v9690_v39  ;;  %v1008_v15 = vpop.f32.mrb[11].mxu0 }
 0x909   :  { %v13601_v27 = vadd.f32 %v9690_v39, %v1008_v15 }
 0x90a   :  { %v1038_v6 = vmul.f32 %v13599_v50, %v13599_v50 }
 0x90b   :  { %v10095_v56 = vpop.f32.mrb[12].mxu0  ;;  %v1037_v22 = vmul.f32 %v13601_v27, %v13601_v27 }
 0x90c   :  { %v13607_v9 = vadd.f32 %v10095_v56, %v9690_v39  ;;  %v1018_v28 = vpop.f32.mrb[13].mxu0  ;;  %v1044_v21 = vsel %vm86_vm0, %v1038_v6, 0.0 }
 0x90d   :  { %v13610_v14 = vadd.f32 %v9690_v39, %v1018_v28  ;;  %1045 = vadd.xlane.f32.xlu1 %v1044_v21  ;;  %v1041_v2 = vsel %vm86_vm0, %v1037_v22, 0.0  ;;  %v15799_v28 = vlaneseq }
 0x90e   :  { %1042 = vadd.xlane.f32.xlu0 %v1041_v2  ;;  %v1040_v15 = vmul.f32 %v13607_v9, %v13607_v9 }
 0x90f   :  { %v1039_v26 = vmul.f32 %v13610_v14, %v13610_v14  ;;  %v13624_v6 = vshrl.u32 %v15799_v28, 7 }
 0x910   :  { %v1050_v11 = vsel %vm86_vm0, %v1040_v15, 0.0 }
 0x911   :  { %1051 = vadd.xlane.f32.xlu1 %v1050_v11  ;;  %v1047_v56 = vsel %vm86_vm0, %v1039_v26, 0.0  ;;  %v13627_v21 = vsub.s32 0, %v13624_v6  ;;  %v1239_v11 = vld [vmem:[%s15747_s9] sm:$0xf]  ;;  %v13633_v26 = vsub.s32 1, %v13624_v6 }
 0x912   :  { %1048 = vadd.xlane.f32.xlu0 %v1047_v56  ;;  %v1251_v56 = vsub.s32 2, %v13624_v6 }
 0x914   :  { %v13644_v28 = vrot.slane %v1239_v11, %v1251_v56 }
 0x916   :  { %15978 = vst [vmem:[#allocation45_spill] sm:$0xff] %v13644_v28 }
 0x922   :  { %1071 = vrot.lane.b32.xlu1 %v13378_v59, %s13161_s7  ;;  %v13636_v59 = vrot.slane %v1239_v11, %v13627_v21 }
 0x924   :  { %15976 = vst [vmem:[#allocation43_spill] sm:$0xff] %v13636_v59 }
 0x926   :  { %1073 = vrot.lane.b32.xlu1 %v13382_v61, %s13161_s7  ;;  %v1377_v61 = vpop.f32.mrb[10].mxu1 }
 0x927   :  { %v1379_v39 = vpop.f32.mrb[11].mxu1 }
 0x928   :  { %1069 = vrot.lane.b32.xlu0 %v13380_v60, %s13161_s7  ;;  %v13639_v60 = vrot.slane %v1239_v11, %v13633_v26 }
 0x92a   :  { %1075 = vrot.lane.b32.xlu1 %v13384_v62, %s13161_s7  ;;  %15977 = vst [vmem:[#allocation44_spill] sm:$0xff] %v13639_v60  ;;  %v1378_v62 = vadd.f32 %v1377_v61, %v13636_v59  ;;  %v1380_v22 = vadd.f32 %v1379_v39, %v13639_v60 }
 0x92c   :  { %v9691_v2 = vmul.f32 -1.442695, %v1378_v62  ;;  %v9692_v15 = vmul.f32 -1.442695, %v1380_v22 }
 0x92e   :  { %12658 = vpow2.f32 %v9691_v2 }
 0x92f   :  { %12660 = vpow2.f32 %v9692_v15 }
 0x938   :  { %v12659_v7 = vpop.eup %12658 }
 0x939   :  { %v12661_v38 = vpop.eup %12660  ;;  %v1456_v29 = vadd.f32 1.0, %v12659_v7 }
 0x93a   :  { %v1462_v54 = vadd.f32 1.0, %v12661_v38 }
 0x93b   :  { %12662 = vrcp.f32 %v1456_v29  ;;  %v15822_v29 = vmov 0.0|0.0  }
 0x93c   :  { %12664 = vrcp.f32 %v1462_v54  ;;  %10515 = vmatprep.subr.bf16.mxu1 %v15822_v29  ;;  %10519 = vmatprep.subr.bf16.mxu0 %v15822_v29 }
 0x945   :  { %v12663_v61 = vpop.eup %12662 }
 0x946   :  { %v12665_v62 = vpop.eup %12664 }
 0x947   :  { %v1448_v4 = vpop.f32.mrb[14].mxu0  ;;  %v1472_v22 = vmul.f32 0.0, %v12665_v62 }
 0x948   :  { %v1449_v58 = vadd.f32 %v1448_v4, %v13644_v28  ;;  %v1450_v43 = vpop.f32.mrb[15].mxu0 }
 0x94a   :  { %12666 = vtanh.f32 %v1449_v58 }
 0x954   :  { %v12667_v39 = vpop.eup %12666 }
 0x955   :  { %v1473_v2 = vmul.f32 %v12667_v39, %v12663_v61 }
 0x957   :  { %v13647_v15 = vadd.f32 %v1473_v2, %v1472_v22 }
 0x959   :  { %15979 = vst [vmem:[#allocation46_spill] sm:$0xff] %v13647_v15 }
 0x99a   :  { %v1046_v56 = vpop.xlane.xlu1 %1045 }
 0x99b   :  { %v1054_v60 = vmax.f32 %v1046_v56, 1e-24  ;;  %v1043_v59 = vpop.xlane.xlu0 %1042 }
 0x99c   :  { %v1053_v57 = vmax.f32 %v1043_v59, 1e-24  ;;  %v13163_v59 = vmov 0  }
 0x99d   :  { %12668 = vrsqrt.f32 %v1054_v60  ;;  %12633 = vset.pattern.permute.xlu1 %v13163_v59  ;;  %12632 = vset.pattern.permute.xlu0 %v13163_v59 }
 0x99e   :  { %12670 = vrsqrt.f32 %v1053_v57  ;;  %v1052_v38 = vpop.xlane.xlu1 %1051 }
 0x99f   :  { %v1056_v7 = vmax.f32 %v1052_v38, 1e-24  ;;  %v1049_v4 = vpop.xlane.xlu0 %1048 }
 0x9a0   :  { %v1055_v28 = vmax.f32 %v1049_v4, 1e-24 }
 0x9a1   :  { %12672 = vrsqrt.f32 %v1056_v7 }
 0x9a2   :  { %12674 = vrsqrt.f32 %v1055_v28 }
 0x9a7   :  { %v12669_v58 = vpop.eup %12668 }
 0x9a8   :  { %v12671_v54 = vpop.eup %12670  ;;  %v1062_v61 = vmul.f32 %v12669_v58, %v13599_v50  ;;  %v1255_v50 = vsub.s32 3, %v13624_v6 }
 0x9a9   :  { %v1061_v62 = vmul.f32 %v12671_v54, %v13601_v27  ;;  %v1072_v54 = vpop.permute.xlu1 %1071 }
 0x9aa   :  { %1087 = vrot.lane.b32.xlu1 %v1062_v61, %s13156_s24  ;;  %v13660_v27 = vrot.slane %v1239_v11, %v1255_v50  ;;  %v1098_v50 = vsel %vm86_vm0, %v13335_v32, %v1072_v54 }
 0x9ab   :  { %v12673_v57 = vpop.eup %12672  ;;  %1085 = vrot.lane.b32.xlu0 %v1061_v62, %s13156_s24 }
 0x9ac   :  { %v12675_v60 = vpop.eup %12674  ;;  %v1064_v39 = vmul.f32 %v12673_v57, %v13607_v9  ;;  %15980 = vst [vmem:[#allocation47_spill] sm:$0xff] %v13660_v27  ;;  %v1451_v28 = vadd.f32 %v1450_v43, %v13660_v27  ;;  %v13164_v9 = vmov 1966171168  }
 0x9ad   :  { %v1063_v22 = vmul.f32 %v12675_v60, %v13610_v14  ;;  %v1479_v7 = vunpack.c.l.s4 %v13164_v9  ;;  %v1074_v62 = vpop.permute.xlu1 %1073  ;;  %v1070_v60 = vpop.permute.xlu0 %1069  ;;  %v15982_v9 = vmov 0 }
 0x9ae   :  { %1091 = vrot.lane.b32.xlu1 %v1064_v39, %s13156_s24  ;;  %v9693_v2 = vmul.f32 -1.442695, %v1451_v28  ;;  %v15983_v9 = vsel %vm13680_vm4, 4294967295, %v15982_v9 }
 0x9af   :  { %1089 = vrot.lane.b32.xlu0 %v1063_v22, %s13156_s24  ;;  %v1480_v4 = vunpack.c.0.s8 %v1479_v7  ;;  %15984 = vst [vmem:[#allocation49_spill] sm:$0xff] %v15983_v9 }
 0x9b0   :  { %12676 = vpow2.f32 %v9693_v2  ;;  %v1097_v2 = vsel %vm86_vm0, %v13333_v31, %v1070_v60  ;;  %v1099_v60 = vsel %vm86_vm0, %v13341_v35, %v1074_v62 }
 0x9b1   :  { %12678 = vtanh.f32 %v13647_v15  ;;  %v13667_v11 = vsub.s32 %v1480_v4, %v13624_v6  ;;  %v1076_v59 = vpop.permute.xlu1 %1075 }
 0x9b2   :  { %v1100_v54 = vsel %vm86_vm0, %v13337_v33, %v1076_v59 }
 0x9b3   :  { %15981 = vst [vmem:[#allocation48_spill] sm:$0xff] %v13667_v11 }
 0x9ba   :  { %v12677_v56 = vpop.eup %12676 }
 0x9bb   :  { %v1469_v38 = vadd.f32 1.0, %v12677_v56  ;;  %v12679_v14 = vpop.eup %12678 }
 0x9bd   :  { %12680 = vrcp.f32 %v1469_v38 }
 0x9c7   :  { %v12681_v58 = vpop.eup %12680 }
 0x9c8   :  { %v13664_v61 = vmul.f32 %v12681_v58, %v12679_v14 }
 0x9ca   :  { %v1484_v43 = vrot.slane %v13664_v61, %v13667_v11 }
 0x9cc   :  { %v1492_v57 = vrot.slane %v1484_v43, %v13667_v11  ;;  %v1485_v39 = vcombine.high %v1484_v43, %v1484_v43 }
 0x9ce   :  { %v1503_v22 = vrot.slane %v1492_v57, %v13627_v21  ;;  %v1499_v32 = vrot.slane %v1485_v39, %v13667_v11 }
 0xa1c   :  { %v1088_v28 = vpop.permute.xlu1 %1087 }
 0xa1d   :  { %v1103_v56 = vsel %vm1101_vm2, %v1098_v50, %v1088_v28  ;;  %v1086_v38 = vpop.permute.xlu0 %1085 }
 0xa1e   :  { %v13685_v7 = vsel %vm1106_vm3, %v1103_v56, 0.0  ;;  %v1102_v14 = vsel %vm1101_vm2, %v1097_v2, %v1086_v38  ;;  %v1514_v2 = vrot.slane %v1499_v32, %v13627_v21 }
 0xa1f   :  { %15985 = vst [vmem:[#allocation50_spill] sm:$0xff] %v13685_v7  ;;  %v13690_v4 = vsel %vm1106_vm3, %v1102_v14, 0.0  ;;  %v13692_v31 = vpack.c.bf16 %v1103_v56, %v1102_v14  ;;  %v1506_v58 = vmul.f32 %v1503_v22, %v13685_v7 }
 0xa20   :  { %15986 = vst [vmem:[#allocation51_spill] sm:$0xff] %v13690_v4  ;;  %v1092_v43 = vpop.permute.xlu1 %1091  ;;  %v1505_v57 = vmul.f32 %v1503_v22, %v13690_v4 }
 0xa21   :  { %15987 = vst [vmem:[#allocation52_spill] sm:$0xff] %v13692_v31  ;;  %v1105_v50 = vsel %vm1101_vm2, %v1100_v54, %v1092_v43  ;;  %1509 = vadd.xlane.f32.xlu1 %v1506_v58  ;;  %10518 = vmatpush3.bf16.msk.msra.mxu1 %vm13680_vm4, %v13692_v31  ;;  %v1090_v39 = vpop.permute.xlu0 %1089  ;;  %v15991_v58 = vlaneseq }
 0xa22   :  { %v1104_v28 = vsel %vm1101_vm2, %v1099_v60, %v1090_v39  ;;  %1507 = vadd.xlane.f32.xlu0 %v1505_v57  ;;  %10524 = vmatprep.subr.bf16.mxu1 %v13396_v5  ;;  %v13714_v62 = vsel %vm1106_vm3, %v1105_v50, 0.0 }
 0xa23   :  { %v13708_v33 = vsel %vm1106_vm3, %v1104_v28, 0.0  ;;  %v13710_v59 = vpack.c.bf16 %v1105_v50, %v1104_v28  ;;  %15990 = vst [vmem:[#allocation55_spill] sm:$0xff] %v13714_v62  ;;  %v1517_v22 = vmul.f32 %v1514_v2, %v13714_v62  ;;  %v1539_v54 = vand.u32 127, %v15991_v58 }
 0xa24   :  { %15988 = vst [vmem:[#allocation53_spill] sm:$0xff] %v13708_v33  ;;  %v1516_v35 = vmul.f32 %v1514_v2, %v13708_v33 }
 0xa25   :  { %15989 = vst [vmem:[#allocation54_spill] sm:$0xff] %v13710_v59  ;;  %10522 = vmatpush3.bf16.msk.msra.mxu0 %vm13680_vm4, %v13710_v59  ;;  %v1544_v43 = vadd.s32 4294967288, %v1539_v54  ;;  %v13723_v60 = vsub.s32 %v1539_v54, %v13624_v6 }
 0xa26   :  { %1518 = vadd.xlane.f32.xlu0 %v1516_v35  ;;  %10588 = vmatprep.subr.bf16.mxu0 %v13409_v23 }
 0xa27   :  { %v13726_v50 = vsub.s32 %v1544_v43, %v13624_v6 }
 0xa2a   :  { %1520 = vadd.xlane.f32.xlu0 %v1517_v22 }
 0xaae   :  { %v1510_v56 = vpop.xlane.xlu1 %1509 }
 0xaaf   :  { %1530 = vperm.xlu1 %12633, %v1510_v56   ;;  %v1508_v38 = vpop.xlane.xlu0 %1507 }
 0xab0   :  { %1527 = vperm.xlu0 %12632, %v1508_v38  }
 0xab3   :  { %v1519_v14 = vpop.xlane.xlu0 %1518 }
 0xab4   :  { %1533 = vperm.xlu1 %12633, %v1519_v14  }
 0xab7   :  { %v1521_v32 = vpop.xlane.xlu0 %1520 }
 0xab8   :  { %1536 = vperm.xlu1 %12633, %v1521_v32  }
 0xb2e   :  { %v1531_v57 = vpop.permute.xlu1 %1530 }
 0xb2f   :  { %v1528_v39 = vpop.permute.xlu0 %1527  ;;  %v1548_v2 = vrot.slane %v1531_v57, %v13726_v50 }
 0xb30   :  { %v1543_v35 = vrot.slane %v1528_v39, %v13723_v60 }
 0xb32   :  { %v1550_v54 = vsel %vm1549_vm5, %v1548_v2, %v1543_v35 }
 0xb33   :  { %v1534_v28 = vpop.permute.xlu1 %1533 }
 0xb34   :  { %v1554_v29 = vrot.slane %v1534_v28, %v13723_v60 }
 0xb37   :  { %v1537_v22 = vpop.permute.xlu1 %1536 }
 0xb38   :  { %v1558_v58 = vrot.slane %v1537_v22, %v13726_v50 }
 0xb3a   :  { %v1559_v62 = vsel %vm1549_vm5, %v1558_v58, %v1554_v29 }
 0xb3b   :  { %v1561_v6 = vsel %vm1560_vm6, %v1559_v62, %v1550_v54 }
 0xb3c   :  { %v1564_v43 = vsel %vm1563_vm7, %v1561_v6, -inf }
 0xb3d   :  { %1565 = vmax.xlane.f32.xlu1 %v1564_v43 }
 0xbca   :  { %v1566_v57 = vpop.xlane.xlu1 %1565 }
 0xbcb   :  { %v1571_v39 = vrot.slane %v1566_v57, %v13627_v21  ;;  %v1575_v33 = vrot.slane %v1566_v57, %v13633_v26 }
 0xbcd   :  { %v1578_v4 = vsub.f32 %v1508_v38, %v1571_v39  ;;  %v1579_v28 = vsub.f32 %v1510_v56, %v1571_v39  ;;  %v1580_v22 = vsub.f32 %v1519_v14, %v1575_v33  ;;  %v1581_v15 = vsub.f32 %v1521_v32, %v1575_v33 }
 0xbcf   :  { %v1582_v7 = vmul.f32 1.442695, %v1578_v4  ;;  %v1584_v11 = vmul.f32 1.442695, %v1579_v28  ;;  %v1586_v2 = vmul.f32 1.442695, %v1580_v22 }
 0xbd0   :  { %v1588_v29 = vmul.f32 1.442695, %v1581_v15 }
 0xbd1   :  { %12682 = vpow2.f32 %v1582_v7 }
 0xbd2   :  { %12684 = vpow2.f32 %v1584_v11 }
 0xbd3   :  { %12686 = vpow2.f32 %v1586_v2 }
 0xbd4   :  { %12688 = vpow2.f32 %v1588_v29 }
 0xbdb   :  { %v12683_v62 = vpop.eup %12682 }
 0xbdc   :  { %1595 = vperm.xlu0 %12632, %v12683_v62   ;;  %v12685_v35 = vpop.eup %12684 }
 0xbdd   :  { %v12687_v58 = vpop.eup %12686 }
 0xbde   :  { %v12689_v54 = vpop.eup %12688 }
 0xbe0   :  { %1598 = vperm.xlu0 %12632, %v12685_v35  }
 0xbe4   :  { %1601 = vperm.xlu0 %12632, %v12687_v58  }
 0xbe8   :  { %1604 = vperm.xlu0 %12632, %v12689_v54  }
 0xc5b   :  { %v1596_v38 = vpop.permute.xlu0 %1595 }
 0xc5c   :  { %v1609_v11 = vrot.slane %v1596_v38, %v13723_v60 }
 0xc5f   :  { %v1599_v56 = vpop.permute.xlu0 %1598 }
 0xc60   :  { %v1613_v7 = vrot.slane %v1599_v56, %v13726_v50  ;;  %v15992_v56 = vmov 0.0  }
 0xc61   :  { %10107 = vmatprep.mubr.msk.f32.mxu0 %vm13165_vm8, %v15992_v56  ;;  %10100 = vmatprep.mubr.msk.f32.mxu1 %vm13165_vm8, %v15992_v56 }
 0xc62   :  { %v1614_v32 = vsel %vm1549_vm5, %v1613_v7, %v1609_v11 }
 0xc63   :  { %v1602_v4 = vpop.permute.xlu0 %1601 }
 0xc64   :  { %v1618_v33 = vrot.slane %v1602_v4, %v13723_v60 }
 0xc67   :  { %v1605_v14 = vpop.permute.xlu0 %1604 }
 0xc68   :  { %v1622_v15 = vrot.slane %v1605_v14, %v13726_v50 }
 0xc6a   :  { %v1623_v6 = vsel %vm1549_vm5, %v1622_v15, %v1618_v33 }
 0xc6b   :  { %v1624_v43 = vsel %vm1560_vm6, %v1623_v6, %v1614_v32 }
 0xc6c   :  { %v1626_v57 = vsel %vm1563_vm7, %v1624_v43, 0.0  ;;  %v15993_v43 = vld [vmem:[#allocation13_spill] sm:$0xff] }
 0xc6d   :  { %1627 = vadd.xlane.f32.xlu0 %v1626_v57  ;;  %v15994_v57 = vld [vmem:[#allocation25_spill] sm:$0xff] }
 0xcfa   :  { %v1628_v39 = vpop.xlane.xlu0 %1627 }
 0xcfb   :  { %12690 = vrcp.f32 %v1628_v39  ;;  %v15995_v39 = vld [vmem:[#allocation14_spill] sm:$0xff] }
 0xd05   :  { %v12691_v28 = vpop.eup %12690 }
 0xd06   :  { %v1638_v22 = vrot.slane %v12691_v28, %v13633_v26  ;;  %v1634_v38 = vrot.slane %v12691_v28, %v13627_v21  ;;  %v15996_v28 = vld [vmem:[#allocation27_spill] sm:$0xff] }
 0xd08   :  { %v1643_v2 = vmul.f32 %v12687_v58, %v1638_v22  ;;  %v1644_v29 = vmul.f32 %v12689_v54, %v1638_v22  ;;  %v1641_v4 = vmul.f32 %v12683_v62, %v1634_v38  ;;  %v1642_v7 = vmul.f32 %v12685_v35, %v1634_v38  ;;  %v15997_v22 = vld [vmem:[#allocation15_spill] sm:$0xff] }
 0xd09   :  { %v16000_v38 = vld [vmem:[#allocation31_spill] sm:$0xff] }
 0xd0a   :  { %1737 = vperm.xlu1 %12633, %v1643_v2   ;;  %v15998_v2 = vld [vmem:[#allocation29_spill] sm:$0xff] }
 0xd0e   :  { %1740 = vperm.xlu1 %12633, %v1644_v29   ;;  %v15999_v29 = vld [vmem:[#allocation16_spill] sm:$0xff] }
 0xd12   :  { %1648 = vperm.xlu1 %12633, %v1641_v4   ;;  %v16001_v4 = vld [vmem:[#allocation17_spill] sm:$0xff] }
 0xd16   :  { %1651 = vperm.xlu1 %12633, %v1642_v7   ;;  %v16002_v7 = vld [vmem:[#allocation33_spill] sm:$0xff] }
 0xd89   :  { %v1738_v14 = vpop.permute.xlu1 %1737 }
 0xd8a   :  { %v1745_v58 = vrot.slane %v1738_v14, %v13723_v60  ;;  %v16003_v14 = vld [vmem:[#allocation18_spill] sm:$0xff] }
 0xd8d   :  { %v1741_v11 = vpop.permute.xlu1 %1740 }
 0xd8e   :  { %v1749_v54 = vrot.slane %v1741_v11, %v13726_v50  ;;  %v16004_v11 = vld [vmem:[#allocation35_spill] sm:$0xff] }
 0xd90   :  { %v1750_v33 = vsel %vm1549_vm5, %v1749_v54, %v1745_v58  ;;  %v16005_v58 = vld [vmem:[#allocation19_spill] sm:$0xff]  ;;  %v16006_v54 = vld [vmem:[#allocation36_spill] sm:$0xff] }
 0xd91   :  { %10108 = vmatmul.mubr.msk.f32.vlgmr.msra.gmra.mrb[16].mxu0 %vm86_vm0, %v1750_v33  ;;  %v1649_v15 = vpop.permute.xlu1 %1648  ;;  %v16007_v33 = vld [vmem:[#allocation20_spill] sm:$0xff] }
 0xd92   :  { %10590 = vmatpush1.bf16.msra.mxu0 %v13471_v42  ;;  %v1656_v62 = vrot.slane %v1649_v15, %v13723_v60  ;;  %v16008_v15 = vld [vmem:[#allocation37_spill] sm:$0xff] }
 0xd93   :  { %10592 = vmatprep.subr.bf16.mxu0 %v13473_v44 }
 0xd95   :  { %v1652_v32 = vpop.permute.xlu1 %1651 }
 0xd96   :  { %v1660_v35 = vrot.slane %v1652_v32, %v13726_v50  ;;  %10594 = vmatpush1.bf16.msra.mxu0 %v13478_v53  ;;  %v16009_v32 = vld [vmem:[#allocation21_spill] sm:$0xff] }
 0xd97   :  { %10596 = vmatprep.subr.bf16.mxu0 %v13481_v55 }
 0xd98   :  { %v1661_v6 = vsel %vm1549_vm5, %v1660_v35, %v1656_v62  ;;  %v16010_v62 = vld [vmem:[#allocation38_spill] sm:$0xff] }
 0xd99   :  { %10101 = vmatmul.mubr.msk.f32.vlgmr.msra.gmra.mrb[12].mxu1 %vm86_vm0, %v1661_v6  ;;  %v16011_v35 = vld [vmem:[#allocation22_spill] sm:$0xff]  ;;  %v16012_v6 = vld [vmem:[#allocation39_spill] sm:$0xff] }
 0xd9a   :  { %10526 = vmatpush1.bf16.msra.mxu1 %v13398_v12  ;;  %10598 = vmatpush1.bf16.msra.mxu0 %v13486_v3 }
 0xd9b   :  { %10528 = vmatprep.subr.bf16.mxu1 %v13400_v13  ;;  %10600 = vmatprep.subr.bf16.mxu0 %v13489_v8 }
 0xd9e   :  { %10530 = vmatpush1.bf16.msra.mxu1 %v13404_v10  ;;  %10602 = vmatpush1.bf16.msra.mxu0 %v13492_v18 }
 0xd9f   :  { %10532 = vmatprep.subr.bf16.mxu1 %v13407_v17  ;;  %10604 = vmatprep.subr.bf16.mxu0 %v13495_v19 }
 0xda2   :  { %10534 = vmatpush1.bf16.msra.mxu1 %v13412_v24  ;;  %10606 = vmatpush1.bf16.msra.mxu0 %v13498_v36 }
 0xda3   :  { %10536 = vmatprep.subr.bf16.mxu1 %v13416_v25  ;;  %10608 = vmatprep.subr.bf16.mxu0 %v13501_v37 }
 0xda6   :  { %10538 = vmatpush1.bf16.msra.mxu1 %v13419_v30  ;;  %10610 = vmatpush1.bf16.msra.mxu0 %v13504_v47 }
 0xda7   :  { %10540 = vmatprep.subr.bf16.mxu1 %v13422_v34  ;;  %10612 = vmatprep.subr.bf16.mxu0 %v13507_v48 }
 0xdaa   :  { %10542 = vmatpush1.bf16.msra.mxu1 %v13425_v40  ;;  %10614 = vmatpush1.bf16.msra.mxu0 %v13510_v63 }
 0xdab   :  { %10544 = vmatprep.subr.bf16.mxu1 %v13428_v41  ;;  %10616 = vmatprep.subr.bf16.mxu0 %v13513_v0 }
 0xdae   :  { %10546 = vmatpush1.bf16.msra.mxu1 %v13431_v45  ;;  %10618 = vmatpush1.bf16.msra.mxu0 %v13516_v16 }
 0xdaf   :  { %10548 = vmatprep.subr.bf16.mxu1 %v13434_v46  ;;  %10620 = vmatprep.subr.bf16.mxu0 %v13519_v20 }
 0xdb2   :  { %10550 = vmatpush1.bf16.msra.mxu1 %v13437_v51  ;;  %10622 = vmatpush1.bf16.msra.mxu0 %v13525_v49 }
 0xdb3   :  { %10552 = vmatprep.subr.bf16.mxu1 %v13440_v52  ;;  %10624 = vmatprep.subr.bf16.mxu0 %v13532_v1 }
 0xdb6   :  { %10554 = vmatpush1.bf16.msra.mxu1 %v15993_v43  ;;  %10626 = vmatpush1.bf16.msra.mxu0 %v15994_v57 }
 0xdb7   :  { %10556 = vmatprep.subr.bf16.mxu1 %v15995_v39  ;;  %10628 = vmatprep.subr.bf16.mxu0 %v15996_v28 }
 0xdba   :  { %10558 = vmatpush1.bf16.msra.mxu1 %v15997_v22  ;;  %10630 = vmatpush1.bf16.msra.mxu0 %v15998_v2 }
 0xdbb   :  { %10560 = vmatprep.subr.bf16.mxu1 %v15999_v29  ;;  %10632 = vmatprep.subr.bf16.mxu0 %v16000_v38 }
 0xdbe   :  { %10562 = vmatpush1.bf16.msra.mxu1 %v16001_v4  ;;  %10634 = vmatpush1.bf16.msra.mxu0 %v16002_v7  ;;  %v16013_v7 = vld [vmem:[#allocation23_spill] sm:$0xff] }
 0xdbf   :  { %10564 = vmatprep.subr.bf16.mxu1 %v16003_v14  ;;  %10636 = vmatprep.subr.bf16.mxu0 %v16004_v11  ;;  %v16014_v14 = vld [vmem:[#allocation40_spill] sm:$0xff] }
 0xdc0   :  { %v16015_v11 = vld [vmem:[#allocation24_spill] sm:$0xff] }
 0xdc2   :  { %10566 = vmatpush1.bf16.msra.mxu1 %v16005_v58  ;;  %10638 = vmatpush1.bf16.msra.mxu0 %v16006_v54  ;;  %v16016_v58 = vld [vmem:[#allocation41_spill] sm:$0xff]  ;;  %v16017_v54 = vld [vmem:[#allocation26_spill] sm:$0xff] }
 0xdc3   :  { %10568 = vmatprep.subr.bf16.mxu1 %v16007_v33  ;;  %10640 = vmatprep.subr.bf16.mxu0 %v16008_v15  ;;  %v16018_v33 = vld [vmem:[#allocation42_spill] sm:$0xff]  ;;  %v16019_v15 = vld [vmem:[#allocation28_spill] sm:$0xff] }
 0xdc6   :  { %10570 = vmatpush1.bf16.msra.mxu1 %v16009_v32  ;;  %10642 = vmatpush1.bf16.msra.mxu0 %v16010_v62  ;;  %v16020_v32 = vmov 0.0|0.0   ;;  %v16021_v62 = vld [vmem:[#allocation30_spill] sm:$0xff] }
 0xdc7   :  { %10572 = vmatprep.subr.bf16.mxu1 %v16011_v35  ;;  %10644 = vmatprep.subr.bf16.mxu0 %v16012_v6  ;;  %v16022_v35 = vld [vmem:[#allocation32_spill] sm:$0xff]  ;;  %v16023_v6 = vld [vmem:[#allocation34_spill] sm:$0xff] }
 0xdca   :  { %10574 = vmatpush1.bf16.msra.mxu1 %v16013_v7  ;;  %10646 = vmatpush1.bf16.msra.mxu0 %v16014_v14 }
 0xdcb   :  { %10576 = vmatprep.subr.bf16.mxu1 %v16015_v11  ;;  %10648 = vmatprep.subr.bf16.mxu0 %v16016_v58 }
 0xdce   :  { %10578 = vmatpush1.bf16.msra.mxu1 %v16017_v54  ;;  %10650 = vmatpush1.bf16.msra.mxu0 %v16018_v33 }
 0xdcf   :  { %10580 = vmatprep.subr.bf16.mxu1 %v16019_v15  ;;  %10655 = vmatprep.subr.bf16.mxu0 %v16020_v32 }
 0xdd2   :  { %10582 = vmatpush1.bf16.msra.mxu1 %v16021_v62 }
 0xdd3   :  { %10584 = vmatprep.subr.bf16.mxu1 %v16022_v35 }
 0xdd6   :  { %10586 = vmatpush1.bf16.msra.mxu1 %v16023_v6 }
 0xdd7   :  { %10651 = vmatprep.subr.bf16.mxu1 %v16020_v32 }
 0xe64   :  { %v1819_v14 = vpop.f32.mrb[16].mxu0 }
 0xe65   :  { %v10109_v11 = vpop.f32.mrb[17].mxu0  ;;  %v1825_v7 = vrot.slane %v1819_v14, 7 }
 0xe6c   :  { %v1730_v58 = vpop.f32.mrb[12].mxu1 }
 0xe6d   :  { %v10102_v4 = vpop.f32.mrb[13].mxu1  ;;  %v1826_v54 = vsel %vm1560_vm6, %v1825_v7, %v1730_v58  ;;  %v16024_v7 = vld [vmem:[#allocation43_spill] sm:$0xff] }
 0xe6e   :  { %1892 = vmatprep.mubr.f32.mxu1 %v1826_v54  ;;  %1963 = vmatprep.mubr.f32.mxu0 %v1826_v54  ;;  %v16025_v54 = vld [vmem:[#allocation44_spill] sm:$0xff] }
 0xe6f   :  { %1893 = vmatmul.mubr.f32.vlgmr.msra.gmra.mrb[14].mxu1 %v13664_v61  ;;  %1964 = vmatmul.mubr.f32.vlgmr.msra.gmra.mrb[18].mxu0 %v13664_v61 }
 0xe70   :  { %10654 = vmatpush3.bf16.msk.msra.mxu1 %vm13680_vm4, %v13692_v31  ;;  %10658 = vmatpush3.bf16.msk.msra.mxu0 %vm13680_vm4, %v13710_v59 }
 0xe71   :  { %10121 = vmatprep.mubr.msk.f32.mxu0 %vm13165_vm8, %v15992_v56  ;;  %10114 = vmatprep.mubr.msk.f32.mxu1 %vm13165_vm8, %v15992_v56  ;;  %v16026_v56 = vld [vmem:[#allocation45_spill] sm:$0xff] }
 0xe72   :  { %10660 = vmatprep.subr.bf16.mxu1 %v13396_v5  ;;  %10724 = vmatprep.subr.bf16.mxu0 %v13409_v23 }
 0xf42   :  { %v1894_v4 = vpop.f32.mrb[14].mxu1  ;;  %v1965_v61 = vpop.f32.mrb[18].mxu0 }
 0xf43   :  { %v1895_v14 = vadd.f32 %v1894_v4, %v16024_v7  ;;  %v1896_v11 = vpop.f32.mrb[15].mxu1  ;;  %v1967_v58 = vpop.f32.mrb[19].mxu0  ;;  %v1966_v62 = vadd.f32 %v1965_v61, %v16026_v56 }
 0xf44   :  { %v1897_v31 = vadd.f32 %v1896_v11, %v16025_v54  ;;  %v1968_v6 = vadd.f32 %v1967_v58, %v13660_v27 }
 0xf45   :  { %v9700_v9 = vmul.f32 -1.442695, %v1895_v14 }
 0xf46   :  { %v9701_v59 = vmul.f32 -1.442695, %v1897_v31  ;;  %v9702_v35 = vmul.f32 -1.442695, %v1968_v6 }
 0xf47   :  { %12692 = vpow2.f32 %v9700_v9 }
 0xf48   :  { %12694 = vpow2.f32 %v9701_v59  ;;  %v16027_v59 = vld [vmem:[#allocation46_spill] sm:$0xff] }
 0xf49   :  { %12696 = vpow2.f32 %v9702_v35 }
 0xf4a   :  { %12698 = vtanh.f32 %v1966_v62 }
 0xf51   :  { %v12693_v5 = vpop.eup %12692 }
 0xf52   :  { %v12695_v32 = vpop.eup %12694  ;;  %v1973_v23 = vadd.f32 1.0, %v12693_v5 }
 0xf53   :  { %v1979_v15 = vadd.f32 1.0, %v12695_v32  ;;  %v12697_v4 = vpop.eup %12696  ;;  %v16030_v32 = vld [vmem:[#allocation48_spill] sm:$0xff] }
 0xf54   :  { %12700 = vrcp.f32 %v1973_v23  ;;  %v12699_v7 = vpop.eup %12698  ;;  %v1986_v9 = vadd.f32 1.0, %v12697_v4  ;;  %v16031_v4 = vld [vmem:[#allocation50_spill] sm:$0xff] }
 0xf55   :  { %12702 = vrcp.f32 %v1979_v15 }
 0xf56   :  { %12704 = vrcp.f32 %v1986_v9  ;;  %v16033_v9 = vld [vmem:[#allocation53_spill] sm:$0xff] }
 0xf5e   :  { %v12701_v11 = vpop.eup %12700 }
 0xf5f   :  { %v12703_v14 = vpop.eup %12702  ;;  %v1990_v31 = vmul.f32 %v12701_v11, %v12699_v7  ;;  %v16032_v11 = vld [vmem:[#allocation51_spill] sm:$0xff] }
 0xf60   :  { %v1989_v54 = vmul.f32 %v12703_v14, %v16027_v59  ;;  %v12705_v6 = vpop.eup %12704 }
 0xf62   :  { %v13844_v58 = vadd.f32 %v1990_v31, %v1989_v54 }
 0xf64   :  { %16028 = vst [vmem:[#allocation13_spill] sm:$0xff] %v13844_v58  ;;  %12706 = vtanh.f32 %v13844_v58 }
 0xf6e   :  { %v12707_v5 = vpop.eup %12706 }
 0xf6f   :  { %v13847_v35 = vmul.f32 %v12707_v5, %v12705_v6  ;;  %v16034_v6 = vld [vmem:[#allocation55_spill] sm:$0xff] }
 0xf71   :  { %16029 = vst [vmem:[#allocation25_spill] sm:$0xff] %v13847_v35  ;;  %v2001_v23 = vrot.slane %v13847_v35, %v16030_v32 }
 0xf73   :  { %v2009_v15 = vrot.slane %v2001_v23, %v16030_v32  ;;  %v2002_v62 = vcombine.high %v2001_v23, %v2001_v23 }
 0xf75   :  { %v2020_v61 = vrot.slane %v2009_v15, %v13627_v21  ;;  %v2016_v7 = vrot.slane %v2002_v62, %v16030_v32 }
 0xf77   :  { %v2023_v54 = vmul.f32 %v2020_v61, %v16031_v4  ;;  %v2022_v14 = vmul.f32 %v2020_v61, %v16032_v11  ;;  %v2031_v31 = vrot.slane %v2016_v7, %v13627_v21 }
 0xf79   :  { %2026 = vadd.xlane.f32.xlu0 %v2023_v54  ;;  %2024 = vadd.xlane.f32.xlu1 %v2022_v14  ;;  %v2033_v59 = vmul.f32 %v2031_v31, %v16033_v9  ;;  %v2034_v5 = vmul.f32 %v2031_v31, %v16034_v6 }
 0xf7d   :  { %2035 = vadd.xlane.f32.xlu0 %v2033_v59 }
 0xf81   :  { %2037 = vadd.xlane.f32.xlu0 %v2034_v5 }
0x1006   :  { %v2027_v58 = vpop.xlane.xlu0 %2026  ;;  %v2025_v23 = vpop.xlane.xlu1 %2024 }
0x1007   :  { %2044 = vperm.xlu0 %12632, %v2025_v23  }
0x100a   :  { %v2036_v15 = vpop.xlane.xlu0 %2035 }
0x100b   :  { %2047 = vperm.xlu0 %12632, %v2027_v58   ;;  %2050 = vperm.xlu1 %12633, %v2036_v15  }
0x100e   :  { %v2038_v62 = vpop.xlane.xlu0 %2037 }
0x100f   :  { %2053 = vperm.xlu0 %12632, %v2038_v62  }
0x1086   :  { %v2045_v4 = vpop.permute.xlu0 %2044 }
0x1087   :  { %v2058_v14 = vrot.slane %v2045_v4, %v13723_v60 }
0x108a   :  { %v2048_v61 = vpop.permute.xlu0 %2047  ;;  %v2051_v11 = vpop.permute.xlu1 %2050 }
0x108b   :  { %v2062_v7 = vrot.slane %v2048_v61, %v13726_v50  ;;  %v2067_v59 = vrot.slane %v2051_v11, %v13723_v60 }
0x108d   :  { %v2063_v5 = vsel %vm1549_vm5, %v2062_v7, %v2058_v14 }
0x108e   :  { %v2054_v54 = vpop.permute.xlu0 %2053 }
0x108f   :  { %v2071_v31 = vrot.slane %v2054_v54, %v13726_v50 }
0x1091   :  { %v2072_v6 = vsel %vm1549_vm5, %v2071_v31, %v2067_v59 }
0x1092   :  { %v2073_v9 = vsel %vm1560_vm6, %v2072_v6, %v2063_v5 }
0x1093   :  { %v2075_v32 = vsel %vm1563_vm7, %v2073_v9, -inf }
0x1094   :  { %2076 = vmax.xlane.f32.xlu0 %v2075_v32 }
0x1121   :  { %v2077_v56 = vpop.xlane.xlu0 %2076 }
0x1122   :  { %v2082_v27 = vrot.slane %v2077_v56, %v13627_v21  ;;  %v2086_v61 = vrot.slane %v2077_v56, %v13633_v26 }
0x1124   :  { %v2089_v35 = vsub.f32 %v2025_v23, %v2082_v27  ;;  %v2090_v4 = vsub.f32 %v2027_v58, %v2082_v27  ;;  %v2091_v11 = vsub.f32 %v2036_v15, %v2086_v61  ;;  %v2092_v38 = vsub.f32 %v2038_v62, %v2086_v61 }
0x1126   :  { %v2093_v33 = vmul.f32 1.442695, %v2089_v35  ;;  %v2095_v54 = vmul.f32 1.442695, %v2090_v4  ;;  %v2097_v7 = vmul.f32 1.442695, %v2091_v11 }
0x1127   :  { %v2099_v14 = vmul.f32 1.442695, %v2092_v38 }
0x1128   :  { %12708 = vpow2.f32 %v2093_v33 }
0x1129   :  { %12710 = vpow2.f32 %v2095_v54 }
0x112a   :  { %12712 = vpow2.f32 %v2097_v7 }
0x112b   :  { %12714 = vpow2.f32 %v2099_v14 }
0x1132   :  { %v12709_v6 = vpop.eup %12708 }
0x1133   :  { %2106 = vperm.xlu1 %12633, %v12709_v6   ;;  %v12711_v32 = vpop.eup %12710 }
0x1134   :  { %v12713_v9 = vpop.eup %12712 }
0x1135   :  { %v12715_v59 = vpop.eup %12714 }
0x1137   :  { %2109 = vperm.xlu1 %12633, %v12711_v32  }
0x113b   :  { %2112 = vperm.xlu1 %12633, %v12713_v9  }
0x113f   :  { %2115 = vperm.xlu1 %12633, %v12715_v59  }
0x11b2   :  { %v2107_v56 = vpop.permute.xlu1 %2106 }
0x11b3   :  { %v2120_v23 = vrot.slane %v2107_v56, %v13723_v60 }
0x11b6   :  { %v2110_v27 = vpop.permute.xlu1 %2109 }
0x11b7   :  { %v2124_v33 = vrot.slane %v2110_v27, %v13726_v50 }
0x11b9   :  { %v2125_v62 = vsel %vm1549_vm5, %v2124_v33, %v2120_v23 }
0x11ba   :  { %v2113_v58 = vpop.permute.xlu1 %2112 }
0x11bb   :  { %v2129_v15 = vrot.slane %v2113_v58, %v13723_v60 }
0x11be   :  { %v2116_v35 = vpop.permute.xlu1 %2115 }
0x11bf   :  { %v2133_v38 = vrot.slane %v2116_v35, %v13726_v50 }
0x11c1   :  { %v2134_v31 = vsel %vm1549_vm5, %v2133_v38, %v2129_v15 }
0x11c2   :  { %v2135_v5 = vsel %vm1560_vm6, %v2134_v31, %v2125_v62  ;;  %v16035_v31 = vld [vmem:[#allocation31_spill] sm:$0xff] }
0x11c3   :  { %v2137_v61 = vsel %vm1563_vm7, %v2135_v5, 0.0  ;;  %v16036_v5 = vld [vmem:[#allocation17_spill] sm:$0xff] }
0x11c4   :  { %2138 = vadd.xlane.f32.xlu1 %v2137_v61  ;;  %v16037_v61 = vld [vmem:[#allocation33_spill] sm:$0xff] }
0x1251   :  { %v2139_v4 = vpop.xlane.xlu1 %2138 }
0x1252   :  { %12716 = vrcp.f32 %v2139_v4  ;;  %v16038_v4 = vld [vmem:[#allocation18_spill] sm:$0xff] }
0x125c   :  { %v12717_v11 = vpop.eup %12716 }
0x125d   :  { %v2149_v54 = vrot.slane %v12717_v11, %v13633_v26  ;;  %v2145_v56 = vrot.slane %v12717_v11, %v13627_v21  ;;  %v16039_v11 = vld [vmem:[#allocation35_spill] sm:$0xff] }
0x125f   :  { %v2154_v7 = vmul.f32 %v12713_v9, %v2149_v54  ;;  %v2155_v14 = vmul.f32 %v12715_v59, %v2149_v54  ;;  %v2152_v27 = vmul.f32 %v12709_v6, %v2145_v56  ;;  %v2153_v58 = vmul.f32 %v12711_v32, %v2145_v56  ;;  %v16040_v54 = vld [vmem:[#allocation19_spill] sm:$0xff]  ;;  %v16043_v56 = vld [vmem:[#allocation37_spill] sm:$0xff] }
0x1261   :  { %2248 = vperm.xlu0 %12632, %v2154_v7   ;;  %v16041_v7 = vld [vmem:[#allocation36_spill] sm:$0xff] }
0x1265   :  { %2251 = vperm.xlu0 %12632, %v2155_v14   ;;  %v16042_v14 = vld [vmem:[#allocation20_spill] sm:$0xff] }
0x1269   :  { %2159 = vperm.xlu0 %12632, %v2152_v27   ;;  %v16044_v27 = vld [vmem:[#allocation21_spill] sm:$0xff] }
0x126d   :  { %2162 = vperm.xlu0 %12632, %v2153_v58   ;;  %v16045_v58 = vld [vmem:[#allocation38_spill] sm:$0xff] }
0x12e0   :  { %v2249_v33 = vpop.permute.xlu0 %2248 }
0x12e1   :  { %v2256_v23 = vrot.slane %v2249_v33, %v13723_v60  ;;  %v16046_v33 = vld [vmem:[#allocation22_spill] sm:$0xff] }
0x12e4   :  { %v2252_v35 = vpop.permute.xlu0 %2251 }
0x12e5   :  { %v2260_v15 = vrot.slane %v2252_v35, %v13726_v50  ;;  %v16047_v35 = vld [vmem:[#allocation39_spill] sm:$0xff] }
0x12e7   :  { %v2261_v38 = vsel %vm1549_vm5, %v2260_v15, %v2256_v23  ;;  %v16048_v23 = vld [vmem:[#allocation23_spill] sm:$0xff]  ;;  %v16049_v15 = vld [vmem:[#allocation40_spill] sm:$0xff] }
0x12e8   :  { %10122 = vmatmul.mubr.msk.f32.vlgmr.msra.gmra.mrb[20].mxu0 %vm86_vm0, %v2261_v38  ;;  %v2160_v9 = vpop.permute.xlu0 %2159  ;;  %v16050_v38 = vld [vmem:[#allocation24_spill] sm:$0xff] }
0x12e9   :  { %10726 = vmatpush1.bf16.msra.mxu0 %v13471_v42  ;;  %v2167_v6 = vrot.slane %v2160_v9, %v13723_v60  ;;  %v16051_v9 = vld [vmem:[#allocation41_spill] sm:$0xff] }
0x12ea   :  { %10728 = vmatprep.subr.bf16.mxu0 %v13473_v44 }
0x12ec   :  { %v2163_v59 = vpop.permute.xlu0 %2162 }
0x12ed   :  { %v2171_v32 = vrot.slane %v2163_v59, %v13726_v50  ;;  %10730 = vmatpush1.bf16.msra.mxu0 %v13478_v53  ;;  %v16052_v59 = vld [vmem:[#allocation26_spill] sm:$0xff] }
0x12ee   :  { %10732 = vmatprep.subr.bf16.mxu0 %v13481_v55 }
0x12ef   :  { %v2172_v62 = vsel %vm1549_vm5, %v2171_v32, %v2167_v6  ;;  %v16053_v6 = vld [vmem:[#allocation42_spill] sm:$0xff]  ;;  %v16054_v32 = vld [vmem:[#allocation28_spill] sm:$0xff] }
0x12f0   :  { %10115 = vmatmul.mubr.msk.f32.vlgmr.msra.gmra.mrb[16].mxu1 %vm86_vm0, %v2172_v62  ;;  %v16055_v62 = vmov 0.0|0.0  }
0x12f1   :  { %10662 = vmatpush1.bf16.msra.mxu1 %v13398_v12  ;;  %10734 = vmatpush1.bf16.msra.mxu0 %v13486_v3 }
0x12f2   :  { %10664 = vmatprep.subr.bf16.mxu1 %v13400_v13  ;;  %10736 = vmatprep.subr.bf16.mxu0 %v13489_v8 }
0x12f5   :  { %10666 = vmatpush1.bf16.msra.mxu1 %v13404_v10  ;;  %10738 = vmatpush1.bf16.msra.mxu0 %v13492_v18 }
0x12f6   :  { %10668 = vmatprep.subr.bf16.mxu1 %v13407_v17  ;;  %10740 = vmatprep.subr.bf16.mxu0 %v13495_v19 }
0x12f9   :  { %10670 = vmatpush1.bf16.msra.mxu1 %v13412_v24  ;;  %10742 = vmatpush1.bf16.msra.mxu0 %v13498_v36 }
0x12fa   :  { %10672 = vmatprep.subr.bf16.mxu1 %v13416_v25  ;;  %10744 = vmatprep.subr.bf16.mxu0 %v13501_v37 }
0x12fd   :  { %10674 = vmatpush1.bf16.msra.mxu1 %v13419_v30  ;;  %10746 = vmatpush1.bf16.msra.mxu0 %v13504_v47 }
0x12fe   :  { %10676 = vmatprep.subr.bf16.mxu1 %v13422_v34  ;;  %10748 = vmatprep.subr.bf16.mxu0 %v13507_v48 }
0x1301   :  { %10678 = vmatpush1.bf16.msra.mxu1 %v13425_v40  ;;  %10750 = vmatpush1.bf16.msra.mxu0 %v13510_v63 }
0x1302   :  { %10680 = vmatprep.subr.bf16.mxu1 %v13428_v41  ;;  %10752 = vmatprep.subr.bf16.mxu0 %v13513_v0 }
0x1305   :  { %10682 = vmatpush1.bf16.msra.mxu1 %v13431_v45  ;;  %10754 = vmatpush1.bf16.msra.mxu0 %v13516_v16 }
0x1306   :  { %10684 = vmatprep.subr.bf16.mxu1 %v13434_v46  ;;  %10756 = vmatprep.subr.bf16.mxu0 %v13519_v20 }
0x1309   :  { %10686 = vmatpush1.bf16.msra.mxu1 %v13437_v51  ;;  %10758 = vmatpush1.bf16.msra.mxu0 %v13525_v49 }
0x130a   :  { %10688 = vmatprep.subr.bf16.mxu1 %v13440_v52  ;;  %10760 = vmatprep.subr.bf16.mxu0 %v13532_v1 }
0x130d   :  { %10690 = vmatpush1.bf16.msra.mxu1 %v15993_v43  ;;  %10762 = vmatpush1.bf16.msra.mxu0 %v15994_v57 }
0x130e   :  { %10692 = vmatprep.subr.bf16.mxu1 %v15995_v39  ;;  %10764 = vmatprep.subr.bf16.mxu0 %v15996_v28 }
0x1311   :  { %10694 = vmatpush1.bf16.msra.mxu1 %v15997_v22  ;;  %10766 = vmatpush1.bf16.msra.mxu0 %v15998_v2 }
0x1312   :  { %10696 = vmatprep.subr.bf16.mxu1 %v15999_v29  ;;  %10768 = vmatprep.subr.bf16.mxu0 %v16035_v31 }
0x1315   :  { %10698 = vmatpush1.bf16.msra.mxu1 %v16036_v5  ;;  %10770 = vmatpush1.bf16.msra.mxu0 %v16037_v61 }
0x1316   :  { %10700 = vmatprep.subr.bf16.mxu1 %v16038_v4  ;;  %10772 = vmatprep.subr.bf16.mxu0 %v16039_v11 }
0x1319   :  { %10702 = vmatpush1.bf16.msra.mxu1 %v16040_v54  ;;  %10774 = vmatpush1.bf16.msra.mxu0 %v16041_v7 }
0x131a   :  { %10704 = vmatprep.subr.bf16.mxu1 %v16042_v14  ;;  %10776 = vmatprep.subr.bf16.mxu0 %v16043_v56  ;;  %v16068_v14 = vld [vmem:[#allocation47_spill] sm:$0xff] }
0x131d   :  { %10706 = vmatpush1.bf16.msra.mxu1 %v16044_v27  ;;  %10778 = vmatpush1.bf16.msra.mxu0 %v16045_v58  ;;  %v16056_v58 = vld [vmem:[#allocation30_spill] sm:$0xff] }
0x131e   :  { %10708 = vmatprep.subr.bf16.mxu1 %v16046_v33  ;;  %10780 = vmatprep.subr.bf16.mxu0 %v16047_v35  ;;  %v16057_v33 = vld [vmem:[#allocation32_spill] sm:$0xff]  ;;  %v16058_v35 = vld [vmem:[#allocation34_spill] sm:$0xff] }
0x1321   :  { %10710 = vmatpush1.bf16.msra.mxu1 %v16048_v23  ;;  %10782 = vmatpush1.bf16.msra.mxu0 %v16049_v15 }
0x1322   :  { %10712 = vmatprep.subr.bf16.mxu1 %v16050_v38  ;;  %10784 = vmatprep.subr.bf16.mxu0 %v16051_v9 }
0x1325   :  { %10714 = vmatpush1.bf16.msra.mxu1 %v16052_v59  ;;  %10786 = vmatpush1.bf16.msra.mxu0 %v16053_v6 }
0x1326   :  { %10716 = vmatprep.subr.bf16.mxu1 %v16054_v32  ;;  %10791 = vmatprep.subr.bf16.mxu0 %v16055_v62  ;;  %v16059_v32 = vld [vmem:[#allocation25_spill] sm:$0xff] }
0x1329   :  { %10718 = vmatpush1.bf16.msra.mxu1 %v16056_v58  ;;  %v16060_v58 = vld [vmem:[#allocation52_spill] sm:$0xff] }
0x132a   :  { %10720 = vmatprep.subr.bf16.mxu1 %v16057_v33 }
0x132d   :  { %10722 = vmatpush1.bf16.msra.mxu1 %v16058_v35  ;;  %v16062_v35 = vld [vmem:[#allocation54_spill] sm:$0xff] }
0x132e   :  { %10787 = vmatprep.subr.bf16.mxu1 %v16055_v62  ;;  %v16067_v62 = vld [vmem:[#allocation44_spill] sm:$0xff] }
0x13bb   :  { %v2330_v15 = vpop.f32.mrb[20].mxu0 }
0x13bc   :  { %v10123_v38 = vpop.f32.mrb[21].mxu0  ;;  %v2336_v23 = vrot.slane %v2330_v15, 7 }
0x13bd   :  { %v16063_v38 = vmov 0.0  }
0x13c3   :  { %v2241_v9 = vpop.f32.mrb[16].mxu1 }
0x13c4   :  { %v10116_v27 = vpop.f32.mrb[17].mxu1  ;;  %v2337_v59 = vsel %vm1560_vm6, %v2336_v23, %v2241_v9  ;;  %v16065_v23 = vld [vmem:[#allocation12_spill] sm:$0xff] }
0x13c5   :  { %2403 = vmatprep.mubr.f32.mxu1 %v2337_v59  ;;  %2474 = vmatprep.mubr.f32.mxu0 %v2337_v59  ;;  %v16064_v27 = vld [vmem:[#allocation11_spill] sm:$0xff] }
0x13c6   :  { %2404 = vmatmul.mubr.f32.vlgmr.msra.gmra.mrb[18].mxu1 %v16059_v32  ;;  %2475 = vmatmul.mubr.f32.vlgmr.msra.gmra.mrb[22].mxu0 %v16059_v32  ;;  %v16066_v59 = vld [vmem:[#allocation43_spill] sm:$0xff] }
0x13c7   :  { %10790 = vmatpush3.bf16.msk.msra.mxu1 %vm13680_vm4, %v16060_v58  ;;  %10794 = vmatpush3.bf16.msk.msra.mxu0 %vm13680_vm4, %v16062_v35 }
0x13c8   :  { %10135 = vmatprep.mubr.msk.f32.mxu0 %vm13165_vm8, %v16063_v38  ;;  %10128 = vmatprep.mubr.msk.f32.mxu1 %vm13165_vm8, %v16063_v38  ;;  %v16069_v38 = vld [vmem:[#allocation45_spill] sm:$0xff] }
0x13c9   :  { %10796 = vmatprep.subr.bf16.mxu1 %v16064_v27  ;;  %10860 = vmatprep.subr.bf16.mxu0 %v16065_v23 }
0x1499   :  { %v2405_v15 = vpop.f32.mrb[18].mxu1  ;;  %v2476_v9 = vpop.f32.mrb[22].mxu0 }
0x149a   :  { %v2406_v32 = vadd.f32 %v2405_v15, %v16066_v59  ;;  %v2407_v33 = vpop.f32.mrb[19].mxu1  ;;  %v2478_v58 = vpop.f32.mrb[23].mxu0  ;;  %v2477_v11 = vadd.f32 %v2476_v9, %v16069_v38 }
0x149b   :  { %v2408_v56 = vadd.f32 %v2407_v33, %v16067_v62  ;;  %v2479_v7 = vadd.f32 %v2478_v58, %v16068_v14 }
0x149c   :  { %v9709_v6 = vmul.f32 -1.442695, %v2406_v32 }
0x149d   :  { %v9710_v35 = vmul.f32 -1.442695, %v2408_v56  ;;  %v9711_v54 = vmul.f32 -1.442695, %v2479_v7 }
0x149e   :  { %12718 = vpow2.f32 %v9709_v6 }
0x149f   :  { %12720 = vpow2.f32 %v9710_v35  ;;  %v16070_v35 = vld [vmem:[#allocation13_spill] sm:$0xff] }
0x14a0   :  { %12722 = vpow2.f32 %v9711_v54 }
0x14a1   :  { %12724 = vtanh.f32 %v2477_v11 }
0x14a8   :  { %v12719_v27 = vpop.eup %12718 }
0x14a9   :  { %v12721_v4 = vpop.eup %12720  ;;  %v2484_v23 = vadd.f32 1.0, %v12719_v27 }
0x14aa   :  { %v2490_v61 = vadd.f32 1.0, %v12721_v4  ;;  %v12723_v15 = vpop.eup %12722  ;;  %v16073_v4 = vld [vmem:[#allocation48_spill] sm:$0xff] }
0x14ab   :  { %12726 = vrcp.f32 %v2484_v23  ;;  %v12725_v59 = vpop.eup %12724  ;;  %v2497_v6 = vadd.f32 1.0, %v12723_v15  ;;  %v16074_v15 = vld [vmem:[#allocation50_spill] sm:$0xff] }
0x14ac   :  { %12728 = vrcp.f32 %v2490_v61 }
0x14ad   :  { %12730 = vrcp.f32 %v2497_v6  ;;  %v16076_v6 = vld [vmem:[#allocation53_spill] sm:$0xff] }
0x14b5   :  { %v12727_v33 = vpop.eup %12726 }
0x14b6   :  { %v12729_v32 = vpop.eup %12728  ;;  %v2501_v56 = vmul.f32 %v12727_v33, %v12725_v59  ;;  %v16075_v33 = vld [vmem:[#allocation51_spill] sm:$0xff] }
0x14b7   :  { %v2500_v62 = vmul.f32 %v12729_v32, %v16070_v35  ;;  %v12731_v7 = vpop.eup %12730 }
0x14b9   :  { %v13971_v58 = vadd.f32 %v2501_v56, %v2500_v62 }
0x14bb   :  { %16071 = vst [vmem:[#allocation14_spill] sm:$0xff] %v13971_v58  ;;  %12732 = vtanh.f32 %v13971_v58 }
0x14c5   :  { %v12733_v27 = vpop.eup %12732 }
0x14c6   :  { %v13974_v54 = vmul.f32 %v12733_v27, %v12731_v7  ;;  %v16077_v7 = vld [vmem:[#allocation55_spill] sm:$0xff] }
0x14c8   :  { %16072 = vst [vmem:[#allocation27_spill] sm:$0xff] %v13974_v54  ;;  %v2512_v61 = vrot.slane %v13974_v54, %v16073_v4 }
0x14ca   :  { %v2520_v11 = vrot.slane %v2512_v61, %v16073_v4  ;;  %v2513_v23 = vcombine.high %v2512_v61, %v2512_v61 }
0x14cc   :  { %v2531_v9 = vrot.slane %v2520_v11, %v13627_v21  ;;  %v2527_v59 = vrot.slane %v2513_v23, %v16073_v4 }
0x14ce   :  { %v2534_v62 = vmul.f32 %v2531_v9, %v16074_v15  ;;  %v2533_v32 = vmul.f32 %v2531_v9, %v16075_v33  ;;  %v2542_v56 = vrot.slane %v2527_v59, %v13627_v21 }
0x14d0   :  { %2537 = vadd.xlane.f32.xlu0 %v2534_v62  ;;  %2535 = vadd.xlane.f32.xlu1 %v2533_v32  ;;  %v2544_v35 = vmul.f32 %v2542_v56, %v16076_v6  ;;  %v2545_v27 = vmul.f32 %v2542_v56, %v16077_v7 }
0x14d4   :  { %2546 = vadd.xlane.f32.xlu1 %v2544_v35 }
0x14d8   :  { %2548 = vadd.xlane.f32.xlu1 %v2545_v27 }
0x155d   :  { %v2536_v58 = vpop.xlane.xlu1 %2535  ;;  %v2538_v61 = vpop.xlane.xlu0 %2537 }
0x155e   :  { %2555 = vperm.xlu1 %12633, %v2536_v58  }
0x1561   :  { %v2547_v11 = vpop.xlane.xlu1 %2546 }
0x1562   :  { %2558 = vperm.xlu1 %12633, %v2538_v61  }
0x1565   :  { %v2549_v23 = vpop.xlane.xlu1 %2548 }
0x1566   :  { %2561 = vperm.xlu1 %12633, %v2547_v11   ;;  %2564 = vperm.xlu0 %12632, %v2549_v23  }
0x15dd   :  { %v2556_v15 = vpop.permute.xlu1 %2555 }
0x15de   :  { %v2569_v6 = vrot.slane %v2556_v15, %v13723_v60 }
0x15e1   :  { %v2559_v9 = vpop.permute.xlu1 %2558 }
0x15e2   :  { %v2573_v59 = vrot.slane %v2559_v9, %v13726_v50 }
0x15e4   :  { %v2574_v27 = vsel %vm1549_vm5, %v2573_v59, %v2569_v6 }
0x15e5   :  { %v2565_v62 = vpop.permute.xlu0 %2564  ;;  %v2562_v32 = vpop.permute.xlu1 %2561 }
0x15e6   :  { %v2582_v35 = vrot.slane %v2565_v62, %v13726_v50  ;;  %v2578_v56 = vrot.slane %v2562_v32, %v13723_v60 }
0x15e8   :  { %v2583_v7 = vsel %vm1549_vm5, %v2582_v35, %v2578_v56 }
0x15e9   :  { %v2584_v33 = vsel %vm1560_vm6, %v2583_v7, %v2574_v27 }
0x15ea   :  { %v2586_v4 = vsel %vm1563_vm7, %v2584_v33, -inf }
0x15eb   :  { %2587 = vmax.xlane.f32.xlu1 %v2586_v4 }
0x1678   :  { %v2588_v38 = vpop.xlane.xlu1 %2587 }
0x1679   :  { %v2593_v9 = vrot.slane %v2588_v38, %v13627_v21  ;;  %v2597_v14 = vrot.slane %v2588_v38, %v13633_v26 }
0x167b   :  { %v2600_v54 = vsub.f32 %v2536_v58, %v2593_v9  ;;  %v2601_v15 = vsub.f32 %v2538_v61, %v2593_v9  ;;  %v2602_v62 = vsub.f32 %v2547_v11, %v2597_v14  ;;  %v2603_v31 = vsub.f32 %v2549_v23, %v2597_v14 }
0x167d   :  { %v2604_v5 = vmul.f32 1.442695, %v2600_v54  ;;  %v2606_v32 = vmul.f32 1.442695, %v2601_v15  ;;  %v2608_v6 = vmul.f32 1.442695, %v2602_v62 }
0x167e   :  { %v2610_v59 = vmul.f32 1.442695, %v2603_v31 }
0x167f   :  { %12734 = vpow2.f32 %v2604_v5 }
0x1680   :  { %12736 = vpow2.f32 %v2606_v32 }
0x1681   :  { %12738 = vpow2.f32 %v2608_v6 }
0x1682   :  { %12740 = vpow2.f32 %v2610_v59 }
0x1689   :  { %v12735_v7 = vpop.eup %12734 }
0x168a   :  { %2617 = vperm.xlu0 %12632, %v12735_v7   ;;  %v12737_v4 = vpop.eup %12736 }
0x168b   :  { %v12739_v33 = vpop.eup %12738 }
0x168c   :  { %v12741_v35 = vpop.eup %12740 }
0x168e   :  { %2620 = vperm.xlu0 %12632, %v12737_v4  }
0x1692   :  { %2623 = vperm.xlu0 %12632, %v12739_v33  }
0x1696   :  { %2626 = vperm.xlu0 %12632, %v12741_v35  }
0x1709   :  { %v2618_v38 = vpop.permute.xlu0 %2617 }
0x170a   :  { %v2631_v14 = vrot.slane %v2618_v38, %v13723_v60 }
0x170d   :  { %v2621_v58 = vpop.permute.xlu0 %2620 }
0x170e   :  { %v2635_v5 = vrot.slane %v2621_v58, %v13726_v50 }
0x1710   :  { %v2636_v23 = vsel %vm1549_vm5, %v2635_v5, %v2631_v14 }
0x1711   :  { %v2624_v54 = vpop.permute.xlu0 %2623 }
0x1712   :  { %v2640_v11 = vrot.slane %v2624_v54, %v13723_v60 }
0x1715   :  { %v2627_v61 = vpop.permute.xlu0 %2626 }
0x1716   :  { %v2644_v31 = vrot.slane %v2627_v61, %v13726_v50 }
0x1718   :  { %v2645_v56 = vsel %vm1549_vm5, %v2644_v31, %v2640_v11 }
0x1719   :  { %v2646_v27 = vsel %vm1560_vm6, %v2645_v56, %v2636_v23  ;;  %v16078_v56 = vld [vmem:[#allocation31_spill] sm:$0xff] }
0x171a   :  { %v2648_v9 = vsel %vm1563_vm7, %v2646_v27, 0.0  ;;  %v16079_v27 = vld [vmem:[#allocation17_spill] sm:$0xff] }
0x171b   :  { %2649 = vadd.xlane.f32.xlu0 %v2648_v9  ;;  %v16080_v9 = vld [vmem:[#allocation33_spill] sm:$0xff] }
0x17a8   :  { %v2650_v15 = vpop.xlane.xlu0 %2649 }
0x17a9   :  { %12742 = vrcp.f32 %v2650_v15  ;;  %v16081_v15 = vld [vmem:[#allocation18_spill] sm:$0xff] }
0x17b3   :  { %v12743_v62 = vpop.eup %12742 }
0x17b4   :  { %v2660_v32 = vrot.slane %v12743_v62, %v13633_v26  ;;  %v2656_v38 = vrot.slane %v12743_v62, %v13627_v21  ;;  %v16082_v62 = vld [vmem:[#allocation35_spill] sm:$0xff] }
0x17b6   :  { %v2665_v6 = vmul.f32 %v12739_v33, %v2660_v32  ;;  %v2666_v59 = vmul.f32 %v12741_v35, %v2660_v32  ;;  %v2663_v58 = vmul.f32 %v12735_v7, %v2656_v38  ;;  %v2664_v54 = vmul.f32 %v12737_v4, %v2656_v38  ;;  %v16083_v32 = vld [vmem:[#allocation19_spill] sm:$0xff]  ;;  %v16086_v38 = vld [vmem:[#allocation37_spill] sm:$0xff] }
0x17b8   :  { %2759 = vperm.xlu1 %12633, %v2665_v6   ;;  %v16084_v6 = vld [vmem:[#allocation36_spill] sm:$0xff] }
0x17bc   :  { %2762 = vperm.xlu1 %12633, %v2666_v59   ;;  %v16085_v59 = vld [vmem:[#allocation20_spill] sm:$0xff] }
0x17c0   :  { %2670 = vperm.xlu1 %12633, %v2663_v58   ;;  %v16087_v58 = vld [vmem:[#allocation21_spill] sm:$0xff] }
0x17c4   :  { %2673 = vperm.xlu1 %12633, %v2664_v54   ;;  %v16088_v54 = vld [vmem:[#allocation38_spill] sm:$0xff] }
0x1837   :  { %v2760_v5 = vpop.permute.xlu1 %2759 }
0x1838   :  { %v2767_v14 = vrot.slane %v2760_v5, %v13723_v60  ;;  %v16089_v5 = vld [vmem:[#allocation22_spill] sm:$0xff] }
0x183b   :  { %v2763_v61 = vpop.permute.xlu1 %2762 }
0x183c   :  { %v2771_v11 = vrot.slane %v2763_v61, %v13726_v50  ;;  %v16090_v61 = vld [vmem:[#allocation39_spill] sm:$0xff] }
0x183e   :  { %v2772_v31 = vsel %vm1549_vm5, %v2771_v11, %v2767_v14  ;;  %v16091_v14 = vld [vmem:[#allocation23_spill] sm:$0xff]  ;;  %v16092_v11 = vld [vmem:[#allocation40_spill] sm:$0xff] }
0x183f   :  { %10136 = vmatmul.mubr.msk.f32.vlgmr.msra.gmra.mrb[24].mxu0 %vm86_vm0, %v2772_v31  ;;  %v2671_v33 = vpop.permute.xlu1 %2670  ;;  %v16093_v31 = vld [vmem:[#allocation24_spill] sm:$0xff] }
0x1840   :  { %10862 = vmatpush1.bf16.msra.mxu0 %v13471_v42  ;;  %v2678_v7 = vrot.slane %v2671_v33, %v13723_v60  ;;  %v16094_v33 = vld [vmem:[#allocation41_spill] sm:$0xff] }
0x1841   :  { %10864 = vmatprep.subr.bf16.mxu0 %v13473_v44 }
0x1843   :  { %v2674_v35 = vpop.permute.xlu1 %2673 }
0x1844   :  { %v2682_v4 = vrot.slane %v2674_v35, %v13726_v50  ;;  %10866 = vmatpush1.bf16.msra.mxu0 %v13478_v53  ;;  %v16095_v35 = vld [vmem:[#allocation26_spill] sm:$0xff] }
0x1845   :  { %10868 = vmatprep.subr.bf16.mxu0 %v13481_v55 }
0x1846   :  { %v2683_v23 = vsel %vm1549_vm5, %v2682_v4, %v2678_v7  ;;  %v16096_v7 = vld [vmem:[#allocation42_spill] sm:$0xff]  ;;  %v16097_v4 = vld [vmem:[#allocation28_spill] sm:$0xff] }
0x1847   :  { %10129 = vmatmul.mubr.msk.f32.vlgmr.msra.gmra.mrb[20].mxu1 %vm86_vm0, %v2683_v23  ;;  %v16098_v23 = vmov 0.0|0.0  }
0x1848   :  { %10798 = vmatpush1.bf16.msra.mxu1 %v13398_v12  ;;  %10870 = vmatpush1.bf16.msra.mxu0 %v13486_v3 }
0x1849   :  { %10800 = vmatprep.subr.bf16.mxu1 %v13400_v13  ;;  %10872 = vmatprep.subr.bf16.mxu0 %v13489_v8 }
0x184c   :  { %10802 = vmatpush1.bf16.msra.mxu1 %v13404_v10  ;;  %10874 = vmatpush1.bf16.msra.mxu0 %v13492_v18 }
0x184d   :  { %10804 = vmatprep.subr.bf16.mxu1 %v13407_v17  ;;  %10876 = vmatprep.subr.bf16.mxu0 %v13495_v19 }
0x1850   :  { %10806 = vmatpush1.bf16.msra.mxu1 %v13412_v24  ;;  %10878 = vmatpush1.bf16.msra.mxu0 %v13498_v36 }
0x1851   :  { %10808 = vmatprep.subr.bf16.mxu1 %v13416_v25  ;;  %10880 = vmatprep.subr.bf16.mxu0 %v13501_v37 }
0x1854   :  { %10810 = vmatpush1.bf16.msra.mxu1 %v13419_v30  ;;  %10882 = vmatpush1.bf16.msra.mxu0 %v13504_v47 }
0x1855   :  { %10812 = vmatprep.subr.bf16.mxu1 %v13422_v34  ;;  %10884 = vmatprep.subr.bf16.mxu0 %v13507_v48 }
0x1858   :  { %10814 = vmatpush1.bf16.msra.mxu1 %v13425_v40  ;;  %10886 = vmatpush1.bf16.msra.mxu0 %v13510_v63 }
0x1859   :  { %10816 = vmatprep.subr.bf16.mxu1 %v13428_v41  ;;  %10888 = vmatprep.subr.bf16.mxu0 %v13513_v0 }
0x185c   :  { %10818 = vmatpush1.bf16.msra.mxu1 %v13431_v45  ;;  %10890 = vmatpush1.bf16.msra.mxu0 %v13516_v16 }
0x185d   :  { %10820 = vmatprep.subr.bf16.mxu1 %v13434_v46  ;;  %10892 = vmatprep.subr.bf16.mxu0 %v13519_v20 }
0x1860   :  { %10822 = vmatpush1.bf16.msra.mxu1 %v13437_v51  ;;  %10894 = vmatpush1.bf16.msra.mxu0 %v13525_v49 }
0x1861   :  { %10824 = vmatprep.subr.bf16.mxu1 %v13440_v52  ;;  %10896 = vmatprep.subr.bf16.mxu0 %v13532_v1 }
0x1864   :  { %10826 = vmatpush1.bf16.msra.mxu1 %v15993_v43  ;;  %10898 = vmatpush1.bf16.msra.mxu0 %v15994_v57 }
0x1865   :  { %10828 = vmatprep.subr.bf16.mxu1 %v15995_v39  ;;  %10900 = vmatprep.subr.bf16.mxu0 %v15996_v28 }
0x1868   :  { %10830 = vmatpush1.bf16.msra.mxu1 %v15997_v22  ;;  %10902 = vmatpush1.bf16.msra.mxu0 %v15998_v2 }
0x1869   :  { %10832 = vmatprep.subr.bf16.mxu1 %v15999_v29  ;;  %10904 = vmatprep.subr.bf16.mxu0 %v16078_v56 }
0x186c   :  { %10834 = vmatpush1.bf16.msra.mxu1 %v16079_v27  ;;  %10906 = vmatpush1.bf16.msra.mxu0 %v16080_v9 }
0x186d   :  { %10836 = vmatprep.subr.bf16.mxu1 %v16081_v15  ;;  %10908 = vmatprep.subr.bf16.mxu0 %v16082_v62 }
0x1870   :  { %10838 = vmatpush1.bf16.msra.mxu1 %v16083_v32  ;;  %10910 = vmatpush1.bf16.msra.mxu0 %v16084_v6 }
0x1871   :  { %10840 = vmatprep.subr.bf16.mxu1 %v16085_v59  ;;  %10912 = vmatprep.subr.bf16.mxu0 %v16086_v38  ;;  %v16111_v59 = vld [vmem:[#allocation47_spill] sm:$0xff] }
0x1874   :  { %10842 = vmatpush1.bf16.msra.mxu1 %v16087_v58  ;;  %10914 = vmatpush1.bf16.msra.mxu0 %v16088_v54  ;;  %v16099_v54 = vld [vmem:[#allocation30_spill] sm:$0xff] }
0x1875   :  { %10844 = vmatprep.subr.bf16.mxu1 %v16089_v5  ;;  %10916 = vmatprep.subr.bf16.mxu0 %v16090_v61  ;;  %v16100_v5 = vld [vmem:[#allocation32_spill] sm:$0xff]  ;;  %v16101_v61 = vld [vmem:[#allocation34_spill] sm:$0xff] }
0x1878   :  { %10846 = vmatpush1.bf16.msra.mxu1 %v16091_v14  ;;  %10918 = vmatpush1.bf16.msra.mxu0 %v16092_v11 }
0x1879   :  { %10848 = vmatprep.subr.bf16.mxu1 %v16093_v31  ;;  %10920 = vmatprep.subr.bf16.mxu0 %v16094_v33 }
0x187c   :  { %10850 = vmatpush1.bf16.msra.mxu1 %v16095_v35  ;;  %10922 = vmatpush1.bf16.msra.mxu0 %v16096_v7 }
0x187d   :  { %10852 = vmatprep.subr.bf16.mxu1 %v16097_v4  ;;  %10927 = vmatprep.subr.bf16.mxu0 %v16098_v23  ;;  %v16102_v4 = vld [vmem:[#allocation27_spill] sm:$0xff] }
0x1880   :  { %10854 = vmatpush1.bf16.msra.mxu1 %v16099_v54  ;;  %v16103_v54 = vld [vmem:[#allocation52_spill] sm:$0xff] }
0x1881   :  { %10856 = vmatprep.subr.bf16.mxu1 %v16100_v5 }
0x1884   :  { %10858 = vmatpush1.bf16.msra.mxu1 %v16101_v61  ;;  %v16105_v61 = vld [vmem:[#allocation54_spill] sm:$0xff] }
0x1885   :  { %10923 = vmatprep.subr.bf16.mxu1 %v16098_v23  ;;  %v16110_v23 = vld [vmem:[#allocation44_spill] sm:$0xff] }
0x1912   :  { %v2841_v11 = vpop.f32.mrb[24].mxu0 }
0x1913   :  { %v10137_v31 = vpop.f32.mrb[25].mxu0  ;;  %v2847_v14 = vrot.slane %v2841_v11, 7 }
0x1914   :  { %v16106_v31 = vmov 0.0  }
0x191a   :  { %v2752_v33 = vpop.f32.mrb[20].mxu1 }
0x191b   :  { %v10130_v58 = vpop.f32.mrb[21].mxu1  ;;  %v2848_v35 = vsel %vm1560_vm6, %v2847_v14, %v2752_v33  ;;  %v16108_v14 = vld [vmem:[#allocation12_spill] sm:$0xff] }
0x191c   :  { %2914 = vmatprep.mubr.f32.mxu1 %v2848_v35  ;;  %2985 = vmatprep.mubr.f32.mxu0 %v2848_v35  ;;  %v16107_v58 = vld [vmem:[#allocation11_spill] sm:$0xff] }
0x191d   :  { %2915 = vmatmul.mubr.f32.vlgmr.msra.gmra.mrb[22].mxu1 %v16102_v4  ;;  %2986 = vmatmul.mubr.f32.vlgmr.msra.gmra.mrb[26].mxu0 %v16102_v4  ;;  %v16109_v35 = vld [vmem:[#allocation43_spill] sm:$0xff] }
0x191e   :  { %10926 = vmatpush3.bf16.msk.msra.mxu1 %vm13680_vm4, %v16103_v54  ;;  %10930 = vmatpush3.bf16.msk.msra.mxu0 %vm13680_vm4, %v16105_v61 }
0x191f   :  { %10149 = vmatprep.mubr.msk.f32.mxu0 %vm13165_vm8, %v16106_v31  ;;  %10142 = vmatprep.mubr.msk.f32.mxu1 %vm13165_vm8, %v16106_v31  ;;  %v16112_v31 = vld [vmem:[#allocation45_spill] sm:$0xff] }
0x1920   :  { %10932 = vmatprep.subr.bf16.mxu1 %v16107_v58  ;;  %10996 = vmatprep.subr.bf16.mxu0 %v16108_v14 }
0x19f0   :  { %v2916_v11 = vpop.f32.mrb[22].mxu1  ;;  %v2987_v33 = vpop.f32.mrb[26].mxu0 }
0x19f1   :  { %v2917_v4 = vadd.f32 %v2916_v11, %v16109_v35  ;;  %v2918_v5 = vpop.f32.mrb[23].mxu1  ;;  %v2989_v54 = vpop.f32.mrb[27].mxu0  ;;  %v2988_v62 = vadd.f32 %v2987_v33, %v16112_v31 }
0x19f2   :  { %v2919_v38 = vadd.f32 %v2918_v5, %v16110_v23  ;;  %v2990_v6 = vadd.f32 %v2989_v54, %v16111_v59 }
0x19f3   :  { %v9718_v7 = vmul.f32 -1.442695, %v2917_v4 }
0x19f4   :  { %v9719_v61 = vmul.f32 -1.442695, %v2919_v38  ;;  %v9720_v32 = vmul.f32 -1.442695, %v2990_v6 }
0x19f5   :  { %12744 = vpow2.f32 %v9718_v7 }
0x19f6   :  { %12746 = vpow2.f32 %v9719_v61  ;;  %v16113_v61 = vld [vmem:[#allocation14_spill] sm:$0xff] }
0x19f7   :  { %12748 = vpow2.f32 %v9720_v32 }
0x19f8   :  { %12750 = vtanh.f32 %v2988_v62 }
0x19ff   :  { %v12745_v58 = vpop.eup %12744 }
0x1a00   :  { %v12747_v15 = vpop.eup %12746  ;;  %v2995_v14 = vadd.f32 1.0, %v12745_v58 }
0x1a01   :  { %v3001_v9 = vadd.f32 1.0, %v12747_v15  ;;  %v12749_v11 = vpop.eup %12748  ;;  %v16116_v15 = vld [vmem:[#allocation48_spill] sm:$0xff] }
0x1a02   :  { %12752 = vrcp.f32 %v2995_v14  ;;  %v12751_v35 = vpop.eup %12750  ;;  %v3008_v7 = vadd.f32 1.0, %v12749_v11  ;;  %v16117_v11 = vld [vmem:[#allocation50_spill] sm:$0xff] }
0x1a03   :  { %12754 = vrcp.f32 %v3001_v9 }
0x1a04   :  { %12756 = vrcp.f32 %v3008_v7  ;;  %v16119_v7 = vld [vmem:[#allocation53_spill] sm:$0xff] }
0x1a0c   :  { %v12753_v5 = vpop.eup %12752 }
0x1a0d   :  { %v12755_v4 = vpop.eup %12754  ;;  %v3012_v38 = vmul.f32 %v12753_v5, %v12751_v35  ;;  %v16118_v5 = vld [vmem:[#allocation51_spill] sm:$0xff] }
0x1a0e   :  { %v3011_v23 = vmul.f32 %v12755_v4, %v16113_v61  ;;  %v12757_v6 = vpop.eup %12756 }
0x1a10   :  { %v14098_v54 = vadd.f32 %v3012_v38, %v3011_v23 }
0x1a12   :  { %16114 = vst [vmem:[#allocation15_spill] sm:$0xff] %v14098_v54  ;;  %12758 = vtanh.f32 %v14098_v54 }
0x1a1c   :  { %v12759_v58 = vpop.eup %12758 }
0x1a1d   :  { %v14101_v32 = vmul.f32 %v12759_v58, %v12757_v6  ;;  %v16120_v6 = vld [vmem:[#allocation55_spill] sm:$0xff] }
0x1a1f   :  { %16115 = vst [vmem:[#allocation29_spill] sm:$0xff] %v14101_v32  ;;  %v3023_v9 = vrot.slane %v14101_v32, %v16116_v15 }
0x1a21   :  { %v3031_v62 = vrot.slane %v3023_v9, %v16116_v15  ;;  %v3024_v14 = vcombine.high %v3023_v9, %v3023_v9 }
0x1a23   :  { %v3042_v33 = vrot.slane %v3031_v62, %v13627_v21  ;;  %v3038_v35 = vrot.slane %v3024_v14, %v16116_v15 }
0x1a25   :  { %v3045_v23 = vmul.f32 %v3042_v33, %v16117_v11  ;;  %v3044_v4 = vmul.f32 %v3042_v33, %v16118_v5  ;;  %v3053_v38 = vrot.slane %v3038_v35, %v13627_v21 }
0x1a27   :  { %3048 = vadd.xlane.f32.xlu0 %v3045_v23  ;;  %3046 = vadd.xlane.f32.xlu1 %v3044_v4  ;;  %v3055_v61 = vmul.f32 %v3053_v38, %v16119_v7  ;;  %v3056_v58 = vmul.f32 %v3053_v38, %v16120_v6 }
0x1a2b   :  { %3057 = vadd.xlane.f32.xlu0 %v3055_v61 }
0x1a2f   :  { %3059 = vadd.xlane.f32.xlu0 %v3056_v58 }
0x1ab4   :  { %v3049_v54 = vpop.xlane.xlu0 %3048  ;;  %v3047_v9 = vpop.xlane.xlu1 %3046 }
0x1ab5   :  { %3066 = vperm.xlu0 %12632, %v3047_v9  }
0x1ab8   :  { %v3058_v62 = vpop.xlane.xlu0 %3057 }
0x1ab9   :  { %3069 = vperm.xlu0 %12632, %v3049_v54   ;;  %3072 = vperm.xlu1 %12633, %v3058_v62  }
0x1abc   :  { %v3060_v14 = vpop.xlane.xlu0 %3059 }
0x1abd   :  { %3075 = vperm.xlu0 %12632, %v3060_v14  }
0x1b34   :  { %v3067_v11 = vpop.permute.xlu0 %3066 }
0x1b35   :  { %v3080_v4 = vrot.slane %v3067_v11, %v13723_v60 }
0x1b38   :  { %v3070_v33 = vpop.permute.xlu0 %3069  ;;  %v3073_v5 = vpop.permute.xlu1 %3072 }
0x1b39   :  { %v3084_v35 = vrot.slane %v3070_v33, %v13726_v50  ;;  %v3089_v61 = vrot.slane %v3073_v5, %v13723_v60 }
0x1b3b   :  { %v3085_v58 = vsel %vm1549_vm5, %v3084_v35, %v3080_v4 }
0x1b3c   :  { %v3076_v23 = vpop.permute.xlu0 %3075 }
0x1b3d   :  { %v3093_v38 = vrot.slane %v3076_v23, %v13726_v50 }
0x1b3f   :  { %v3094_v6 = vsel %vm1549_vm5, %v3093_v38, %v3089_v61 }
0x1b40   :  { %v3095_v7 = vsel %vm1560_vm6, %v3094_v6, %v3085_v58 }
0x1b41   :  { %v3097_v15 = vsel %vm1563_vm7, %v3095_v7, -inf }
0x1b42   :  { %3098 = vmax.xlane.f32.xlu0 %v3097_v15 }
0x1bcf   :  { %v3099_v31 = vpop.xlane.xlu0 %3098 }
0x1bd0   :  { %v3104_v59 = vrot.slane %v3099_v31, %v13627_v21  ;;  %v3108_v33 = vrot.slane %v3099_v31, %v13633_v26 }
0x1bd2   :  { %v3111_v32 = vsub.f32 %v3047_v9, %v3104_v59  ;;  %v3112_v11 = vsub.f32 %v3049_v54, %v3104_v59  ;;  %v3113_v5 = vsub.f32 %v3058_v62, %v3108_v33  ;;  %v3114_v56 = vsub.f32 %v3060_v14, %v3108_v33 }
0x1bd4   :  { %v3115_v27 = vmul.f32 1.442695, %v3111_v32  ;;  %v3117_v23 = vmul.f32 1.442695, %v3112_v11  ;;  %v3119_v35 = vmul.f32 1.442695, %v3113_v5 }
0x1bd5   :  { %v3121_v4 = vmul.f32 1.442695, %v3114_v56 }
0x1bd6   :  { %12760 = vpow2.f32 %v3115_v27 }
0x1bd7   :  { %12762 = vpow2.f32 %v3117_v23 }
0x1bd8   :  { %12764 = vpow2.f32 %v3119_v35 }
0x1bd9   :  { %12766 = vpow2.f32 %v3121_v4 }
0x1be0   :  { %v12761_v6 = vpop.eup %12760 }
0x1be1   :  { %3128 = vperm.xlu1 %12633, %v12761_v6   ;;  %v12763_v15 = vpop.eup %12762 }
0x1be2   :  { %v12765_v7 = vpop.eup %12764 }
0x1be3   :  { %v12767_v61 = vpop.eup %12766 }
0x1be5   :  { %3131 = vperm.xlu1 %12633, %v12763_v15  }
0x1be9   :  { %3134 = vperm.xlu1 %12633, %v12765_v7  }
0x1bed   :  { %3137 = vperm.xlu1 %12633, %v12767_v61  }
0x1c60   :  { %v3129_v31 = vpop.permute.xlu1 %3128 }
0x1c61   :  { %v3142_v9 = vrot.slane %v3129_v31, %v13723_v60 }
0x1c64   :  { %v3132_v59 = vpop.permute.xlu1 %3131 }
0x1c65   :  { %v3146_v27 = vrot.slane %v3132_v59, %v13726_v50 }
0x1c67   :  { %v3147_v14 = vsel %vm1549_vm5, %v3146_v27, %v3142_v9 }
0x1c68   :  { %v3135_v54 = vpop.permute.xlu1 %3134 }
0x1c69   :  { %v3151_v62 = vrot.slane %v3135_v54, %v13723_v60 }
0x1c6c   :  { %v3138_v32 = vpop.permute.xlu1 %3137 }
0x1c6d   :  { %v3155_v56 = vrot.slane %v3138_v32, %v13726_v50 }
0x1c6f   :  { %v3156_v38 = vsel %vm1549_vm5, %v3155_v56, %v3151_v62 }
0x1c70   :  { %v3157_v58 = vsel %vm1560_vm6, %v3156_v38, %v3147_v14  ;;  %v16121_v38 = vld [vmem:[#allocation31_spill] sm:$0xff] }
0x1c71   :  { %v3159_v33 = vsel %vm1563_vm7, %v3157_v58, 0.0  ;;  %v16122_v58 = vld [vmem:[#allocation17_spill] sm:$0xff] }
0x1c72   :  { %3160 = vadd.xlane.f32.xlu1 %v3159_v33  ;;  %v16123_v33 = vld [vmem:[#allocation33_spill] sm:$0xff] }
0x1cff   :  { %v3161_v11 = vpop.xlane.xlu1 %3160 }
0x1d00   :  { %12768 = vrcp.f32 %v3161_v11  ;;  %v16124_v11 = vld [vmem:[#allocation18_spill] sm:$0xff] }
0x1d0a   :  { %v12769_v5 = vpop.eup %12768 }
0x1d0b   :  { %v3171_v23 = vrot.slane %v12769_v5, %v13633_v26  ;;  %v3167_v31 = vrot.slane %v12769_v5, %v13627_v21  ;;  %v16125_v5 = vld [vmem:[#allocation35_spill] sm:$0xff] }
0x1d0d   :  { %v3176_v35 = vmul.f32 %v12765_v7, %v3171_v23  ;;  %v3177_v4 = vmul.f32 %v12767_v61, %v3171_v23  ;;  %v3174_v59 = vmul.f32 %v12761_v6, %v3167_v31  ;;  %v3175_v54 = vmul.f32 %v12763_v15, %v3167_v31  ;;  %v16126_v23 = vld [vmem:[#allocation19_spill] sm:$0xff]  ;;  %v16129_v31 = vld [vmem:[#allocation37_spill] sm:$0xff] }
0x1d0f   :  { %3270 = vperm.xlu0 %12632, %v3176_v35   ;;  %v16127_v35 = vld [vmem:[#allocation36_spill] sm:$0xff] }
0x1d13   :  { %3273 = vperm.xlu0 %12632, %v3177_v4   ;;  %v16128_v4 = vld [vmem:[#allocation20_spill] sm:$0xff] }
0x1d17   :  { %3181 = vperm.xlu0 %12632, %v3174_v59   ;;  %v16130_v59 = vld [vmem:[#allocation21_spill] sm:$0xff] }
0x1d1b   :  { %3184 = vperm.xlu0 %12632, %v3175_v54   ;;  %v16131_v54 = vld [vmem:[#allocation38_spill] sm:$0xff] }
0x1d8e   :  { %v3271_v27 = vpop.permute.xlu0 %3270 }
0x1d8f   :  { %v3278_v9 = vrot.slane %v3271_v27, %v13723_v60  ;;  %v16132_v27 = vld [vmem:[#allocation22_spill] sm:$0xff] }
0x1d92   :  { %v3274_v32 = vpop.permute.xlu0 %3273 }
0x1d93   :  { %v3282_v62 = vrot.slane %v3274_v32, %v13726_v50  ;;  %v16133_v32 = vld [vmem:[#allocation39_spill] sm:$0xff] }
0x1d95   :  { %v3283_v56 = vsel %vm1549_vm5, %v3282_v62, %v3278_v9  ;;  %v16134_v9 = vld [vmem:[#allocation23_spill] sm:$0xff]  ;;  %v16135_v62 = vld [vmem:[#allocation40_spill] sm:$0xff] }
0x1d96   :  { %10150 = vmatmul.mubr.msk.f32.vlgmr.msra.gmra.mrb[28].mxu0 %vm86_vm0, %v3283_v56  ;;  %v3182_v7 = vpop.permute.xlu0 %3181  ;;  %v16136_v56 = vld [vmem:[#allocation24_spill] sm:$0xff] }
0x1d97   :  { %10998 = vmatpush1.bf16.msra.mxu0 %v13471_v42  ;;  %v3189_v6 = vrot.slane %v3182_v7, %v13723_v60  ;;  %v16137_v7 = vld [vmem:[#allocation41_spill] sm:$0xff] }
0x1d98   :  { %11000 = vmatprep.subr.bf16.mxu0 %v13473_v44 }
0x1d9a   :  { %v3185_v61 = vpop.permute.xlu0 %3184 }
0x1d9b   :  { %v3193_v15 = vrot.slane %v3185_v61, %v13726_v50  ;;  %11002 = vmatpush1.bf16.msra.mxu0 %v13478_v53  ;;  %v16138_v61 = vld [vmem:[#allocation26_spill] sm:$0xff] }
0x1d9c   :  { %11004 = vmatprep.subr.bf16.mxu0 %v13481_v55 }
0x1d9d   :  { %v3194_v14 = vsel %vm1549_vm5, %v3193_v15, %v3189_v6  ;;  %v16139_v6 = vld [vmem:[#allocation42_spill] sm:$0xff]  ;;  %v16140_v15 = vld [vmem:[#allocation28_spill] sm:$0xff] }
0x1d9e   :  { %10143 = vmatmul.mubr.msk.f32.vlgmr.msra.gmra.mrb[24].mxu1 %vm86_vm0, %v3194_v14  ;;  %v16141_v14 = vmov 0.0|0.0  }
0x1d9f   :  { %10934 = vmatpush1.bf16.msra.mxu1 %v13398_v12  ;;  %11006 = vmatpush1.bf16.msra.mxu0 %v13486_v3 }
0x1da0   :  { %10936 = vmatprep.subr.bf16.mxu1 %v13400_v13  ;;  %11008 = vmatprep.subr.bf16.mxu0 %v13489_v8 }
0x1da3   :  { %10938 = vmatpush1.bf16.msra.mxu1 %v13404_v10  ;;  %11010 = vmatpush1.bf16.msra.mxu0 %v13492_v18 }
0x1da4   :  { %10940 = vmatprep.subr.bf16.mxu1 %v13407_v17  ;;  %11012 = vmatprep.subr.bf16.mxu0 %v13495_v19 }
0x1da7   :  { %10942 = vmatpush1.bf16.msra.mxu1 %v13412_v24  ;;  %11014 = vmatpush1.bf16.msra.mxu0 %v13498_v36 }
0x1da8   :  { %10944 = vmatprep.subr.bf16.mxu1 %v13416_v25  ;;  %11016 = vmatprep.subr.bf16.mxu0 %v13501_v37 }
0x1dab   :  { %10946 = vmatpush1.bf16.msra.mxu1 %v13419_v30  ;;  %11018 = vmatpush1.bf16.msra.mxu0 %v13504_v47 }
0x1dac   :  { %10948 = vmatprep.subr.bf16.mxu1 %v13422_v34  ;;  %11020 = vmatprep.subr.bf16.mxu0 %v13507_v48 }
0x1daf   :  { %10950 = vmatpush1.bf16.msra.mxu1 %v13425_v40  ;;  %11022 = vmatpush1.bf16.msra.mxu0 %v13510_v63 }
0x1db0   :  { %10952 = vmatprep.subr.bf16.mxu1 %v13428_v41  ;;  %11024 = vmatprep.subr.bf16.mxu0 %v13513_v0 }
0x1db3   :  { %10954 = vmatpush1.bf16.msra.mxu1 %v13431_v45  ;;  %11026 = vmatpush1.bf16.msra.mxu0 %v13516_v16 }
0x1db4   :  { %10956 = vmatprep.subr.bf16.mxu1 %v13434_v46  ;;  %11028 = vmatprep.subr.bf16.mxu0 %v13519_v20 }
0x1db7   :  { %10958 = vmatpush1.bf16.msra.mxu1 %v13437_v51  ;;  %11030 = vmatpush1.bf16.msra.mxu0 %v13525_v49 }
0x1db8   :  { %10960 = vmatprep.subr.bf16.mxu1 %v13440_v52  ;;  %11032 = vmatprep.subr.bf16.mxu0 %v13532_v1 }
0x1dbb   :  { %10962 = vmatpush1.bf16.msra.mxu1 %v15993_v43  ;;  %11034 = vmatpush1.bf16.msra.mxu0 %v15994_v57 }
0x1dbc   :  { %10964 = vmatprep.subr.bf16.mxu1 %v15995_v39  ;;  %11036 = vmatprep.subr.bf16.mxu0 %v15996_v28 }
0x1dbf   :  { %10966 = vmatpush1.bf16.msra.mxu1 %v15997_v22  ;;  %11038 = vmatpush1.bf16.msra.mxu0 %v15998_v2 }
0x1dc0   :  { %10968 = vmatprep.subr.bf16.mxu1 %v15999_v29  ;;  %11040 = vmatprep.subr.bf16.mxu0 %v16121_v38 }
0x1dc3   :  { %10970 = vmatpush1.bf16.msra.mxu1 %v16122_v58  ;;  %11042 = vmatpush1.bf16.msra.mxu0 %v16123_v33 }
0x1dc4   :  { %10972 = vmatprep.subr.bf16.mxu1 %v16124_v11  ;;  %11044 = vmatprep.subr.bf16.mxu0 %v16125_v5 }
0x1dc7   :  { %10974 = vmatpush1.bf16.msra.mxu1 %v16126_v23  ;;  %11046 = vmatpush1.bf16.msra.mxu0 %v16127_v35 }
0x1dc8   :  { %10976 = vmatprep.subr.bf16.mxu1 %v16128_v4  ;;  %11048 = vmatprep.subr.bf16.mxu0 %v16129_v31  ;;  %v16154_v4 = vld [vmem:[#allocation47_spill] sm:$0xff] }
0x1dcb   :  { %10978 = vmatpush1.bf16.msra.mxu1 %v16130_v59  ;;  %11050 = vmatpush1.bf16.msra.mxu0 %v16131_v54  ;;  %v16142_v54 = vld [vmem:[#allocation30_spill] sm:$0xff] }
0x1dcc   :  { %10980 = vmatprep.subr.bf16.mxu1 %v16132_v27  ;;  %11052 = vmatprep.subr.bf16.mxu0 %v16133_v32  ;;  %v16143_v27 = vld [vmem:[#allocation32_spill] sm:$0xff]  ;;  %v16144_v32 = vld [vmem:[#allocation34_spill] sm:$0xff] }
0x1dcf   :  { %10982 = vmatpush1.bf16.msra.mxu1 %v16134_v9  ;;  %11054 = vmatpush1.bf16.msra.mxu0 %v16135_v62 }
0x1dd0   :  { %10984 = vmatprep.subr.bf16.mxu1 %v16136_v56  ;;  %11056 = vmatprep.subr.bf16.mxu0 %v16137_v7 }
0x1dd3   :  { %10986 = vmatpush1.bf16.msra.mxu1 %v16138_v61  ;;  %11058 = vmatpush1.bf16.msra.mxu0 %v16139_v6 }
0x1dd4   :  { %10988 = vmatprep.subr.bf16.mxu1 %v16140_v15  ;;  %11063 = vmatprep.subr.bf16.mxu0 %v16141_v14  ;;  %v16145_v15 = vld [vmem:[#allocation29_spill] sm:$0xff] }
0x1dd7   :  { %10990 = vmatpush1.bf16.msra.mxu1 %v16142_v54  ;;  %v16146_v54 = vld [vmem:[#allocation52_spill] sm:$0xff] }
0x1dd8   :  { %10992 = vmatprep.subr.bf16.mxu1 %v16143_v27 }
0x1ddb   :  { %10994 = vmatpush1.bf16.msra.mxu1 %v16144_v32  ;;  %v16148_v32 = vld [vmem:[#allocation54_spill] sm:$0xff] }
0x1ddc   :  { %11059 = vmatprep.subr.bf16.mxu1 %v16141_v14  ;;  %v16153_v14 = vld [vmem:[#allocation44_spill] sm:$0xff] }
0x1e69   :  { %v3352_v62 = vpop.f32.mrb[28].mxu0 }
0x1e6a   :  { %v10151_v56 = vpop.f32.mrb[29].mxu0  ;;  %v3358_v9 = vrot.slane %v3352_v62, 7 }
0x1e6b   :  { %v16149_v56 = vmov 0.0  }
0x1e71   :  { %v3263_v7 = vpop.f32.mrb[24].mxu1 }
0x1e72   :  { %v10144_v59 = vpop.f32.mrb[25].mxu1  ;;  %v3359_v61 = vsel %vm1560_vm6, %v3358_v9, %v3263_v7  ;;  %v16151_v9 = vld [vmem:[#allocation12_spill] sm:$0xff] }
0x1e73   :  { %3425 = vmatprep.mubr.f32.mxu1 %v3359_v61  ;;  %3496 = vmatprep.mubr.f32.mxu0 %v3359_v61  ;;  %v16150_v59 = vld [vmem:[#allocation11_spill] sm:$0xff] }
0x1e74   :  { %3426 = vmatmul.mubr.f32.vlgmr.msra.gmra.mrb[26].mxu1 %v16145_v15  ;;  %3497 = vmatmul.mubr.f32.vlgmr.msra.gmra.mrb[30].mxu0 %v16145_v15  ;;  %v16152_v61 = vld [vmem:[#allocation43_spill] sm:$0xff] }
0x1e75   :  { %11062 = vmatpush3.bf16.msk.msra.mxu1 %vm13680_vm4, %v16146_v54  ;;  %11066 = vmatpush3.bf16.msk.msra.mxu0 %vm13680_vm4, %v16148_v32 }
0x1e76   :  { %10163 = vmatprep.mubr.msk.f32.mxu0 %vm13165_vm8, %v16149_v56  ;;  %10156 = vmatprep.mubr.msk.f32.mxu1 %vm13165_vm8, %v16149_v56  ;;  %v16155_v56 = vld [vmem:[#allocation45_spill] sm:$0xff] }
0x1e77   :  { %11068 = vmatprep.subr.bf16.mxu1 %v16150_v59  ;;  %11132 = vmatprep.subr.bf16.mxu0 %v16151_v9 }
0x1f47   :  { %v3427_v62 = vpop.f32.mrb[26].mxu1  ;;  %v3498_v7 = vpop.f32.mrb[30].mxu0 }
0x1f48   :  { %v3428_v15 = vadd.f32 %v3427_v62, %v16152_v61  ;;  %v3429_v27 = vpop.f32.mrb[27].mxu1  ;;  %v3500_v54 = vpop.f32.mrb[31].mxu0  ;;  %v3499_v5 = vadd.f32 %v3498_v7, %v16155_v56 }
0x1f49   :  { %v3430_v31 = vadd.f32 %v3429_v27, %v16153_v14  ;;  %v3501_v35 = vadd.f32 %v3500_v54, %v16154_v4 }
0x1f4a   :  { %v9727_v6 = vmul.f32 -1.442695, %v3428_v15 }
0x1f4b   :  { %v9728_v32 = vmul.f32 -1.442695, %v3430_v31  ;;  %v9729_v23 = vmul.f32 -1.442695, %v3501_v35 }
0x1f4c   :  { %12770 = vpow2.f32 %v9727_v6 }
0x1f4d   :  { %12772 = vpow2.f32 %v9728_v32  ;;  %v16156_v32 = vld [vmem:[#allocation15_spill] sm:$0xff] }
0x1f4e   :  { %12774 = vpow2.f32 %v9729_v23 }
0x1f4f   :  { %12776 = vtanh.f32 %v3499_v5 }
0x1f56   :  { %v12771_v59 = vpop.eup %12770 }
0x1f57   :  { %v12773_v11 = vpop.eup %12772  ;;  %v3506_v9 = vadd.f32 1.0, %v12771_v59 }
0x1f58   :  { %v3512_v33 = vadd.f32 1.0, %v12773_v11  ;;  %v12775_v62 = vpop.eup %12774  ;;  %v16159_v11 = vld [vmem:[#allocation48_spill] sm:$0xff] }
0x1f59   :  { %12778 = vrcp.f32 %v3506_v9  ;;  %v12777_v61 = vpop.eup %12776  ;;  %v3519_v6 = vadd.f32 1.0, %v12775_v62  ;;  %v16160_v62 = vld [vmem:[#allocation50_spill] sm:$0xff] }
0x1f5a   :  { %12780 = vrcp.f32 %v3512_v33 }
0x1f5b   :  { %12782 = vrcp.f32 %v3519_v6  ;;  %v16162_v6 = vld [vmem:[#allocation53_spill] sm:$0xff] }
0x1f63   :  { %v12779_v27 = vpop.eup %12778 }
0x1f64   :  { %v12781_v15 = vpop.eup %12780  ;;  %v3523_v31 = vmul.f32 %v12779_v27, %v12777_v61  ;;  %v16161_v27 = vld [vmem:[#allocation51_spill] sm:$0xff] }
0x1f65   :  { %v3522_v14 = vmul.f32 %v12781_v15, %v16156_v32  ;;  %v12783_v35 = vpop.eup %12782 }
0x1f67   :  { %v14225_v54 = vadd.f32 %v3523_v31, %v3522_v14 }
0x1f69   :  { %16157 = vst [vmem:[#allocation16_spill] sm:$0xff] %v14225_v54  ;;  %12784 = vtanh.f32 %v14225_v54 }
0x1f73   :  { %v12785_v59 = vpop.eup %12784 }
0x1f74   :  { %v14228_v23 = vmul.f32 %v12785_v59, %v12783_v35  ;;  %v16163_v35 = vld [vmem:[#allocation55_spill] sm:$0xff] }
0x1f76   :  { %16158 = vst [vmem:[#allocation46_spill] sm:$0xff] %v14228_v23  ;;  %v3534_v33 = vrot.slane %v14228_v23, %v16159_v11 }
0x1f78   :  { %v3542_v5 = vrot.slane %v3534_v33, %v16159_v11  ;;  %v3535_v9 = vcombine.high %v3534_v33, %v3534_v33 }
0x1f7a   :  { %v3553_v7 = vrot.slane %v3542_v5, %v13627_v21  ;;  %v3549_v61 = vrot.slane %v3535_v9, %v16159_v11 }
0x1f7c   :  { %v3556_v14 = vmul.f32 %v3553_v7, %v16160_v62  ;;  %v3555_v15 = vmul.f32 %v3553_v7, %v16161_v27  ;;  %v3564_v31 = vrot.slane %v3549_v61, %v13627_v21 }
0x1f7e   :  { %3559 = vadd.xlane.f32.xlu0 %v3556_v14  ;;  %3557 = vadd.xlane.f32.xlu1 %v3555_v15  ;;  %v3566_v32 = vmul.f32 %v3564_v31, %v16162_v6  ;;  %v3567_v59 = vmul.f32 %v3564_v31, %v16163_v35 }
0x1f82   :  { %3568 = vadd.xlane.f32.xlu1 %v3566_v32 }
0x1f86   :  { %3570 = vadd.xlane.f32.xlu1 %v3567_v59 }
0x200b   :  { %v3558_v54 = vpop.xlane.xlu1 %3557  ;;  %v3560_v33 = vpop.xlane.xlu0 %3559 }
0x200c   :  { %3577 = vperm.xlu1 %12633, %v3558_v54  }
0x200f   :  { %v3569_v5 = vpop.xlane.xlu1 %3568 }
0x2010   :  { %3580 = vperm.xlu1 %12633, %v3560_v33  }
0x2013   :  { %v3571_v9 = vpop.xlane.xlu1 %3570 }
0x2014   :  { %3583 = vperm.xlu1 %12633, %v3569_v5   ;;  %3586 = vperm.xlu0 %12632, %v3571_v9  }
0x208b   :  { %v3578_v62 = vpop.permute.xlu1 %3577 }
0x208c   :  { %v3591_v6 = vrot.slane %v3578_v62, %v13723_v60 }
0x208f   :  { %v3581_v7 = vpop.permute.xlu1 %3580 }
0x2090   :  { %v3595_v61 = vrot.slane %v3581_v7, %v13726_v50 }
0x2092   :  { %v3596_v59 = vsel %vm1549_vm5, %v3595_v61, %v3591_v6 }
0x2093   :  { %v3587_v14 = vpop.permute.xlu0 %3586  ;;  %v3584_v15 = vpop.permute.xlu1 %3583 }
0x2094   :  { %v3604_v32 = vrot.slane %v3587_v14, %v13726_v50  ;;  %v3600_v31 = vrot.slane %v3584_v15, %v13723_v60 }
0x2096   :  { %v3605_v35 = vsel %vm1549_vm5, %v3604_v32, %v3600_v31 }
0x2097   :  { %v3606_v27 = vsel %vm1560_vm6, %v3605_v35, %v3596_v59 }
0x2098   :  { %v3608_v11 = vsel %vm1563_vm7, %v3606_v27, -inf }
0x2099   :  { %3609 = vmax.xlane.f32.xlu1 %v3608_v11 }
0x2126   :  { %v3610_v56 = vpop.xlane.xlu1 %3609 }
0x2127   :  { %v3615_v7 = vrot.slane %v3610_v56, %v13627_v21  ;;  %v3619_v4 = vrot.slane %v3610_v56, %v13633_v26 }
0x2129   :  { %v3622_v23 = vsub.f32 %v3558_v54, %v3615_v7  ;;  %v3623_v62 = vsub.f32 %v3560_v33, %v3615_v7  ;;  %v3624_v14 = vsub.f32 %v3569_v5, %v3619_v4  ;;  %v3625_v38 = vsub.f32 %v3571_v9, %v3619_v4 }
0x212b   :  { %v3626_v58 = vmul.f32 1.442695, %v3622_v23  ;;  %v3628_v15 = vmul.f32 1.442695, %v3623_v62  ;;  %v3630_v6 = vmul.f32 1.442695, %v3624_v14 }
0x212c   :  { %v3632_v61 = vmul.f32 1.442695, %v3625_v38 }
0x212d   :  { %12786 = vpow2.f32 %v3626_v58 }
0x212e   :  { %12788 = vpow2.f32 %v3628_v15 }
0x212f   :  { %12790 = vpow2.f32 %v3630_v6 }
0x2130   :  { %12792 = vpow2.f32 %v3632_v61 }
0x2137   :  { %v12787_v35 = vpop.eup %12786 }
0x2138   :  { %3639 = vperm.xlu0 %12632, %v12787_v35   ;;  %v12789_v11 = vpop.eup %12788 }
0x2139   :  { %v12791_v27 = vpop.eup %12790 }
0x213a   :  { %v12793_v32 = vpop.eup %12792 }
0x213c   :  { %3642 = vperm.xlu0 %12632, %v12789_v11  }
0x2140   :  { %3645 = vperm.xlu0 %12632, %v12791_v27  }
0x2144   :  { %3648 = vperm.xlu0 %12632, %v12793_v32  }
0x21b7   :  { %v3640_v56 = vpop.permute.xlu0 %3639 }
0x21b8   :  { %v3653_v4 = vrot.slane %v3640_v56, %v13723_v60 }
0x21bb   :  { %v3643_v54 = vpop.permute.xlu0 %3642 }
0x21bc   :  { %v3657_v58 = vrot.slane %v3643_v54, %v13726_v50 }
0x21be   :  { %v3658_v9 = vsel %vm1549_vm5, %v3657_v58, %v3653_v4 }
0x21bf   :  { %v3646_v23 = vpop.permute.xlu0 %3645 }
0x21c0   :  { %v3662_v5 = vrot.slane %v3646_v23, %v13723_v60 }
0x21c3   :  { %v3649_v33 = vpop.permute.xlu0 %3648 }
0x21c4   :  { %v3666_v38 = vrot.slane %v3649_v33, %v13726_v50 }
0x21c6   :  { %v3667_v31 = vsel %vm1549_vm5, %v3666_v38, %v3662_v5 }
0x21c7   :  { %v3668_v59 = vsel %vm1560_vm6, %v3667_v31, %v3658_v9  ;;  %v16164_v31 = vld [vmem:[#allocation31_spill] sm:$0xff] }
0x21c8   :  { %v3670_v7 = vsel %vm1563_vm7, %v3668_v59, 0.0  ;;  %v16165_v59 = vld [vmem:[#allocation17_spill] sm:$0xff] }
0x21c9   :  { %3671 = vadd.xlane.f32.xlu0 %v3670_v7  ;;  %v16166_v7 = vld [vmem:[#allocation33_spill] sm:$0xff] }
0x2256   :  { %v3672_v62 = vpop.xlane.xlu0 %3671 }
0x2257   :  { %12794 = vrcp.f32 %v3672_v62  ;;  %v16167_v62 = vld [vmem:[#allocation18_spill] sm:$0xff] }
0x2261   :  { %v12795_v14 = vpop.eup %12794 }
0x2262   :  { %v3682_v15 = vrot.slane %v12795_v14, %v13633_v26  ;;  %v3678_v56 = vrot.slane %v12795_v14, %v13627_v21  ;;  %v16168_v14 = vld [vmem:[#allocation35_spill] sm:$0xff] }
0x2264   :  { %v3687_v6 = vmul.f32 %v12791_v27, %v3682_v15  ;;  %v3688_v61 = vmul.f32 %v12793_v32, %v3682_v15  ;;  %v3685_v54 = vmul.f32 %v12787_v35, %v3678_v56  ;;  %v3686_v23 = vmul.f32 %v12789_v11, %v3678_v56  ;;  %v16169_v15 = vld [vmem:[#allocation19_spill] sm:$0xff]  ;;  %v16172_v56 = vld [vmem:[#allocation37_spill] sm:$0xff] }
0x2266   :  { %3781 = vperm.xlu1 %12633, %v3687_v6   ;;  %v16170_v6 = vld [vmem:[#allocation36_spill] sm:$0xff] }
0x226a   :  { %3784 = vperm.xlu1 %12633, %v3688_v61   ;;  %v16171_v61 = vld [vmem:[#allocation20_spill] sm:$0xff] }
0x226e   :  { %3692 = vperm.xlu1 %12633, %v3685_v54   ;;  %v16173_v54 = vld [vmem:[#allocation21_spill] sm:$0xff] }
0x2272   :  { %3695 = vperm.xlu1 %12633, %v3686_v23   ;;  %v16174_v23 = vld [vmem:[#allocation38_spill] sm:$0xff] }
0x22e5   :  { %v3782_v58 = vpop.permute.xlu1 %3781 }
0x22e6   :  { %v3789_v4 = vrot.slane %v3782_v58, %v13723_v60  ;;  %v16175_v58 = vld [vmem:[#allocation22_spill] sm:$0xff] }
0x22e9   :  { %v3785_v33 = vpop.permute.xlu1 %3784 }
0x22ea   :  { %v3793_v5 = vrot.slane %v3785_v33, %v13726_v50  ;;  %v16176_v33 = vld [vmem:[#allocation39_spill] sm:$0xff] }
0x22ec   :  { %v3794_v38 = vsel %vm1549_vm5, %v3793_v5, %v3789_v4  ;;  %v16177_v4 = vld [vmem:[#allocation23_spill] sm:$0xff]  ;;  %v16178_v5 = vld [vmem:[#allocation40_spill] sm:$0xff] }
0x22ed   :  { %10164 = vmatmul.mubr.msk.f32.vlgmr.msra.gmra.mrb[32].mxu0 %vm86_vm0, %v3794_v38  ;;  %v3693_v27 = vpop.permute.xlu1 %3692  ;;  %v16179_v38 = vld [vmem:[#allocation24_spill] sm:$0xff] }
0x22ee   :  { %11134 = vmatpush1.bf16.msra.mxu0 %v13471_v42  ;;  %v3700_v35 = vrot.slane %v3693_v27, %v13723_v60  ;;  %v16180_v27 = vld [vmem:[#allocation41_spill] sm:$0xff] }
0x22ef   :  { %11136 = vmatprep.subr.bf16.mxu0 %v13473_v44 }
0x22f1   :  { %v3696_v32 = vpop.permute.xlu1 %3695 }
0x22f2   :  { %v3704_v11 = vrot.slane %v3696_v32, %v13726_v50  ;;  %11138 = vmatpush1.bf16.msra.mxu0 %v13478_v53  ;;  %v16181_v32 = vld [vmem:[#allocation26_spill] sm:$0xff] }
0x22f3   :  { %11140 = vmatprep.subr.bf16.mxu0 %v13481_v55 }
0x22f4   :  { %v3705_v9 = vsel %vm1549_vm5, %v3704_v11, %v3700_v35  ;;  %v16182_v35 = vld [vmem:[#allocation42_spill] sm:$0xff]  ;;  %v16183_v11 = vld [vmem:[#allocation28_spill] sm:$0xff] }
0x22f5   :  { %10157 = vmatmul.mubr.msk.f32.vlgmr.msra.gmra.mrb[28].mxu1 %vm86_vm0, %v3705_v9  ;;  %v16184_v9 = vmov 0.0|0.0  }
0x22f6   :  { %11070 = vmatpush1.bf16.msra.mxu1 %v13398_v12  ;;  %11142 = vmatpush1.bf16.msra.mxu0 %v13486_v3 }
0x22f7   :  { %11072 = vmatprep.subr.bf16.mxu1 %v13400_v13  ;;  %11144 = vmatprep.subr.bf16.mxu0 %v13489_v8 }
0x22fa   :  { %11074 = vmatpush1.bf16.msra.mxu1 %v13404_v10  ;;  %11146 = vmatpush1.bf16.msra.mxu0 %v13492_v18 }
0x22fb   :  { %11076 = vmatprep.subr.bf16.mxu1 %v13407_v17  ;;  %11148 = vmatprep.subr.bf16.mxu0 %v13495_v19 }
0x22fe   :  { %11078 = vmatpush1.bf16.msra.mxu1 %v13412_v24  ;;  %11150 = vmatpush1.bf16.msra.mxu0 %v13498_v36 }
0x22ff   :  { %11080 = vmatprep.subr.bf16.mxu1 %v13416_v25  ;;  %11152 = vmatprep.subr.bf16.mxu0 %v13501_v37 }
0x2302   :  { %11082 = vmatpush1.bf16.msra.mxu1 %v13419_v30  ;;  %11154 = vmatpush1.bf16.msra.mxu0 %v13504_v47 }
0x2303   :  { %11084 = vmatprep.subr.bf16.mxu1 %v13422_v34  ;;  %11156 = vmatprep.subr.bf16.mxu0 %v13507_v48 }
0x2306   :  { %11086 = vmatpush1.bf16.msra.mxu1 %v13425_v40  ;;  %11158 = vmatpush1.bf16.msra.mxu0 %v13510_v63 }
0x2307   :  { %11088 = vmatprep.subr.bf16.mxu1 %v13428_v41  ;;  %11160 = vmatprep.subr.bf16.mxu0 %v13513_v0 }
0x230a   :  { %11090 = vmatpush1.bf16.msra.mxu1 %v13431_v45  ;;  %11162 = vmatpush1.bf16.msra.mxu0 %v13516_v16 }
0x230b   :  { %11092 = vmatprep.subr.bf16.mxu1 %v13434_v46  ;;  %11164 = vmatprep.subr.bf16.mxu0 %v13519_v20 }
0x230e   :  { %11094 = vmatpush1.bf16.msra.mxu1 %v13437_v51  ;;  %11166 = vmatpush1.bf16.msra.mxu0 %v13525_v49 }
0x230f   :  { %11096 = vmatprep.subr.bf16.mxu1 %v13440_v52  ;;  %11168 = vmatprep.subr.bf16.mxu0 %v13532_v1 }
0x2312   :  { %11098 = vmatpush1.bf16.msra.mxu1 %v15993_v43  ;;  %11170 = vmatpush1.bf16.msra.mxu0 %v15994_v57 }
0x2313   :  { %11100 = vmatprep.subr.bf16.mxu1 %v15995_v39  ;;  %11172 = vmatprep.subr.bf16.mxu0 %v15996_v28 }
0x2316   :  { %11102 = vmatpush1.bf16.msra.mxu1 %v15997_v22  ;;  %11174 = vmatpush1.bf16.msra.mxu0 %v15998_v2 }
0x2317   :  { %11104 = vmatprep.subr.bf16.mxu1 %v15999_v29  ;;  %11176 = vmatprep.subr.bf16.mxu0 %v16164_v31 }
0x231a   :  { %11106 = vmatpush1.bf16.msra.mxu1 %v16165_v59  ;;  %11178 = vmatpush1.bf16.msra.mxu0 %v16166_v7 }
0x231b   :  { %11108 = vmatprep.subr.bf16.mxu1 %v16167_v62  ;;  %11180 = vmatprep.subr.bf16.mxu0 %v16168_v14 }
0x231e   :  { %11110 = vmatpush1.bf16.msra.mxu1 %v16169_v15  ;;  %11182 = vmatpush1.bf16.msra.mxu0 %v16170_v6 }
0x231f   :  { %11112 = vmatprep.subr.bf16.mxu1 %v16171_v61  ;;  %11184 = vmatprep.subr.bf16.mxu0 %v16172_v56  ;;  %v16197_v61 = vld [vmem:[#allocation47_spill] sm:$0xff] }
0x2322   :  { %11114 = vmatpush1.bf16.msra.mxu1 %v16173_v54  ;;  %11186 = vmatpush1.bf16.msra.mxu0 %v16174_v23  ;;  %v16185_v23 = vld [vmem:[#allocation30_spill] sm:$0xff] }
0x2323   :  { %11116 = vmatprep.subr.bf16.mxu1 %v16175_v58  ;;  %11188 = vmatprep.subr.bf16.mxu0 %v16176_v33  ;;  %v16186_v58 = vld [vmem:[#allocation32_spill] sm:$0xff]  ;;  %v16187_v33 = vld [vmem:[#allocation34_spill] sm:$0xff] }
0x2326   :  { %11118 = vmatpush1.bf16.msra.mxu1 %v16177_v4  ;;  %11190 = vmatpush1.bf16.msra.mxu0 %v16178_v5 }
0x2327   :  { %11120 = vmatprep.subr.bf16.mxu1 %v16179_v38  ;;  %11192 = vmatprep.subr.bf16.mxu0 %v16180_v27 }
0x232a   :  { %11122 = vmatpush1.bf16.msra.mxu1 %v16181_v32  ;;  %11194 = vmatpush1.bf16.msra.mxu0 %v16182_v35 }
0x232b   :  { %11124 = vmatprep.subr.bf16.mxu1 %v16183_v11  ;;  %11199 = vmatprep.subr.bf16.mxu0 %v16184_v9  ;;  %v16188_v11 = vld [vmem:[#allocation46_spill] sm:$0xff] }
0x232e   :  { %11126 = vmatpush1.bf16.msra.mxu1 %v16185_v23  ;;  %v16189_v23 = vld [vmem:[#allocation52_spill] sm:$0xff] }
0x232f   :  { %11128 = vmatprep.subr.bf16.mxu1 %v16186_v58 }
0x2332   :  { %11130 = vmatpush1.bf16.msra.mxu1 %v16187_v33  ;;  %v16191_v33 = vld [vmem:[#allocation54_spill] sm:$0xff] }
0x2333   :  { %11195 = vmatprep.subr.bf16.mxu1 %v16184_v9  ;;  %v16196_v9 = vld [vmem:[#allocation44_spill] sm:$0xff] }
0x23c0   :  { %v3863_v5 = vpop.f32.mrb[32].mxu0 }
0x23c1   :  { %v10165_v38 = vpop.f32.mrb[33].mxu0  ;;  %v3869_v4 = vrot.slane %v3863_v5, 7 }
0x23c2   :  { %v16192_v38 = vmov 0.0  }
0x23c8   :  { %v3774_v27 = vpop.f32.mrb[28].mxu1 }
0x23c9   :  { %v10158_v54 = vpop.f32.mrb[29].mxu1  ;;  %v3870_v32 = vsel %vm1560_vm6, %v3869_v4, %v3774_v27  ;;  %v16194_v4 = vld [vmem:[#allocation12_spill] sm:$0xff] }
0x23ca   :  { %3936 = vmatprep.mubr.f32.mxu1 %v3870_v32  ;;  %4007 = vmatprep.mubr.f32.mxu0 %v3870_v32  ;;  %v16193_v54 = vld [vmem:[#allocation11_spill] sm:$0xff] }
0x23cb   :  { %3937 = vmatmul.mubr.f32.vlgmr.msra.gmra.mrb[30].mxu1 %v16188_v11  ;;  %4008 = vmatmul.mubr.f32.vlgmr.msra.gmra.mrb[34].mxu0 %v16188_v11  ;;  %v16195_v32 = vld [vmem:[#allocation43_spill] sm:$0xff] }
0x23cc   :  { %11198 = vmatpush3.bf16.msk.msra.mxu1 %vm13680_vm4, %v16189_v23  ;;  %11202 = vmatpush3.bf16.msk.msra.mxu0 %vm13680_vm4, %v16191_v33 }
0x23cd   :  { %10177 = vmatprep.mubr.msk.f32.mxu0 %vm13165_vm8, %v16192_v38  ;;  %10170 = vmatprep.mubr.msk.f32.mxu1 %vm13165_vm8, %v16192_v38  ;;  %v16198_v38 = vld [vmem:[#allocation45_spill] sm:$0xff] }
0x23ce   :  { %11204 = vmatprep.subr.bf16.mxu1 %v16193_v54  ;;  %11268 = vmatprep.subr.bf16.mxu0 %v16194_v4 }
0x249e   :  { %v3938_v5 = vpop.f32.mrb[30].mxu1  ;;  %v4009_v27 = vpop.f32.mrb[34].mxu0 }
0x249f   :  { %v3939_v11 = vadd.f32 %v3938_v5, %v16195_v32  ;;  %v3940_v58 = vpop.f32.mrb[31].mxu1  ;;  %v4011_v23 = vpop.f32.mrb[35].mxu0  ;;  %v4010_v14 = vadd.f32 %v4009_v27, %v16198_v38 }
0x24a0   :  { %v3941_v56 = vadd.f32 %v3940_v58, %v16196_v9  ;;  %v4012_v6 = vadd.f32 %v4011_v23, %v16197_v61 }
0x24a1   :  { %v9736_v35 = vmul.f32 -1.442695, %v3939_v11 }
0x24a2   :  { %v9737_v33 = vmul.f32 -1.442695, %v3941_v56  ;;  %v9738_v15 = vmul.f32 -1.442695, %v4012_v6 }
0x24a3   :  { %12796 = vpow2.f32 %v9736_v35 }
0x24a4   :  { %12798 = vpow2.f32 %v9737_v33  ;;  %v16199_v33 = vld [vmem:[#allocation16_spill] sm:$0xff] }
0x24a5   :  { %12800 = vpow2.f32 %v9738_v15 }
0x24a6   :  { %12802 = vtanh.f32 %v4010_v14 }
0x24ad   :  { %v12797_v54 = vpop.eup %12796 }
0x24ae   :  { %v12799_v62 = vpop.eup %12798  ;;  %v4017_v4 = vadd.f32 1.0, %v12797_v54 }
0x24af   :  { %v4023_v7 = vadd.f32 1.0, %v12799_v62  ;;  %v12801_v5 = vpop.eup %12800  ;;  %v16202_v62 = vld [vmem:[#allocation48_spill] sm:$0xff] }
0x24b0   :  { %12804 = vrcp.f32 %v4017_v4  ;;  %v12803_v32 = vpop.eup %12802  ;;  %v4030_v35 = vadd.f32 1.0, %v12801_v5  ;;  %v16203_v5 = vld [vmem:[#allocation50_spill] sm:$0xff] }
0x24b1   :  { %12806 = vrcp.f32 %v4023_v7 }
0x24b2   :  { %12808 = vrcp.f32 %v4030_v35  ;;  %v16205_v35 = vld [vmem:[#allocation53_spill] sm:$0xff] }
0x24ba   :  { %v12805_v58 = vpop.eup %12804 }
0x24bb   :  { %v12807_v11 = vpop.eup %12806  ;;  %v4034_v56 = vmul.f32 %v12805_v58, %v12803_v32  ;;  %v16204_v58 = vld [vmem:[#allocation51_spill] sm:$0xff] }
0x24bc   :  { %v4033_v9 = vmul.f32 %v12807_v11, %v16199_v33  ;;  %v12809_v6 = vpop.eup %12808 }
0x24be   :  { %v14352_v23 = vadd.f32 %v4034_v56, %v4033_v9 }
0x24c0   :  { %16200 = vst [vmem:[#allocation25_spill] sm:$0xff] %v14352_v23  ;;  %12810 = vtanh.f32 %v14352_v23 }
0x24ca   :  { %v12811_v54 = vpop.eup %12810 }
0x24cb   :  { %v14355_v15 = vmul.f32 %v12811_v54, %v12809_v6  ;;  %v16206_v6 = vld [vmem:[#allocation55_spill] sm:$0xff] }
0x24cd   :  { %16201 = vst [vmem:[#allocation13_spill] sm:$0xff] %v14355_v15  ;;  %v4045_v7 = vrot.slane %v14355_v15, %v16202_v62 }
0x24cf   :  { %v4053_v14 = vrot.slane %v4045_v7, %v16202_v62  ;;  %v4046_v4 = vcombine.high %v4045_v7, %v4045_v7 }
0x24d1   :  { %v4064_v27 = vrot.slane %v4053_v14, %v13627_v21  ;;  %v4060_v32 = vrot.slane %v4046_v4, %v16202_v62 }
0x24d3   :  { %v4067_v9 = vmul.f32 %v4064_v27, %v16203_v5  ;;  %v4066_v11 = vmul.f32 %v4064_v27, %v16204_v58  ;;  %v4075_v56 = vrot.slane %v4060_v32, %v13627_v21 }
0x24d5   :  { %4070 = vadd.xlane.f32.xlu0 %v4067_v9  ;;  %4068 = vadd.xlane.f32.xlu1 %v4066_v11  ;;  %v4077_v33 = vmul.f32 %v4075_v56, %v16205_v35  ;;  %v4078_v54 = vmul.f32 %v4075_v56, %v16206_v6 }
0x24d9   :  { %4079 = vadd.xlane.f32.xlu0 %v4077_v33 }
0x24dd   :  { %4081 = vadd.xlane.f32.xlu0 %v4078_v54 }
0x2562   :  { %v4071_v23 = vpop.xlane.xlu0 %4070  ;;  %v4069_v7 = vpop.xlane.xlu1 %4068 }
0x2563   :  { %4088 = vperm.xlu0 %12632, %v4069_v7  }
0x2566   :  { %v4080_v14 = vpop.xlane.xlu0 %4079 }
0x2567   :  { %4091 = vperm.xlu0 %12632, %v4071_v23   ;;  %4094 = vperm.xlu1 %12633, %v4080_v14  }
0x256a   :  { %v4082_v4 = vpop.xlane.xlu0 %4081 }
0x256b   :  { %4097 = vperm.xlu0 %12632, %v4082_v4  }
0x25e2   :  { %v4089_v5 = vpop.permute.xlu0 %4088 }
0x25e3   :  { %v4102_v11 = vrot.slane %v4089_v5, %v13723_v60 }
0x25e6   :  { %v4092_v27 = vpop.permute.xlu0 %4091  ;;  %v4095_v58 = vpop.permute.xlu1 %4094 }
0x25e7   :  { %v4106_v32 = vrot.slane %v4092_v27, %v13726_v50  ;;  %v4111_v33 = vrot.slane %v4095_v58, %v13723_v60 }
0x25e9   :  { %v4107_v54 = vsel %vm1549_vm5, %v4106_v32, %v4102_v11 }
0x25ea   :  { %v4098_v9 = vpop.permute.xlu0 %4097 }
0x25eb   :  { %v4115_v56 = vrot.slane %v4098_v9, %v13726_v50 }
0x25ed   :  { %v4116_v6 = vsel %vm1549_vm5, %v4115_v56, %v4111_v33 }
0x25ee   :  { %v4117_v35 = vsel %vm1560_vm6, %v4116_v6, %v4107_v54 }
0x25ef   :  { %v4119_v62 = vsel %vm1563_vm7, %v4117_v35, -inf }
0x25f0   :  { %4120 = vmax.xlane.f32.xlu0 %v4119_v62 }
0x267d   :  { %v4121_v38 = vpop.xlane.xlu0 %4120 }
0x267e   :  { %v4126_v61 = vrot.slane %v4121_v38, %v13627_v21  ;;  %v4130_v27 = vrot.slane %v4121_v38, %v13633_v26 }
0x2680   :  { %v4133_v15 = vsub.f32 %v4069_v7, %v4126_v61  ;;  %v4134_v5 = vsub.f32 %v4071_v23, %v4126_v61  ;;  %v4135_v58 = vsub.f32 %v4080_v14, %v4130_v27  ;;  %v4136_v31 = vsub.f32 %v4082_v4, %v4130_v27 }
0x2682   :  { %v4137_v59 = vmul.f32 1.442695, %v4133_v15  ;;  %v4139_v9 = vmul.f32 1.442695, %v4134_v5  ;;  %v4141_v32 = vmul.f32 1.442695, %v4135_v58 }
0x2683   :  { %v4143_v11 = vmul.f32 1.442695, %v4136_v31 }
0x2684   :  { %12812 = vpow2.f32 %v4137_v59 }
0x2685   :  { %12814 = vpow2.f32 %v4139_v9 }
0x2686   :  { %12816 = vpow2.f32 %v4141_v32 }
0x2687   :  { %12818 = vpow2.f32 %v4143_v11 }
0x268e   :  { %v12813_v6 = vpop.eup %12812 }
0x268f   :  { %4150 = vperm.xlu1 %12633, %v12813_v6   ;;  %v12815_v62 = vpop.eup %12814 }
0x2690   :  { %v12817_v35 = vpop.eup %12816 }
0x2691   :  { %v12819_v33 = vpop.eup %12818 }
0x2693   :  { %4153 = vperm.xlu1 %12633, %v12815_v62  }
0x2697   :  { %4156 = vperm.xlu1 %12633, %v12817_v35  }
0x269b   :  { %4159 = vperm.xlu1 %12633, %v12819_v33  }
0x270e   :  { %v4151_v38 = vpop.permute.xlu1 %4150 }
0x270f   :  { %v4164_v7 = vrot.slane %v4151_v38, %v13723_v60 }
0x2712   :  { %v4154_v61 = vpop.permute.xlu1 %4153 }
0x2713   :  { %v4168_v59 = vrot.slane %v4154_v61, %v13726_v50 }
0x2715   :  { %v4169_v4 = vsel %vm1549_vm5, %v4168_v59, %v4164_v7 }
0x2716   :  { %v4157_v23 = vpop.permute.xlu1 %4156 }
0x2717   :  { %v4173_v14 = vrot.slane %v4157_v23, %v13723_v60 }
0x271a   :  { %v4160_v15 = vpop.permute.xlu1 %4159 }
0x271b   :  { %v4177_v31 = vrot.slane %v4160_v15, %v13726_v50 }
0x271d   :  { %v4178_v56 = vsel %vm1549_vm5, %v4177_v31, %v4173_v14 }
0x271e   :  { %v4179_v54 = vsel %vm1560_vm6, %v4178_v56, %v4169_v4  ;;  %v16207_v56 = vld [vmem:[#allocation31_spill] sm:$0xff] }
0x271f   :  { %v4181_v27 = vsel %vm1563_vm7, %v4179_v54, 0.0  ;;  %v16208_v54 = vld [vmem:[#allocation17_spill] sm:$0xff] }
0x2720   :  { %4182 = vadd.xlane.f32.xlu1 %v4181_v27  ;;  %v16209_v27 = vld [vmem:[#allocation33_spill] sm:$0xff] }
0x27ad   :  { %v4183_v5 = vpop.xlane.xlu1 %4182 }
0x27ae   :  { %12820 = vrcp.f32 %v4183_v5  ;;  %v16210_v5 = vld [vmem:[#allocation18_spill] sm:$0xff] }
0x27b8   :  { %v12821_v58 = vpop.eup %12820 }
0x27b9   :  { %v4193_v9 = vrot.slane %v12821_v58, %v13633_v26  ;;  %v4189_v38 = vrot.slane %v12821_v58, %v13627_v21  ;;  %v16211_v58 = vld [vmem:[#allocation35_spill] sm:$0xff] }
0x27bb   :  { %v4198_v32 = vmul.f32 %v12817_v35, %v4193_v9  ;;  %v4199_v11 = vmul.f32 %v12819_v33, %v4193_v9  ;;  %v4196_v61 = vmul.f32 %v12813_v6, %v4189_v38  ;;  %v4197_v23 = vmul.f32 %v12815_v62, %v4189_v38  ;;  %v16212_v9 = vld [vmem:[#allocation19_spill] sm:$0xff]  ;;  %v16215_v38 = vld [vmem:[#allocation37_spill] sm:$0xff] }
0x27bd   :  { %4292 = vperm.xlu0 %12632, %v4198_v32   ;;  %v16213_v32 = vld [vmem:[#allocation36_spill] sm:$0xff] }
0x27c1   :  { %4295 = vperm.xlu0 %12632, %v4199_v11   ;;  %v16214_v11 = vld [vmem:[#allocation20_spill] sm:$0xff] }
0x27c5   :  { %4203 = vperm.xlu0 %12632, %v4196_v61   ;;  %v16216_v61 = vld [vmem:[#allocation21_spill] sm:$0xff] }
0x27c9   :  { %4206 = vperm.xlu0 %12632, %v4197_v23   ;;  %v16217_v23 = vld [vmem:[#allocation38_spill] sm:$0xff] }
0x283c   :  { %v4293_v59 = vpop.permute.xlu0 %4292 }
0x283d   :  { %v4300_v7 = vrot.slane %v4293_v59, %v13723_v60  ;;  %v16218_v59 = vld [vmem:[#allocation22_spill] sm:$0xff] }
0x2840   :  { %v4296_v15 = vpop.permute.xlu0 %4295 }
0x2841   :  { %v4304_v14 = vrot.slane %v4296_v15, %v13726_v50  ;;  %v16219_v15 = vld [vmem:[#allocation39_spill] sm:$0xff] }
0x2843   :  { %v4305_v31 = vsel %vm1549_vm5, %v4304_v14, %v4300_v7  ;;  %v16220_v7 = vld [vmem:[#allocation23_spill] sm:$0xff]  ;;  %v16221_v14 = vld [vmem:[#allocation40_spill] sm:$0xff] }
0x2844   :  { %10178 = vmatmul.mubr.msk.f32.vlgmr.msra.gmra.mrb[36].mxu0 %vm86_vm0, %v4305_v31  ;;  %v4204_v35 = vpop.permute.xlu0 %4203  ;;  %v16222_v31 = vld [vmem:[#allocation24_spill] sm:$0xff] }
0x2845   :  { %11270 = vmatpush1.bf16.msra.mxu0 %v13471_v42  ;;  %v4211_v6 = vrot.slane %v4204_v35, %v13723_v60  ;;  %v16223_v35 = vld [vmem:[#allocation41_spill] sm:$0xff] }
0x2846   :  { %11272 = vmatprep.subr.bf16.mxu0 %v13473_v44 }
0x2848   :  { %v4207_v33 = vpop.permute.xlu0 %4206 }
0x2849   :  { %v4215_v62 = vrot.slane %v4207_v33, %v13726_v50  ;;  %11274 = vmatpush1.bf16.msra.mxu0 %v13478_v53  ;;  %v16224_v33 = vld [vmem:[#allocation26_spill] sm:$0xff] }
0x284a   :  { %11276 = vmatprep.subr.bf16.mxu0 %v13481_v55 }
0x284b   :  { %v4216_v4 = vsel %vm1549_vm5, %v4215_v62, %v4211_v6  ;;  %v16225_v6 = vld [vmem:[#allocation42_spill] sm:$0xff]  ;;  %v16226_v62 = vld [vmem:[#allocation28_spill] sm:$0xff] }
0x284c   :  { %10171 = vmatmul.mubr.msk.f32.vlgmr.msra.gmra.mrb[32].mxu1 %vm86_vm0, %v4216_v4  ;;  %v16227_v4 = vmov 0.0|0.0  }
0x284d   :  { %11206 = vmatpush1.bf16.msra.mxu1 %v13398_v12  ;;  %11278 = vmatpush1.bf16.msra.mxu0 %v13486_v3 }
0x284e   :  { %11208 = vmatprep.subr.bf16.mxu1 %v13400_v13  ;;  %11280 = vmatprep.subr.bf16.mxu0 %v13489_v8 }
0x2851   :  { %11210 = vmatpush1.bf16.msra.mxu1 %v13404_v10  ;;  %11282 = vmatpush1.bf16.msra.mxu0 %v13492_v18 }
0x2852   :  { %11212 = vmatprep.subr.bf16.mxu1 %v13407_v17  ;;  %11284 = vmatprep.subr.bf16.mxu0 %v13495_v19 }
0x2855   :  { %11214 = vmatpush1.bf16.msra.mxu1 %v13412_v24  ;;  %11286 = vmatpush1.bf16.msra.mxu0 %v13498_v36 }
0x2856   :  { %11216 = vmatprep.subr.bf16.mxu1 %v13416_v25  ;;  %11288 = vmatprep.subr.bf16.mxu0 %v13501_v37 }
0x2859   :  { %11218 = vmatpush1.bf16.msra.mxu1 %v13419_v30  ;;  %11290 = vmatpush1.bf16.msra.mxu0 %v13504_v47 }
0x285a   :  { %11220 = vmatprep.subr.bf16.mxu1 %v13422_v34  ;;  %11292 = vmatprep.subr.bf16.mxu0 %v13507_v48 }
0x285d   :  { %11222 = vmatpush1.bf16.msra.mxu1 %v13425_v40  ;;  %11294 = vmatpush1.bf16.msra.mxu0 %v13510_v63 }
0x285e   :  { %11224 = vmatprep.subr.bf16.mxu1 %v13428_v41  ;;  %11296 = vmatprep.subr.bf16.mxu0 %v13513_v0 }
0x2861   :  { %11226 = vmatpush1.bf16.msra.mxu1 %v13431_v45  ;;  %11298 = vmatpush1.bf16.msra.mxu0 %v13516_v16 }
0x2862   :  { %11228 = vmatprep.subr.bf16.mxu1 %v13434_v46  ;;  %11300 = vmatprep.subr.bf16.mxu0 %v13519_v20 }
0x2865   :  { %11230 = vmatpush1.bf16.msra.mxu1 %v13437_v51  ;;  %11302 = vmatpush1.bf16.msra.mxu0 %v13525_v49 }
0x2866   :  { %11232 = vmatprep.subr.bf16.mxu1 %v13440_v52  ;;  %11304 = vmatprep.subr.bf16.mxu0 %v13532_v1 }
0x2869   :  { %11234 = vmatpush1.bf16.msra.mxu1 %v15993_v43  ;;  %11306 = vmatpush1.bf16.msra.mxu0 %v15994_v57 }
0x286a   :  { %11236 = vmatprep.subr.bf16.mxu1 %v15995_v39  ;;  %11308 = vmatprep.subr.bf16.mxu0 %v15996_v28 }
0x286d   :  { %11238 = vmatpush1.bf16.msra.mxu1 %v15997_v22  ;;  %11310 = vmatpush1.bf16.msra.mxu0 %v15998_v2 }
0x286e   :  { %11240 = vmatprep.subr.bf16.mxu1 %v15999_v29  ;;  %11312 = vmatprep.subr.bf16.mxu0 %v16207_v56 }
0x2871   :  { %11242 = vmatpush1.bf16.msra.mxu1 %v16208_v54  ;;  %11314 = vmatpush1.bf16.msra.mxu0 %v16209_v27 }
0x2872   :  { %11244 = vmatprep.subr.bf16.mxu1 %v16210_v5  ;;  %11316 = vmatprep.subr.bf16.mxu0 %v16211_v58 }
0x2875   :  { %11246 = vmatpush1.bf16.msra.mxu1 %v16212_v9  ;;  %11318 = vmatpush1.bf16.msra.mxu0 %v16213_v32 }
0x2876   :  { %11248 = vmatprep.subr.bf16.mxu1 %v16214_v11  ;;  %11320 = vmatprep.subr.bf16.mxu0 %v16215_v38  ;;  %v16240_v11 = vld [vmem:[#allocation47_spill] sm:$0xff] }
0x2879   :  { %11250 = vmatpush1.bf16.msra.mxu1 %v16216_v61  ;;  %11322 = vmatpush1.bf16.msra.mxu0 %v16217_v23  ;;  %v16228_v23 = vld [vmem:[#allocation30_spill] sm:$0xff] }
0x287a   :  { %11252 = vmatprep.subr.bf16.mxu1 %v16218_v59  ;;  %11324 = vmatprep.subr.bf16.mxu0 %v16219_v15  ;;  %v16229_v59 = vld [vmem:[#allocation32_spill] sm:$0xff]  ;;  %v16230_v15 = vld [vmem:[#allocation34_spill] sm:$0xff] }
0x287d   :  { %11254 = vmatpush1.bf16.msra.mxu1 %v16220_v7  ;;  %11326 = vmatpush1.bf16.msra.mxu0 %v16221_v14 }
0x287e   :  { %11256 = vmatprep.subr.bf16.mxu1 %v16222_v31  ;;  %11328 = vmatprep.subr.bf16.mxu0 %v16223_v35 }
0x2881   :  { %11258 = vmatpush1.bf16.msra.mxu1 %v16224_v33  ;;  %11330 = vmatpush1.bf16.msra.mxu0 %v16225_v6 }
0x2882   :  { %11260 = vmatprep.subr.bf16.mxu1 %v16226_v62  ;;  %11335 = vmatprep.subr.bf16.mxu0 %v16227_v4  ;;  %v16231_v62 = vld [vmem:[#allocation13_spill] sm:$0xff] }
0x2885   :  { %11262 = vmatpush1.bf16.msra.mxu1 %v16228_v23  ;;  %v16232_v23 = vld [vmem:[#allocation52_spill] sm:$0xff] }
0x2886   :  { %11264 = vmatprep.subr.bf16.mxu1 %v16229_v59 }
0x2889   :  { %11266 = vmatpush1.bf16.msra.mxu1 %v16230_v15  ;;  %v16234_v15 = vld [vmem:[#allocation54_spill] sm:$0xff] }
0x288a   :  { %11331 = vmatprep.subr.bf16.mxu1 %v16227_v4  ;;  %v16239_v4 = vld [vmem:[#allocation44_spill] sm:$0xff] }
0x2917   :  { %v4374_v14 = vpop.f32.mrb[36].mxu0 }
0x2918   :  { %v10179_v31 = vpop.f32.mrb[37].mxu0  ;;  %v4380_v7 = vrot.slane %v4374_v14, 7 }
0x2919   :  { %v16235_v31 = vmov 0.0  }
0x291f   :  { %v4285_v35 = vpop.f32.mrb[32].mxu1 }
0x2920   :  { %v10172_v61 = vpop.f32.mrb[33].mxu1  ;;  %v4381_v33 = vsel %vm1560_vm6, %v4380_v7, %v4285_v35  ;;  %v16237_v7 = vld [vmem:[#allocation12_spill] sm:$0xff] }
0x2921   :  { %4447 = vmatprep.mubr.f32.mxu1 %v4381_v33  ;;  %4518 = vmatprep.mubr.f32.mxu0 %v4381_v33  ;;  %v16236_v61 = vld [vmem:[#allocation11_spill] sm:$0xff] }
0x2922   :  { %4448 = vmatmul.mubr.f32.vlgmr.msra.gmra.mrb[34].mxu1 %v16231_v62  ;;  %4519 = vmatmul.mubr.f32.vlgmr.msra.gmra.mrb[38].mxu0 %v16231_v62  ;;  %v16238_v33 = vld [vmem:[#allocation43_spill] sm:$0xff] }
0x2923   :  { %11334 = vmatpush3.bf16.msk.msra.mxu1 %vm13680_vm4, %v16232_v23  ;;  %11338 = vmatpush3.bf16.msk.msra.mxu0 %vm13680_vm4, %v16234_v15 }
0x2924   :  { %10191 = vmatprep.mubr.msk.f32.mxu0 %vm13165_vm8, %v16235_v31  ;;  %10184 = vmatprep.mubr.msk.f32.mxu1 %vm13165_vm8, %v16235_v31  ;;  %v16241_v31 = vld [vmem:[#allocation45_spill] sm:$0xff] }
0x2925   :  { %11340 = vmatprep.subr.bf16.mxu1 %v16236_v61  ;;  %11404 = vmatprep.subr.bf16.mxu0 %v16237_v7 }
0x29f5   :  { %v4449_v14 = vpop.f32.mrb[34].mxu1  ;;  %v4520_v35 = vpop.f32.mrb[38].mxu0 }
0x29f6   :  { %v4450_v62 = vadd.f32 %v4449_v14, %v16238_v33  ;;  %v4451_v59 = vpop.f32.mrb[35].mxu1  ;;  %v4522_v23 = vpop.f32.mrb[39].mxu0  ;;  %v4521_v58 = vadd.f32 %v4520_v35, %v16241_v31 }
0x29f7   :  { %v4452_v38 = vadd.f32 %v4451_v59, %v16239_v4  ;;  %v4523_v32 = vadd.f32 %v4522_v23, %v16240_v11 }
0x29f8   :  { %v9745_v6 = vmul.f32 -1.442695, %v4450_v62 }
0x29f9   :  { %v9746_v15 = vmul.f32 -1.442695, %v4452_v38  ;;  %v9747_v9 = vmul.f32 -1.442695, %v4523_v32 }
0x29fa   :  { %12822 = vpow2.f32 %v9745_v6 }
0x29fb   :  { %12824 = vpow2.f32 %v9746_v15  ;;  %v16242_v15 = vld [vmem:[#allocation25_spill] sm:$0xff] }
0x29fc   :  { %12826 = vpow2.f32 %v9747_v9 }
0x29fd   :  { %12828 = vtanh.f32 %v4521_v58 }
0x2a04   :  { %v12823_v61 = vpop.eup %12822 }
0x2a05   :  { %v12825_v5 = vpop.eup %12824  ;;  %v4528_v7 = vadd.f32 1.0, %v12823_v61 }
0x2a06   :  { %v4534_v27 = vadd.f32 1.0, %v12825_v5  ;;  %v12827_v14 = vpop.eup %12826  ;;  %v16245_v5 = vld [vmem:[#allocation48_spill] sm:$0xff] }
0x2a07   :  { %12830 = vrcp.f32 %v4528_v7  ;;  %v12829_v33 = vpop.eup %12828  ;;  %v4541_v6 = vadd.f32 1.0, %v12827_v14  ;;  %v16246_v14 = vld [vmem:[#allocation50_spill] sm:$0xff] }
0x2a08   :  { %12832 = vrcp.f32 %v4534_v27 }
0x2a09   :  { %12834 = vrcp.f32 %v4541_v6  ;;  %v16248_v6 = vld [vmem:[#allocation53_spill] sm:$0xff] }
0x2a11   :  { %v12831_v59 = vpop.eup %12830 }
0x2a12   :  { %v12833_v62 = vpop.eup %12832  ;;  %v4545_v38 = vmul.f32 %v12831_v59, %v12829_v33  ;;  %v16247_v59 = vld [vmem:[#allocation51_spill] sm:$0xff] }
0x2a13   :  { %v4544_v4 = vmul.f32 %v12833_v62, %v16242_v15  ;;  %v12835_v32 = vpop.eup %12834 }
0x2a15   :  { %v14479_v23 = vadd.f32 %v4545_v38, %v4544_v4 }
0x2a17   :  { %16243 = vst [vmem:[#allocation27_spill] sm:$0xff] %v14479_v23  ;;  %12836 = vtanh.f32 %v14479_v23 }
0x2a21   :  { %v12837_v61 = vpop.eup %12836 }
0x2a22   :  { %v14482_v9 = vmul.f32 %v12837_v61, %v12835_v32  ;;  %v16249_v32 = vld [vmem:[#allocation55_spill] sm:$0xff] }
0x2a24   :  { %16244 = vst [vmem:[#allocation14_spill] sm:$0xff] %v14482_v9  ;;  %v4556_v27 = vrot.slane %v14482_v9, %v16245_v5 }
0x2a26   :  { %v4564_v58 = vrot.slane %v4556_v27, %v16245_v5  ;;  %v4557_v7 = vcombine.high %v4556_v27, %v4556_v27 }
0x2a28   :  { %v4575_v35 = vrot.slane %v4564_v58, %v13627_v21  ;;  %v4571_v33 = vrot.slane %v4557_v7, %v16245_v5 }
0x2a2a   :  { %v4578_v4 = vmul.f32 %v4575_v35, %v16246_v14  ;;  %v4577_v62 = vmul.f32 %v4575_v35, %v16247_v59  ;;  %v4586_v38 = vrot.slane %v4571_v33, %v13627_v21 }
0x2a2c   :  { %4581 = vadd.xlane.f32.xlu0 %v4578_v4  ;;  %4579 = vadd.xlane.f32.xlu1 %v4577_v62  ;;  %v4588_v15 = vmul.f32 %v4586_v38, %v16248_v6  ;;  %v4589_v61 = vmul.f32 %v4586_v38, %v16249_v32 }
0x2a30   :  { %4590 = vadd.xlane.f32.xlu1 %v4588_v15 }
0x2a34   :  { %4592 = vadd.xlane.f32.xlu1 %v4589_v61 }
0x2ab9   :  { %v4580_v23 = vpop.xlane.xlu1 %4579  ;;  %v4582_v27 = vpop.xlane.xlu0 %4581 }
0x2aba   :  { %4599 = vperm.xlu1 %12633, %v4580_v23  }
0x2abd   :  { %v4591_v58 = vpop.xlane.xlu1 %4590 }
0x2abe   :  { %4602 = vperm.xlu1 %12633, %v4582_v27  }
0x2ac1   :  { %v4593_v7 = vpop.xlane.xlu1 %4592 }
0x2ac2   :  { %4605 = vperm.xlu1 %12633, %v4591_v58   ;;  %4608 = vperm.xlu0 %12632, %v4593_v7  }
0x2b39   :  { %v4600_v14 = vpop.permute.xlu1 %4599 }
0x2b3a   :  { %v4613_v6 = vrot.slane %v4600_v14, %v13723_v60 }
0x2b3d   :  { %v4603_v35 = vpop.permute.xlu1 %4602 }
0x2b3e   :  { %v4617_v33 = vrot.slane %v4603_v35, %v13726_v50 }
0x2b40   :  { %v4618_v61 = vsel %vm1549_vm5, %v4617_v33, %v4613_v6 }
0x2b41   :  { %v4609_v4 = vpop.permute.xlu0 %4608  ;;  %v4606_v62 = vpop.permute.xlu1 %4605 }
0x2b42   :  { %v4626_v15 = vrot.slane %v4609_v4, %v13726_v50  ;;  %v4622_v38 = vrot.slane %v4606_v62, %v13723_v60 }
0x2b44   :  { %v4627_v32 = vsel %vm1549_vm5, %v4626_v15, %v4622_v38 }
0x2b45   :  { %v4628_v59 = vsel %vm1560_vm6, %v4627_v32, %v4618_v61 }
0x2b46   :  { %v4630_v5 = vsel %vm1563_vm7, %v4628_v59, -inf }
0x2b47   :  { %4631 = vmax.xlane.f32.xlu1 %v4630_v5 }
0x2bd4   :  { %v4632_v31 = vpop.xlane.xlu1 %4631 }
0x2bd5   :  { %v4637_v35 = vrot.slane %v4632_v31, %v13627_v21  ;;  %v4641_v11 = vrot.slane %v4632_v31, %v13633_v26 }
0x2bd7   :  { %v4644_v9 = vsub.f32 %v4580_v23, %v4637_v35  ;;  %v4645_v14 = vsub.f32 %v4582_v27, %v4637_v35  ;;  %v4646_v4 = vsub.f32 %v4591_v58, %v4641_v11  ;;  %v4647_v56 = vsub.f32 %v4593_v7, %v4641_v11 }
0x2bd9   :  { %v4648_v54 = vmul.f32 1.442695, %v4644_v9  ;;  %v4650_v62 = vmul.f32 1.442695, %v4645_v14  ;;  %v4652_v6 = vmul.f32 1.442695, %v4646_v4 }
0x2bda   :  { %v4654_v33 = vmul.f32 1.442695, %v4647_v56 }
0x2bdb   :  { %12838 = vpow2.f32 %v4648_v54 }
0x2bdc   :  { %12840 = vpow2.f32 %v4650_v62 }
0x2bdd   :  { %12842 = vpow2.f32 %v4652_v6 }
0x2bde   :  { %12844 = vpow2.f32 %v4654_v33 }
0x2be5   :  { %v12839_v32 = vpop.eup %12838 }
0x2be6   :  { %4661 = vperm.xlu0 %12632, %v12839_v32   ;;  %v12841_v5 = vpop.eup %12840 }
0x2be7   :  { %v12843_v59 = vpop.eup %12842 }
0x2be8   :  { %v12845_v15 = vpop.eup %12844 }
0x2bea   :  { %4664 = vperm.xlu0 %12632, %v12841_v5  }
0x2bee   :  { %4667 = vperm.xlu0 %12632, %v12843_v59  }
0x2bf2   :  { %4670 = vperm.xlu0 %12632, %v12845_v15  }
0x2c65   :  { %v4662_v31 = vpop.permute.xlu0 %4661 }
0x2c66   :  { %v4675_v11 = vrot.slane %v4662_v31, %v13723_v60 }
0x2c69   :  { %v4665_v23 = vpop.permute.xlu0 %4664 }
0x2c6a   :  { %v4679_v54 = vrot.slane %v4665_v23, %v13726_v50 }
0x2c6c   :  { %v4680_v7 = vsel %vm1549_vm5, %v4679_v54, %v4675_v11 }
0x2c6d   :  { %v4668_v9 = vpop.permute.xlu0 %4667 }
0x2c6e   :  { %v4684_v58 = vrot.slane %v4668_v9, %v13723_v60 }
0x2c71   :  { %v4671_v27 = vpop.permute.xlu0 %4670 }
0x2c72   :  { %v4688_v56 = vrot.slane %v4671_v27, %v13726_v50 }
0x2c74   :  { %v4689_v38 = vsel %vm1549_vm5, %v4688_v56, %v4684_v58 }
0x2c75   :  { %v4690_v61 = vsel %vm1560_vm6, %v4689_v38, %v4680_v7  ;;  %v16250_v38 = vld [vmem:[#allocation31_spill] sm:$0xff] }
0x2c76   :  { %v4692_v35 = vsel %vm1563_vm7, %v4690_v61, 0.0  ;;  %v16251_v61 = vld [vmem:[#allocation17_spill] sm:$0xff] }
0x2c77   :  { %4693 = vadd.xlane.f32.xlu0 %v4692_v35  ;;  %v16252_v35 = vld [vmem:[#allocation33_spill] sm:$0xff] }
0x2d04   :  { %v4694_v14 = vpop.xlane.xlu0 %4693 }
0x2d05   :  { %12846 = vrcp.f32 %v4694_v14  ;;  %v16253_v14 = vld [vmem:[#allocation18_spill] sm:$0xff] }
0x2d0f   :  { %v12847_v4 = vpop.eup %12846 }
0x2d10   :  { %v4704_v62 = vrot.slane %v12847_v4, %v13633_v26  ;;  %v4700_v31 = vrot.slane %v12847_v4, %v13627_v21  ;;  %v16254_v4 = vld [vmem:[#allocation35_spill] sm:$0xff] }
0x2d12   :  { %v4709_v6 = vmul.f32 %v12843_v59, %v4704_v62  ;;  %v4710_v33 = vmul.f32 %v12845_v15, %v4704_v62  ;;  %v4707_v23 = vmul.f32 %v12839_v32, %v4700_v31  ;;  %v4708_v9 = vmul.f32 %v12841_v5, %v4700_v31  ;;  %v16255_v62 = vld [vmem:[#allocation19_spill] sm:$0xff]  ;;  %v16258_v31 = vld [vmem:[#allocation37_spill] sm:$0xff] }
0x2d14   :  { %4803 = vperm.xlu1 %12633, %v4709_v6   ;;  %v16256_v6 = vld [vmem:[#allocation36_spill] sm:$0xff] }
0x2d18   :  { %4806 = vperm.xlu1 %12633, %v4710_v33   ;;  %v16257_v33 = vld [vmem:[#allocation20_spill] sm:$0xff] }
0x2d1c   :  { %4714 = vperm.xlu1 %12633, %v4707_v23   ;;  %v16259_v23 = vld [vmem:[#allocation21_spill] sm:$0xff] }
0x2d20   :  { %4717 = vperm.xlu1 %12633, %v4708_v9   ;;  %v16260_v9 = vld [vmem:[#allocation38_spill] sm:$0xff] }
0x2d93   :  { %v4804_v54 = vpop.permute.xlu1 %4803 }
0x2d94   :  { %v4811_v11 = vrot.slane %v4804_v54, %v13723_v60  ;;  %v16261_v54 = vld [vmem:[#allocation22_spill] sm:$0xff] }
0x2d97   :  { %v4807_v27 = vpop.permute.xlu1 %4806 }
0x2d98   :  { %v4815_v58 = vrot.slane %v4807_v27, %v13726_v50  ;;  %v16262_v27 = vld [vmem:[#allocation39_spill] sm:$0xff] }
0x2d9a   :  { %v4816_v56 = vsel %vm1549_vm5, %v4815_v58, %v4811_v11  ;;  %v16263_v11 = vld [vmem:[#allocation23_spill] sm:$0xff]  ;;  %v16264_v58 = vld [vmem:[#allocation40_spill] sm:$0xff] }
0x2d9b   :  { %10192 = vmatmul.mubr.msk.f32.vlgmr.msra.gmra.mrb[40].mxu0 %vm86_vm0, %v4816_v56  ;;  %v4715_v59 = vpop.permute.xlu1 %4714  ;;  %v16265_v56 = vld [vmem:[#allocation24_spill] sm:$0xff] }
0x2d9c   :  { %11406 = vmatpush1.bf16.msra.mxu0 %v13471_v42  ;;  %v4722_v32 = vrot.slane %v4715_v59, %v13723_v60  ;;  %v16266_v59 = vld [vmem:[#allocation41_spill] sm:$0xff] }
0x2d9d   :  { %11408 = vmatprep.subr.bf16.mxu0 %v13473_v44 }
0x2d9f   :  { %v4718_v15 = vpop.permute.xlu1 %4717 }
0x2da0   :  { %v4726_v5 = vrot.slane %v4718_v15, %v13726_v50  ;;  %11410 = vmatpush1.bf16.msra.mxu0 %v13478_v53  ;;  %v16267_v15 = vld [vmem:[#allocation26_spill] sm:$0xff] }
0x2da1   :  { %11412 = vmatprep.subr.bf16.mxu0 %v13481_v55 }
0x2da2   :  { %v4727_v7 = vsel %vm1549_vm5, %v4726_v5, %v4722_v32  ;;  %v16268_v32 = vld [vmem:[#allocation42_spill] sm:$0xff]  ;;  %v16269_v5 = vld [vmem:[#allocation28_spill] sm:$0xff] }
0x2da3   :  { %10185 = vmatmul.mubr.msk.f32.vlgmr.msra.gmra.mrb[36].mxu1 %vm86_vm0, %v4727_v7  ;;  %v16270_v7 = vmov 0.0|0.0  }
0x2da4   :  { %11342 = vmatpush1.bf16.msra.mxu1 %v13398_v12  ;;  %11414 = vmatpush1.bf16.msra.mxu0 %v13486_v3 }
0x2da5   :  { %11344 = vmatprep.subr.bf16.mxu1 %v13400_v13  ;;  %11416 = vmatprep.subr.bf16.mxu0 %v13489_v8 }
0x2da8   :  { %11346 = vmatpush1.bf16.msra.mxu1 %v13404_v10  ;;  %11418 = vmatpush1.bf16.msra.mxu0 %v13492_v18 }
0x2da9   :  { %11348 = vmatprep.subr.bf16.mxu1 %v13407_v17  ;;  %11420 = vmatprep.subr.bf16.mxu0 %v13495_v19 }
0x2dac   :  { %11350 = vmatpush1.bf16.msra.mxu1 %v13412_v24  ;;  %11422 = vmatpush1.bf16.msra.mxu0 %v13498_v36 }
0x2dad   :  { %11352 = vmatprep.subr.bf16.mxu1 %v13416_v25  ;;  %11424 = vmatprep.subr.bf16.mxu0 %v13501_v37 }
0x2db0   :  { %11354 = vmatpush1.bf16.msra.mxu1 %v13419_v30  ;;  %11426 = vmatpush1.bf16.msra.mxu0 %v13504_v47 }
0x2db1   :  { %11356 = vmatprep.subr.bf16.mxu1 %v13422_v34  ;;  %11428 = vmatprep.subr.bf16.mxu0 %v13507_v48 }
0x2db4   :  { %11358 = vmatpush1.bf16.msra.mxu1 %v13425_v40  ;;  %11430 = vmatpush1.bf16.msra.mxu0 %v13510_v63 }
0x2db5   :  { %11360 = vmatprep.subr.bf16.mxu1 %v13428_v41  ;;  %11432 = vmatprep.subr.bf16.mxu0 %v13513_v0 }
0x2db8   :  { %11362 = vmatpush1.bf16.msra.mxu1 %v13431_v45  ;;  %11434 = vmatpush1.bf16.msra.mxu0 %v13516_v16 }
0x2db9   :  { %11364 = vmatprep.subr.bf16.mxu1 %v13434_v46  ;;  %11436 = vmatprep.subr.bf16.mxu0 %v13519_v20 }
0x2dbc   :  { %11366 = vmatpush1.bf16.msra.mxu1 %v13437_v51  ;;  %11438 = vmatpush1.bf16.msra.mxu0 %v13525_v49 }
0x2dbd   :  { %11368 = vmatprep.subr.bf16.mxu1 %v13440_v52  ;;  %11440 = vmatprep.subr.bf16.mxu0 %v13532_v1 }
0x2dc0   :  { %11370 = vmatpush1.bf16.msra.mxu1 %v15993_v43  ;;  %11442 = vmatpush1.bf16.msra.mxu0 %v15994_v57 }
0x2dc1   :  { %11372 = vmatprep.subr.bf16.mxu1 %v15995_v39  ;;  %11444 = vmatprep.subr.bf16.mxu0 %v15996_v28 }
0x2dc4   :  { %11374 = vmatpush1.bf16.msra.mxu1 %v15997_v22  ;;  %11446 = vmatpush1.bf16.msra.mxu0 %v15998_v2 }
0x2dc5   :  { %11376 = vmatprep.subr.bf16.mxu1 %v15999_v29  ;;  %11448 = vmatprep.subr.bf16.mxu0 %v16250_v38 }
0x2dc8   :  { %11378 = vmatpush1.bf16.msra.mxu1 %v16251_v61  ;;  %11450 = vmatpush1.bf16.msra.mxu0 %v16252_v35 }
0x2dc9   :  { %11380 = vmatprep.subr.bf16.mxu1 %v16253_v14  ;;  %11452 = vmatprep.subr.bf16.mxu0 %v16254_v4 }
0x2dcc   :  { %11382 = vmatpush1.bf16.msra.mxu1 %v16255_v62  ;;  %11454 = vmatpush1.bf16.msra.mxu0 %v16256_v6 }
0x2dcd   :  { %11384 = vmatprep.subr.bf16.mxu1 %v16257_v33  ;;  %11456 = vmatprep.subr.bf16.mxu0 %v16258_v31  ;;  %v16283_v33 = vld [vmem:[#allocation47_spill] sm:$0xff] }
0x2dd0   :  { %11386 = vmatpush1.bf16.msra.mxu1 %v16259_v23  ;;  %11458 = vmatpush1.bf16.msra.mxu0 %v16260_v9  ;;  %v16271_v9 = vld [vmem:[#allocation30_spill] sm:$0xff] }
0x2dd1   :  { %11388 = vmatprep.subr.bf16.mxu1 %v16261_v54  ;;  %11460 = vmatprep.subr.bf16.mxu0 %v16262_v27  ;;  %v16272_v54 = vld [vmem:[#allocation32_spill] sm:$0xff]  ;;  %v16273_v27 = vld [vmem:[#allocation34_spill] sm:$0xff] }
0x2dd4   :  { %11390 = vmatpush1.bf16.msra.mxu1 %v16263_v11  ;;  %11462 = vmatpush1.bf16.msra.mxu0 %v16264_v58 }
0x2dd5   :  { %11392 = vmatprep.subr.bf16.mxu1 %v16265_v56  ;;  %11464 = vmatprep.subr.bf16.mxu0 %v16266_v59 }
0x2dd8   :  { %11394 = vmatpush1.bf16.msra.mxu1 %v16267_v15  ;;  %11466 = vmatpush1.bf16.msra.mxu0 %v16268_v32 }
0x2dd9   :  { %11396 = vmatprep.subr.bf16.mxu1 %v16269_v5  ;;  %11471 = vmatprep.subr.bf16.mxu0 %v16270_v7  ;;  %v16274_v5 = vld [vmem:[#allocation14_spill] sm:$0xff] }
0x2ddc   :  { %11398 = vmatpush1.bf16.msra.mxu1 %v16271_v9  ;;  %v16275_v9 = vld [vmem:[#allocation52_spill] sm:$0xff] }
0x2ddd   :  { %11400 = vmatprep.subr.bf16.mxu1 %v16272_v54 }
0x2de0   :  { %11402 = vmatpush1.bf16.msra.mxu1 %v16273_v27  ;;  %v16277_v27 = vld [vmem:[#allocation54_spill] sm:$0xff] }
0x2de1   :  { %11467 = vmatprep.subr.bf16.mxu1 %v16270_v7  ;;  %v16282_v7 = vld [vmem:[#allocation44_spill] sm:$0xff] }
0x2e6e   :  { %v4885_v58 = vpop.f32.mrb[40].mxu0 }
0x2e6f   :  { %v10193_v56 = vpop.f32.mrb[41].mxu0  ;;  %v4891_v11 = vrot.slane %v4885_v58, 7 }
0x2e70   :  { %v16278_v56 = vmov 0.0  }
0x2e76   :  { %v4796_v59 = vpop.f32.mrb[36].mxu1 }
0x2e77   :  { %v10186_v23 = vpop.f32.mrb[37].mxu1  ;;  %v4892_v15 = vsel %vm1560_vm6, %v4891_v11, %v4796_v59  ;;  %v16280_v11 = vld [vmem:[#allocation12_spill] sm:$0xff] }
0x2e78   :  { %4958 = vmatprep.mubr.f32.mxu1 %v4892_v15  ;;  %5029 = vmatprep.mubr.f32.mxu0 %v4892_v15  ;;  %v16279_v23 = vld [vmem:[#allocation11_spill] sm:$0xff] }
0x2e79   :  { %4959 = vmatmul.mubr.f32.vlgmr.msra.gmra.mrb[38].mxu1 %v16274_v5  ;;  %5030 = vmatmul.mubr.f32.vlgmr.msra.gmra.mrb[42].mxu0 %v16274_v5  ;;  %v16281_v15 = vld [vmem:[#allocation43_spill] sm:$0xff] }
0x2e7a   :  { %11470 = vmatpush3.bf16.msk.msra.mxu1 %vm13680_vm4, %v16275_v9  ;;  %11474 = vmatpush3.bf16.msk.msra.mxu0 %vm13680_vm4, %v16277_v27 }
0x2e7b   :  { %10205 = vmatprep.mubr.msk.f32.mxu0 %vm13165_vm8, %v16278_v56  ;;  %10198 = vmatprep.mubr.msk.f32.mxu1 %vm13165_vm8, %v16278_v56  ;;  %v16284_v56 = vld [vmem:[#allocation45_spill] sm:$0xff] }
0x2e7c   :  { %11476 = vmatprep.subr.bf16.mxu1 %v16279_v23  ;;  %11540 = vmatprep.subr.bf16.mxu0 %v16280_v11 }
0x2f4c   :  { %v4960_v58 = vpop.f32.mrb[38].mxu1  ;;  %v5031_v59 = vpop.f32.mrb[42].mxu0 }
0x2f4d   :  { %v4961_v5 = vadd.f32 %v4960_v58, %v16281_v15  ;;  %v4962_v54 = vpop.f32.mrb[39].mxu1  ;;  %v5033_v9 = vpop.f32.mrb[43].mxu0  ;;  %v5032_v4 = vadd.f32 %v5031_v59, %v16284_v56 }
0x2f4e   :  { %v4963_v31 = vadd.f32 %v4962_v54, %v16282_v7  ;;  %v5034_v6 = vadd.f32 %v5033_v9, %v16283_v33 }
0x2f4f   :  { %v9754_v32 = vmul.f32 -1.442695, %v4961_v5 }
0x2f50   :  { %v9755_v27 = vmul.f32 -1.442695, %v4963_v31  ;;  %v9756_v62 = vmul.f32 -1.442695, %v5034_v6 }
0x2f51   :  { %12848 = vpow2.f32 %v9754_v32 }
0x2f52   :  { %12850 = vpow2.f32 %v9755_v27  ;;  %v16285_v27 = vld [vmem:[#allocation27_spill] sm:$0xff] }
0x2f53   :  { %12852 = vpow2.f32 %v9756_v62 }
0x2f54   :  { %12854 = vtanh.f32 %v5032_v4 }
0x2f5b   :  { %v12849_v23 = vpop.eup %12848 }
0x2f5c   :  { %v12851_v14 = vpop.eup %12850  ;;  %v5039_v11 = vadd.f32 1.0, %v12849_v23 }
0x2f5d   :  { %v5045_v35 = vadd.f32 1.0, %v12851_v14  ;;  %v12853_v58 = vpop.eup %12852  ;;  %v16288_v14 = vld [vmem:[#allocation48_spill] sm:$0xff] }
0x2f5e   :  { %12856 = vrcp.f32 %v5039_v11  ;;  %v12855_v15 = vpop.eup %12854  ;;  %v5052_v32 = vadd.f32 1.0, %v12853_v58  ;;  %v16289_v58 = vld [vmem:[#allocation50_spill] sm:$0xff] }
0x2f5f   :  { %12858 = vrcp.f32 %v5045_v35 }
0x2f60   :  { %12860 = vrcp.f32 %v5052_v32  ;;  %v16291_v32 = vld [vmem:[#allocation53_spill] sm:$0xff] }
0x2f68   :  { %v12857_v54 = vpop.eup %12856 }
0x2f69   :  { %v12859_v5 = vpop.eup %12858  ;;  %v5056_v31 = vmul.f32 %v12857_v54, %v12855_v15  ;;  %v16290_v54 = vld [vmem:[#allocation51_spill] sm:$0xff] }
0x2f6a   :  { %v5055_v7 = vmul.f32 %v12859_v5, %v16285_v27  ;;  %v12861_v6 = vpop.eup %12860 }
0x2f6c   :  { %v14606_v9 = vadd.f32 %v5056_v31, %v5055_v7 }
0x2f6e   :  { %16286 = vst [vmem:[#allocation29_spill] sm:$0xff] %v14606_v9  ;;  %12862 = vtanh.f32 %v14606_v9 }
0x2f78   :  { %v12863_v23 = vpop.eup %12862 }
0x2f79   :  { %v14609_v62 = vmul.f32 %v12863_v23, %v12861_v6  ;;  %v16292_v6 = vld [vmem:[#allocation55_spill] sm:$0xff] }
0x2f7b   :  { %16287 = vst [vmem:[#allocation15_spill] sm:$0xff] %v14609_v62  ;;  %v5067_v35 = vrot.slane %v14609_v62, %v16288_v14 }
0x2f7d   :  { %v5075_v4 = vrot.slane %v5067_v35, %v16288_v14  ;;  %v5068_v11 = vcombine.high %v5067_v35, %v5067_v35 }
0x2f7f   :  { %v5086_v59 = vrot.slane %v5075_v4, %v13627_v21  ;;  %v5082_v15 = vrot.slane %v5068_v11, %v16288_v14 }
0x2f81   :  { %v5089_v7 = vmul.f32 %v5086_v59, %v16289_v58  ;;  %v5088_v5 = vmul.f32 %v5086_v59, %v16290_v54  ;;  %v5097_v31 = vrot.slane %v5082_v15, %v13627_v21 }
0x2f83   :  { %5092 = vadd.xlane.f32.xlu0 %v5089_v7  ;;  %5090 = vadd.xlane.f32.xlu1 %v5088_v5  ;;  %v5099_v27 = vmul.f32 %v5097_v31, %v16291_v32  ;;  %v5100_v23 = vmul.f32 %v5097_v31, %v16292_v6 }
0x2f87   :  { %5101 = vadd.xlane.f32.xlu0 %v5099_v27 }
0x2f8b   :  { %5103 = vadd.xlane.f32.xlu0 %v5100_v23 }
0x3010   :  { %v5093_v9 = vpop.xlane.xlu0 %5092  ;;  %v5091_v35 = vpop.xlane.xlu1 %5090 }
0x3011   :  { %5110 = vperm.xlu0 %12632, %v5091_v35  }
0x3014   :  { %v5102_v4 = vpop.xlane.xlu0 %5101 }
0x3015   :  { %5113 = vperm.xlu0 %12632, %v5093_v9   ;;  %5116 = vperm.xlu1 %12633, %v5102_v4  }
0x3018   :  { %v5104_v11 = vpop.xlane.xlu0 %5103 }
0x3019   :  { %5119 = vperm.xlu0 %12632, %v5104_v11  }
0x3090   :  { %v5111_v58 = vpop.permute.xlu0 %5110 }
0x3091   :  { %v5124_v5 = vrot.slane %v5111_v58, %v13723_v60 }
0x3094   :  { %v5114_v59 = vpop.permute.xlu0 %5113  ;;  %v5117_v54 = vpop.permute.xlu1 %5116 }
0x3095   :  { %v5128_v15 = vrot.slane %v5114_v59, %v13726_v50  ;;  %v5133_v27 = vrot.slane %v5117_v54, %v13723_v60 }
0x3097   :  { %v5129_v23 = vsel %vm1549_vm5, %v5128_v15, %v5124_v5 }
0x3098   :  { %v5120_v7 = vpop.permute.xlu0 %5119 }
0x3099   :  { %v5137_v31 = vrot.slane %v5120_v7, %v13726_v50 }
0x309b   :  { %v5138_v6 = vsel %vm1549_vm5, %v5137_v31, %v5133_v27 }
0x309c   :  { %v5139_v32 = vsel %vm1560_vm6, %v5138_v6, %v5129_v23 }
0x309d   :  { %v5141_v14 = vsel %vm1563_vm7, %v5139_v32, -inf }
0x309e   :  { %5142 = vmax.xlane.f32.xlu0 %v5141_v14 }
0x312b   :  { %v5143_v56 = vpop.xlane.xlu0 %5142 }
0x312c   :  { %v5148_v33 = vrot.slane %v5143_v56, %v13627_v21  ;;  %v5152_v59 = vrot.slane %v5143_v56, %v13633_v26 }
0x312e   :  { %v5155_v62 = vsub.f32 %v5091_v35, %v5148_v33  ;;  %v5156_v58 = vsub.f32 %v5093_v9, %v5148_v33  ;;  %v5157_v54 = vsub.f32 %v5102_v4, %v5152_v59  ;;  %v5158_v38 = vsub.f32 %v5104_v11, %v5152_v59 }
0x3130   :  { %v5159_v61 = vmul.f32 1.442695, %v5155_v62  ;;  %v5161_v7 = vmul.f32 1.442695, %v5156_v58  ;;  %v5163_v15 = vmul.f32 1.442695, %v5157_v54 }
0x3131   :  { %v5165_v5 = vmul.f32 1.442695, %v5158_v38 }
0x3132   :  { %12864 = vpow2.f32 %v5159_v61 }
0x3133   :  { %12866 = vpow2.f32 %v5161_v7 }
0x3134   :  { %12868 = vpow2.f32 %v5163_v15 }
0x3135   :  { %12870 = vpow2.f32 %v5165_v5 }
0x313c   :  { %v12865_v6 = vpop.eup %12864 }
0x313d   :  { %5172 = vperm.xlu1 %12633, %v12865_v6   ;;  %v12867_v14 = vpop.eup %12866 }
0x313e   :  { %v12869_v32 = vpop.eup %12868 }
0x313f   :  { %v12871_v27 = vpop.eup %12870 }
0x3141   :  { %5175 = vperm.xlu1 %12633, %v12867_v14  }
0x3145   :  { %5178 = vperm.xlu1 %12633, %v12869_v32  }
0x3149   :  { %5181 = vperm.xlu1 %12633, %v12871_v27  }
0x31bc   :  { %v5173_v56 = vpop.permute.xlu1 %5172 }
0x31bd   :  { %v5186_v35 = vrot.slane %v5173_v56, %v13723_v60 }
0x31c0   :  { %v5176_v33 = vpop.permute.xlu1 %5175 }
0x31c1   :  { %v5190_v61 = vrot.slane %v5176_v33, %v13726_v50 }
0x31c3   :  { %v5191_v11 = vsel %vm1549_vm5, %v5190_v61, %v5186_v35 }
0x31c4   :  { %v5179_v9 = vpop.permute.xlu1 %5178 }
0x31c5   :  { %v5195_v4 = vrot.slane %v5179_v9, %v13723_v60 }
0x31c8   :  { %v5182_v62 = vpop.permute.xlu1 %5181 }
0x31c9   :  { %v5199_v38 = vrot.slane %v5182_v62, %v13726_v50 }
0x31cb   :  { %v5200_v31 = vsel %vm1549_vm5, %v5199_v38, %v5195_v4 }
0x31cc   :  { %v5201_v23 = vsel %vm1560_vm6, %v5200_v31, %v5191_v11  ;;  %v16293_v31 = vld [vmem:[#allocation31_spill] sm:$0xff] }
0x31cd   :  { %v5203_v59 = vsel %vm1563_vm7, %v5201_v23, 0.0  ;;  %v16294_v23 = vld [vmem:[#allocation17_spill] sm:$0xff] }
0x31ce   :  { %5204 = vadd.xlane.f32.xlu1 %v5203_v59  ;;  %v16295_v59 = vld [vmem:[#allocation33_spill] sm:$0xff] }
0x325b   :  { %v5205_v58 = vpop.xlane.xlu1 %5204 }
0x325c   :  { %12872 = vrcp.f32 %v5205_v58  ;;  %v16296_v58 = vld [vmem:[#allocation18_spill] sm:$0xff] }
0x3266   :  { %v12873_v54 = vpop.eup %12872 }
0x3267   :  { %v5215_v7 = vrot.slane %v12873_v54, %v13633_v26  ;;  %v5211_v56 = vrot.slane %v12873_v54, %v13627_v21  ;;  %v16297_v54 = vld [vmem:[#allocation35_spill] sm:$0xff] }
0x3269   :  { %v5220_v15 = vmul.f32 %v12869_v32, %v5215_v7  ;;  %v5221_v5 = vmul.f32 %v12871_v27, %v5215_v7  ;;  %v5218_v33 = vmul.f32 %v12865_v6, %v5211_v56  ;;  %v5219_v9 = vmul.f32 %v12867_v14, %v5211_v56  ;;  %v16298_v7 = vld [vmem:[#allocation19_spill] sm:$0xff]  ;;  %v16301_v56 = vld [vmem:[#allocation37_spill] sm:$0xff] }
0x326b   :  { %5314 = vperm.xlu0 %12632, %v5220_v15   ;;  %v16299_v15 = vld [vmem:[#allocation36_spill] sm:$0xff] }
0x326f   :  { %5317 = vperm.xlu0 %12632, %v5221_v5   ;;  %v16300_v5 = vld [vmem:[#allocation20_spill] sm:$0xff] }
0x3273   :  { %5225 = vperm.xlu0 %12632, %v5218_v33   ;;  %v16302_v33 = vld [vmem:[#allocation21_spill] sm:$0xff] }
0x3277   :  { %5228 = vperm.xlu0 %12632, %v5219_v9   ;;  %v16303_v9 = vld [vmem:[#allocation38_spill] sm:$0xff] }
0x32ea   :  { %v5315_v61 = vpop.permute.xlu0 %5314 }
0x32eb   :  { %v5322_v35 = vrot.slane %v5315_v61, %v13723_v60  ;;  %v16304_v61 = vld [vmem:[#allocation22_spill] sm:$0xff] }
0x32ee   :  { %v5318_v62 = vpop.permute.xlu0 %5317 }
0x32ef   :  { %v5326_v4 = vrot.slane %v5318_v62, %v13726_v50  ;;  %v16305_v62 = vld [vmem:[#allocation39_spill] sm:$0xff] }
0x32f1   :  { %v5327_v38 = vsel %vm1549_vm5, %v5326_v4, %v5322_v35  ;;  %v16306_v35 = vld [vmem:[#allocation23_spill] sm:$0xff]  ;;  %v16307_v4 = vld [vmem:[#allocation40_spill] sm:$0xff] }
0x32f2   :  { %10206 = vmatmul.mubr.msk.f32.vlgmr.msra.gmra.mrb[44].mxu0 %vm86_vm0, %v5327_v38  ;;  %v5226_v32 = vpop.permute.xlu0 %5225  ;;  %v16308_v38 = vld [vmem:[#allocation24_spill] sm:$0xff] }
0x32f3   :  { %11542 = vmatpush1.bf16.msra.mxu0 %v13471_v42  ;;  %v5233_v6 = vrot.slane %v5226_v32, %v13723_v60  ;;  %v16309_v32 = vld [vmem:[#allocation41_spill] sm:$0xff] }
0x32f4   :  { %11544 = vmatprep.subr.bf16.mxu0 %v13473_v44 }
0x32f6   :  { %v5229_v27 = vpop.permute.xlu0 %5228 }
0x32f7   :  { %v5237_v14 = vrot.slane %v5229_v27, %v13726_v50  ;;  %11546 = vmatpush1.bf16.msra.mxu0 %v13478_v53  ;;  %v16310_v27 = vld [vmem:[#allocation26_spill] sm:$0xff] }
0x32f8   :  { %11548 = vmatprep.subr.bf16.mxu0 %v13481_v55 }
0x32f9   :  { %v5238_v11 = vsel %vm1549_vm5, %v5237_v14, %v5233_v6  ;;  %v16311_v6 = vld [vmem:[#allocation42_spill] sm:$0xff]  ;;  %v16312_v14 = vld [vmem:[#allocation28_spill] sm:$0xff] }
0x32fa   :  { %10199 = vmatmul.mubr.msk.f32.vlgmr.msra.gmra.mrb[40].mxu1 %vm86_vm0, %v5238_v11  ;;  %v16313_v11 = vmov 0.0|0.0  }
0x32fb   :  { %11478 = vmatpush1.bf16.msra.mxu1 %v13398_v12  ;;  %11550 = vmatpush1.bf16.msra.mxu0 %v13486_v3 }
0x32fc   :  { %11480 = vmatprep.subr.bf16.mxu1 %v13400_v13  ;;  %11552 = vmatprep.subr.bf16.mxu0 %v13489_v8 }
0x32ff   :  { %11482 = vmatpush1.bf16.msra.mxu1 %v13404_v10  ;;  %11554 = vmatpush1.bf16.msra.mxu0 %v13492_v18 }
0x3300   :  { %11484 = vmatprep.subr.bf16.mxu1 %v13407_v17  ;;  %11556 = vmatprep.subr.bf16.mxu0 %v13495_v19 }
0x3303   :  { %11486 = vmatpush1.bf16.msra.mxu1 %v13412_v24  ;;  %11558 = vmatpush1.bf16.msra.mxu0 %v13498_v36 }
0x3304   :  { %11488 = vmatprep.subr.bf16.mxu1 %v13416_v25  ;;  %11560 = vmatprep.subr.bf16.mxu0 %v13501_v37 }
0x3307   :  { %11490 = vmatpush1.bf16.msra.mxu1 %v13419_v30  ;;  %11562 = vmatpush1.bf16.msra.mxu0 %v13504_v47 }
0x3308   :  { %11492 = vmatprep.subr.bf16.mxu1 %v13422_v34  ;;  %11564 = vmatprep.subr.bf16.mxu0 %v13507_v48 }
0x330b   :  { %11494 = vmatpush1.bf16.msra.mxu1 %v13425_v40  ;;  %11566 = vmatpush1.bf16.msra.mxu0 %v13510_v63 }
0x330c   :  { %11496 = vmatprep.subr.bf16.mxu1 %v13428_v41  ;;  %11568 = vmatprep.subr.bf16.mxu0 %v13513_v0 }
0x330f   :  { %11498 = vmatpush1.bf16.msra.mxu1 %v13431_v45  ;;  %11570 = vmatpush1.bf16.msra.mxu0 %v13516_v16 }
0x3310   :  { %11500 = vmatprep.subr.bf16.mxu1 %v13434_v46  ;;  %11572 = vmatprep.subr.bf16.mxu0 %v13519_v20 }
0x3313   :  { %11502 = vmatpush1.bf16.msra.mxu1 %v13437_v51  ;;  %11574 = vmatpush1.bf16.msra.mxu0 %v13525_v49 }
0x3314   :  { %11504 = vmatprep.subr.bf16.mxu1 %v13440_v52  ;;  %11576 = vmatprep.subr.bf16.mxu0 %v13532_v1 }
0x3317   :  { %11506 = vmatpush1.bf16.msra.mxu1 %v15993_v43  ;;  %11578 = vmatpush1.bf16.msra.mxu0 %v15994_v57 }
0x3318   :  { %11508 = vmatprep.subr.bf16.mxu1 %v15995_v39  ;;  %11580 = vmatprep.subr.bf16.mxu0 %v15996_v28 }
0x331b   :  { %11510 = vmatpush1.bf16.msra.mxu1 %v15997_v22  ;;  %11582 = vmatpush1.bf16.msra.mxu0 %v15998_v2 }
0x331c   :  { %11512 = vmatprep.subr.bf16.mxu1 %v15999_v29  ;;  %11584 = vmatprep.subr.bf16.mxu0 %v16293_v31 }
0x331f   :  { %11514 = vmatpush1.bf16.msra.mxu1 %v16294_v23  ;;  %11586 = vmatpush1.bf16.msra.mxu0 %v16295_v59 }
0x3320   :  { %11516 = vmatprep.subr.bf16.mxu1 %v16296_v58  ;;  %11588 = vmatprep.subr.bf16.mxu0 %v16297_v54 }
0x3323   :  { %11518 = vmatpush1.bf16.msra.mxu1 %v16298_v7  ;;  %11590 = vmatpush1.bf16.msra.mxu0 %v16299_v15 }
0x3324   :  { %11520 = vmatprep.subr.bf16.mxu1 %v16300_v5  ;;  %11592 = vmatprep.subr.bf16.mxu0 %v16301_v56  ;;  %v16326_v5 = vld [vmem:[#allocation47_spill] sm:$0xff] }
0x3327   :  { %11522 = vmatpush1.bf16.msra.mxu1 %v16302_v33  ;;  %11594 = vmatpush1.bf16.msra.mxu0 %v16303_v9  ;;  %v16314_v9 = vld [vmem:[#allocation30_spill] sm:$0xff] }
0x3328   :  { %11524 = vmatprep.subr.bf16.mxu1 %v16304_v61  ;;  %11596 = vmatprep.subr.bf16.mxu0 %v16305_v62  ;;  %v16315_v61 = vld [vmem:[#allocation32_spill] sm:$0xff]  ;;  %v16316_v62 = vld [vmem:[#allocation34_spill] sm:$0xff] }
0x332b   :  { %11526 = vmatpush1.bf16.msra.mxu1 %v16306_v35  ;;  %11598 = vmatpush1.bf16.msra.mxu0 %v16307_v4 }
0x332c   :  { %11528 = vmatprep.subr.bf16.mxu1 %v16308_v38  ;;  %11600 = vmatprep.subr.bf16.mxu0 %v16309_v32 }
0x332f   :  { %11530 = vmatpush1.bf16.msra.mxu1 %v16310_v27  ;;  %11602 = vmatpush1.bf16.msra.mxu0 %v16311_v6 }
0x3330   :  { %11532 = vmatprep.subr.bf16.mxu1 %v16312_v14  ;;  %11607 = vmatprep.subr.bf16.mxu0 %v16313_v11  ;;  %v16317_v14 = vld [vmem:[#allocation15_spill] sm:$0xff] }
0x3333   :  { %11534 = vmatpush1.bf16.msra.mxu1 %v16314_v9  ;;  %v16318_v9 = vld [vmem:[#allocation52_spill] sm:$0xff] }
0x3334   :  { %11536 = vmatprep.subr.bf16.mxu1 %v16315_v61 }
0x3337   :  { %11538 = vmatpush1.bf16.msra.mxu1 %v16316_v62  ;;  %v16320_v62 = vld [vmem:[#allocation54_spill] sm:$0xff] }
0x3338   :  { %11603 = vmatprep.subr.bf16.mxu1 %v16313_v11  ;;  %v16325_v11 = vld [vmem:[#allocation44_spill] sm:$0xff] }
0x33c5   :  { %v5396_v4 = vpop.f32.mrb[44].mxu0 }
0x33c6   :  { %v10207_v38 = vpop.f32.mrb[45].mxu0  ;;  %v5402_v35 = vrot.slane %v5396_v4, 7 }
0x33c7   :  { %v16321_v38 = vmov 0.0  }
0x33cd   :  { %v5307_v32 = vpop.f32.mrb[40].mxu1 }
0x33ce   :  { %v10200_v33 = vpop.f32.mrb[41].mxu1  ;;  %v5403_v27 = vsel %vm1560_vm6, %v5402_v35, %v5307_v32  ;;  %v16323_v35 = vld [vmem:[#allocation12_spill] sm:$0xff] }
0x33cf   :  { %5469 = vmatprep.mubr.f32.mxu1 %v5403_v27  ;;  %5540 = vmatprep.mubr.f32.mxu0 %v5403_v27  ;;  %v16322_v33 = vld [vmem:[#allocation11_spill] sm:$0xff] }
0x33d0   :  { %5470 = vmatmul.mubr.f32.vlgmr.msra.gmra.mrb[42].mxu1 %v16317_v14  ;;  %5541 = vmatmul.mubr.f32.vlgmr.msra.gmra.mrb[46].mxu0 %v16317_v14  ;;  %v16324_v27 = vld [vmem:[#allocation43_spill] sm:$0xff] }
0x33d1   :  { %11606 = vmatpush3.bf16.msk.msra.mxu1 %vm13680_vm4, %v16318_v9  ;;  %11610 = vmatpush3.bf16.msk.msra.mxu0 %vm13680_vm4, %v16320_v62 }
0x33d2   :  { %10219 = vmatprep.mubr.msk.f32.mxu0 %vm13165_vm8, %v16321_v38  ;;  %10212 = vmatprep.mubr.msk.f32.mxu1 %vm13165_vm8, %v16321_v38  ;;  %v16327_v38 = vld [vmem:[#allocation45_spill] sm:$0xff] }
0x33d3   :  { %11612 = vmatprep.subr.bf16.mxu1 %v16322_v33  ;;  %11676 = vmatprep.subr.bf16.mxu0 %v16323_v35 }
0x34a3   :  { %v5471_v4 = vpop.f32.mrb[42].mxu1  ;;  %v5542_v32 = vpop.f32.mrb[46].mxu0 }
0x34a4   :  { %v5472_v14 = vadd.f32 %v5471_v4, %v16324_v27  ;;  %v5473_v61 = vpop.f32.mrb[43].mxu1  ;;  %v5544_v9 = vpop.f32.mrb[47].mxu0  ;;  %v5543_v54 = vadd.f32 %v5542_v32, %v16327_v38 }
0x34a5   :  { %v5474_v56 = vadd.f32 %v5473_v61, %v16325_v11  ;;  %v5545_v15 = vadd.f32 %v5544_v9, %v16326_v5 }
0x34a6   :  { %v9763_v6 = vmul.f32 -1.442695, %v5472_v14 }
0x34a7   :  { %v9764_v62 = vmul.f32 -1.442695, %v5474_v56  ;;  %v9765_v7 = vmul.f32 -1.442695, %v5545_v15 }
0x34a8   :  { %12874 = vpow2.f32 %v9763_v6 }
0x34a9   :  { %12876 = vpow2.f32 %v9764_v62  ;;  %v16328_v62 = vld [vmem:[#allocation29_spill] sm:$0xff] }
0x34aa   :  { %12878 = vpow2.f32 %v9765_v7 }
0x34ab   :  { %12880 = vtanh.f32 %v5543_v54 }
0x34b2   :  { %v12875_v33 = vpop.eup %12874 }
0x34b3   :  { %v12877_v58 = vpop.eup %12876  ;;  %v5550_v35 = vadd.f32 1.0, %v12875_v33 }
0x34b4   :  { %v5556_v59 = vadd.f32 1.0, %v12877_v58  ;;  %v12879_v4 = vpop.eup %12878  ;;  %v16331_v58 = vld [vmem:[#allocation48_spill] sm:$0xff] }
0x34b5   :  { %12882 = vrcp.f32 %v5550_v35  ;;  %v12881_v27 = vpop.eup %12880  ;;  %v5563_v6 = vadd.f32 1.0, %v12879_v4  ;;  %v16332_v4 = vld [vmem:[#allocation50_spill] sm:$0xff] }
0x34b6   :  { %12884 = vrcp.f32 %v5556_v59 }
0x34b7   :  { %12886 = vrcp.f32 %v5563_v6  ;;  %v16334_v6 = vld [vmem:[#allocation53_spill] sm:$0xff] }
0x34bf   :  { %v12883_v61 = vpop.eup %12882 }
0x34c0   :  { %v12885_v14 = vpop.eup %12884  ;;  %v5567_v56 = vmul.f32 %v12883_v61, %v12881_v27  ;;  %v16333_v61 = vld [vmem:[#allocation51_spill] sm:$0xff] }
0x34c1   :  { %v5566_v11 = vmul.f32 %v12885_v14, %v16328_v62  ;;  %v12887_v15 = vpop.eup %12886 }
0x34c3   :  { %v14733_v9 = vadd.f32 %v5567_v56, %v5566_v11 }
0x34c5   :  { %16329 = vst [vmem:[#allocation46_spill] sm:$0xff] %v14733_v9  ;;  %12888 = vtanh.f32 %v14733_v9 }
0x34cf   :  { %v12889_v33 = vpop.eup %12888 }
0x34d0   :  { %v14736_v7 = vmul.f32 %v12889_v33, %v12887_v15  ;;  %v16335_v15 = vld [vmem:[#allocation55_spill] sm:$0xff] }
0x34d2   :  { %16330 = vst [vmem:[#allocation16_spill] sm:$0xff] %v14736_v7  ;;  %v5578_v59 = vrot.slane %v14736_v7, %v16331_v58 }
0x34d4   :  { %v5586_v54 = vrot.slane %v5578_v59, %v16331_v58  ;;  %v5579_v35 = vcombine.high %v5578_v59, %v5578_v59 }
0x34d6   :  { %v5597_v32 = vrot.slane %v5586_v54, %v13627_v21  ;;  %v5593_v27 = vrot.slane %v5579_v35, %v16331_v58 }
0x34d8   :  { %v5600_v11 = vmul.f32 %v5597_v32, %v16332_v4  ;;  %v5599_v14 = vmul.f32 %v5597_v32, %v16333_v61  ;;  %v5608_v56 = vrot.slane %v5593_v27, %v13627_v21 }
0x34da   :  { %5603 = vadd.xlane.f32.xlu0 %v5600_v11  ;;  %5601 = vadd.xlane.f32.xlu1 %v5599_v14  ;;  %v5610_v62 = vmul.f32 %v5608_v56, %v16334_v6  ;;  %v5611_v33 = vmul.f32 %v5608_v56, %v16335_v15 }
0x34de   :  { %5612 = vadd.xlane.f32.xlu1 %v5610_v62 }
0x34e2   :  { %5614 = vadd.xlane.f32.xlu1 %v5611_v33 }
0x3567   :  { %v5602_v9 = vpop.xlane.xlu1 %5601  ;;  %v5604_v59 = vpop.xlane.xlu0 %5603 }
0x3568   :  { %5621 = vperm.xlu1 %12633, %v5602_v9  }
0x356b   :  { %v5613_v54 = vpop.xlane.xlu1 %5612 }
0x356c   :  { %5624 = vperm.xlu1 %12633, %v5604_v59  }
0x356f   :  { %v5615_v35 = vpop.xlane.xlu1 %5614 }
0x3570   :  { %5627 = vperm.xlu1 %12633, %v5613_v54   ;;  %5630 = vperm.xlu0 %12632, %v5615_v35  }
0x35e7   :  { %v5622_v4 = vpop.permute.xlu1 %5621 }
0x35e8   :  { %v5635_v6 = vrot.slane %v5622_v4, %v13723_v60 }
0x35eb   :  { %v5625_v32 = vpop.permute.xlu1 %5624 }
0x35ec   :  { %v5639_v27 = vrot.slane %v5625_v32, %v13726_v50 }
0x35ee   :  { %v5640_v33 = vsel %vm1549_vm5, %v5639_v27, %v5635_v6 }
0x35ef   :  { %v5631_v11 = vpop.permute.xlu0 %5630  ;;  %v5628_v14 = vpop.permute.xlu1 %5627 }
0x35f0   :  { %v5648_v62 = vrot.slane %v5631_v11, %v13726_v50  ;;  %v5644_v56 = vrot.slane %v5628_v14, %v13723_v60 }
0x35f2   :  { %v5649_v15 = vsel %vm1549_vm5, %v5648_v62, %v5644_v56 }
0x35f3   :  { %v5650_v61 = vsel %vm1560_vm6, %v5649_v15, %v5640_v33 }
0x35f4   :  { %v5652_v58 = vsel %vm1563_vm7, %v5650_v61, -inf }
0x35f5   :  { %5653 = vmax.xlane.f32.xlu1 %v5652_v58 }
0x3682   :  { %v5654_v38 = vpop.xlane.xlu1 %5653 }
0x3683   :  { %v5659_v32 = vrot.slane %v5654_v38, %v13627_v21  ;;  %v5663_v5 = vrot.slane %v5654_v38, %v13633_v26 }
0x3685   :  { %v5666_v7 = vsub.f32 %v5602_v9, %v5659_v32  ;;  %v5667_v4 = vsub.f32 %v5604_v59, %v5659_v32  ;;  %v5668_v11 = vsub.f32 %v5613_v54, %v5663_v5  ;;  %v5669_v31 = vsub.f32 %v5615_v35, %v5663_v5 }
0x3687   :  { %v5670_v23 = vmul.f32 1.442695, %v5666_v7  ;;  %v5672_v14 = vmul.f32 1.442695, %v5667_v4  ;;  %v5674_v6 = vmul.f32 1.442695, %v5668_v11 }
0x3688   :  { %v5676_v27 = vmul.f32 1.442695, %v5669_v31 }
0x3689   :  { %12890 = vpow2.f32 %v5670_v23 }
0x368a   :  { %12892 = vpow2.f32 %v5672_v14 }
0x368b   :  { %12894 = vpow2.f32 %v5674_v6 }
0x368c   :  { %12896 = vpow2.f32 %v5676_v27 }
0x3693   :  { %v12891_v15 = vpop.eup %12890 }
0x3694   :  { %5683 = vperm.xlu0 %12632, %v12891_v15   ;;  %v12893_v58 = vpop.eup %12892 }
0x3695   :  { %v12895_v61 = vpop.eup %12894 }
0x3696   :  { %v12897_v62 = vpop.eup %12896 }
0x3698   :  { %5686 = vperm.xlu0 %12632, %v12893_v58  }
0x369c   :  { %5689 = vperm.xlu0 %12632, %v12895_v61  }
0x36a0   :  { %5692 = vperm.xlu0 %12632, %v12897_v62  }
0x3713   :  { %v5684_v38 = vpop.permute.xlu0 %5683 }
0x3714   :  { %v5697_v5 = vrot.slane %v5684_v38, %v13723_v60 }
0x3717   :  { %v5687_v9 = vpop.permute.xlu0 %5686 }
0x3718   :  { %v5701_v23 = vrot.slane %v5687_v9, %v13726_v50 }
0x371a   :  { %v5702_v35 = vsel %vm1549_vm5, %v5701_v23, %v5697_v5 }
0x371b   :  { %v5690_v7 = vpop.permute.xlu0 %5689 }
0x371c   :  { %v5706_v54 = vrot.slane %v5690_v7, %v13723_v60 }
0x371f   :  { %v5693_v59 = vpop.permute.xlu0 %5692 }
0x3720   :  { %v5710_v31 = vrot.slane %v5693_v59, %v13726_v50 }
0x3722   :  { %v5711_v56 = vsel %vm1549_vm5, %v5710_v31, %v5706_v54 }
0x3723   :  { %v5712_v33 = vsel %vm1560_vm6, %v5711_v56, %v5702_v35  ;;  %v16336_v56 = vld [vmem:[#allocation31_spill] sm:$0xff] }
0x3724   :  { %v5714_v32 = vsel %vm1563_vm7, %v5712_v33, 0.0  ;;  %v16337_v33 = vld [vmem:[#allocation17_spill] sm:$0xff] }
0x3725   :  { %5715 = vadd.xlane.f32.xlu0 %v5714_v32  ;;  %v16338_v32 = vld [vmem:[#allocation33_spill] sm:$0xff] }
0x37b2   :  { %v5716_v4 = vpop.xlane.xlu0 %5715 }
0x37b3   :  { %12898 = vrcp.f32 %v5716_v4  ;;  %v16339_v4 = vld [vmem:[#allocation18_spill] sm:$0xff] }
0x37bd   :  { %v12899_v11 = vpop.eup %12898 }
0x37be   :  { %v5726_v14 = vrot.slane %v12899_v11, %v13633_v26  ;;  %v5722_v38 = vrot.slane %v12899_v11, %v13627_v21  ;;  %v16340_v11 = vld [vmem:[#allocation35_spill] sm:$0xff] }
0x37c0   :  { %v5731_v6 = vmul.f32 %v12895_v61, %v5726_v14  ;;  %v5732_v27 = vmul.f32 %v12897_v62, %v5726_v14  ;;  %v5729_v9 = vmul.f32 %v12891_v15, %v5722_v38  ;;  %v5730_v7 = vmul.f32 %v12893_v58, %v5722_v38  ;;  %v16341_v14 = vld [vmem:[#allocation19_spill] sm:$0xff]  ;;  %v16344_v38 = vld [vmem:[#allocation37_spill] sm:$0xff] }
0x37c2   :  { %5825 = vperm.xlu1 %12633, %v5731_v6   ;;  %v16342_v6 = vld [vmem:[#allocation36_spill] sm:$0xff] }
0x37c6   :  { %5828 = vperm.xlu1 %12633, %v5732_v27   ;;  %v16343_v27 = vld [vmem:[#allocation20_spill] sm:$0xff] }
0x37ca   :  { %5736 = vperm.xlu1 %12633, %v5729_v9   ;;  %v16345_v9 = vld [vmem:[#allocation21_spill] sm:$0xff] }
0x37ce   :  { %5739 = vperm.xlu1 %12633, %v5730_v7   ;;  %v16346_v7 = vld [vmem:[#allocation38_spill] sm:$0xff] }
0x3841   :  { %v5826_v23 = vpop.permute.xlu1 %5825 }
0x3842   :  { %v5833_v5 = vrot.slane %v5826_v23, %v13723_v60  ;;  %v16347_v23 = vld [vmem:[#allocation22_spill] sm:$0xff] }
0x3845   :  { %v5829_v59 = vpop.permute.xlu1 %5828 }
0x3846   :  { %v5837_v54 = vrot.slane %v5829_v59, %v13726_v50  ;;  %v16348_v59 = vld [vmem:[#allocation39_spill] sm:$0xff] }
0x3848   :  { %v5838_v31 = vsel %vm1549_vm5, %v5837_v54, %v5833_v5  ;;  %v16349_v5 = vld [vmem:[#allocation23_spill] sm:$0xff]  ;;  %v16350_v54 = vld [vmem:[#allocation40_spill] sm:$0xff] }
0x3849   :  { %10220 = vmatmul.mubr.msk.f32.vlgmr.msra.gmra.mrb[48].mxu0 %vm86_vm0, %v5838_v31  ;;  %v5737_v61 = vpop.permute.xlu1 %5736  ;;  %v16351_v31 = vld [vmem:[#allocation24_spill] sm:$0xff] }
0x384a   :  { %11678 = vmatpush1.bf16.msra.mxu0 %v13471_v42  ;;  %v5744_v15 = vrot.slane %v5737_v61, %v13723_v60  ;;  %v16352_v61 = vld [vmem:[#allocation41_spill] sm:$0xff] }
0x384b   :  { %11680 = vmatprep.subr.bf16.mxu0 %v13473_v44 }
0x384d   :  { %v5740_v62 = vpop.permute.xlu1 %5739 }
0x384e   :  { %v5748_v58 = vrot.slane %v5740_v62, %v13726_v50  ;;  %11682 = vmatpush1.bf16.msra.mxu0 %v13478_v53  ;;  %v16353_v62 = vld [vmem:[#allocation26_spill] sm:$0xff] }
0x384f   :  { %11684 = vmatprep.subr.bf16.mxu0 %v13481_v55 }
0x3850   :  { %v5749_v35 = vsel %vm1549_vm5, %v5748_v58, %v5744_v15  ;;  %v16354_v15 = vld [vmem:[#allocation42_spill] sm:$0xff]  ;;  %v16355_v58 = vld [vmem:[#allocation28_spill] sm:$0xff] }
0x3851   :  { %10213 = vmatmul.mubr.msk.f32.vlgmr.msra.gmra.mrb[44].mxu1 %vm86_vm0, %v5749_v35  ;;  %v16356_v35 = vmov 0.0|0.0  }
0x3852   :  { %11614 = vmatpush1.bf16.msra.mxu1 %v13398_v12  ;;  %11686 = vmatpush1.bf16.msra.mxu0 %v13486_v3 }
0x3853   :  { %11616 = vmatprep.subr.bf16.mxu1 %v13400_v13  ;;  %11688 = vmatprep.subr.bf16.mxu0 %v13489_v8 }
0x3856   :  { %11618 = vmatpush1.bf16.msra.mxu1 %v13404_v10  ;;  %11690 = vmatpush1.bf16.msra.mxu0 %v13492_v18 }
0x3857   :  { %11620 = vmatprep.subr.bf16.mxu1 %v13407_v17  ;;  %11692 = vmatprep.subr.bf16.mxu0 %v13495_v19 }
0x385a   :  { %11622 = vmatpush1.bf16.msra.mxu1 %v13412_v24  ;;  %11694 = vmatpush1.bf16.msra.mxu0 %v13498_v36 }
0x385b   :  { %11624 = vmatprep.subr.bf16.mxu1 %v13416_v25  ;;  %11696 = vmatprep.subr.bf16.mxu0 %v13501_v37 }
0x385e   :  { %11626 = vmatpush1.bf16.msra.mxu1 %v13419_v30  ;;  %11698 = vmatpush1.bf16.msra.mxu0 %v13504_v47 }
0x385f   :  { %11628 = vmatprep.subr.bf16.mxu1 %v13422_v34  ;;  %11700 = vmatprep.subr.bf16.mxu0 %v13507_v48 }
0x3862   :  { %11630 = vmatpush1.bf16.msra.mxu1 %v13425_v40  ;;  %11702 = vmatpush1.bf16.msra.mxu0 %v13510_v63 }
0x3863   :  { %11632 = vmatprep.subr.bf16.mxu1 %v13428_v41  ;;  %11704 = vmatprep.subr.bf16.mxu0 %v13513_v0 }
0x3866   :  { %11634 = vmatpush1.bf16.msra.mxu1 %v13431_v45  ;;  %11706 = vmatpush1.bf16.msra.mxu0 %v13516_v16 }
0x3867   :  { %11636 = vmatprep.subr.bf16.mxu1 %v13434_v46  ;;  %11708 = vmatprep.subr.bf16.mxu0 %v13519_v20 }
0x386a   :  { %11638 = vmatpush1.bf16.msra.mxu1 %v13437_v51  ;;  %11710 = vmatpush1.bf16.msra.mxu0 %v13525_v49 }
0x386b   :  { %11640 = vmatprep.subr.bf16.mxu1 %v13440_v52  ;;  %11712 = vmatprep.subr.bf16.mxu0 %v13532_v1 }
0x386e   :  { %11642 = vmatpush1.bf16.msra.mxu1 %v15993_v43  ;;  %11714 = vmatpush1.bf16.msra.mxu0 %v15994_v57 }
0x386f   :  { %11644 = vmatprep.subr.bf16.mxu1 %v15995_v39  ;;  %11716 = vmatprep.subr.bf16.mxu0 %v15996_v28 }
0x3872   :  { %11646 = vmatpush1.bf16.msra.mxu1 %v15997_v22  ;;  %11718 = vmatpush1.bf16.msra.mxu0 %v15998_v2 }
0x3873   :  { %11648 = vmatprep.subr.bf16.mxu1 %v15999_v29  ;;  %11720 = vmatprep.subr.bf16.mxu0 %v16336_v56 }
0x3876   :  { %11650 = vmatpush1.bf16.msra.mxu1 %v16337_v33  ;;  %11722 = vmatpush1.bf16.msra.mxu0 %v16338_v32 }
0x3877   :  { %11652 = vmatprep.subr.bf16.mxu1 %v16339_v4  ;;  %11724 = vmatprep.subr.bf16.mxu0 %v16340_v11 }
0x387a   :  { %11654 = vmatpush1.bf16.msra.mxu1 %v16341_v14  ;;  %11726 = vmatpush1.bf16.msra.mxu0 %v16342_v6 }
0x387b   :  { %11656 = vmatprep.subr.bf16.mxu1 %v16343_v27  ;;  %11728 = vmatprep.subr.bf16.mxu0 %v16344_v38  ;;  %v16369_v27 = vld [vmem:[#allocation47_spill] sm:$0xff] }
0x387e   :  { %11658 = vmatpush1.bf16.msra.mxu1 %v16345_v9  ;;  %11730 = vmatpush1.bf16.msra.mxu0 %v16346_v7  ;;  %v16357_v7 = vld [vmem:[#allocation30_spill] sm:$0xff] }
0x387f   :  { %11660 = vmatprep.subr.bf16.mxu1 %v16347_v23  ;;  %11732 = vmatprep.subr.bf16.mxu0 %v16348_v59  ;;  %v16358_v23 = vld [vmem:[#allocation32_spill] sm:$0xff]  ;;  %v16359_v59 = vld [vmem:[#allocation34_spill] sm:$0xff] }
0x3882   :  { %11662 = vmatpush1.bf16.msra.mxu1 %v16349_v5  ;;  %11734 = vmatpush1.bf16.msra.mxu0 %v16350_v54 }
0x3883   :  { %11664 = vmatprep.subr.bf16.mxu1 %v16351_v31  ;;  %11736 = vmatprep.subr.bf16.mxu0 %v16352_v61 }
0x3886   :  { %11666 = vmatpush1.bf16.msra.mxu1 %v16353_v62  ;;  %11738 = vmatpush1.bf16.msra.mxu0 %v16354_v15 }
0x3887   :  { %11668 = vmatprep.subr.bf16.mxu1 %v16355_v58  ;;  %11743 = vmatprep.subr.bf16.mxu0 %v16356_v35  ;;  %v16360_v58 = vld [vmem:[#allocation16_spill] sm:$0xff] }
0x388a   :  { %11670 = vmatpush1.bf16.msra.mxu1 %v16357_v7  ;;  %v16361_v7 = vld [vmem:[#allocation52_spill] sm:$0xff] }
0x388b   :  { %11672 = vmatprep.subr.bf16.mxu1 %v16358_v23 }
0x388e   :  { %11674 = vmatpush1.bf16.msra.mxu1 %v16359_v59  ;;  %v16363_v59 = vld [vmem:[#allocation54_spill] sm:$0xff] }
0x388f   :  { %11739 = vmatprep.subr.bf16.mxu1 %v16356_v35  ;;  %v16368_v35 = vld [vmem:[#allocation44_spill] sm:$0xff] }
0x391c   :  { %v5907_v54 = vpop.f32.mrb[48].mxu0 }
0x391d   :  { %v10221_v31 = vpop.f32.mrb[49].mxu0  ;;  %v5913_v5 = vrot.slane %v5907_v54, 7 }
0x391e   :  { %v16364_v31 = vmov 0.0  }
0x3924   :  { %v5818_v61 = vpop.f32.mrb[44].mxu1 }
0x3925   :  { %v10214_v9 = vpop.f32.mrb[45].mxu1  ;;  %v5914_v62 = vsel %vm1560_vm6, %v5913_v5, %v5818_v61  ;;  %v16366_v5 = vld [vmem:[#allocation12_spill] sm:$0xff] }
0x3926   :  { %5980 = vmatprep.mubr.f32.mxu1 %v5914_v62  ;;  %6051 = vmatprep.mubr.f32.mxu0 %v5914_v62  ;;  %v16365_v9 = vld [vmem:[#allocation11_spill] sm:$0xff] }
0x3927   :  { %5981 = vmatmul.mubr.f32.vlgmr.msra.gmra.mrb[46].mxu1 %v16360_v58  ;;  %6052 = vmatmul.mubr.f32.vlgmr.msra.gmra.mrb[50].mxu0 %v16360_v58  ;;  %v16367_v62 = vld [vmem:[#allocation43_spill] sm:$0xff] }
0x3928   :  { %11742 = vmatpush3.bf16.msk.msra.mxu1 %vm13680_vm4, %v16361_v7  ;;  %11746 = vmatpush3.bf16.msk.msra.mxu0 %vm13680_vm4, %v16363_v59 }
0x3929   :  { %10233 = vmatprep.mubr.msk.f32.mxu0 %vm13165_vm8, %v16364_v31  ;;  %10226 = vmatprep.mubr.msk.f32.mxu1 %vm13165_vm8, %v16364_v31  ;;  %v16370_v31 = vld [vmem:[#allocation45_spill] sm:$0xff] }
0x392a   :  { %11748 = vmatprep.subr.bf16.mxu1 %v16365_v9  ;;  %11812 = vmatprep.subr.bf16.mxu0 %v16366_v5 }
0x39fa   :  { %v5982_v54 = vpop.f32.mrb[46].mxu1  ;;  %v6053_v61 = vpop.f32.mrb[50].mxu0 }
0x39fb   :  { %v5983_v58 = vadd.f32 %v5982_v54, %v16367_v62  ;;  %v5984_v23 = vpop.f32.mrb[47].mxu1  ;;  %v6055_v7 = vpop.f32.mrb[51].mxu0  ;;  %v6054_v11 = vadd.f32 %v6053_v61, %v16370_v31 }
0x39fc   :  { %v5985_v38 = vadd.f32 %v5984_v23, %v16368_v35  ;;  %v6056_v6 = vadd.f32 %v6055_v7, %v16369_v27 }
0x39fd   :  { %v9772_v15 = vmul.f32 -1.442695, %v5983_v58 }
0x39fe   :  { %v9773_v59 = vmul.f32 -1.442695, %v5985_v38  ;;  %v9774_v14 = vmul.f32 -1.442695, %v6056_v6 }
0x39ff   :  { %12900 = vpow2.f32 %v9772_v15 }
0x3a00   :  { %12902 = vpow2.f32 %v9773_v59  ;;  %v16371_v59 = vld [vmem:[#allocation46_spill] sm:$0xff] }
0x3a01   :  { %12904 = vpow2.f32 %v9774_v14 }
0x3a02   :  { %12906 = vtanh.f32 %v6054_v11 }
0x3a09   :  { %v12901_v9 = vpop.eup %12900 }
0x3a0a   :  { %v12903_v4 = vpop.eup %12902  ;;  %v6061_v5 = vadd.f32 1.0, %v12901_v9 }
0x3a0b   :  { %v6067_v32 = vadd.f32 1.0, %v12903_v4  ;;  %v12905_v54 = vpop.eup %12904  ;;  %v16374_v4 = vld [vmem:[#allocation48_spill] sm:$0xff] }
0x3a0c   :  { %12908 = vrcp.f32 %v6061_v5  ;;  %v12907_v62 = vpop.eup %12906  ;;  %v6074_v15 = vadd.f32 1.0, %v12905_v54  ;;  %v16375_v54 = vld [vmem:[#allocation50_spill] sm:$0xff] }
0x3a0d   :  { %12910 = vrcp.f32 %v6067_v32 }
0x3a0e   :  { %12912 = vrcp.f32 %v6074_v15  ;;  %v16377_v15 = vld [vmem:[#allocation53_spill] sm:$0xff] }
0x3a16   :  { %v12909_v23 = vpop.eup %12908 }
0x3a17   :  { %v12911_v58 = vpop.eup %12910  ;;  %v6078_v38 = vmul.f32 %v12909_v23, %v12907_v62  ;;  %v16376_v23 = vld [vmem:[#allocation51_spill] sm:$0xff] }
0x3a18   :  { %v6077_v35 = vmul.f32 %v12911_v58, %v16371_v59  ;;  %v12913_v6 = vpop.eup %12912 }
0x3a1a   :  { %v14860_v7 = vadd.f32 %v6078_v38, %v6077_v35 }
0x3a1c   :  { %16372 = vst [vmem:[#allocation13_spill] sm:$0xff] %v14860_v7  ;;  %12914 = vtanh.f32 %v14860_v7 }
0x3a26   :  { %v12915_v9 = vpop.eup %12914 }
0x3a27   :  { %v14863_v14 = vmul.f32 %v12915_v9, %v12913_v6  ;;  %v16378_v6 = vld [vmem:[#allocation55_spill] sm:$0xff] }
0x3a29   :  { %16373 = vst [vmem:[#allocation25_spill] sm:$0xff] %v14863_v14  ;;  %v6089_v32 = vrot.slane %v14863_v14, %v16374_v4 }
0x3a2b   :  { %v6097_v11 = vrot.slane %v6089_v32, %v16374_v4  ;;  %v6090_v5 = vcombine.high %v6089_v32, %v6089_v32 }
0x3a2d   :  { %v6108_v61 = vrot.slane %v6097_v11, %v13627_v21  ;;  %v6104_v62 = vrot.slane %v6090_v5, %v16374_v4 }
0x3a2f   :  { %v6111_v35 = vmul.f32 %v6108_v61, %v16375_v54  ;;  %v6110_v58 = vmul.f32 %v6108_v61, %v16376_v23  ;;  %v6119_v38 = vrot.slane %v6104_v62, %v13627_v21 }
0x3a31   :  { %6114 = vadd.xlane.f32.xlu0 %v6111_v35  ;;  %6112 = vadd.xlane.f32.xlu1 %v6110_v58  ;;  %v6121_v59 = vmul.f32 %v6119_v38, %v16377_v15  ;;  %v6122_v9 = vmul.f32 %v6119_v38, %v16378_v6 }
0x3a35   :  { %6123 = vadd.xlane.f32.xlu0 %v6121_v59 }
0x3a39   :  { %6125 = vadd.xlane.f32.xlu0 %v6122_v9 }
0x3abe   :  { %v6115_v7 = vpop.xlane.xlu0 %6114  ;;  %v6113_v32 = vpop.xlane.xlu1 %6112 }
0x3abf   :  { %6132 = vperm.xlu0 %12632, %v6113_v32  }
0x3ac2   :  { %v6124_v11 = vpop.xlane.xlu0 %6123 }
0x3ac3   :  { %6135 = vperm.xlu0 %12632, %v6115_v7   ;;  %6138 = vperm.xlu1 %12633, %v6124_v11  }
0x3ac6   :  { %v6126_v5 = vpop.xlane.xlu0 %6125 }
0x3ac7   :  { %6141 = vperm.xlu0 %12632, %v6126_v5  }
0x3b3e   :  { %v6133_v54 = vpop.permute.xlu0 %6132 }
0x3b3f   :  { %v6146_v58 = vrot.slane %v6133_v54, %v13723_v60 }
0x3b42   :  { %v6136_v61 = vpop.permute.xlu0 %6135  ;;  %v6139_v23 = vpop.permute.xlu1 %6138 }
0x3b43   :  { %v6150_v62 = vrot.slane %v6136_v61, %v13726_v50  ;;  %v6155_v59 = vrot.slane %v6139_v23, %v13723_v60 }
0x3b45   :  { %v6151_v9 = vsel %vm1549_vm5, %v6150_v62, %v6146_v58 }
0x3b46   :  { %v6142_v35 = vpop.permute.xlu0 %6141 }
0x3b47   :  { %v6159_v38 = vrot.slane %v6142_v35, %v13726_v50 }
0x3b49   :  { %v6160_v6 = vsel %vm1549_vm5, %v6159_v38, %v6155_v59 }
0x3b4a   :  { %v6161_v15 = vsel %vm1560_vm6, %v6160_v6, %v6151_v9 }
0x3b4b   :  { %v6163_v4 = vsel %vm1563_vm7, %v6161_v15, -inf }
0x3b4c   :  { %6164 = vmax.xlane.f32.xlu0 %v6163_v4 }
0x3bd9   :  { %v6165_v31 = vpop.xlane.xlu0 %6164 }
0x3bda   :  { %v6170_v27 = vrot.slane %v6165_v31, %v13627_v21  ;;  %v6174_v61 = vrot.slane %v6165_v31, %v13633_v26 }
0x3bdc   :  { %v6177_v14 = vsub.f32 %v6113_v32, %v6170_v27  ;;  %v6178_v54 = vsub.f32 %v6115_v7, %v6170_v27  ;;  %v6179_v23 = vsub.f32 %v6124_v11, %v6174_v61  ;;  %v6180_v56 = vsub.f32 %v6126_v5, %v6174_v61 }
0x3bde   :  { %v6181_v33 = vmul.f32 1.442695, %v6177_v14  ;;  %v6183_v35 = vmul.f32 1.442695, %v6178_v54  ;;  %v6185_v62 = vmul.f32 1.442695, %v6179_v23 }
0x3bdf   :  { %v6187_v58 = vmul.f32 1.442695, %v6180_v56 }
0x3be0   :  { %12916 = vpow2.f32 %v6181_v33 }
0x3be1   :  { %12918 = vpow2.f32 %v6183_v35 }
0x3be2   :  { %12920 = vpow2.f32 %v6185_v62 }
0x3be3   :  { %12922 = vpow2.f32 %v6187_v58 }
0x3bea   :  { %v12917_v6 = vpop.eup %12916 }
0x3beb   :  { %6194 = vperm.xlu1 %12633, %v12917_v6   ;;  %v12919_v4 = vpop.eup %12918 }
0x3bec   :  { %v12921_v15 = vpop.eup %12920 }
0x3bed   :  { %v12923_v59 = vpop.eup %12922 }
0x3bef   :  { %6197 = vperm.xlu1 %12633, %v12919_v4  }
0x3bf3   :  { %6200 = vperm.xlu1 %12633, %v12921_v15  }
0x3bf7   :  { %6203 = vperm.xlu1 %12633, %v12923_v59  }
0x3c6a   :  { %v6195_v31 = vpop.permute.xlu1 %6194 }
0x3c6b   :  { %v6208_v32 = vrot.slane %v6195_v31, %v13723_v60 }
0x3c6e   :  { %v6198_v27 = vpop.permute.xlu1 %6197 }
0x3c6f   :  { %v6212_v33 = vrot.slane %v6198_v27, %v13726_v50 }
0x3c71   :  { %v6213_v5 = vsel %vm1549_vm5, %v6212_v33, %v6208_v32 }
0x3c72   :  { %v6201_v7 = vpop.permute.xlu1 %6200 }
0x3c73   :  { %v6217_v11 = vrot.slane %v6201_v7, %v13723_v60 }
0x3c76   :  { %v6204_v14 = vpop.permute.xlu1 %6203 }
0x3c77   :  { %v6221_v56 = vrot.slane %v6204_v14, %v13726_v50 }
0x3c79   :  { %v6222_v38 = vsel %vm1549_vm5, %v6221_v56, %v6217_v11 }
0x3c7a   :  { %v6223_v9 = vsel %vm1560_vm6, %v6222_v38, %v6213_v5  ;;  %v16379_v38 = vld [vmem:[#allocation31_spill] sm:$0xff] }
0x3c7b   :  { %v6225_v61 = vsel %vm1563_vm7, %v6223_v9, 0.0  ;;  %v16380_v9 = vld [vmem:[#allocation17_spill] sm:$0xff] }
0x3c7c   :  { %6226 = vadd.xlane.f32.xlu1 %v6225_v61  ;;  %v16381_v61 = vld [vmem:[#allocation33_spill] sm:$0xff] }
0x3d09   :  { %v6227_v54 = vpop.xlane.xlu1 %6226 }
0x3d0a   :  { %12924 = vrcp.f32 %v6227_v54  ;;  %v16382_v54 = vld [vmem:[#allocation18_spill] sm:$0xff] }
0x3d14   :  { %v12925_v23 = vpop.eup %12924 }
0x3d15   :  { %v6237_v35 = vrot.slane %v12925_v23, %v13633_v26  ;;  %v6233_v31 = vrot.slane %v12925_v23, %v13627_v21  ;;  %v16383_v23 = vld [vmem:[#allocation35_spill] sm:$0xff] }
0x3d17   :  { %v6242_v62 = vmul.f32 %v12921_v15, %v6237_v35  ;;  %v6243_v58 = vmul.f32 %v12923_v59, %v6237_v35  ;;  %v6240_v27 = vmul.f32 %v12917_v6, %v6233_v31  ;;  %v6241_v7 = vmul.f32 %v12919_v4, %v6233_v31  ;;  %v16384_v35 = vld [vmem:[#allocation19_spill] sm:$0xff]  ;;  %v16387_v31 = vld [vmem:[#allocation37_spill] sm:$0xff] }
0x3d19   :  { %6336 = vperm.xlu0 %12632, %v6242_v62   ;;  %v16385_v62 = vld [vmem:[#allocation36_spill] sm:$0xff] }
0x3d1d   :  { %6339 = vperm.xlu0 %12632, %v6243_v58   ;;  %v16386_v58 = vld [vmem:[#allocation20_spill] sm:$0xff] }
0x3d21   :  { %6247 = vperm.xlu0 %12632, %v6240_v27   ;;  %v16388_v27 = vld [vmem:[#allocation21_spill] sm:$0xff] }
0x3d25   :  { %6250 = vperm.xlu0 %12632, %v6241_v7   ;;  %v16389_v7 = vld [vmem:[#allocation38_spill] sm:$0xff] }
0x3d98   :  { %v6337_v33 = vpop.permute.xlu0 %6336 }
0x3d99   :  { %v6344_v32 = vrot.slane %v6337_v33, %v13723_v60  ;;  %v16390_v33 = vld [vmem:[#allocation22_spill] sm:$0xff] }
0x3d9c   :  { %v6340_v14 = vpop.permute.xlu0 %6339 }
0x3d9d   :  { %v6348_v11 = vrot.slane %v6340_v14, %v13726_v50  ;;  %v16391_v14 = vld [vmem:[#allocation39_spill] sm:$0xff] }
0x3d9f   :  { %v6349_v56 = vsel %vm1549_vm5, %v6348_v11, %v6344_v32  ;;  %v16392_v32 = vld [vmem:[#allocation23_spill] sm:$0xff]  ;;  %v16393_v11 = vld [vmem:[#allocation40_spill] sm:$0xff] }
0x3da0   :  { %10234 = vmatmul.mubr.msk.f32.vlgmr.msra.gmra.mrb[52].mxu0 %vm86_vm0, %v6349_v56  ;;  %v6248_v15 = vpop.permute.xlu0 %6247  ;;  %v16394_v56 = vld [vmem:[#allocation24_spill] sm:$0xff] }
0x3da1   :  { %11814 = vmatpush1.bf16.msra.mxu0 %v13471_v42  ;;  %v6255_v6 = vrot.slane %v6248_v15, %v13723_v60  ;;  %v16395_v15 = vld [vmem:[#allocation41_spill] sm:$0xff] }
0x3da2   :  { %11816 = vmatprep.subr.bf16.mxu0 %v13473_v44 }
0x3da4   :  { %v6251_v59 = vpop.permute.xlu0 %6250 }
0x3da5   :  { %v6259_v4 = vrot.slane %v6251_v59, %v13726_v50  ;;  %11818 = vmatpush1.bf16.msra.mxu0 %v13478_v53  ;;  %v16396_v59 = vld [vmem:[#allocation26_spill] sm:$0xff] }
0x3da6   :  { %11820 = vmatprep.subr.bf16.mxu0 %v13481_v55 }
0x3da7   :  { %v6260_v5 = vsel %vm1549_vm5, %v6259_v4, %v6255_v6  ;;  %v16397_v6 = vld [vmem:[#allocation42_spill] sm:$0xff]  ;;  %v16398_v4 = vld [vmem:[#allocation28_spill] sm:$0xff] }
0x3da8   :  { %10227 = vmatmul.mubr.msk.f32.vlgmr.msra.gmra.mrb[48].mxu1 %vm86_vm0, %v6260_v5  ;;  %v16399_v5 = vmov 0.0|0.0  }
0x3da9   :  { %11750 = vmatpush1.bf16.msra.mxu1 %v13398_v12  ;;  %11822 = vmatpush1.bf16.msra.mxu0 %v13486_v3 }
0x3daa   :  { %11752 = vmatprep.subr.bf16.mxu1 %v13400_v13  ;;  %11824 = vmatprep.subr.bf16.mxu0 %v13489_v8 }
0x3dad   :  { %11754 = vmatpush1.bf16.msra.mxu1 %v13404_v10  ;;  %11826 = vmatpush1.bf16.msra.mxu0 %v13492_v18 }
0x3dae   :  { %11756 = vmatprep.subr.bf16.mxu1 %v13407_v17  ;;  %11828 = vmatprep.subr.bf16.mxu0 %v13495_v19 }
0x3db1   :  { %11758 = vmatpush1.bf16.msra.mxu1 %v13412_v24  ;;  %11830 = vmatpush1.bf16.msra.mxu0 %v13498_v36 }
0x3db2   :  { %11760 = vmatprep.subr.bf16.mxu1 %v13416_v25  ;;  %11832 = vmatprep.subr.bf16.mxu0 %v13501_v37 }
0x3db5   :  { %11762 = vmatpush1.bf16.msra.mxu1 %v13419_v30  ;;  %11834 = vmatpush1.bf16.msra.mxu0 %v13504_v47 }
0x3db6   :  { %11764 = vmatprep.subr.bf16.mxu1 %v13422_v34  ;;  %11836 = vmatprep.subr.bf16.mxu0 %v13507_v48 }
0x3db9   :  { %11766 = vmatpush1.bf16.msra.mxu1 %v13425_v40  ;;  %11838 = vmatpush1.bf16.msra.mxu0 %v13510_v63 }
0x3dba   :  { %11768 = vmatprep.subr.bf16.mxu1 %v13428_v41  ;;  %11840 = vmatprep.subr.bf16.mxu0 %v13513_v0 }
0x3dbd   :  { %11770 = vmatpush1.bf16.msra.mxu1 %v13431_v45  ;;  %11842 = vmatpush1.bf16.msra.mxu0 %v13516_v16 }
0x3dbe   :  { %11772 = vmatprep.subr.bf16.mxu1 %v13434_v46  ;;  %11844 = vmatprep.subr.bf16.mxu0 %v13519_v20 }
0x3dc1   :  { %11774 = vmatpush1.bf16.msra.mxu1 %v13437_v51  ;;  %11846 = vmatpush1.bf16.msra.mxu0 %v13525_v49 }
0x3dc2   :  { %11776 = vmatprep.subr.bf16.mxu1 %v13440_v52  ;;  %11848 = vmatprep.subr.bf16.mxu0 %v13532_v1 }
0x3dc5   :  { %11778 = vmatpush1.bf16.msra.mxu1 %v15993_v43  ;;  %11850 = vmatpush1.bf16.msra.mxu0 %v15994_v57 }
0x3dc6   :  { %11780 = vmatprep.subr.bf16.mxu1 %v15995_v39  ;;  %11852 = vmatprep.subr.bf16.mxu0 %v15996_v28 }
0x3dc9   :  { %11782 = vmatpush1.bf16.msra.mxu1 %v15997_v22  ;;  %11854 = vmatpush1.bf16.msra.mxu0 %v15998_v2 }
0x3dca   :  { %11784 = vmatprep.subr.bf16.mxu1 %v15999_v29  ;;  %11856 = vmatprep.subr.bf16.mxu0 %v16379_v38 }
0x3dcd   :  { %11786 = vmatpush1.bf16.msra.mxu1 %v16380_v9  ;;  %11858 = vmatpush1.bf16.msra.mxu0 %v16381_v61 }
0x3dce   :  { %11788 = vmatprep.subr.bf16.mxu1 %v16382_v54  ;;  %11860 = vmatprep.subr.bf16.mxu0 %v16383_v23 }
0x3dd1   :  { %11790 = vmatpush1.bf16.msra.mxu1 %v16384_v35  ;;  %11862 = vmatpush1.bf16.msra.mxu0 %v16385_v62 }
0x3dd2   :  { %11792 = vmatprep.subr.bf16.mxu1 %v16386_v58  ;;  %11864 = vmatprep.subr.bf16.mxu0 %v16387_v31  ;;  %v16412_v58 = vld [vmem:[#allocation47_spill] sm:$0xff] }
0x3dd5   :  { %11794 = vmatpush1.bf16.msra.mxu1 %v16388_v27  ;;  %11866 = vmatpush1.bf16.msra.mxu0 %v16389_v7  ;;  %v16400_v7 = vld [vmem:[#allocation30_spill] sm:$0xff] }
0x3dd6   :  { %11796 = vmatprep.subr.bf16.mxu1 %v16390_v33  ;;  %11868 = vmatprep.subr.bf16.mxu0 %v16391_v14  ;;  %v16401_v33 = vld [vmem:[#allocation32_spill] sm:$0xff]  ;;  %v16402_v14 = vld [vmem:[#allocation34_spill] sm:$0xff] }
0x3dd9   :  { %11798 = vmatpush1.bf16.msra.mxu1 %v16392_v32  ;;  %11870 = vmatpush1.bf16.msra.mxu0 %v16393_v11 }
0x3dda   :  { %11800 = vmatprep.subr.bf16.mxu1 %v16394_v56  ;;  %11872 = vmatprep.subr.bf16.mxu0 %v16395_v15 }
0x3ddd   :  { %11802 = vmatpush1.bf16.msra.mxu1 %v16396_v59  ;;  %11874 = vmatpush1.bf16.msra.mxu0 %v16397_v6 }
0x3dde   :  { %11804 = vmatprep.subr.bf16.mxu1 %v16398_v4  ;;  %11879 = vmatprep.subr.bf16.mxu0 %v16399_v5  ;;  %v16403_v4 = vld [vmem:[#allocation25_spill] sm:$0xff] }
0x3de1   :  { %11806 = vmatpush1.bf16.msra.mxu1 %v16400_v7  ;;  %v16404_v7 = vld [vmem:[#allocation52_spill] sm:$0xff] }
0x3de2   :  { %11808 = vmatprep.subr.bf16.mxu1 %v16401_v33 }
0x3de5   :  { %11810 = vmatpush1.bf16.msra.mxu1 %v16402_v14  ;;  %v16406_v14 = vld [vmem:[#allocation54_spill] sm:$0xff] }
0x3de6   :  { %11875 = vmatprep.subr.bf16.mxu1 %v16399_v5  ;;  %v16411_v5 = vld [vmem:[#allocation44_spill] sm:$0xff] }
0x3e73   :  { %v6418_v11 = vpop.f32.mrb[52].mxu0 }
0x3e74   :  { %v10235_v56 = vpop.f32.mrb[53].mxu0  ;;  %v6424_v32 = vrot.slane %v6418_v11, 7 }
0x3e75   :  { %v16407_v56 = vmov 0.0  }
0x3e7b   :  { %v6329_v15 = vpop.f32.mrb[48].mxu1 }
0x3e7c   :  { %v10228_v27 = vpop.f32.mrb[49].mxu1  ;;  %v6425_v59 = vsel %vm1560_vm6, %v6424_v32, %v6329_v15  ;;  %v16409_v32 = vld [vmem:[#allocation12_spill] sm:$0xff] }
0x3e7d   :  { %6491 = vmatprep.mubr.f32.mxu1 %v6425_v59  ;;  %6562 = vmatprep.mubr.f32.mxu0 %v6425_v59  ;;  %v16408_v27 = vld [vmem:[#allocation11_spill] sm:$0xff] }
0x3e7e   :  { %6492 = vmatmul.mubr.f32.vlgmr.msra.gmra.mrb[50].mxu1 %v16403_v4  ;;  %6563 = vmatmul.mubr.f32.vlgmr.msra.gmra.mrb[54].mxu0 %v16403_v4  ;;  %v16410_v59 = vld [vmem:[#allocation43_spill] sm:$0xff] }
0x3e7f   :  { %11878 = vmatpush3.bf16.msk.msra.mxu1 %vm13680_vm4, %v16404_v7  ;;  %11882 = vmatpush3.bf16.msk.msra.mxu0 %vm13680_vm4, %v16406_v14 }
0x3e80   :  { %10247 = vmatprep.mubr.msk.f32.mxu0 %vm13165_vm8, %v16407_v56  ;;  %10240 = vmatprep.mubr.msk.f32.mxu1 %vm13165_vm8, %v16407_v56  ;;  %v16413_v56 = vld [vmem:[#allocation45_spill] sm:$0xff] }
0x3e81   :  { %11884 = vmatprep.subr.bf16.mxu1 %v16408_v27  ;;  %11948 = vmatprep.subr.bf16.mxu0 %v16409_v32 }
0x3f51   :  { %v6493_v11 = vpop.f32.mrb[50].mxu1  ;;  %v6564_v15 = vpop.f32.mrb[54].mxu0 }
0x3f52   :  { %v6494_v4 = vadd.f32 %v6493_v11, %v16410_v59  ;;  %v6495_v33 = vpop.f32.mrb[51].mxu1  ;;  %v6566_v7 = vpop.f32.mrb[55].mxu0  ;;  %v6565_v23 = vadd.f32 %v6564_v15, %v16413_v56 }
0x3f53   :  { %v6496_v31 = vadd.f32 %v6495_v33, %v16411_v5  ;;  %v6567_v62 = vadd.f32 %v6566_v7, %v16412_v58 }
0x3f54   :  { %v9781_v6 = vmul.f32 -1.442695, %v6494_v4 }
0x3f55   :  { %v9782_v14 = vmul.f32 -1.442695, %v6496_v31  ;;  %v9783_v35 = vmul.f32 -1.442695, %v6567_v62 }
0x3f56   :  { %12926 = vpow2.f32 %v9781_v6 }
0x3f57   :  { %12928 = vpow2.f32 %v9782_v14  ;;  %v16414_v14 = vld [vmem:[#allocation13_spill] sm:$0xff] }
0x3f58   :  { %12930 = vpow2.f32 %v9783_v35 }
0x3f59   :  { %12932 = vtanh.f32 %v6565_v23 }
0x3f60   :  { %v12927_v27 = vpop.eup %12926 }
0x3f61   :  { %v12929_v54 = vpop.eup %12928  ;;  %v6572_v32 = vadd.f32 1.0, %v12927_v27 }
0x3f62   :  { %v6578_v61 = vadd.f32 1.0, %v12929_v54  ;;  %v12931_v11 = vpop.eup %12930  ;;  %v16417_v54 = vld [vmem:[#allocation48_spill] sm:$0xff] }
0x3f63   :  { %12934 = vrcp.f32 %v6572_v32  ;;  %v12933_v59 = vpop.eup %12932  ;;  %v6585_v6 = vadd.f32 1.0, %v12931_v11  ;;  %v16418_v11 = vld [vmem:[#allocation50_spill] sm:$0xff] }
0x3f64   :  { %12936 = vrcp.f32 %v6578_v61 }
0x3f65   :  { %12938 = vrcp.f32 %v6585_v6  ;;  %v16420_v6 = vld [vmem:[#allocation53_spill] sm:$0xff] }
0x3f6d   :  { %v12935_v33 = vpop.eup %12934 }
0x3f6e   :  { %v12937_v4 = vpop.eup %12936  ;;  %v6589_v31 = vmul.f32 %v12935_v33, %v12933_v59  ;;  %v16419_v33 = vld [vmem:[#allocation51_spill] sm:$0xff] }
0x3f6f   :  { %v6588_v5 = vmul.f32 %v12937_v4, %v16414_v14  ;;  %v12939_v62 = vpop.eup %12938 }
0x3f71   :  { %v14987_v7 = vadd.f32 %v6589_v31, %v6588_v5 }
0x3f73   :  { %16415 = vst [vmem:[#allocation14_spill] sm:$0xff] %v14987_v7  ;;  %12940 = vtanh.f32 %v14987_v7 }
0x3f7d   :  { %v12941_v27 = vpop.eup %12940 }
0x3f7e   :  { %v14990_v35 = vmul.f32 %v12941_v27, %v12939_v62  ;;  %v16421_v62 = vld [vmem:[#allocation55_spill] sm:$0xff] }
0x3f80   :  { %16416 = vst [vmem:[#allocation27_spill] sm:$0xff] %v14990_v35  ;;  %v6600_v61 = vrot.slane %v14990_v35, %v16417_v54 }
0x3f82   :  { %v6608_v23 = vrot.slane %v6600_v61, %v16417_v54  ;;  %v6601_v32 = vcombine.high %v6600_v61, %v6600_v61 }
0x3f84   :  { %v6619_v15 = vrot.slane %v6608_v23, %v13627_v21  ;;  %v6615_v59 = vrot.slane %v6601_v32, %v16417_v54 }
0x3f86   :  { %v6622_v5 = vmul.f32 %v6619_v15, %v16418_v11  ;;  %v6621_v4 = vmul.f32 %v6619_v15, %v16419_v33  ;;  %v6630_v31 = vrot.slane %v6615_v59, %v13627_v21 }
0x3f88   :  { %6625 = vadd.xlane.f32.xlu0 %v6622_v5  ;;  %6623 = vadd.xlane.f32.xlu1 %v6621_v4  ;;  %v6632_v14 = vmul.f32 %v6630_v31, %v16420_v6  ;;  %v6633_v27 = vmul.f32 %v6630_v31, %v16421_v62 }
0x3f8c   :  { %6634 = vadd.xlane.f32.xlu1 %v6632_v14 }
0x3f90   :  { %6636 = vadd.xlane.f32.xlu1 %v6633_v27 }
0x4015   :  { %v6624_v7 = vpop.xlane.xlu1 %6623  ;;  %v6626_v61 = vpop.xlane.xlu0 %6625 }
0x4016   :  { %6643 = vperm.xlu1 %12633, %v6624_v7  }
0x4019   :  { %v6635_v23 = vpop.xlane.xlu1 %6634 }
0x401a   :  { %6646 = vperm.xlu1 %12633, %v6626_v61  }
0x401d   :  { %v6637_v32 = vpop.xlane.xlu1 %6636 }
0x401e   :  { %6649 = vperm.xlu1 %12633, %v6635_v23   ;;  %6652 = vperm.xlu0 %12632, %v6637_v32  }
0x4095   :  { %v6644_v11 = vpop.permute.xlu1 %6643 }
0x4096   :  { %v6657_v6 = vrot.slane %v6644_v11, %v13723_v60 }
0x4099   :  { %v6647_v15 = vpop.permute.xlu1 %6646 }
0x409a   :  { %v6661_v59 = vrot.slane %v6647_v15, %v13726_v50 }
0x409c   :  { %v6662_v27 = vsel %vm1549_vm5, %v6661_v59, %v6657_v6 }
0x409d   :  { %v6653_v5 = vpop.permute.xlu0 %6652  ;;  %v6650_v4 = vpop.permute.xlu1 %6649 }
0x409e   :  { %v6670_v14 = vrot.slane %v6653_v5, %v13726_v50  ;;  %v6666_v31 = vrot.slane %v6650_v4, %v13723_v60 }
0x40a0   :  { %v6671_v62 = vsel %vm1549_vm5, %v6670_v14, %v6666_v31 }
0x40a1   :  { %v6672_v33 = vsel %vm1560_vm6, %v6671_v62, %v6662_v27 }
0x40a2   :  { %v6674_v54 = vsel %vm1563_vm7, %v6672_v33, -inf }
0x40a3   :  { %6675 = vmax.xlane.f32.xlu1 %v6674_v54 }
0x4130   :  { %v6676_v56 = vpop.xlane.xlu1 %6675 }
0x4131   :  { %v6681_v15 = vrot.slane %v6676_v56, %v13627_v21  ;;  %v6685_v58 = vrot.slane %v6676_v56, %v13633_v26 }
0x4133   :  { %v6688_v35 = vsub.f32 %v6624_v7, %v6681_v15  ;;  %v6689_v11 = vsub.f32 %v6626_v61, %v6681_v15  ;;  %v6690_v5 = vsub.f32 %v6635_v23, %v6685_v58  ;;  %v6691_v38 = vsub.f32 %v6637_v32, %v6685_v58 }
0x4135   :  { %v6692_v9 = vmul.f32 1.442695, %v6688_v35  ;;  %v6694_v4 = vmul.f32 1.442695, %v6689_v11  ;;  %v6696_v6 = vmul.f32 1.442695, %v6690_v5 }
0x4136   :  { %v6698_v59 = vmul.f32 1.442695, %v6691_v38 }
0x4137   :  { %12942 = vpow2.f32 %v6692_v9 }
0x4138   :  { %12944 = vpow2.f32 %v6694_v4 }
0x4139   :  { %12946 = vpow2.f32 %v6696_v6 }
0x413a   :  { %12948 = vpow2.f32 %v6698_v59 }
0x4141   :  { %v12943_v62 = vpop.eup %12942 }
0x4142   :  { %6705 = vperm.xlu0 %12632, %v12943_v62   ;;  %v12945_v54 = vpop.eup %12944 }
0x4143   :  { %v12947_v33 = vpop.eup %12946 }
0x4144   :  { %v12949_v14 = vpop.eup %12948 }
0x4146   :  { %6708 = vperm.xlu0 %12632, %v12945_v54  }
0x414a   :  { %6711 = vperm.xlu0 %12632, %v12947_v33  }
0x414e   :  { %6714 = vperm.xlu0 %12632, %v12949_v14  }
0x41c1   :  { %v6706_v56 = vpop.permute.xlu0 %6705 }
0x41c2   :  { %v6719_v58 = vrot.slane %v6706_v56, %v13723_v60 }
0x41c5   :  { %v6709_v7 = vpop.permute.xlu0 %6708 }
0x41c6   :  { %v6723_v9 = vrot.slane %v6709_v7, %v13726_v50 }
0x41c8   :  { %v6724_v32 = vsel %vm1549_vm5, %v6723_v9, %v6719_v58 }
0x41c9   :  { %v6712_v35 = vpop.permute.xlu0 %6711 }
0x41ca   :  { %v6728_v23 = vrot.slane %v6712_v35, %v13723_v60 }
0x41cd   :  { %v6715_v61 = vpop.permute.xlu0 %6714 }
0x41ce   :  { %v6732_v38 = vrot.slane %v6715_v61, %v13726_v50 }
0x41d0   :  { %v6733_v31 = vsel %vm1549_vm5, %v6732_v38, %v6728_v23 }
0x41d1   :  { %v6734_v27 = vsel %vm1560_vm6, %v6733_v31, %v6724_v32  ;;  %v16422_v31 = vld [vmem:[#allocation31_spill] sm:$0xff] }
0x41d2   :  { %v6736_v15 = vsel %vm1563_vm7, %v6734_v27, 0.0  ;;  %v16423_v27 = vld [vmem:[#allocation17_spill] sm:$0xff] }
0x41d3   :  { %6737 = vadd.xlane.f32.xlu0 %v6736_v15  ;;  %v16424_v15 = vld [vmem:[#allocation33_spill] sm:$0xff] }
0x4260   :  { %v6738_v11 = vpop.xlane.xlu0 %6737 }
0x4261   :  { %12950 = vrcp.f32 %v6738_v11  ;;  %v16425_v11 = vld [vmem:[#allocation18_spill] sm:$0xff] }
0x426b   :  { %v12951_v5 = vpop.eup %12950 }
0x426c   :  { %v6748_v4 = vrot.slane %v12951_v5, %v13633_v26  ;;  %v6744_v56 = vrot.slane %v12951_v5, %v13627_v21  ;;  %v16426_v5 = vld [vmem:[#allocation35_spill] sm:$0xff] }
0x426e   :  { %v6753_v6 = vmul.f32 %v12947_v33, %v6748_v4  ;;  %v6754_v59 = vmul.f32 %v12949_v14, %v6748_v4  ;;  %v6751_v7 = vmul.f32 %v12943_v62, %v6744_v56  ;;  %v6752_v35 = vmul.f32 %v12945_v54, %v6744_v56  ;;  %v16427_v4 = vld [vmem:[#allocation19_spill] sm:$0xff]  ;;  %v16430_v56 = vld [vmem:[#allocation37_spill] sm:$0xff] }
0x4270   :  { %6847 = vperm.xlu1 %12633, %v6753_v6   ;;  %v16428_v6 = vld [vmem:[#allocation36_spill] sm:$0xff] }
0x4274   :  { %6850 = vperm.xlu1 %12633, %v6754_v59   ;;  %v16429_v59 = vld [vmem:[#allocation20_spill] sm:$0xff] }
0x4278   :  { %6758 = vperm.xlu1 %12633, %v6751_v7   ;;  %v16431_v7 = vld [vmem:[#allocation21_spill] sm:$0xff] }
0x427c   :  { %6761 = vperm.xlu1 %12633, %v6752_v35   ;;  %v16432_v35 = vld [vmem:[#allocation38_spill] sm:$0xff] }
0x42ef   :  { %v6848_v9 = vpop.permute.xlu1 %6847 }
0x42f0   :  { %v6855_v58 = vrot.slane %v6848_v9, %v13723_v60  ;;  %v16433_v9 = vld [vmem:[#allocation22_spill] sm:$0xff] }
0x42f3   :  { %v6851_v61 = vpop.permute.xlu1 %6850 }
0x42f4   :  { %v6859_v23 = vrot.slane %v6851_v61, %v13726_v50  ;;  %v16434_v61 = vld [vmem:[#allocation39_spill] sm:$0xff] }
0x42f6   :  { %v6860_v38 = vsel %vm1549_vm5, %v6859_v23, %v6855_v58  ;;  %v16435_v58 = vld [vmem:[#allocation23_spill] sm:$0xff]  ;;  %v16436_v23 = vld [vmem:[#allocation40_spill] sm:$0xff] }
0x42f7   :  { %10248 = vmatmul.mubr.msk.f32.vlgmr.msra.gmra.mrb[56].mxu0 %vm86_vm0, %v6860_v38  ;;  %v6759_v33 = vpop.permute.xlu1 %6758  ;;  %v16437_v38 = vld [vmem:[#allocation24_spill] sm:$0xff] }
0x42f8   :  { %11950 = vmatpush1.bf16.msra.mxu0 %v13471_v42  ;;  %v6766_v62 = vrot.slane %v6759_v33, %v13723_v60  ;;  %v16438_v33 = vld [vmem:[#allocation41_spill] sm:$0xff] }
0x42f9   :  { %11952 = vmatprep.subr.bf16.mxu0 %v13473_v44 }
0x42fb   :  { %v6762_v14 = vpop.permute.xlu1 %6761 }
0x42fc   :  { %v6770_v54 = vrot.slane %v6762_v14, %v13726_v50  ;;  %11954 = vmatpush1.bf16.msra.mxu0 %v13478_v53  ;;  %v16439_v14 = vld [vmem:[#allocation26_spill] sm:$0xff] }
0x42fd   :  { %11956 = vmatprep.subr.bf16.mxu0 %v13481_v55 }
0x42fe   :  { %v6771_v32 = vsel %vm1549_vm5, %v6770_v54, %v6766_v62  ;;  %v16440_v62 = vld [vmem:[#allocation42_spill] sm:$0xff]  ;;  %v16441_v54 = vld [vmem:[#allocation28_spill] sm:$0xff] }
0x42ff   :  { %10241 = vmatmul.mubr.msk.f32.vlgmr.msra.gmra.mrb[52].mxu1 %vm86_vm0, %v6771_v32  ;;  %v16442_v32 = vmov 0.0|0.0  }
0x4300   :  { %11886 = vmatpush1.bf16.msra.mxu1 %v13398_v12  ;;  %11958 = vmatpush1.bf16.msra.mxu0 %v13486_v3 }
0x4301   :  { %11888 = vmatprep.subr.bf16.mxu1 %v13400_v13  ;;  %11960 = vmatprep.subr.bf16.mxu0 %v13489_v8 }
0x4304   :  { %11890 = vmatpush1.bf16.msra.mxu1 %v13404_v10  ;;  %11962 = vmatpush1.bf16.msra.mxu0 %v13492_v18 }
0x4305   :  { %11892 = vmatprep.subr.bf16.mxu1 %v13407_v17  ;;  %11964 = vmatprep.subr.bf16.mxu0 %v13495_v19 }
0x4308   :  { %11894 = vmatpush1.bf16.msra.mxu1 %v13412_v24  ;;  %11966 = vmatpush1.bf16.msra.mxu0 %v13498_v36 }
0x4309   :  { %11896 = vmatprep.subr.bf16.mxu1 %v13416_v25  ;;  %11968 = vmatprep.subr.bf16.mxu0 %v13501_v37 }
0x430c   :  { %11898 = vmatpush1.bf16.msra.mxu1 %v13419_v30  ;;  %11970 = vmatpush1.bf16.msra.mxu0 %v13504_v47 }
0x430d   :  { %11900 = vmatprep.subr.bf16.mxu1 %v13422_v34  ;;  %11972 = vmatprep.subr.bf16.mxu0 %v13507_v48 }
0x4310   :  { %11902 = vmatpush1.bf16.msra.mxu1 %v13425_v40  ;;  %11974 = vmatpush1.bf16.msra.mxu0 %v13510_v63 }
0x4311   :  { %11904 = vmatprep.subr.bf16.mxu1 %v13428_v41  ;;  %11976 = vmatprep.subr.bf16.mxu0 %v13513_v0 }
0x4314   :  { %11906 = vmatpush1.bf16.msra.mxu1 %v13431_v45  ;;  %11978 = vmatpush1.bf16.msra.mxu0 %v13516_v16 }
0x4315   :  { %11908 = vmatprep.subr.bf16.mxu1 %v13434_v46  ;;  %11980 = vmatprep.subr.bf16.mxu0 %v13519_v20 }
0x4318   :  { %11910 = vmatpush1.bf16.msra.mxu1 %v13437_v51  ;;  %11982 = vmatpush1.bf16.msra.mxu0 %v13525_v49 }
0x4319   :  { %11912 = vmatprep.subr.bf16.mxu1 %v13440_v52  ;;  %11984 = vmatprep.subr.bf16.mxu0 %v13532_v1 }
0x431c   :  { %11914 = vmatpush1.bf16.msra.mxu1 %v15993_v43  ;;  %11986 = vmatpush1.bf16.msra.mxu0 %v15994_v57 }
0x431d   :  { %11916 = vmatprep.subr.bf16.mxu1 %v15995_v39  ;;  %11988 = vmatprep.subr.bf16.mxu0 %v15996_v28 }
0x4320   :  { %11918 = vmatpush1.bf16.msra.mxu1 %v15997_v22  ;;  %11990 = vmatpush1.bf16.msra.mxu0 %v15998_v2 }
0x4321   :  { %11920 = vmatprep.subr.bf16.mxu1 %v15999_v29  ;;  %11992 = vmatprep.subr.bf16.mxu0 %v16422_v31 }
0x4324   :  { %11922 = vmatpush1.bf16.msra.mxu1 %v16423_v27  ;;  %11994 = vmatpush1.bf16.msra.mxu0 %v16424_v15 }
0x4325   :  { %11924 = vmatprep.subr.bf16.mxu1 %v16425_v11  ;;  %11996 = vmatprep.subr.bf16.mxu0 %v16426_v5 }
0x4328   :  { %11926 = vmatpush1.bf16.msra.mxu1 %v16427_v4  ;;  %11998 = vmatpush1.bf16.msra.mxu0 %v16428_v6 }
0x4329   :  { %11928 = vmatprep.subr.bf16.mxu1 %v16429_v59  ;;  %12000 = vmatprep.subr.bf16.mxu0 %v16430_v56  ;;  %v16455_v59 = vld [vmem:[#allocation47_spill] sm:$0xff] }
0x432c   :  { %11930 = vmatpush1.bf16.msra.mxu1 %v16431_v7  ;;  %12002 = vmatpush1.bf16.msra.mxu0 %v16432_v35  ;;  %v16443_v35 = vld [vmem:[#allocation30_spill] sm:$0xff] }
0x432d   :  { %11932 = vmatprep.subr.bf16.mxu1 %v16433_v9  ;;  %12004 = vmatprep.subr.bf16.mxu0 %v16434_v61  ;;  %v16444_v9 = vld [vmem:[#allocation32_spill] sm:$0xff]  ;;  %v16445_v61 = vld [vmem:[#allocation34_spill] sm:$0xff] }
0x4330   :  { %11934 = vmatpush1.bf16.msra.mxu1 %v16435_v58  ;;  %12006 = vmatpush1.bf16.msra.mxu0 %v16436_v23 }
0x4331   :  { %11936 = vmatprep.subr.bf16.mxu1 %v16437_v38  ;;  %12008 = vmatprep.subr.bf16.mxu0 %v16438_v33 }
0x4334   :  { %11938 = vmatpush1.bf16.msra.mxu1 %v16439_v14  ;;  %12010 = vmatpush1.bf16.msra.mxu0 %v16440_v62 }
0x4335   :  { %11940 = vmatprep.subr.bf16.mxu1 %v16441_v54  ;;  %12015 = vmatprep.subr.bf16.mxu0 %v16442_v32  ;;  %v16446_v54 = vld [vmem:[#allocation27_spill] sm:$0xff] }
0x4338   :  { %11942 = vmatpush1.bf16.msra.mxu1 %v16443_v35  ;;  %v16447_v35 = vld [vmem:[#allocation52_spill] sm:$0xff] }
0x4339   :  { %11944 = vmatprep.subr.bf16.mxu1 %v16444_v9 }
0x433c   :  { %11946 = vmatpush1.bf16.msra.mxu1 %v16445_v61  ;;  %v16449_v61 = vld [vmem:[#allocation54_spill] sm:$0xff] }
0x433d   :  { %12011 = vmatprep.subr.bf16.mxu1 %v16442_v32  ;;  %v16454_v32 = vld [vmem:[#allocation44_spill] sm:$0xff] }
0x43ca   :  { %v6929_v23 = vpop.f32.mrb[56].mxu0 }
0x43cb   :  { %v10249_v38 = vpop.f32.mrb[57].mxu0  ;;  %v6935_v58 = vrot.slane %v6929_v23, 7 }
0x43cc   :  { %v16450_v38 = vmov 0.0  }
0x43d2   :  { %v6840_v33 = vpop.f32.mrb[52].mxu1 }
0x43d3   :  { %v10242_v7 = vpop.f32.mrb[53].mxu1  ;;  %v6936_v14 = vsel %vm1560_vm6, %v6935_v58, %v6840_v33  ;;  %v16452_v58 = vld [vmem:[#allocation12_spill] sm:$0xff] }
0x43d4   :  { %7002 = vmatprep.mubr.f32.mxu1 %v6936_v14  ;;  %7073 = vmatprep.mubr.f32.mxu0 %v6936_v14  ;;  %v16451_v7 = vld [vmem:[#allocation11_spill] sm:$0xff] }
0x43d5   :  { %7003 = vmatmul.mubr.f32.vlgmr.msra.gmra.mrb[54].mxu1 %v16446_v54  ;;  %7074 = vmatmul.mubr.f32.vlgmr.msra.gmra.mrb[58].mxu0 %v16446_v54  ;;  %v16453_v14 = vld [vmem:[#allocation43_spill] sm:$0xff] }
0x43d6   :  { %12014 = vmatpush3.bf16.msk.msra.mxu1 %vm13680_vm4, %v16447_v35  ;;  %12018 = vmatpush3.bf16.msk.msra.mxu0 %vm13680_vm4, %v16449_v61 }
0x43d7   :  { %10261 = vmatprep.mubr.msk.f32.mxu0 %vm13165_vm8, %v16450_v38  ;;  %10254 = vmatprep.mubr.msk.f32.mxu1 %vm13165_vm8, %v16450_v38  ;;  %v16456_v38 = vld [vmem:[#allocation45_spill] sm:$0xff] }
0x43d8   :  { %12020 = vmatprep.subr.bf16.mxu1 %v16451_v7  ;;  %12084 = vmatprep.subr.bf16.mxu0 %v16452_v58 }
0x44a8   :  { %v7004_v23 = vpop.f32.mrb[54].mxu1  ;;  %v7075_v33 = vpop.f32.mrb[58].mxu0 }
0x44a9   :  { %v7005_v54 = vadd.f32 %v7004_v23, %v16453_v14  ;;  %v7006_v9 = vpop.f32.mrb[55].mxu1  ;;  %v7077_v35 = vpop.f32.mrb[59].mxu0  ;;  %v7076_v5 = vadd.f32 %v7075_v33, %v16456_v38 }
0x44aa   :  { %v7007_v56 = vadd.f32 %v7006_v9, %v16454_v32  ;;  %v7078_v6 = vadd.f32 %v7077_v35, %v16455_v59 }
0x44ab   :  { %v9790_v62 = vmul.f32 -1.442695, %v7005_v54 }
0x44ac   :  { %v9791_v61 = vmul.f32 -1.442695, %v7007_v56  ;;  %v9792_v4 = vmul.f32 -1.442695, %v7078_v6 }
0x44ad   :  { %12952 = vpow2.f32 %v9790_v62 }
0x44ae   :  { %12954 = vpow2.f32 %v9791_v61  ;;  %v16457_v61 = vld [vmem:[#allocation14_spill] sm:$0xff] }
0x44af   :  { %12956 = vpow2.f32 %v9792_v4 }
0x44b0   :  { %12958 = vtanh.f32 %v7076_v5 }
0x44b7   :  { %v12953_v7 = vpop.eup %12952 }
0x44b8   :  { %v12955_v11 = vpop.eup %12954  ;;  %v7083_v58 = vadd.f32 1.0, %v12953_v7 }
0x44b9   :  { %v7089_v15 = vadd.f32 1.0, %v12955_v11  ;;  %v12957_v23 = vpop.eup %12956  ;;  %v16460_v11 = vld [vmem:[#allocation48_spill] sm:$0xff] }
0x44ba   :  { %12960 = vrcp.f32 %v7083_v58  ;;  %v12959_v14 = vpop.eup %12958  ;;  %v7096_v62 = vadd.f32 1.0, %v12957_v23  ;;  %v16461_v23 = vld [vmem:[#allocation50_spill] sm:$0xff] }
0x44bb   :  { %12962 = vrcp.f32 %v7089_v15 }
0x44bc   :  { %12964 = vrcp.f32 %v7096_v62  ;;  %v16463_v62 = vld [vmem:[#allocation53_spill] sm:$0xff] }
0x44c4   :  { %v12961_v9 = vpop.eup %12960 }
0x44c5   :  { %v12963_v54 = vpop.eup %12962  ;;  %v7100_v56 = vmul.f32 %v12961_v9, %v12959_v14  ;;  %v16462_v9 = vld [vmem:[#allocation51_spill] sm:$0xff] }
0x44c6   :  { %v7099_v32 = vmul.f32 %v12963_v54, %v16457_v61  ;;  %v12965_v6 = vpop.eup %12964 }
0x44c8   :  { %v15114_v35 = vadd.f32 %v7100_v56, %v7099_v32 }
0x44ca   :  { %16458 = vst [vmem:[#allocation15_spill] sm:$0xff] %v15114_v35  ;;  %12966 = vtanh.f32 %v15114_v35 }
0x44d4   :  { %v12967_v7 = vpop.eup %12966 }
0x44d5   :  { %v15117_v4 = vmul.f32 %v12967_v7, %v12965_v6  ;;  %v16464_v6 = vld [vmem:[#allocation55_spill] sm:$0xff] }
0x44d7   :  { %16459 = vst [vmem:[#allocation29_spill] sm:$0xff] %v15117_v4  ;;  %v7111_v15 = vrot.slane %v15117_v4, %v16460_v11 }
0x44d9   :  { %v7119_v5 = vrot.slane %v7111_v15, %v16460_v11  ;;  %v7112_v58 = vcombine.high %v7111_v15, %v7111_v15 }
0x44db   :  { %v7130_v33 = vrot.slane %v7119_v5, %v13627_v21  ;;  %v7126_v14 = vrot.slane %v7112_v58, %v16460_v11 }
0x44dd   :  { %v7133_v32 = vmul.f32 %v7130_v33, %v16461_v23  ;;  %v7132_v54 = vmul.f32 %v7130_v33, %v16462_v9  ;;  %v7141_v56 = vrot.slane %v7126_v14, %v13627_v21 }
0x44df   :  { %7136 = vadd.xlane.f32.xlu0 %v7133_v32  ;;  %7134 = vadd.xlane.f32.xlu1 %v7132_v54  ;;  %v7143_v61 = vmul.f32 %v7141_v56, %v16463_v62  ;;  %v7144_v7 = vmul.f32 %v7141_v56, %v16464_v6 }
0x44e3   :  { %7145 = vadd.xlane.f32.xlu0 %v7143_v61 }
0x44e7   :  { %7147 = vadd.xlane.f32.xlu0 %v7144_v7 }
0x456c   :  { %v7137_v35 = vpop.xlane.xlu0 %7136  ;;  %v7135_v15 = vpop.xlane.xlu1 %7134 }
0x456d   :  { %7154 = vperm.xlu0 %12632, %v7135_v15  }
0x4570   :  { %v7146_v5 = vpop.xlane.xlu0 %7145 }
0x4571   :  { %7157 = vperm.xlu0 %12632, %v7137_v35   ;;  %7160 = vperm.xlu1 %12633, %v7146_v5  }
0x4574   :  { %v7148_v58 = vpop.xlane.xlu0 %7147 }
0x4575   :  { %7163 = vperm.xlu0 %12632, %v7148_v58  }
0x45ec   :  { %v7155_v23 = vpop.permute.xlu0 %7154 }
0x45ed   :  { %v7168_v54 = vrot.slane %v7155_v23, %v13723_v60 }
0x45f0   :  { %v7158_v33 = vpop.permute.xlu0 %7157  ;;  %v7161_v9 = vpop.permute.xlu1 %7160 }
0x45f1   :  { %v7172_v14 = vrot.slane %v7158_v33, %v13726_v50  ;;  %v7177_v61 = vrot.slane %v7161_v9, %v13723_v60 }
0x45f3   :  { %v7173_v7 = vsel %vm1549_vm5, %v7172_v14, %v7168_v54 }
0x45f4   :  { %v7164_v32 = vpop.permute.xlu0 %7163 }
0x45f5   :  { %v7181_v56 = vrot.slane %v7164_v32, %v13726_v50 }
0x45f7   :  { %v7182_v6 = vsel %vm1549_vm5, %v7181_v56, %v7177_v61 }
0x45f8   :  { %v7183_v62 = vsel %vm1560_vm6, %v7182_v6, %v7173_v7 }
0x45f9   :  { %v7185_v11 = vsel %vm1563_vm7, %v7183_v62, -inf }
0x45fa   :  { %7186 = vmax.xlane.f32.xlu0 %v7185_v11 }
0x4687   :  { %v7187_v38 = vpop.xlane.xlu0 %7186 }
0x4688   :  { %v7192_v59 = vrot.slane %v7187_v38, %v13627_v21  ;;  %v7196_v33 = vrot.slane %v7187_v38, %v13633_v26 }
0x468a   :  { %v7199_v4 = vsub.f32 %v7135_v15, %v7192_v59  ;;  %v7200_v23 = vsub.f32 %v7137_v35, %v7192_v59  ;;  %v7201_v9 = vsub.f32 %v7146_v5, %v7196_v33  ;;  %v7202_v31 = vsub.f32 %v7148_v58, %v7196_v33 }
0x468c   :  { %v7203_v27 = vmul.f32 1.442695, %v7199_v4  ;;  %v7205_v32 = vmul.f32 1.442695, %v7200_v23  ;;  %v7207_v14 = vmul.f32 1.442695, %v7201_v9 }
0x468d   :  { %v7209_v54 = vmul.f32 1.442695, %v7202_v31 }
0x468e   :  { %12968 = vpow2.f32 %v7203_v27 }
0x468f   :  { %12970 = vpow2.f32 %v7205_v32 }
0x4690   :  { %12972 = vpow2.f32 %v7207_v14 }
0x4691   :  { %12974 = vpow2.f32 %v7209_v54 }
0x4698   :  { %v12969_v6 = vpop.eup %12968 }
0x4699   :  { %7216 = vperm.xlu1 %12633, %v12969_v6   ;;  %v12971_v11 = vpop.eup %12970 }
0x469a   :  { %v12973_v62 = vpop.eup %12972 }
0x469b   :  { %v12975_v61 = vpop.eup %12974 }
0x469d   :  { %7219 = vperm.xlu1 %12633, %v12971_v11  }
0x46a1   :  { %7222 = vperm.xlu1 %12633, %v12973_v62  }
0x46a5   :  { %7225 = vperm.xlu1 %12633, %v12975_v61  }
0x4718   :  { %v7217_v38 = vpop.permute.xlu1 %7216 }
0x4719   :  { %v7230_v15 = vrot.slane %v7217_v38, %v13723_v60 }
0x471c   :  { %v7220_v59 = vpop.permute.xlu1 %7219 }
0x471d   :  { %v7234_v27 = vrot.slane %v7220_v59, %v13726_v50 }
0x471f   :  { %v7235_v58 = vsel %vm1549_vm5, %v7234_v27, %v7230_v15 }
0x4720   :  { %v7223_v35 = vpop.permute.xlu1 %7222 }
0x4721   :  { %v7239_v5 = vrot.slane %v7223_v35, %v13723_v60 }
0x4724   :  { %v7226_v4 = vpop.permute.xlu1 %7225 }
0x4725   :  { %v7243_v31 = vrot.slane %v7226_v4, %v13726_v50 }
0x4727   :  { %v7244_v56 = vsel %vm1549_vm5, %v7243_v31, %v7239_v5 }
0x4728   :  { %v7245_v7 = vsel %vm1560_vm6, %v7244_v56, %v7235_v58  ;;  %v16465_v56 = vld [vmem:[#allocation31_spill] sm:$0xff] }
0x4729   :  { %v7247_v33 = vsel %vm1563_vm7, %v7245_v7, 0.0  ;;  %v16466_v7 = vld [vmem:[#allocation17_spill] sm:$0xff] }
0x472a   :  { %7248 = vadd.xlane.f32.xlu1 %v7247_v33  ;;  %v16467_v33 = vld [vmem:[#allocation33_spill] sm:$0xff] }
0x47b7   :  { %v7249_v23 = vpop.xlane.xlu1 %7248 }
0x47b8   :  { %12976 = vrcp.f32 %v7249_v23  ;;  %v16468_v23 = vld [vmem:[#allocation18_spill] sm:$0xff] }
0x47c2   :  { %v12977_v9 = vpop.eup %12976 }
0x47c3   :  { %v7259_v32 = vrot.slane %v12977_v9, %v13633_v26  ;;  %v7255_v38 = vrot.slane %v12977_v9, %v13627_v21  ;;  %v16469_v9 = vld [vmem:[#allocation35_spill] sm:$0xff] }
0x47c5   :  { %v7264_v14 = vmul.f32 %v12973_v62, %v7259_v32  ;;  %v7265_v54 = vmul.f32 %v12975_v61, %v7259_v32  ;;  %v7262_v59 = vmul.f32 %v12969_v6, %v7255_v38  ;;  %v7263_v35 = vmul.f32 %v12971_v11, %v7255_v38  ;;  %v16470_v32 = vld [vmem:[#allocation19_spill] sm:$0xff]  ;;  %v16473_v38 = vld [vmem:[#allocation37_spill] sm:$0xff] }
0x47c7   :  { %7358 = vperm.xlu0 %12632, %v7264_v14   ;;  %v16471_v14 = vld [vmem:[#allocation36_spill] sm:$0xff] }
0x47cb   :  { %7361 = vperm.xlu0 %12632, %v7265_v54   ;;  %v16472_v54 = vld [vmem:[#allocation20_spill] sm:$0xff] }
0x47cf   :  { %7269 = vperm.xlu0 %12632, %v7262_v59   ;;  %v16474_v59 = vld [vmem:[#allocation21_spill] sm:$0xff] }
0x47d3   :  { %7272 = vperm.xlu0 %12632, %v7263_v35   ;;  %v16475_v35 = vld [vmem:[#allocation38_spill] sm:$0xff] }
0x4846   :  { %v7359_v27 = vpop.permute.xlu0 %7358 }
0x4847   :  { %v7366_v15 = vrot.slane %v7359_v27, %v13723_v60  ;;  %v16476_v27 = vld [vmem:[#allocation22_spill] sm:$0xff] }
0x484a   :  { %v7362_v4 = vpop.permute.xlu0 %7361 }
0x484b   :  { %v7370_v5 = vrot.slane %v7362_v4, %v13726_v50  ;;  %v16477_v4 = vld [vmem:[#allocation39_spill] sm:$0xff] }
0x484d   :  { %v7371_v31 = vsel %vm1549_vm5, %v7370_v5, %v7366_v15  ;;  %v16478_v15 = vld [vmem:[#allocation23_spill] sm:$0xff]  ;;  %v16479_v5 = vld [vmem:[#allocation40_spill] sm:$0xff] }
0x484e   :  { %10262 = vmatmul.mubr.msk.f32.vlgmr.msra.gmra.mrb[60].mxu0 %vm86_vm0, %v7371_v31  ;;  %v7270_v62 = vpop.permute.xlu0 %7269  ;;  %v16480_v31 = vld [vmem:[#allocation24_spill] sm:$0xff] }
0x484f   :  { %12086 = vmatpush1.bf16.msra.mxu0 %v13471_v42  ;;  %v7277_v6 = vrot.slane %v7270_v62, %v13723_v60  ;;  %v16481_v62 = vld [vmem:[#allocation41_spill] sm:$0xff] }
0x4850   :  { %12088 = vmatprep.subr.bf16.mxu0 %v13473_v44 }
0x4852   :  { %v7273_v61 = vpop.permute.xlu0 %7272 }
0x4853   :  { %v7281_v11 = vrot.slane %v7273_v61, %v13726_v50  ;;  %12090 = vmatpush1.bf16.msra.mxu0 %v13478_v53  ;;  %v16482_v61 = vld [vmem:[#allocation26_spill] sm:$0xff] }
0x4854   :  { %12092 = vmatprep.subr.bf16.mxu0 %v13481_v55 }
0x4855   :  { %v7282_v58 = vsel %vm1549_vm5, %v7281_v11, %v7277_v6  ;;  %v16483_v6 = vld [vmem:[#allocation42_spill] sm:$0xff]  ;;  %v16484_v11 = vld [vmem:[#allocation28_spill] sm:$0xff] }
0x4856   :  { %10255 = vmatmul.mubr.msk.f32.vlgmr.msra.gmra.mrb[56].mxu1 %vm86_vm0, %v7282_v58  ;;  %v16485_v58 = vmov 0.0|0.0  }
0x4857   :  { %12022 = vmatpush1.bf16.msra.mxu1 %v13398_v12  ;;  %12094 = vmatpush1.bf16.msra.mxu0 %v13486_v3 }
0x4858   :  { %12024 = vmatprep.subr.bf16.mxu1 %v13400_v13  ;;  %12096 = vmatprep.subr.bf16.mxu0 %v13489_v8 }
0x485b   :  { %12026 = vmatpush1.bf16.msra.mxu1 %v13404_v10  ;;  %12098 = vmatpush1.bf16.msra.mxu0 %v13492_v18 }
0x485c   :  { %12028 = vmatprep.subr.bf16.mxu1 %v13407_v17  ;;  %12100 = vmatprep.subr.bf16.mxu0 %v13495_v19 }
0x485f   :  { %12030 = vmatpush1.bf16.msra.mxu1 %v13412_v24  ;;  %12102 = vmatpush1.bf16.msra.mxu0 %v13498_v36 }
0x4860   :  { %12032 = vmatprep.subr.bf16.mxu1 %v13416_v25  ;;  %12104 = vmatprep.subr.bf16.mxu0 %v13501_v37 }
0x4863   :  { %12034 = vmatpush1.bf16.msra.mxu1 %v13419_v30  ;;  %12106 = vmatpush1.bf16.msra.mxu0 %v13504_v47 }
0x4864   :  { %12036 = vmatprep.subr.bf16.mxu1 %v13422_v34  ;;  %12108 = vmatprep.subr.bf16.mxu0 %v13507_v48 }
0x4867   :  { %12038 = vmatpush1.bf16.msra.mxu1 %v13425_v40  ;;  %12110 = vmatpush1.bf16.msra.mxu0 %v13510_v63 }
0x4868   :  { %12040 = vmatprep.subr.bf16.mxu1 %v13428_v41  ;;  %12112 = vmatprep.subr.bf16.mxu0 %v13513_v0 }
0x486b   :  { %12042 = vmatpush1.bf16.msra.mxu1 %v13431_v45  ;;  %12114 = vmatpush1.bf16.msra.mxu0 %v13516_v16 }
0x486c   :  { %12044 = vmatprep.subr.bf16.mxu1 %v13434_v46  ;;  %12116 = vmatprep.subr.bf16.mxu0 %v13519_v20 }
0x486f   :  { %12046 = vmatpush1.bf16.msra.mxu1 %v13437_v51  ;;  %12118 = vmatpush1.bf16.msra.mxu0 %v13525_v49 }
0x4870   :  { %12048 = vmatprep.subr.bf16.mxu1 %v13440_v52  ;;  %12120 = vmatprep.subr.bf16.mxu0 %v13532_v1 }
0x4873   :  { %12050 = vmatpush1.bf16.msra.mxu1 %v15993_v43  ;;  %12122 = vmatpush1.bf16.msra.mxu0 %v15994_v57 }
0x4874   :  { %12052 = vmatprep.subr.bf16.mxu1 %v15995_v39  ;;  %12124 = vmatprep.subr.bf16.mxu0 %v15996_v28 }
0x4877   :  { %12054 = vmatpush1.bf16.msra.mxu1 %v15997_v22  ;;  %12126 = vmatpush1.bf16.msra.mxu0 %v15998_v2 }
0x4878   :  { %12056 = vmatprep.subr.bf16.mxu1 %v15999_v29  ;;  %12128 = vmatprep.subr.bf16.mxu0 %v16465_v56 }
0x487b   :  { %12058 = vmatpush1.bf16.msra.mxu1 %v16466_v7  ;;  %12130 = vmatpush1.bf16.msra.mxu0 %v16467_v33 }
0x487c   :  { %12060 = vmatprep.subr.bf16.mxu1 %v16468_v23  ;;  %12132 = vmatprep.subr.bf16.mxu0 %v16469_v9 }
0x487f   :  { %12062 = vmatpush1.bf16.msra.mxu1 %v16470_v32  ;;  %12134 = vmatpush1.bf16.msra.mxu0 %v16471_v14 }
0x4880   :  { %12064 = vmatprep.subr.bf16.mxu1 %v16472_v54  ;;  %12136 = vmatprep.subr.bf16.mxu0 %v16473_v38  ;;  %v16498_v54 = vld [vmem:[#allocation47_spill] sm:$0xff] }
0x4883   :  { %12066 = vmatpush1.bf16.msra.mxu1 %v16474_v59  ;;  %12138 = vmatpush1.bf16.msra.mxu0 %v16475_v35  ;;  %v16486_v35 = vld [vmem:[#allocation30_spill] sm:$0xff] }
0x4884   :  { %12068 = vmatprep.subr.bf16.mxu1 %v16476_v27  ;;  %12140 = vmatprep.subr.bf16.mxu0 %v16477_v4  ;;  %v16487_v27 = vld [vmem:[#allocation32_spill] sm:$0xff]  ;;  %v16488_v4 = vld [vmem:[#allocation34_spill] sm:$0xff] }
0x4887   :  { %12070 = vmatpush1.bf16.msra.mxu1 %v16478_v15  ;;  %12142 = vmatpush1.bf16.msra.mxu0 %v16479_v5 }
0x4888   :  { %12072 = vmatprep.subr.bf16.mxu1 %v16480_v31  ;;  %12144 = vmatprep.subr.bf16.mxu0 %v16481_v62 }
0x488b   :  { %12074 = vmatpush1.bf16.msra.mxu1 %v16482_v61  ;;  %12146 = vmatpush1.bf16.msra.mxu0 %v16483_v6 }
0x488c   :  { %12076 = vmatprep.subr.bf16.mxu1 %v16484_v11  ;;  %12151 = vmatprep.subr.bf16.mxu0 %v16485_v58  ;;  %v16489_v11 = vld [vmem:[#allocation29_spill] sm:$0xff] }
0x488f   :  { %12078 = vmatpush1.bf16.msra.mxu1 %v16486_v35  ;;  %v16490_v35 = vld [vmem:[#allocation52_spill] sm:$0xff] }
0x4890   :  { %12080 = vmatprep.subr.bf16.mxu1 %v16487_v27 }
0x4893   :  { %12082 = vmatpush1.bf16.msra.mxu1 %v16488_v4  ;;  %v16492_v4 = vld [vmem:[#allocation54_spill] sm:$0xff] }
0x4894   :  { %12147 = vmatprep.subr.bf16.mxu1 %v16485_v58  ;;  %v16497_v58 = vld [vmem:[#allocation44_spill] sm:$0xff] }
0x4921   :  { %v7440_v5 = vpop.f32.mrb[60].mxu0 }
0x4922   :  { %v10263_v31 = vpop.f32.mrb[61].mxu0  ;;  %v7446_v15 = vrot.slane %v7440_v5, 7 }
0x4923   :  { %v16493_v31 = vmov 0.0  }
0x4929   :  { %v7351_v62 = vpop.f32.mrb[56].mxu1 }
0x492a   :  { %v10256_v59 = vpop.f32.mrb[57].mxu1  ;;  %v7447_v61 = vsel %vm1560_vm6, %v7446_v15, %v7351_v62  ;;  %v16495_v15 = vld [vmem:[#allocation12_spill] sm:$0xff] }
0x492b   :  { %7513 = vmatprep.mubr.f32.mxu1 %v7447_v61  ;;  %7584 = vmatprep.mubr.f32.mxu0 %v7447_v61  ;;  %v16494_v59 = vld [vmem:[#allocation11_spill] sm:$0xff] }
0x492c   :  { %7514 = vmatmul.mubr.f32.vlgmr.msra.gmra.mrb[58].mxu1 %v16489_v11  ;;  %7585 = vmatmul.mubr.f32.vlgmr.msra.gmra.mrb[62].mxu0 %v16489_v11  ;;  %v16496_v61 = vld [vmem:[#allocation43_spill] sm:$0xff] }
0x492d   :  { %12150 = vmatpush3.bf16.msk.msra.mxu1 %vm13680_vm4, %v16490_v35  ;;  %12154 = vmatpush3.bf16.msk.msra.mxu0 %vm13680_vm4, %v16492_v4 }
0x492e   :  { %10275 = vmatprep.mubr.msk.f32.mxu0 %vm13165_vm8, %v16493_v31  ;;  %10268 = vmatprep.mubr.msk.f32.mxu1 %vm13165_vm8, %v16493_v31  ;;  %v16499_v31 = vld [vmem:[#allocation45_spill] sm:$0xff] }
0x492f   :  { %12156 = vmatprep.subr.bf16.mxu1 %v16494_v59  ;;  %12220 = vmatprep.subr.bf16.mxu0 %v16495_v15 }
0x49ff   :  { %v7515_v5 = vpop.f32.mrb[58].mxu1  ;;  %v7586_v62 = vpop.f32.mrb[62].mxu0 }
0x4a00   :  { %v7516_v11 = vadd.f32 %v7515_v5, %v16496_v61  ;;  %v7517_v27 = vpop.f32.mrb[59].mxu1  ;;  %v7588_v35 = vpop.f32.mrb[63].mxu0  ;;  %v7587_v9 = vadd.f32 %v7586_v62, %v16499_v31 }
0x4a01   :  { %v7518_v38 = vadd.f32 %v7517_v27, %v16497_v58  ;;  %v7589_v14 = vadd.f32 %v7588_v35, %v16498_v54 }
0x4a02   :  { %v9799_v6 = vmul.f32 -1.442695, %v7516_v11 }
0x4a03   :  { %v9800_v4 = vmul.f32 -1.442695, %v7518_v38  ;;  %v9801_v32 = vmul.f32 -1.442695, %v7589_v14 }
0x4a04   :  { %12978 = vpow2.f32 %v9799_v6 }
0x4a05   :  { %12980 = vpow2.f32 %v9800_v4  ;;  %v16500_v4 = vld [vmem:[#allocation15_spill] sm:$0xff] }
0x4a06   :  { %12982 = vpow2.f32 %v9801_v32 }
0x4a07   :  { %12984 = vtanh.f32 %v7587_v9 }
0x4a0e   :  { %v12979_v59 = vpop.eup %12978 }
0x4a0f   :  { %v12981_v23 = vpop.eup %12980  ;;  %v7594_v15 = vadd.f32 1.0, %v12979_v59 }
0x4a10   :  { %v7600_v33 = vadd.f32 1.0, %v12981_v23  ;;  %v12983_v5 = vpop.eup %12982  ;;  %v16503_v23 = vld [vmem:[#allocation48_spill] sm:$0xff] }
0x4a11   :  { %12986 = vrcp.f32 %v7594_v15  ;;  %v12985_v61 = vpop.eup %12984  ;;  %v7607_v6 = vadd.f32 1.0, %v12983_v5  ;;  %v16504_v5 = vld [vmem:[#allocation50_spill] sm:$0xff] }
0x4a12   :  { %12988 = vrcp.f32 %v7600_v33 }
0x4a13   :  { %12990 = vrcp.f32 %v7607_v6  ;;  %v16506_v6 = vld [vmem:[#allocation53_spill] sm:$0xff] }
0x4a1b   :  { %v12987_v27 = vpop.eup %12986 }
0x4a1c   :  { %v12989_v11 = vpop.eup %12988  ;;  %v7611_v38 = vmul.f32 %v12987_v27, %v12985_v61  ;;  %v16505_v27 = vld [vmem:[#allocation51_spill] sm:$0xff] }
0x4a1d   :  { %v7610_v58 = vmul.f32 %v12989_v11, %v16500_v4  ;;  %v12991_v14 = vpop.eup %12990 }
0x4a1f   :  { %v15241_v35 = vadd.f32 %v7611_v38, %v7610_v58 }
0x4a21   :  { %16501 = vst [vmem:[#allocation16_spill] sm:$0xff] %v15241_v35  ;;  %12992 = vtanh.f32 %v15241_v35 }
0x4a2b   :  { %v12993_v59 = vpop.eup %12992 }
0x4a2c   :  { %v15244_v32 = vmul.f32 %v12993_v59, %v12991_v14  ;;  %v16507_v14 = vld [vmem:[#allocation55_spill] sm:$0xff] }
0x4a2e   :  { %16502 = vst [vmem:[#allocation46_spill] sm:$0xff] %v15244_v32  ;;  %v7622_v33 = vrot.slane %v15244_v32, %v16503_v23 }
0x4a30   :  { %v7630_v9 = vrot.slane %v7622_v33, %v16503_v23  ;;  %v7623_v15 = vcombine.high %v7622_v33, %v7622_v33 }
0x4a32   :  { %v7641_v62 = vrot.slane %v7630_v9, %v13627_v21  ;;  %v7637_v61 = vrot.slane %v7623_v15, %v16503_v23 }
0x4a34   :  { %v7644_v58 = vmul.f32 %v7641_v62, %v16504_v5  ;;  %v7643_v11 = vmul.f32 %v7641_v62, %v16505_v27  ;;  %v7652_v38 = vrot.slane %v7637_v61, %v13627_v21 }
0x4a36   :  { %7647 = vadd.xlane.f32.xlu0 %v7644_v58  ;;  %7645 = vadd.xlane.f32.xlu1 %v7643_v11  ;;  %v7654_v4 = vmul.f32 %v7652_v38, %v16506_v6  ;;  %v7655_v59 = vmul.f32 %v7652_v38, %v16507_v14 }
0x4a3a   :  { %7656 = vadd.xlane.f32.xlu1 %v7654_v4 }
0x4a3e   :  { %7658 = vadd.xlane.f32.xlu1 %v7655_v59 }
0x4ac3   :  { %v7646_v35 = vpop.xlane.xlu1 %7645  ;;  %v7648_v33 = vpop.xlane.xlu0 %7647 }
0x4ac4   :  { %7665 = vperm.xlu1 %12633, %v7646_v35  }
0x4ac7   :  { %v7657_v9 = vpop.xlane.xlu1 %7656 }
0x4ac8   :  { %7668 = vperm.xlu1 %12633, %v7648_v33  }
0x4acb   :  { %v7659_v15 = vpop.xlane.xlu1 %7658 }
0x4acc   :  { %7671 = vperm.xlu1 %12633, %v7657_v9   ;;  %7674 = vperm.xlu0 %12632, %v7659_v15  }
0x4b43   :  { %v7666_v5 = vpop.permute.xlu1 %7665 }
0x4b44   :  { %v7679_v6 = vrot.slane %v7666_v5, %v13723_v60 }
0x4b47   :  { %v7669_v62 = vpop.permute.xlu1 %7668 }
0x4b48   :  { %v7683_v61 = vrot.slane %v7669_v62, %v13726_v50 }
0x4b4a   :  { %v7684_v59 = vsel %vm1549_vm5, %v7683_v61, %v7679_v6 }
0x4b4b   :  { %v7675_v58 = vpop.permute.xlu0 %7674  ;;  %v7672_v11 = vpop.permute.xlu1 %7671 }
0x4b4c   :  { %v7692_v4 = vrot.slane %v7675_v58, %v13726_v50  ;;  %v7688_v38 = vrot.slane %v7672_v11, %v13723_v60 }
0x4b4e   :  { %v7693_v14 = vsel %vm1549_vm5, %v7692_v4, %v7688_v38 }
0x4b4f   :  { %v7694_v27 = vsel %vm1560_vm6, %v7693_v14, %v7684_v59 }
0x4b50   :  { %v7696_v23 = vsel %vm1563_vm7, %v7694_v27, -inf }
0x4b51   :  { %7697 = vmax.xlane.f32.xlu1 %v7696_v23 }
0x4bde   :  { %v7698_v31 = vpop.xlane.xlu1 %7697 }
0x4bdf   :  { %v7703_v62 = vrot.slane %v7698_v31, %v13627_v21  ;;  %v7707_v54 = vrot.slane %v7698_v31, %v13633_v26 }
0x4be1   :  { %v7710_v32 = vsub.f32 %v7646_v35, %v7703_v62  ;;  %v7711_v5 = vsub.f32 %v7648_v33, %v7703_v62  ;;  %v7712_v58 = vsub.f32 %v7657_v9, %v7707_v54  ;;  %v7713_v56 = vsub.f32 %v7659_v15, %v7707_v54 }
0x4be3   :  { %v7714_v7 = vmul.f32 1.442695, %v7710_v32  ;;  %v7716_v11 = vmul.f32 1.442695, %v7711_v5  ;;  %v7718_v6 = vmul.f32 1.442695, %v7712_v58 }
0x4be4   :  { %v7720_v61 = vmul.f32 1.442695, %v7713_v56 }
0x4be5   :  { %12994 = vpow2.f32 %v7714_v7 }
0x4be6   :  { %12996 = vpow2.f32 %v7716_v11 }
0x4be7   :  { %12998 = vpow2.f32 %v7718_v6 }
0x4be8   :  { %13000 = vpow2.f32 %v7720_v61 }
0x4bef   :  { %v12995_v14 = vpop.eup %12994 }
0x4bf0   :  { %7727 = vperm.xlu0 %12632, %v12995_v14   ;;  %v12997_v23 = vpop.eup %12996 }
0x4bf1   :  { %v12999_v27 = vpop.eup %12998 }
0x4bf2   :  { %v13001_v4 = vpop.eup %13000 }
0x4bf4   :  { %7730 = vperm.xlu0 %12632, %v12997_v23  }
0x4bf8   :  { %7733 = vperm.xlu0 %12632, %v12999_v27  }
0x4bfc   :  { %7736 = vperm.xlu0 %12632, %v13001_v4  }
0x4c6f   :  { %v7728_v31 = vpop.permute.xlu0 %7727 }
0x4c70   :  { %v7741_v54 = vrot.slane %v7728_v31, %v13723_v60 }
0x4c73   :  { %v7731_v35 = vpop.permute.xlu0 %7730 }
0x4c74   :  { %v7745_v7 = vrot.slane %v7731_v35, %v13726_v50 }
0x4c76   :  { %v7746_v15 = vsel %vm1549_vm5, %v7745_v7, %v7741_v54 }
0x4c77   :  { %v7734_v32 = vpop.permute.xlu0 %7733 }
0x4c78   :  { %v7750_v9 = vrot.slane %v7734_v32, %v13723_v60 }
0x4c7b   :  { %v7737_v33 = vpop.permute.xlu0 %7736 }
0x4c7c   :  { %v7754_v56 = vrot.slane %v7737_v33, %v13726_v50 }
0x4c7e   :  { %v7755_v38 = vsel %vm1549_vm5, %v7754_v56, %v7750_v9 }
0x4c7f   :  { %v7756_v59 = vsel %vm1560_vm6, %v7755_v38, %v7746_v15  ;;  %v16508_v38 = vld [vmem:[#allocation31_spill] sm:$0xff] }
0x4c80   :  { %v7758_v62 = vsel %vm1563_vm7, %v7756_v59, 0.0  ;;  %v16509_v59 = vld [vmem:[#allocation17_spill] sm:$0xff] }
0x4c81   :  { %7759 = vadd.xlane.f32.xlu0 %v7758_v62  ;;  %v16510_v62 = vld [vmem:[#allocation33_spill] sm:$0xff] }
0x4d0e   :  { %v7760_v5 = vpop.xlane.xlu0 %7759 }
0x4d0f   :  { %13002 = vrcp.f32 %v7760_v5  ;;  %v16511_v5 = vld [vmem:[#allocation18_spill] sm:$0xff] }
0x4d19   :  { %v13003_v58 = vpop.eup %13002 }
0x4d1a   :  { %v7770_v11 = vrot.slane %v13003_v58, %v13633_v26  ;;  %v7766_v31 = vrot.slane %v13003_v58, %v13627_v21  ;;  %v16512_v58 = vld [vmem:[#allocation35_spill] sm:$0xff] }
0x4d1c   :  { %v7775_v6 = vmul.f32 %v12999_v27, %v7770_v11  ;;  %v7776_v61 = vmul.f32 %v13001_v4, %v7770_v11  ;;  %v7773_v35 = vmul.f32 %v12995_v14, %v7766_v31  ;;  %v7774_v32 = vmul.f32 %v12997_v23, %v7766_v31  ;;  %v16513_v11 = vld [vmem:[#allocation19_spill] sm:$0xff]  ;;  %v16516_v31 = vld [vmem:[#allocation37_spill] sm:$0xff] }
0x4d1e   :  { %7869 = vperm.xlu1 %12633, %v7775_v6   ;;  %v16514_v6 = vld [vmem:[#allocation36_spill] sm:$0xff] }
0x4d22   :  { %7872 = vperm.xlu1 %12633, %v7776_v61   ;;  %v16515_v61 = vld [vmem:[#allocation20_spill] sm:$0xff] }
0x4d26   :  { %7780 = vperm.xlu1 %12633, %v7773_v35   ;;  %v16517_v35 = vld [vmem:[#allocation21_spill] sm:$0xff] }
0x4d2a   :  { %7783 = vperm.xlu1 %12633, %v7774_v32   ;;  %v16518_v32 = vld [vmem:[#allocation38_spill] sm:$0xff] }
0x4d9d   :  { %v7870_v7 = vpop.permute.xlu1 %7869 }
0x4d9e   :  { %v7877_v54 = vrot.slane %v7870_v7, %v13723_v60  ;;  %v16519_v7 = vld [vmem:[#allocation22_spill] sm:$0xff] }
0x4da1   :  { %v7873_v33 = vpop.permute.xlu1 %7872 }
0x4da2   :  { %v7881_v9 = vrot.slane %v7873_v33, %v13726_v50  ;;  %v16520_v33 = vld [vmem:[#allocation39_spill] sm:$0xff] }
0x4da4   :  { %v7882_v56 = vsel %vm1549_vm5, %v7881_v9, %v7877_v54  ;;  %v16521_v54 = vld [vmem:[#allocation23_spill] sm:$0xff]  ;;  %v16522_v9 = vld [vmem:[#allocation40_spill] sm:$0xff] }
0x4da5   :  { %10276 = vmatmul.mubr.msk.f32.vlgmr.msra.gmra.mrb[64].mxu0 %vm86_vm0, %v7882_v56  ;;  %v7781_v27 = vpop.permute.xlu1 %7780  ;;  %v16523_v56 = vld [vmem:[#allocation24_spill] sm:$0xff] }
0x4da6   :  { %12222 = vmatpush1.bf16.msra.mxu0 %v13471_v42  ;;  %v7788_v14 = vrot.slane %v7781_v27, %v13723_v60  ;;  %v16524_v27 = vld [vmem:[#allocation41_spill] sm:$0xff] }
0x4da7   :  { %12224 = vmatprep.subr.bf16.mxu0 %v13473_v44 }
0x4da9   :  { %v7784_v4 = vpop.permute.xlu1 %7783 }
0x4daa   :  { %v7792_v23 = vrot.slane %v7784_v4, %v13726_v50  ;;  %12226 = vmatpush1.bf16.msra.mxu0 %v13478_v53  ;;  %v16525_v4 = vld [vmem:[#allocation26_spill] sm:$0xff] }
0x4dab   :  { %12228 = vmatprep.subr.bf16.mxu0 %v13481_v55 }
0x4dac   :  { %v7793_v15 = vsel %vm1549_vm5, %v7792_v23, %v7788_v14  ;;  %v16526_v14 = vld [vmem:[#allocation42_spill] sm:$0xff]  ;;  %v16527_v23 = vld [vmem:[#allocation28_spill] sm:$0xff] }
0x4dad   :  { %10269 = vmatmul.mubr.msk.f32.vlgmr.msra.gmra.mrb[60].mxu1 %vm86_vm0, %v7793_v15  ;;  %v16528_v15 = vmov 0.0|0.0  }
0x4dae   :  { %12158 = vmatpush1.bf16.msra.mxu1 %v13398_v12  ;;  %12230 = vmatpush1.bf16.msra.mxu0 %v13486_v3 }
0x4daf   :  { %12160 = vmatprep.subr.bf16.mxu1 %v13400_v13  ;;  %12232 = vmatprep.subr.bf16.mxu0 %v13489_v8 }
0x4db2   :  { %12162 = vmatpush1.bf16.msra.mxu1 %v13404_v10  ;;  %12234 = vmatpush1.bf16.msra.mxu0 %v13492_v18 }
0x4db3   :  { %12164 = vmatprep.subr.bf16.mxu1 %v13407_v17  ;;  %12236 = vmatprep.subr.bf16.mxu0 %v13495_v19 }
0x4db6   :  { %12166 = vmatpush1.bf16.msra.mxu1 %v13412_v24  ;;  %12238 = vmatpush1.bf16.msra.mxu0 %v13498_v36 }
0x4db7   :  { %12168 = vmatprep.subr.bf16.mxu1 %v13416_v25  ;;  %12240 = vmatprep.subr.bf16.mxu0 %v13501_v37 }
0x4dba   :  { %12170 = vmatpush1.bf16.msra.mxu1 %v13419_v30  ;;  %12242 = vmatpush1.bf16.msra.mxu0 %v13504_v47 }
0x4dbb   :  { %12172 = vmatprep.subr.bf16.mxu1 %v13422_v34  ;;  %12244 = vmatprep.subr.bf16.mxu0 %v13507_v48 }
0x4dbe   :  { %12174 = vmatpush1.bf16.msra.mxu1 %v13425_v40  ;;  %12246 = vmatpush1.bf16.msra.mxu0 %v13510_v63 }
0x4dbf   :  { %12176 = vmatprep.subr.bf16.mxu1 %v13428_v41  ;;  %12248 = vmatprep.subr.bf16.mxu0 %v13513_v0 }
0x4dc2   :  { %12178 = vmatpush1.bf16.msra.mxu1 %v13431_v45  ;;  %12250 = vmatpush1.bf16.msra.mxu0 %v13516_v16 }
0x4dc3   :  { %12180 = vmatprep.subr.bf16.mxu1 %v13434_v46  ;;  %12252 = vmatprep.subr.bf16.mxu0 %v13519_v20 }
0x4dc6   :  { %12182 = vmatpush1.bf16.msra.mxu1 %v13437_v51  ;;  %12254 = vmatpush1.bf16.msra.mxu0 %v13525_v49 }
0x4dc7   :  { %12184 = vmatprep.subr.bf16.mxu1 %v13440_v52  ;;  %12256 = vmatprep.subr.bf16.mxu0 %v13532_v1 }
0x4dca   :  { %12186 = vmatpush1.bf16.msra.mxu1 %v15993_v43  ;;  %12258 = vmatpush1.bf16.msra.mxu0 %v15994_v57 }
0x4dcb   :  { %12188 = vmatprep.subr.bf16.mxu1 %v15995_v39  ;;  %12260 = vmatprep.subr.bf16.mxu0 %v15996_v28 }
0x4dce   :  { %12190 = vmatpush1.bf16.msra.mxu1 %v15997_v22  ;;  %12262 = vmatpush1.bf16.msra.mxu0 %v15998_v2 }
0x4dcf   :  { %12192 = vmatprep.subr.bf16.mxu1 %v15999_v29  ;;  %12264 = vmatprep.subr.bf16.mxu0 %v16508_v38 }
0x4dd2   :  { %12194 = vmatpush1.bf16.msra.mxu1 %v16509_v59  ;;  %12266 = vmatpush1.bf16.msra.mxu0 %v16510_v62 }
0x4dd3   :  { %12196 = vmatprep.subr.bf16.mxu1 %v16511_v5  ;;  %12268 = vmatprep.subr.bf16.mxu0 %v16512_v58 }
0x4dd6   :  { %12198 = vmatpush1.bf16.msra.mxu1 %v16513_v11  ;;  %12270 = vmatpush1.bf16.msra.mxu0 %v16514_v6 }
0x4dd7   :  { %12200 = vmatprep.subr.bf16.mxu1 %v16515_v61  ;;  %12272 = vmatprep.subr.bf16.mxu0 %v16516_v31  ;;  %v16541_v61 = vld [vmem:[#allocation47_spill] sm:$0xff] }
0x4dda   :  { %12202 = vmatpush1.bf16.msra.mxu1 %v16517_v35  ;;  %12274 = vmatpush1.bf16.msra.mxu0 %v16518_v32  ;;  %v16529_v32 = vld [vmem:[#allocation30_spill] sm:$0xff] }
0x4ddb   :  { %12204 = vmatprep.subr.bf16.mxu1 %v16519_v7  ;;  %12276 = vmatprep.subr.bf16.mxu0 %v16520_v33  ;;  %v16530_v7 = vld [vmem:[#allocation32_spill] sm:$0xff]  ;;  %v16531_v33 = vld [vmem:[#allocation34_spill] sm:$0xff] }
0x4dde   :  { %12206 = vmatpush1.bf16.msra.mxu1 %v16521_v54  ;;  %12278 = vmatpush1.bf16.msra.mxu0 %v16522_v9 }
0x4ddf   :  { %12208 = vmatprep.subr.bf16.mxu1 %v16523_v56  ;;  %12280 = vmatprep.subr.bf16.mxu0 %v16524_v27 }
0x4de2   :  { %12210 = vmatpush1.bf16.msra.mxu1 %v16525_v4  ;;  %12282 = vmatpush1.bf16.msra.mxu0 %v16526_v14 }
0x4de3   :  { %12212 = vmatprep.subr.bf16.mxu1 %v16527_v23  ;;  %12287 = vmatprep.subr.bf16.mxu0 %v16528_v15  ;;  %v16532_v23 = vld [vmem:[#allocation46_spill] sm:$0xff] }
0x4de6   :  { %12214 = vmatpush1.bf16.msra.mxu1 %v16529_v32  ;;  %v16533_v32 = vld [vmem:[#allocation52_spill] sm:$0xff] }
0x4de7   :  { %12216 = vmatprep.subr.bf16.mxu1 %v16530_v7 }
0x4dea   :  { %12218 = vmatpush1.bf16.msra.mxu1 %v16531_v33  ;;  %v16535_v33 = vld [vmem:[#allocation54_spill] sm:$0xff] }
0x4deb   :  { %12283 = vmatprep.subr.bf16.mxu1 %v16528_v15  ;;  %v16540_v15 = vld [vmem:[#allocation44_spill] sm:$0xff] }
0x4e78   :  { %v7951_v9 = vpop.f32.mrb[64].mxu0 }
0x4e79   :  { %v10277_v56 = vpop.f32.mrb[65].mxu0  ;;  %v7957_v54 = vrot.slane %v7951_v9, 7 }
0x4e7a   :  { %v16536_v56 = vmov 0.0  }
0x4e80   :  { %v7862_v27 = vpop.f32.mrb[60].mxu1 }
0x4e81   :  { %v10270_v35 = vpop.f32.mrb[61].mxu1  ;;  %v7958_v4 = vsel %vm1560_vm6, %v7957_v54, %v7862_v27  ;;  %v16538_v54 = vld [vmem:[#allocation12_spill] sm:$0xff] }
0x4e82   :  { %8024 = vmatprep.mubr.f32.mxu1 %v7958_v4  ;;  %8095 = vmatprep.mubr.f32.mxu0 %v7958_v4  ;;  %v16537_v35 = vld [vmem:[#allocation11_spill] sm:$0xff] }
0x4e83   :  { %8025 = vmatmul.mubr.f32.vlgmr.msra.gmra.mrb[62].mxu1 %v16532_v23  ;;  %8096 = vmatmul.mubr.f32.vlgmr.msra.gmra.mrb[66].mxu0 %v16532_v23  ;;  %v16539_v4 = vld [vmem:[#allocation43_spill] sm:$0xff] }
0x4e84   :  { %12286 = vmatpush3.bf16.msk.msra.mxu1 %vm13680_vm4, %v16533_v32  ;;  %12290 = vmatpush3.bf16.msk.msra.mxu0 %vm13680_vm4, %v16535_v33 }
0x4e85   :  { %10289 = vmatprep.mubr.msk.f32.mxu0 %vm13165_vm8, %v16536_v56  ;;  %10282 = vmatprep.mubr.msk.f32.mxu1 %vm13165_vm8, %v16536_v56  ;;  %v16542_v56 = vld [vmem:[#allocation45_spill] sm:$0xff] }
0x4e86   :  { %12292 = vmatprep.subr.bf16.mxu1 %v16537_v35  ;;  %12356 = vmatprep.subr.bf16.mxu0 %v16538_v54 }
0x4f56   :  { %v8026_v9 = vpop.f32.mrb[62].mxu1  ;;  %v8097_v27 = vpop.f32.mrb[66].mxu0 }
0x4f57   :  { %v8027_v23 = vadd.f32 %v8026_v9, %v16539_v4  ;;  %v8028_v7 = vpop.f32.mrb[63].mxu1  ;;  %v8099_v32 = vpop.f32.mrb[67].mxu0  ;;  %v8098_v58 = vadd.f32 %v8097_v27, %v16542_v56 }
0x4f58   :  { %v8029_v31 = vadd.f32 %v8028_v7, %v16540_v15  ;;  %v8100_v6 = vadd.f32 %v8099_v32, %v16541_v61 }
0x4f59   :  { %v9808_v14 = vmul.f32 -1.442695, %v8027_v23 }
0x4f5a   :  { %v9809_v33 = vmul.f32 -1.442695, %v8029_v31  ;;  %v9810_v11 = vmul.f32 -1.442695, %v8100_v6 }
0x4f5b   :  { %13004 = vpow2.f32 %v9808_v14 }
0x4f5c   :  { %13006 = vpow2.f32 %v9809_v33  ;;  %v16543_v33 = vld [vmem:[#allocation16_spill] sm:$0xff] }
0x4f5d   :  { %13008 = vpow2.f32 %v9810_v11 }
0x4f5e   :  { %13010 = vtanh.f32 %v8098_v58 }
0x4f65   :  { %v13005_v35 = vpop.eup %13004 }
0x4f66   :  { %v13007_v5 = vpop.eup %13006  ;;  %v8105_v54 = vadd.f32 1.0, %v13005_v35 }
0x4f67   :  { %v8111_v62 = vadd.f32 1.0, %v13007_v5  ;;  %v13009_v9 = vpop.eup %13008  ;;  %v16546_v5 = vld [vmem:[#allocation48_spill] sm:$0xff] }
0x4f68   :  { %13012 = vrcp.f32 %v8105_v54  ;;  %v13011_v4 = vpop.eup %13010  ;;  %v8118_v14 = vadd.f32 1.0, %v13009_v9  ;;  %v16547_v9 = vld [vmem:[#allocation50_spill] sm:$0xff] }
0x4f69   :  { %13014 = vrcp.f32 %v8111_v62 }
0x4f6a   :  { %13016 = vrcp.f32 %v8118_v14  ;;  %v16549_v14 = vld [vmem:[#allocation53_spill] sm:$0xff] }
0x4f72   :  { %v13013_v7 = vpop.eup %13012 }
0x4f73   :  { %v13015_v23 = vpop.eup %13014  ;;  %v8122_v31 = vmul.f32 %v13013_v7, %v13011_v4  ;;  %v16548_v7 = vld [vmem:[#allocation51_spill] sm:$0xff] }
0x4f74   :  { %v8121_v15 = vmul.f32 %v13015_v23, %v16543_v33  ;;  %v13017_v6 = vpop.eup %13016 }
0x4f76   :  { %v15368_v32 = vadd.f32 %v8122_v31, %v8121_v15 }
0x4f78   :  { %16544 = vst [vmem:[#allocation25_spill] sm:$0xff] %v15368_v32  ;;  %13018 = vtanh.f32 %v15368_v32 }
0x4f82   :  { %v13019_v35 = vpop.eup %13018 }
0x4f83   :  { %v15371_v11 = vmul.f32 %v13019_v35, %v13017_v6  ;;  %v16550_v6 = vld [vmem:[#allocation55_spill] sm:$0xff] }
0x4f85   :  { %16545 = vst [vmem:[#allocation13_spill] sm:$0xff] %v15371_v11  ;;  %v8133_v62 = vrot.slane %v15371_v11, %v16546_v5 }
0x4f87   :  { %v8141_v58 = vrot.slane %v8133_v62, %v16546_v5  ;;  %v8134_v54 = vcombine.high %v8133_v62, %v8133_v62 }
0x4f89   :  { %v8152_v27 = vrot.slane %v8141_v58, %v13627_v21  ;;  %v8148_v4 = vrot.slane %v8134_v54, %v16546_v5 }
0x4f8b   :  { %v8155_v15 = vmul.f32 %v8152_v27, %v16547_v9  ;;  %v8154_v23 = vmul.f32 %v8152_v27, %v16548_v7  ;;  %v8163_v31 = vrot.slane %v8148_v4, %v13627_v21 }
0x4f8d   :  { %8158 = vadd.xlane.f32.xlu0 %v8155_v15  ;;  %8156 = vadd.xlane.f32.xlu1 %v8154_v23  ;;  %v8165_v33 = vmul.f32 %v8163_v31, %v16549_v14  ;;  %v8166_v35 = vmul.f32 %v8163_v31, %v16550_v6 }
0x4f91   :  { %8167 = vadd.xlane.f32.xlu0 %v8165_v33 }
0x4f95   :  { %8169 = vadd.xlane.f32.xlu0 %v8166_v35 }
0x501a   :  { %v8159_v32 = vpop.xlane.xlu0 %8158  ;;  %v8157_v62 = vpop.xlane.xlu1 %8156 }
0x501b   :  { %8176 = vperm.xlu0 %12632, %v8157_v62  }
0x501e   :  { %v8168_v58 = vpop.xlane.xlu0 %8167 }
0x501f   :  { %8179 = vperm.xlu0 %12632, %v8159_v32   ;;  %8182 = vperm.xlu1 %12633, %v8168_v58  }
0x5022   :  { %v8170_v54 = vpop.xlane.xlu0 %8169 }
0x5023   :  { %8185 = vperm.xlu0 %12632, %v8170_v54  }
0x509a   :  { %v8177_v9 = vpop.permute.xlu0 %8176 }
0x509b   :  { %v8190_v23 = vrot.slane %v8177_v9, %v13723_v60 }
0x509e   :  { %v8180_v27 = vpop.permute.xlu0 %8179  ;;  %v8183_v7 = vpop.permute.xlu1 %8182 }
0x509f   :  { %v8194_v4 = vrot.slane %v8180_v27, %v13726_v50  ;;  %v8199_v33 = vrot.slane %v8183_v7, %v13723_v60 }
0x50a1   :  { %v8195_v35 = vsel %vm1549_vm5, %v8194_v4, %v8190_v23 }
0x50a2   :  { %v8186_v15 = vpop.permute.xlu0 %8185 }
0x50a3   :  { %v8203_v31 = vrot.slane %v8186_v15, %v13726_v50 }
0x50a5   :  { %v8204_v6 = vsel %vm1549_vm5, %v8203_v31, %v8199_v33 }
0x50a6   :  { %v8205_v14 = vsel %vm1560_vm6, %v8204_v6, %v8195_v35 }
0x50a7   :  { %v8207_v5 = vsel %vm1563_vm7, %v8205_v14, -inf }
0x50a8   :  { %8208 = vmax.xlane.f32.xlu0 %v8207_v5 }
0x5135   :  { %v8209_v56 = vpop.xlane.xlu0 %8208 }
0x5136   :  { %v8214_v61 = vrot.slane %v8209_v56, %v13627_v21  ;;  %v8218_v27 = vrot.slane %v8209_v56, %v13633_v26 }
0x5138   :  { %v8221_v11 = vsub.f32 %v8157_v62, %v8214_v61  ;;  %v8222_v9 = vsub.f32 %v8159_v32, %v8214_v61  ;;  %v8223_v7 = vsub.f32 %v8168_v58, %v8218_v27  ;;  %v8224_v38 = vsub.f32 %v8170_v54, %v8218_v27 }
0x513a   :  { %v8225_v59 = vmul.f32 1.442695, %v8221_v11  ;;  %v8227_v15 = vmul.f32 1.442695, %v8222_v9  ;;  %v8229_v4 = vmul.f32 1.442695, %v8223_v7 }
0x513b   :  { %v8231_v23 = vmul.f32 1.442695, %v8224_v38 }
0x513c   :  { %13020 = vpow2.f32 %v8225_v59 }
0x513d   :  { %13022 = vpow2.f32 %v8227_v15 }
0x513e   :  { %13024 = vpow2.f32 %v8229_v4 }
0x513f   :  { %13026 = vpow2.f32 %v8231_v23 }
0x5146   :  { %v13021_v6 = vpop.eup %13020 }
0x5147   :  { %8238 = vperm.xlu1 %12633, %v13021_v6   ;;  %v13023_v5 = vpop.eup %13022 }
0x5148   :  { %v13025_v14 = vpop.eup %13024 }
0x5149   :  { %v13027_v33 = vpop.eup %13026 }
0x514b   :  { %8241 = vperm.xlu1 %12633, %v13023_v5  }
0x514f   :  { %8244 = vperm.xlu1 %12633, %v13025_v14  }
0x5153   :  { %8247 = vperm.xlu1 %12633, %v13027_v33  }
0x51c6   :  { %v8239_v56 = vpop.permute.xlu1 %8238 }
0x51c7   :  { %v8252_v62 = vrot.slane %v8239_v56, %v13723_v60 }
0x51ca   :  { %v8242_v61 = vpop.permute.xlu1 %8241 }
0x51cb   :  { %v8256_v59 = vrot.slane %v8242_v61, %v13726_v50 }
0x51cd   :  { %v8257_v54 = vsel %vm1549_vm5, %v8256_v59, %v8252_v62 }
0x51ce   :  { %v8245_v32 = vpop.permute.xlu1 %8244 }
0x51cf   :  { %v8261_v58 = vrot.slane %v8245_v32, %v13723_v60 }
0x51d2   :  { %v8248_v11 = vpop.permute.xlu1 %8247 }
0x51d3   :  { %v8265_v38 = vrot.slane %v8248_v11, %v13726_v50 }
0x51d5   :  { %v8266_v31 = vsel %vm1549_vm5, %v8265_v38, %v8261_v58 }
0x51d6   :  { %v8267_v35 = vsel %vm1560_vm6, %v8266_v31, %v8257_v54  ;;  %v16551_v31 = vld [vmem:[#allocation31_spill] sm:$0xff] }
0x51d7   :  { %v8269_v27 = vsel %vm1563_vm7, %v8267_v35, 0.0  ;;  %v16552_v35 = vld [vmem:[#allocation17_spill] sm:$0xff] }
0x51d8   :  { %8270 = vadd.xlane.f32.xlu1 %v8269_v27  ;;  %v16553_v27 = vld [vmem:[#allocation33_spill] sm:$0xff] }
0x5265   :  { %v8271_v9 = vpop.xlane.xlu1 %8270 }
0x5266   :  { %13028 = vrcp.f32 %v8271_v9  ;;  %v16554_v9 = vld [vmem:[#allocation18_spill] sm:$0xff] }
0x5270   :  { %v13029_v7 = vpop.eup %13028 }
0x5271   :  { %v8281_v15 = vrot.slane %v13029_v7, %v13633_v26  ;;  %v8277_v56 = vrot.slane %v13029_v7, %v13627_v21  ;;  %v16555_v7 = vld [vmem:[#allocation35_spill] sm:$0xff] }
0x5273   :  { %v8286_v4 = vmul.f32 %v13025_v14, %v8281_v15  ;;  %v8287_v23 = vmul.f32 %v13027_v33, %v8281_v15  ;;  %v8284_v61 = vmul.f32 %v13021_v6, %v8277_v56  ;;  %v8285_v32 = vmul.f32 %v13023_v5, %v8277_v56  ;;  %v16556_v15 = vld [vmem:[#allocation19_spill] sm:$0xff]  ;;  %v16559_v56 = vld [vmem:[#allocation37_spill] sm:$0xff] }
0x5275   :  { %8380 = vperm.xlu0 %12632, %v8286_v4   ;;  %v16557_v4 = vld [vmem:[#allocation36_spill] sm:$0xff] }
0x5279   :  { %8383 = vperm.xlu0 %12632, %v8287_v23   ;;  %v16558_v23 = vld [vmem:[#allocation20_spill] sm:$0xff] }
0x527d   :  { %8291 = vperm.xlu0 %12632, %v8284_v61   ;;  %v16560_v61 = vld [vmem:[#allocation21_spill] sm:$0xff] }
0x5281   :  { %8294 = vperm.xlu0 %12632, %v8285_v32   ;;  %v16561_v32 = vld [vmem:[#allocation38_spill] sm:$0xff] }
0x52f4   :  { %v8381_v59 = vpop.permute.xlu0 %8380 }
0x52f5   :  { %v8388_v62 = vrot.slane %v8381_v59, %v13723_v60  ;;  %v16562_v59 = vld [vmem:[#allocation22_spill] sm:$0xff] }
0x52f8   :  { %v8384_v11 = vpop.permute.xlu0 %8383 }
0x52f9   :  { %v8392_v58 = vrot.slane %v8384_v11, %v13726_v50  ;;  %v16563_v11 = vld [vmem:[#allocation39_spill] sm:$0xff] }
0x52fb   :  { %v8393_v38 = vsel %vm1549_vm5, %v8392_v58, %v8388_v62  ;;  %v16564_v62 = vld [vmem:[#allocation23_spill] sm:$0xff]  ;;  %v16565_v58 = vld [vmem:[#allocation40_spill] sm:$0xff] }
0x52fc   :  { %10290 = vmatmul.mubr.msk.f32.vlgmr.msra.gmra.mrb[68].mxu0 %vm86_vm0, %v8393_v38  ;;  %v8292_v14 = vpop.permute.xlu0 %8291  ;;  %v16566_v38 = vld [vmem:[#allocation24_spill] sm:$0xff] }
0x52fd   :  { %12358 = vmatpush1.bf16.msra.mxu0 %v13471_v42  ;;  %v8299_v6 = vrot.slane %v8292_v14, %v13723_v60  ;;  %v16567_v14 = vld [vmem:[#allocation41_spill] sm:$0xff] }
0x52fe   :  { %12360 = vmatprep.subr.bf16.mxu0 %v13473_v44 }
0x5300   :  { %v8295_v33 = vpop.permute.xlu0 %8294 }
0x5301   :  { %v8303_v5 = vrot.slane %v8295_v33, %v13726_v50  ;;  %12362 = vmatpush1.bf16.msra.mxu0 %v13478_v53  ;;  %v16568_v33 = vld [vmem:[#allocation26_spill] sm:$0xff] }
0x5302   :  { %12364 = vmatprep.subr.bf16.mxu0 %v13481_v55 }
0x5303   :  { %v8304_v54 = vsel %vm1549_vm5, %v8303_v5, %v8299_v6  ;;  %v16569_v6 = vld [vmem:[#allocation42_spill] sm:$0xff]  ;;  %v16570_v5 = vld [vmem:[#allocation28_spill] sm:$0xff] }
0x5304   :  { %10283 = vmatmul.mubr.msk.f32.vlgmr.msra.gmra.mrb[64].mxu1 %vm86_vm0, %v8304_v54  ;;  %v16571_v54 = vmov 0.0|0.0  }
0x5305   :  { %12294 = vmatpush1.bf16.msra.mxu1 %v13398_v12  ;;  %12366 = vmatpush1.bf16.msra.mxu0 %v13486_v3 }
0x5306   :  { %12296 = vmatprep.subr.bf16.mxu1 %v13400_v13  ;;  %12368 = vmatprep.subr.bf16.mxu0 %v13489_v8 }
0x5309   :  { %12298 = vmatpush1.bf16.msra.mxu1 %v13404_v10  ;;  %12370 = vmatpush1.bf16.msra.mxu0 %v13492_v18 }
0x530a   :  { %12300 = vmatprep.subr.bf16.mxu1 %v13407_v17  ;;  %12372 = vmatprep.subr.bf16.mxu0 %v13495_v19 }
0x530d   :  { %12302 = vmatpush1.bf16.msra.mxu1 %v13412_v24  ;;  %12374 = vmatpush1.bf16.msra.mxu0 %v13498_v36 }
0x530e   :  { %12304 = vmatprep.subr.bf16.mxu1 %v13416_v25  ;;  %12376 = vmatprep.subr.bf16.mxu0 %v13501_v37 }
0x5311   :  { %12306 = vmatpush1.bf16.msra.mxu1 %v13419_v30  ;;  %12378 = vmatpush1.bf16.msra.mxu0 %v13504_v47 }
0x5312   :  { %12308 = vmatprep.subr.bf16.mxu1 %v13422_v34  ;;  %12380 = vmatprep.subr.bf16.mxu0 %v13507_v48 }
0x5315   :  { %12310 = vmatpush1.bf16.msra.mxu1 %v13425_v40  ;;  %12382 = vmatpush1.bf16.msra.mxu0 %v13510_v63 }
0x5316   :  { %12312 = vmatprep.subr.bf16.mxu1 %v13428_v41  ;;  %12384 = vmatprep.subr.bf16.mxu0 %v13513_v0 }
0x5319   :  { %12314 = vmatpush1.bf16.msra.mxu1 %v13431_v45  ;;  %12386 = vmatpush1.bf16.msra.mxu0 %v13516_v16 }
0x531a   :  { %12316 = vmatprep.subr.bf16.mxu1 %v13434_v46  ;;  %12388 = vmatprep.subr.bf16.mxu0 %v13519_v20 }
0x531d   :  { %12318 = vmatpush1.bf16.msra.mxu1 %v13437_v51  ;;  %12390 = vmatpush1.bf16.msra.mxu0 %v13525_v49 }
0x531e   :  { %12320 = vmatprep.subr.bf16.mxu1 %v13440_v52  ;;  %12392 = vmatprep.subr.bf16.mxu0 %v13532_v1 }
0x5321   :  { %12322 = vmatpush1.bf16.msra.mxu1 %v15993_v43  ;;  %12394 = vmatpush1.bf16.msra.mxu0 %v15994_v57 }
0x5322   :  { %12324 = vmatprep.subr.bf16.mxu1 %v15995_v39  ;;  %12396 = vmatprep.subr.bf16.mxu0 %v15996_v28 }
0x5325   :  { %12326 = vmatpush1.bf16.msra.mxu1 %v15997_v22  ;;  %12398 = vmatpush1.bf16.msra.mxu0 %v15998_v2 }
0x5326   :  { %12328 = vmatprep.subr.bf16.mxu1 %v15999_v29  ;;  %12400 = vmatprep.subr.bf16.mxu0 %v16551_v31 }
0x5329   :  { %12330 = vmatpush1.bf16.msra.mxu1 %v16552_v35  ;;  %12402 = vmatpush1.bf16.msra.mxu0 %v16553_v27 }
0x532a   :  { %12332 = vmatprep.subr.bf16.mxu1 %v16554_v9  ;;  %12404 = vmatprep.subr.bf16.mxu0 %v16555_v7 }
0x532d   :  { %12334 = vmatpush1.bf16.msra.mxu1 %v16556_v15  ;;  %12406 = vmatpush1.bf16.msra.mxu0 %v16557_v4 }
0x532e   :  { %12336 = vmatprep.subr.bf16.mxu1 %v16558_v23  ;;  %12408 = vmatprep.subr.bf16.mxu0 %v16559_v56  ;;  %v16584_v23 = vld [vmem:[#allocation47_spill] sm:$0xff] }
0x5331   :  { %12338 = vmatpush1.bf16.msra.mxu1 %v16560_v61  ;;  %12410 = vmatpush1.bf16.msra.mxu0 %v16561_v32  ;;  %v16572_v32 = vld [vmem:[#allocation30_spill] sm:$0xff] }
0x5332   :  { %12340 = vmatprep.subr.bf16.mxu1 %v16562_v59  ;;  %12412 = vmatprep.subr.bf16.mxu0 %v16563_v11  ;;  %v16573_v59 = vld [vmem:[#allocation32_spill] sm:$0xff]  ;;  %v16574_v11 = vld [vmem:[#allocation34_spill] sm:$0xff] }
0x5335   :  { %12342 = vmatpush1.bf16.msra.mxu1 %v16564_v62  ;;  %12414 = vmatpush1.bf16.msra.mxu0 %v16565_v58 }
0x5336   :  { %12344 = vmatprep.subr.bf16.mxu1 %v16566_v38  ;;  %12416 = vmatprep.subr.bf16.mxu0 %v16567_v14 }
0x5339   :  { %12346 = vmatpush1.bf16.msra.mxu1 %v16568_v33  ;;  %12418 = vmatpush1.bf16.msra.mxu0 %v16569_v6 }
0x533a   :  { %12348 = vmatprep.subr.bf16.mxu1 %v16570_v5  ;;  %12423 = vmatprep.subr.bf16.mxu0 %v16571_v54  ;;  %v16575_v5 = vld [vmem:[#allocation13_spill] sm:$0xff] }
0x533d   :  { %12350 = vmatpush1.bf16.msra.mxu1 %v16572_v32  ;;  %v16576_v32 = vld [vmem:[#allocation52_spill] sm:$0xff] }
0x533e   :  { %12352 = vmatprep.subr.bf16.mxu1 %v16573_v59 }
0x5341   :  { %12354 = vmatpush1.bf16.msra.mxu1 %v16574_v11  ;;  %v16578_v11 = vld [vmem:[#allocation54_spill] sm:$0xff] }
0x5342   :  { %12419 = vmatprep.subr.bf16.mxu1 %v16571_v54  ;;  %v16583_v54 = vld [vmem:[#allocation44_spill] sm:$0xff] }
0x53cf   :  { %v8462_v58 = vpop.f32.mrb[68].mxu0 }
0x53d0   :  { %v10291_v38 = vpop.f32.mrb[69].mxu0  ;;  %v8468_v62 = vrot.slane %v8462_v58, 7 }
0x53d1   :  { %v16579_v38 = vmov 0.0  }
0x53d7   :  { %v8373_v14 = vpop.f32.mrb[64].mxu1 }
0x53d8   :  { %v10284_v61 = vpop.f32.mrb[65].mxu1  ;;  %v8469_v33 = vsel %vm1560_vm6, %v8468_v62, %v8373_v14  ;;  %v16581_v62 = vld [vmem:[#allocation12_spill] sm:$0xff] }
0x53d9   :  { %8535 = vmatprep.mubr.f32.mxu1 %v8469_v33  ;;  %8606 = vmatprep.mubr.f32.mxu0 %v8469_v33  ;;  %v16580_v61 = vld [vmem:[#allocation11_spill] sm:$0xff] }
0x53da   :  { %8536 = vmatmul.mubr.f32.vlgmr.msra.gmra.mrb[66].mxu1 %v16575_v5  ;;  %8607 = vmatmul.mubr.f32.vlgmr.msra.gmra.mrb[70].mxu0 %v16575_v5  ;;  %v16582_v33 = vld [vmem:[#allocation43_spill] sm:$0xff] }
0x53db   :  { %12422 = vmatpush3.bf16.msk.msra.mxu1 %vm13680_vm4, %v16576_v32  ;;  %12426 = vmatpush3.bf16.msk.msra.mxu0 %vm13680_vm4, %v16578_v11 }
0x53dc   :  { %10303 = vmatprep.mubr.msk.f32.mxu0 %vm13165_vm8, %v16579_v38  ;;  %10296 = vmatprep.mubr.msk.f32.mxu1 %vm13165_vm8, %v16579_v38  ;;  %v16585_v38 = vld [vmem:[#allocation45_spill] sm:$0xff] }
0x53dd   :  { %12428 = vmatprep.subr.bf16.mxu1 %v16580_v61  ;;  %12492 = vmatprep.subr.bf16.mxu0 %v16581_v62 }
0x54ad   :  { %v8537_v58 = vpop.f32.mrb[66].mxu1  ;;  %v8608_v14 = vpop.f32.mrb[70].mxu0 }
0x54ae   :  { %v8538_v5 = vadd.f32 %v8537_v58, %v16582_v33  ;;  %v8539_v59 = vpop.f32.mrb[67].mxu1  ;;  %v8610_v32 = vpop.f32.mrb[71].mxu0  ;;  %v8609_v7 = vadd.f32 %v8608_v14, %v16585_v38 }
0x54af   :  { %v8540_v56 = vadd.f32 %v8539_v59, %v16583_v54  ;;  %v8611_v4 = vadd.f32 %v8610_v32, %v16584_v23 }
0x54b0   :  { %v9817_v6 = vmul.f32 -1.442695, %v8538_v5 }
0x54b1   :  { %v9818_v11 = vmul.f32 -1.442695, %v8540_v56  ;;  %v9819_v15 = vmul.f32 -1.442695, %v8611_v4 }
0x54b2   :  { %13030 = vpow2.f32 %v9817_v6 }
0x54b3   :  { %13032 = vpow2.f32 %v9818_v11  ;;  %v16586_v11 = vld [vmem:[#allocation25_spill] sm:$0xff] }
0x54b4   :  { %13034 = vpow2.f32 %v9819_v15 }
0x54b5   :  { %13036 = vtanh.f32 %v8609_v7 }
0x54bc   :  { %v13031_v61 = vpop.eup %13030 }
0x54bd   :  { %v13033_v9 = vpop.eup %13032  ;;  %v8616_v62 = vadd.f32 1.0, %v13031_v61 }
0x54be   :  { %v8622_v27 = vadd.f32 1.0, %v13033_v9  ;;  %v13035_v58 = vpop.eup %13034  ;;  %v16589_v9 = vld [vmem:[#allocation48_spill] sm:$0xff] }
0x54bf   :  { %13038 = vrcp.f32 %v8616_v62  ;;  %v13037_v33 = vpop.eup %13036  ;;  %v8629_v6 = vadd.f32 1.0, %v13035_v58  ;;  %v16590_v58 = vld [vmem:[#allocation50_spill] sm:$0xff] }
0x54c0   :  { %13040 = vrcp.f32 %v8622_v27 }
0x54c1   :  { %13042 = vrcp.f32 %v8629_v6  ;;  %v16592_v6 = vld [vmem:[#allocation53_spill] sm:$0xff] }
0x54c9   :  { %v13039_v59 = vpop.eup %13038 }
0x54ca   :  { %v13041_v5 = vpop.eup %13040  ;;  %v8633_v56 = vmul.f32 %v13039_v59, %v13037_v33  ;;  %v16591_v59 = vld [vmem:[#allocation51_spill] sm:$0xff] }
0x54cb   :  { %v8632_v54 = vmul.f32 %v13041_v5, %v16586_v11  ;;  %v13043_v4 = vpop.eup %13042 }
0x54cd   :  { %v15495_v32 = vadd.f32 %v8633_v56, %v8632_v54 }
0x54cf   :  { %16587 = vst [vmem:[#allocation27_spill] sm:$0xff] %v15495_v32  ;;  %13044 = vtanh.f32 %v15495_v32 }
0x54d9   :  { %v13045_v14 = vpop.eup %13044 }
0x54da   :  { %v15498_v15 = vmul.f32 %v13045_v14, %v13043_v4  ;;  %v16593_v4 = vld [vmem:[#allocation55_spill] sm:$0xff] }
0x54dc   :  { %16588 = vst [vmem:[#allocation14_spill] sm:$0xff] %v15498_v15  ;;  %v8644_v27 = vrot.slane %v15498_v15, %v16589_v9 }
0x54de   :  { %v8652_v7 = vrot.slane %v8644_v27, %v16589_v9  ;;  %v8645_v61 = vcombine.high %v8644_v27, %v8644_v27 }
0x54e0   :  { %v8663_v33 = vrot.slane %v8652_v7, %v13627_v21  ;;  %v8659_v62 = vrot.slane %v8645_v61, %v16589_v9 }
0x54e2   :  { %v8666_v54 = vmul.f32 %v8663_v33, %v16590_v58  ;;  %v8665_v5 = vmul.f32 %v8663_v33, %v16591_v59  ;;  %v8674_v56 = vrot.slane %v8659_v62, %v13627_v21 }
0x54e4   :  { %8669 = vadd.xlane.f32.xlu0 %v8666_v54  ;;  %8667 = vadd.xlane.f32.xlu1 %v8665_v5  ;;  %v8676_v11 = vmul.f32 %v8674_v56, %v16592_v6  ;;  %v8677_v14 = vmul.f32 %v8674_v56, %v16593_v4 }
0x54e8   :  { %8678 = vadd.xlane.f32.xlu1 %v8676_v11 }
0x54ec   :  { %8680 = vadd.xlane.f32.xlu1 %v8677_v14 }
0x5571   :  { %v8668_v32 = vpop.xlane.xlu1 %8667  ;;  %v8670_v27 = vpop.xlane.xlu0 %8669 }
0x5572   :  { %8687 = vperm.xlu1 %12633, %v8668_v32  }
0x5575   :  { %v8679_v7 = vpop.xlane.xlu1 %8678 }
0x5576   :  { %8690 = vperm.xlu1 %12633, %v8670_v27  }
0x5579   :  { %v8681_v61 = vpop.xlane.xlu1 %8680 }
0x557a   :  { %8693 = vperm.xlu1 %12633, %v8679_v7   ;;  %8696 = vperm.xlu0 %12632, %v8681_v61  }
0x55f1   :  { %v8688_v58 = vpop.permute.xlu1 %8687 }
0x55f2   :  { %v8701_v6 = vrot.slane %v8688_v58, %v13723_v60 }
0x55f5   :  { %v8691_v33 = vpop.permute.xlu1 %8690 }
0x55f6   :  { %v8705_v62 = vrot.slane %v8691_v33, %v13726_v50 }
0x55f8   :  { %v8706_v14 = vsel %vm1549_vm5, %v8705_v62, %v8701_v6 }
0x55f9   :  { %v8697_v54 = vpop.permute.xlu0 %8696  ;;  %v8694_v5 = vpop.permute.xlu1 %8693 }
0x55fa   :  { %v8714_v11 = vrot.slane %v8697_v54, %v13726_v50  ;;  %v8710_v56 = vrot.slane %v8694_v5, %v13723_v60 }
0x55fc   :  { %v8715_v4 = vsel %vm1549_vm5, %v8714_v11, %v8710_v56 }
0x55fd   :  { %v8716_v59 = vsel %vm1560_vm6, %v8715_v4, %v8706_v14 }
0x55fe   :  { %v8718_v9 = vsel %vm1563_vm7, %v8716_v59, -inf }
0x55ff   :  { %8719 = vmax.xlane.f32.xlu1 %v8718_v9 }
0x568c   :  { %v8720_v38 = vpop.xlane.xlu1 %8719 }
0x568d   :  { %v8725_v33 = vrot.slane %v8720_v38, %v13627_v21  ;;  %v8729_v23 = vrot.slane %v8720_v38, %v13633_v26 }
0x568f   :  { %v8732_v15 = vsub.f32 %v8668_v32, %v8725_v33  ;;  %v8733_v58 = vsub.f32 %v8670_v27, %v8725_v33  ;;  %v8734_v54 = vsub.f32 %v8679_v7, %v8729_v23  ;;  %v8735_v31 = vsub.f32 %v8681_v61, %v8729_v23 }
0x5691   :  { %v8736_v35 = vmul.f32 1.442695, %v8732_v15  ;;  %v8738_v5 = vmul.f32 1.442695, %v8733_v58  ;;  %v8740_v6 = vmul.f32 1.442695, %v8734_v54 }
0x5692   :  { %v8742_v62 = vmul.f32 1.442695, %v8735_v31 }
0x5693   :  { %13046 = vpow2.f32 %v8736_v35 }
0x5694   :  { %13048 = vpow2.f32 %v8738_v5 }
0x5695   :  { %13050 = vpow2.f32 %v8740_v6 }
0x5696   :  { %13052 = vpow2.f32 %v8742_v62 }
0x569d   :  { %v13047_v4 = vpop.eup %13046 }
0x569e   :  { %8749 = vperm.xlu0 %12632, %v13047_v4   ;;  %v13049_v9 = vpop.eup %13048 }
0x569f   :  { %v13051_v59 = vpop.eup %13050 }
0x56a0   :  { %v13053_v11 = vpop.eup %13052 }
0x56a2   :  { %8752 = vperm.xlu0 %12632, %v13049_v9  }
0x56a6   :  { %8755 = vperm.xlu0 %12632, %v13051_v59  }
0x56aa   :  { %8758 = vperm.xlu0 %12632, %v13053_v11  }
0x571d   :  { %v8750_v38 = vpop.permute.xlu0 %8749 }
0x571e   :  { %v8763_v23 = vrot.slane %v8750_v38, %v13723_v60 }
0x5721   :  { %v8753_v32 = vpop.permute.xlu0 %8752 }
0x5722   :  { %v8767_v35 = vrot.slane %v8753_v32, %v13726_v50 }
0x5724   :  { %v8768_v61 = vsel %vm1549_vm5, %v8767_v35, %v8763_v23 }
0x5725   :  { %v8756_v15 = vpop.permute.xlu0 %8755 }
0x5726   :  { %v8772_v7 = vrot.slane %v8756_v15, %v13723_v60 }
0x5729   :  { %v8759_v27 = vpop.permute.xlu0 %8758 }
0x572a   :  { %v8776_v31 = vrot.slane %v8759_v27, %v13726_v50 }
0x572c   :  { %v8777_v56 = vsel %vm1549_vm5, %v8776_v31, %v8772_v7 }
0x572d   :  { %v8778_v14 = vsel %vm1560_vm6, %v8777_v56, %v8768_v61 }
0x572e   :  { %v8780_v33 = vsel %vm1563_vm7, %v8778_v14, 0.0 }
0x572f   :  { %8781 = vadd.xlane.f32.xlu0 %v8780_v33  ;;  %v16624_v33 = vld [vmem:[#allocation44_spill] sm:$0xff] }
0x57bc   :  { %v8782_v58 = vpop.xlane.xlu0 %8781 }
0x57bd   :  { %13054 = vrcp.f32 %v8782_v58 }
0x57c7   :  { %v13055_v54 = vpop.eup %13054 }
0x57c8   :  { %v8792_v5 = vrot.slane %v13055_v54, %v13633_v26  ;;  %v8788_v38 = vrot.slane %v13055_v54, %v13627_v21 }
0x57ca   :  { %v8797_v6 = vmul.f32 %v13051_v59, %v8792_v5  ;;  %v8798_v62 = vmul.f32 %v13053_v11, %v8792_v5  ;;  %v8795_v32 = vmul.f32 %v13047_v4, %v8788_v38  ;;  %v8796_v15 = vmul.f32 %v13049_v9, %v8788_v38 }
0x57cc   :  { %8891 = vperm.xlu1 %12633, %v8797_v6   ;;  %v16625_v6 = vld [vmem:[#allocation47_spill] sm:$0xff] }
0x57d0   :  { %8894 = vperm.xlu1 %12633, %v8798_v62  }
0x57d4   :  { %8802 = vperm.xlu1 %12633, %v8795_v32   ;;  %v16626_v32 = vld [vmem:[#allocation45_spill] sm:$0xff] }
0x57d8   :  { %8805 = vperm.xlu1 %12633, %v8796_v15  }
0x584b   :  { %v8892_v35 = vpop.permute.xlu1 %8891 }
0x584c   :  { %v8899_v23 = vrot.slane %v8892_v35, %v13723_v60 }
0x584f   :  { %v8895_v27 = vpop.permute.xlu1 %8894 }
0x5850   :  { %v8903_v7 = vrot.slane %v8895_v27, %v13726_v50 }
0x5852   :  { %v8904_v31 = vsel %vm1549_vm5, %v8903_v7, %v8899_v23 }
0x5853   :  { %10304 = vmatmul.mubr.msk.f32.vlgmr.msra.gmra.mrb[72].mxu0 %vm86_vm0, %v8904_v31  ;;  %v8803_v59 = vpop.permute.xlu1 %8802 }
0x5854   :  { %12494 = vmatpush1.bf16.msra.mxu0 %v13471_v42  ;;  %v8810_v4 = vrot.slane %v8803_v59, %v13723_v60  ;;  %v16608_v42 = vld [vmem:[#allocation40_spill] sm:$0xff] }
0x5855   :  { %12496 = vmatprep.subr.bf16.mxu0 %v13473_v44  ;;  %v16609_v44 = vld [vmem:[#allocation24_spill] sm:$0xff] }
0x5857   :  { %v8806_v11 = vpop.permute.xlu1 %8805 }
0x5858   :  { %v8814_v9 = vrot.slane %v8806_v11, %v13726_v50  ;;  %12498 = vmatpush1.bf16.msra.mxu0 %v13478_v53  ;;  %v16610_v53 = vld [vmem:[#allocation41_spill] sm:$0xff] }
0x5859   :  { %12500 = vmatprep.subr.bf16.mxu0 %v13481_v55  ;;  %v16611_v55 = vld [vmem:[#allocation26_spill] sm:$0xff] }
0x585a   :  { %v8815_v61 = vsel %vm1549_vm5, %v8814_v9, %v8810_v4 }
0x585b   :  { %10297 = vmatmul.mubr.msk.f32.vlgmr.msra.gmra.mrb[68].mxu1 %vm86_vm0, %v8815_v61 }
0x585c   :  { %12430 = vmatpush1.bf16.msra.mxu1 %v13398_v12  ;;  %12502 = vmatpush1.bf16.msra.mxu0 %v13486_v3  ;;  %v16594_v12 = vld [vmem:[#allocation31_spill] sm:$0xff]  ;;  %v16612_v3 = vld [vmem:[#allocation42_spill] sm:$0xff] }
0x585d   :  { %12432 = vmatprep.subr.bf16.mxu1 %v13400_v13  ;;  %12504 = vmatprep.subr.bf16.mxu0 %v13489_v8  ;;  %v16595_v13 = vld [vmem:[#allocation17_spill] sm:$0xff]  ;;  %v16613_v8 = vld [vmem:[#allocation28_spill] sm:$0xff] }
0x5860   :  { %12434 = vmatpush1.bf16.msra.mxu1 %v13404_v10  ;;  %12506 = vmatpush1.bf16.msra.mxu0 %v13492_v18  ;;  %v16596_v10 = vld [vmem:[#allocation33_spill] sm:$0xff]  ;;  %v16614_v18 = vmov 0.0|0.0  }
0x5861   :  { %12436 = vmatprep.subr.bf16.mxu1 %v13407_v17  ;;  %12508 = vmatprep.subr.bf16.mxu0 %v13495_v19  ;;  %v16597_v17 = vld [vmem:[#allocation18_spill] sm:$0xff] }
0x5862   :  { %v16615_v19 = vld [vmem:[#allocation30_spill] sm:$0xff] }
0x5864   :  { %12438 = vmatpush1.bf16.msra.mxu1 %v13412_v24  ;;  %12510 = vmatpush1.bf16.msra.mxu0 %v13498_v36  ;;  %v16598_v24 = vld [vmem:[#allocation35_spill] sm:$0xff]  ;;  %v16616_v36 = vld [vmem:[#allocation32_spill] sm:$0xff] }
0x5865   :  { %12440 = vmatprep.subr.bf16.mxu1 %v13416_v25  ;;  %12512 = vmatprep.subr.bf16.mxu0 %v13501_v37  ;;  %v16599_v25 = vld [vmem:[#allocation19_spill] sm:$0xff]  ;;  %v16617_v37 = vld [vmem:[#allocation34_spill] sm:$0xff] }
0x5868   :  { %12442 = vmatpush1.bf16.msra.mxu1 %v13419_v30  ;;  %12514 = vmatpush1.bf16.msra.mxu0 %v13504_v47  ;;  %v16600_v30 = vld [vmem:[#allocation36_spill] sm:$0xff] }
0x5869   :  { %12444 = vmatprep.subr.bf16.mxu1 %v13422_v34  ;;  %12516 = vmatprep.subr.bf16.mxu0 %v13507_v48  ;;  %v16601_v34 = vld [vmem:[#allocation20_spill] sm:$0xff] }
0x586c   :  { %12446 = vmatpush1.bf16.msra.mxu1 %v13425_v40  ;;  %12518 = vmatpush1.bf16.msra.mxu0 %v13510_v63  ;;  %v16602_v40 = vld [vmem:[#allocation37_spill] sm:$0xff] }
0x586d   :  { %12448 = vmatprep.subr.bf16.mxu1 %v13428_v41  ;;  %12520 = vmatprep.subr.bf16.mxu0 %v13513_v0  ;;  %v16603_v41 = vld [vmem:[#allocation21_spill] sm:$0xff] }
0x5870   :  { %12450 = vmatpush1.bf16.msra.mxu1 %v13431_v45  ;;  %12522 = vmatpush1.bf16.msra.mxu0 %v13516_v16  ;;  %v16604_v45 = vld [vmem:[#allocation38_spill] sm:$0xff] }
0x5871   :  { %12452 = vmatprep.subr.bf16.mxu1 %v13434_v46  ;;  %12524 = vmatprep.subr.bf16.mxu0 %v13519_v20  ;;  %v16605_v46 = vld [vmem:[#allocation22_spill] sm:$0xff] }
0x5874   :  { %12454 = vmatpush1.bf16.msra.mxu1 %v13437_v51  ;;  %12526 = vmatpush1.bf16.msra.mxu0 %v13525_v49  ;;  %v16606_v51 = vld [vmem:[#allocation39_spill] sm:$0xff]  ;;  %v16618_v49 = vld [vmem:[#allocation14_spill] sm:$0xff] }
0x5875   :  { %12456 = vmatprep.subr.bf16.mxu1 %v13440_v52  ;;  %12528 = vmatprep.subr.bf16.mxu0 %v13532_v1  ;;  %v16607_v52 = vld [vmem:[#allocation23_spill] sm:$0xff]  ;;  %v16619_v1 = vld [vmem:[#allocation52_spill] sm:$0xff] }
0x5878   :  { %12458 = vmatpush1.bf16.msra.mxu1 %v15993_v43  ;;  %12530 = vmatpush1.bf16.msra.mxu0 %v15994_v57  ;;  %v16621_v57 = vld [vmem:[#allocation54_spill] sm:$0xff] }
0x5879   :  { %12460 = vmatprep.subr.bf16.mxu1 %v15995_v39  ;;  %12532 = vmatprep.subr.bf16.mxu0 %v15996_v28  ;;  %v16622_v39 = vmov 0.0  }
0x587c   :  { %12462 = vmatpush1.bf16.msra.mxu1 %v15997_v22  ;;  %12534 = vmatpush1.bf16.msra.mxu0 %v15998_v2  ;;  %v16623_v2 = vld [vmem:[#allocation43_spill] sm:$0xff] }
0x587d   :  { %12464 = vmatprep.subr.bf16.mxu1 %v15999_v29  ;;  %12536 = vmatprep.subr.bf16.mxu0 %v16594_v12  ;;  %v16627_v12 = vld [vmem:[#allocation27_spill] sm:$0xff] }
0x5880   :  { %12466 = vmatpush1.bf16.msra.mxu1 %v16595_v13  ;;  %12538 = vmatpush1.bf16.msra.mxu0 %v16596_v10 }
0x5881   :  { %12468 = vmatprep.subr.bf16.mxu1 %v16597_v17  ;;  %12540 = vmatprep.subr.bf16.mxu0 %v16598_v24 }
0x5884   :  { %12470 = vmatpush1.bf16.msra.mxu1 %v16599_v25  ;;  %12542 = vmatpush1.bf16.msra.mxu0 %v16600_v30  ;;  %v16628_v30 = vld [vmem:[#allocation48_spill] sm:$0xff] }
0x5885   :  { %12472 = vmatprep.subr.bf16.mxu1 %v16601_v34  ;;  %12544 = vmatprep.subr.bf16.mxu0 %v16602_v40 }
0x5888   :  { %12474 = vmatpush1.bf16.msra.mxu1 %v16603_v41  ;;  %12546 = vmatpush1.bf16.msra.mxu0 %v16604_v45 }
0x5889   :  { %12476 = vmatprep.subr.bf16.mxu1 %v16605_v46  ;;  %12548 = vmatprep.subr.bf16.mxu0 %v16606_v51  ;;  %v16629_v51 = vld [vmem:[#allocation50_spill] sm:$0xff] }
0x588c   :  { %12478 = vmatpush1.bf16.msra.mxu1 %v16607_v52  ;;  %12550 = vmatpush1.bf16.msra.mxu0 %v16608_v42  ;;  %v16630_v42 = vld [vmem:[#allocation51_spill] sm:$0xff] }
0x588d   :  { %12480 = vmatprep.subr.bf16.mxu1 %v16609_v44  ;;  %12552 = vmatprep.subr.bf16.mxu0 %v16610_v53 }
0x5890   :  { %12482 = vmatpush1.bf16.msra.mxu1 %v16611_v55  ;;  %12554 = vmatpush1.bf16.msra.mxu0 %v16612_v3  ;;  %v16631_v55 = vld [vmem:[#allocation53_spill] sm:$0xff] }
0x5891   :  { %12484 = vmatprep.subr.bf16.mxu1 %v16613_v8  ;;  %12559 = vmatprep.subr.bf16.mxu0 %v16614_v18  ;;  %v16632_v8 = vld [vmem:[#allocation55_spill] sm:$0xff] }
0x5894   :  { %12486 = vmatpush1.bf16.msra.mxu1 %v16615_v19 }
0x5895   :  { %12488 = vmatprep.subr.bf16.mxu1 %v16616_v36 }
0x5898   :  { %12490 = vmatpush1.bf16.msra.mxu1 %v16617_v37 }
0x5899   :  { %12555 = vmatprep.subr.bf16.mxu1 %v16614_v18 }
0x5926   :  { %v8973_v47 = vpop.f32.mrb[72].mxu0 }
0x5927   :  { %v10305_v48 = vpop.f32.mrb[73].mxu0  ;;  %v8979_v63 = vrot.slane %v8973_v47, 7 }
0x592e   :  { %v8884_v0 = vpop.f32.mrb[68].mxu1 }
0x592f   :  { %v10298_v16 = vpop.f32.mrb[69].mxu1  ;;  %v8980_v20 = vsel %vm1560_vm6, %v8979_v63, %v8884_v0 }
0x5930   :  { %9046 = vmatprep.mubr.f32.mxu1 %v8980_v20  ;;  %9117 = vmatprep.mubr.f32.mxu0 %v8980_v20 }
0x5931   :  { %9047 = vmatmul.mubr.f32.vlgmr.msra.gmra.mrb[70].mxu1 %v16618_v49  ;;  %9118 = vmatmul.mubr.f32.vlgmr.msra.gmra.mrb[74].mxu0 %v16618_v49 }
0x5932   :  { %12558 = vmatpush3.bf16.msk.msra.mxu1 %vm13680_vm4, %v16619_v1  ;;  %12562 = vmatpush3.bf16.msk.msra.mxu0 %vm13680_vm4, %v16621_v57 }
0x5933   :  { %10317 = vmatprep.mubr.msk.f32.mxu0 %vm13165_vm8, %v16622_v39  ;;  %10310 = vmatprep.mubr.msk.f32.mxu1 %vm13165_vm8, %v16622_v39 }
0x5934   :  { %12595 = vmatprep.subr.bf16.mxu0 %v16614_v18 }
0x5a04   :  { %v9048_v28 = vpop.f32.mrb[70].mxu1  ;;  %v9119_v22 = vpop.f32.mrb[74].mxu0 }
0x5a05   :  { %v9049_v29 = vadd.f32 %v9048_v28, %v16623_v2  ;;  %v9050_v56 = vpop.f32.mrb[71].mxu1  ;;  %v9121_v14 = vpop.f32.mrb[75].mxu0  ;;  %v9120_v15 = vadd.f32 %v9119_v22, %v16626_v32 }
0x5a06   :  { %v9051_v58 = vadd.f32 %v9050_v56, %v16624_v33  ;;  %v9122_v62 = vadd.f32 %v9121_v14, %v16625_v6 }
0x5a07   :  { %v9826_v54 = vmul.f32 -1.442695, %v9049_v29 }
0x5a08   :  { %v9827_v5 = vmul.f32 -1.442695, %v9051_v58  ;;  %v9828_v38 = vmul.f32 -1.442695, %v9122_v62 }
0x5a09   :  { %13056 = vpow2.f32 %v9826_v54 }
0x5a0a   :  { %13058 = vpow2.f32 %v9827_v5 }
0x5a0b   :  { %13060 = vpow2.f32 %v9828_v38 }
0x5a0c   :  { %13062 = vtanh.f32 %v9120_v15 }
0x5a13   :  { %v13057_v35 = vpop.eup %13056 }
0x5a14   :  { %v13059_v27 = vpop.eup %13058  ;;  %v9127_v23 = vadd.f32 1.0, %v13057_v35 }
0x5a15   :  { %v9133_v7 = vadd.f32 1.0, %v13059_v27  ;;  %v13061_v31 = vpop.eup %13060 }
0x5a16   :  { %13064 = vrcp.f32 %v9127_v23  ;;  %v13063_v59 = vpop.eup %13062  ;;  %v9140_v61 = vadd.f32 1.0, %v13061_v31 }
0x5a17   :  { %13066 = vrcp.f32 %v9133_v7 }
0x5a18   :  { %13068 = vrcp.f32 %v9140_v61 }
0x5a20   :  { %v13065_v11 = vpop.eup %13064 }
0x5a21   :  { %v13067_v4 = vpop.eup %13066  ;;  %v9144_v9 = vmul.f32 %v13065_v11, %v13063_v59 }
0x5a22   :  { %v9143_v13 = vmul.f32 %v13067_v4, %v16627_v12  ;;  %v13069_v17 = vpop.eup %13068 }
0x5a24   :  { %v9145_v10 = vadd.f32 %v9144_v9, %v9143_v13 }
0x5a26   :  { %13070 = vtanh.f32 %v9145_v10 }
0x5a30   :  { %v13071_v24 = vpop.eup %13070 }
0x5a31   :  { %v15621_v25 = vmul.f32 %v13071_v24, %v13069_v17 }
0x5a33   :  { %v9155_v34 = vrot.slane %v15621_v25, %v16628_v30 }
0x5a35   :  { %v9163_v40 = vrot.slane %v9155_v34, %v16628_v30  ;;  %v9156_v41 = vcombine.high %v9155_v34, %v9155_v34 }
0x5a37   :  { %v9174_v45 = vrot.slane %v9163_v40, %v13627_v21  ;;  %v9170_v46 = vrot.slane %v9156_v41, %v16628_v30 }
0x5a39   :  { %v9177_v52 = vmul.f32 %v9174_v45, %v16629_v51  ;;  %v9176_v44 = vmul.f32 %v9174_v45, %v16630_v42  ;;  %v9185_v53 = vrot.slane %v9170_v46, %v13627_v21 }
0x5a3b   :  { %9180 = vadd.xlane.f32.xlu0 %v9177_v52  ;;  %9178 = vadd.xlane.f32.xlu1 %v9176_v44  ;;  %v9187_v3 = vmul.f32 %v9185_v53, %v16631_v55  ;;  %v9188_v19 = vmul.f32 %v9185_v53, %v16632_v8  ;;  %v1277_v44 = vld [vmem:[#allocation5 + $0x80] sm:$0xff]  ;;  %v1278_v53 = vld [vmem:[#allocation5 + $0x88] sm:$0xff] }
0x5a3c   :  { %v12563_v55 = vpack.c.bf16 %v1278_v53, %v1277_v44  ;;  %v1297_v44 = vld [vmem:[%s15750_s12 + $0x18] sm:$0xff] }
0x5a3e   :  { %12564 = vmatprep.subr.bf16.mxu1 %v12563_v55  ;;  %v1298_v55 = vld [vmem:[%s15750_s12 + $0x20] sm:$0xff] }
0x5a3f   :  { %9189 = vadd.xlane.f32.xlu0 %v9187_v3 }
0x5a43   :  { %9191 = vadd.xlane.f32.xlu0 %v9188_v19 }
0x5ac8   :  { %v9181_v36 = vpop.xlane.xlu0 %9180  ;;  %v9179_v37 = vpop.xlane.xlu1 %9178 }
0x5ac9   :  { %9198 = vperm.xlu0 %12632, %v9179_v37  }
0x5acc   :  { %v9190_v47 = vpop.xlane.xlu0 %9189 }
0x5acd   :  { %9201 = vperm.xlu0 %12632, %v9181_v36   ;;  %9204 = vperm.xlu1 %12633, %v9190_v47  }
0x5ad0   :  { %v9192_v48 = vpop.xlane.xlu0 %9191 }
0x5ad1   :  { %9207 = vperm.xlu0 %12632, %v9192_v48  }
0x5b48   :  { %v9199_v63 = vpop.permute.xlu0 %9198 }
0x5b49   :  { %v9212_v1 = vrot.slane %v9199_v63, %v13723_v60  ;;  %v1280_v63 = vld [vmem:[#allocation5 + $0x98] sm:$0xff] }
0x5b4c   :  { %v9202_v0 = vpop.permute.xlu0 %9201  ;;  %v9205_v16 = vpop.permute.xlu1 %9204 }
0x5b4d   :  { %v9216_v20 = vrot.slane %v9202_v0, %v13726_v50  ;;  %v9221_v43 = vrot.slane %v9205_v16, %v13723_v60 }
0x5b4f   :  { %v9217_v28 = vsel %vm1549_vm5, %v9216_v20, %v9212_v1 }
0x5b50   :  { %v9208_v49 = vpop.permute.xlu0 %9207 }
0x5b51   :  { %v9225_v57 = vrot.slane %v9208_v49, %v13726_v50 }
0x5b53   :  { %v9226_v22 = vsel %vm1549_vm5, %v9225_v57, %v9221_v43  ;;  %v1263_v43 = vld [vmem:[#allocation5 + $0x10] sm:$0xff]  ;;  %v1264_v57 = vld [vmem:[#allocation5 + $0x18] sm:$0xff] }
0x5b54   :  { %v9227_v2 = vsel %vm1560_vm6, %v9226_v22, %v9217_v28  ;;  %v1281_v22 = vld [vmem:[#allocation5 + $0xa0] sm:$0xff] }
0x5b55   :  { %v9229_v29 = vsel %vm1563_vm7, %v9227_v2, -inf  ;;  %v1282_v2 = vld [vmem:[#allocation5 + $0xa8] sm:$0xff] }
0x5b56   :  { %9230 = vmax.xlane.f32.xlu0 %v9229_v29  ;;  %v12571_v29 = vpack.c.bf16 %v1282_v2, %v1281_v22  ;;  %v1307_v22 = vld [vmem:[%s15750_s12 + $0x68] sm:$0xff] }
0x5be3   :  { %v9231_v56 = vpop.xlane.xlu0 %9230 }
0x5be4   :  { %v9236_v14 = vrot.slane %v9231_v56, %v13627_v21  ;;  %v9240_v33 = vrot.slane %v9231_v56, %v13633_v26  ;;  %v1265_v56 = vld [vmem:[#allocation5 + $0x20] sm:$0xff] }
0x5be6   :  { %v9243_v58 = vsub.f32 %v9179_v37, %v9236_v14  ;;  %v9244_v54 = vsub.f32 %v9181_v36, %v9236_v14  ;;  %v9245_v6 = vsub.f32 %v9190_v47, %v9240_v33  ;;  %v9246_v38 = vsub.f32 %v9192_v48, %v9240_v33  ;;  %v1261_v37 = vld [vmem:[#allocation5] sm:$0xff]  ;;  %v1262_v47 = vld [vmem:[#allocation5 + $0x8] sm:$0xff]  ;;  %v1279_v48 = vld [vmem:[#allocation5 + $0x90] sm:$0xff] }
0x5be7   :  { %v12565_v49 = vpack.c.bf16 %v1262_v47, %v1261_v37  ;;  %v12567_v1 = vpack.c.bf16 %v1280_v63, %v1279_v48  ;;  %v1266_v14 = vld [vmem:[#allocation5 + $0x28] sm:$0xff]  ;;  %v1283_v33 = vld [vmem:[#allocation5 + $0xb0] sm:$0xff]  ;;  %v1305_v63 = vld [vmem:[%s15750_s12 + $0x58] sm:$0xff] }
0x5be8   :  { %v9247_v5 = vmul.f32 1.442695, %v9243_v58  ;;  %v9249_v62 = vmul.f32 1.442695, %v9244_v54  ;;  %v9251_v32 = vmul.f32 1.442695, %v9245_v6 }
0x5be9   :  { %v9253_v15 = vmul.f32 1.442695, %v9246_v38  ;;  %v1267_v54 = vld [vmem:[#allocation5 + $0x30] sm:$0xff]  ;;  %v1285_v6 = vld [vmem:[#allocation5 + $0xc0] sm:$0xff]  ;;  %v1303_v37 = vld [vmem:[%s15750_s12 + $0x48] sm:$0xff] }
0x5bea   :  { %13072 = vpow2.f32 %v9247_v5  ;;  %v1268_v5 = vld [vmem:[#allocation5 + $0x38] sm:$0xff]  ;;  %v1304_v48 = vld [vmem:[%s15750_s12 + $0x50] sm:$0xff] }
0x5beb   :  { %13074 = vpow2.f32 %v9249_v62  ;;  %v1286_v62 = vld [vmem:[#allocation5 + $0xc8] sm:$0xff]  ;;  %v12577_v38 = vpack.c.bf16 %v1268_v5, %v1267_v54 }
0x5bec   :  { %13076 = vpow2.f32 %v9251_v32  ;;  %v12579_v32 = vpack.c.bf16 %v1286_v62, %v1285_v6 }
0x5bed   :  { %13078 = vpow2.f32 %v9253_v15  ;;  %v1269_v15 = vld [vmem:[#allocation5 + $0x40] sm:$0xff] }
0x5bf4   :  { %v13073_v35 = vpop.eup %13072 }
0x5bf5   :  { %9260 = vperm.xlu1 %12633, %v13073_v35   ;;  %v13075_v27 = vpop.eup %13074 }
0x5bf6   :  { %v13077_v23 = vpop.eup %13076 }
0x5bf7   :  { %v13079_v7 = vpop.eup %13078 }
0x5bf9   :  { %9263 = vperm.xlu1 %12633, %v13075_v27  }
0x5bfd   :  { %9266 = vperm.xlu1 %12633, %v13077_v23  }
0x5c01   :  { %9269 = vperm.xlu1 %12633, %v13079_v7  }
0x5c74   :  { %v9261_v31 = vpop.permute.xlu1 %9260 }
0x5c75   :  { %v9274_v61 = vrot.slane %v9261_v31, %v13723_v60 }
0x5c78   :  { %v9264_v59 = vpop.permute.xlu1 %9263 }
0x5c79   :  { %v9278_v4 = vrot.slane %v9264_v59, %v13726_v50  ;;  %v1271_v59 = vld [vmem:[#allocation5 + $0x50] sm:$0xff] }
0x5c7b   :  { %v9279_v10 = vsel %vm1549_vm5, %v9278_v4, %v9274_v61  ;;  %v1290_v61 = vld [vmem:[#allocation5 + $0xe8] sm:$0xff] }
0x5c7c   :  { %v9267_v11 = vpop.permute.xlu1 %9266 }
0x5c7d   :  { %v9283_v12 = vrot.slane %v9267_v11, %v13723_v60  ;;  %v1272_v11 = vld [vmem:[#allocation5 + $0x58] sm:$0xff] }
0x5c7e   :  { %v12585_v4 = vpack.c.bf16 %v1272_v11, %v1271_v59 }
0x5c80   :  { %v9270_v9 = vpop.permute.xlu1 %9269 }
0x5c81   :  { %v9287_v13 = vrot.slane %v9270_v9, %v13726_v50  ;;  %v1289_v9 = vld [vmem:[#allocation5 + $0xe0] sm:$0xff] }
0x5c83   :  { %v9288_v17 = vsel %vm1549_vm5, %v9287_v13, %v9283_v12  ;;  %v1273_v12 = vld [vmem:[#allocation5 + $0x60] sm:$0xff]  ;;  %v12587_v13 = vpack.c.bf16 %v1290_v61, %v1289_v9 }
0x5c84   :  { %v9289_v24 = vsel %vm1560_vm6, %v9288_v17, %v9279_v10  ;;  %v1274_v10 = vld [vmem:[#allocation5 + $0x68] sm:$0xff]  ;;  %v1291_v17 = vld [vmem:[#allocation5 + $0xf0] sm:$0xff] }
0x5c85   :  { %v9291_v30 = vsel %vm1563_vm7, %v9289_v24, 0.0  ;;  %v1292_v24 = vld [vmem:[#allocation5 + $0xf8] sm:$0xff] }
0x5c86   :  { %9292 = vadd.xlane.f32.xlu1 %v9291_v30  ;;  %v12589_v30 = vpack.c.bf16 %v1274_v10, %v1273_v12 }
0x5d13   :  { %v9293_v34 = vpop.xlane.xlu1 %9292 }
0x5d14   :  { %13080 = vrcp.f32 %v9293_v34  ;;  %v12591_v34 = vpack.c.bf16 %v1292_v24, %v1291_v17 }
0x5d1e   :  { %v13081_v40 = vpop.eup %13080 }
0x5d1f   :  { %v9303_v41 = vrot.slane %v13081_v40, %v13633_v26  ;;  %v9299_v51 = vrot.slane %v13081_v40, %v13627_v21  ;;  %v1275_v40 = vld [vmem:[#allocation5 + $0x70] sm:$0xff] }
0x5d21   :  { %v9308_v45 = vmul.f32 %v13077_v23, %v9303_v41  ;;  %v9309_v46 = vmul.f32 %v13079_v7, %v9303_v41  ;;  %v9306_v52 = vmul.f32 %v13073_v35, %v9299_v51  ;;  %v9307_v42 = vmul.f32 %v13075_v27, %v9299_v51  ;;  %v1270_v35 = vld [vmem:[#allocation5 + $0x48] sm:$0xff]  ;;  %v1287_v27 = vld [vmem:[#allocation5 + $0xd0] sm:$0xff]  ;;  %v1288_v23 = vld [vmem:[#allocation5 + $0xd8] sm:$0xff] }
0x5d22   :  { %v12581_v7 = vpack.c.bf16 %v1270_v35, %v1269_v15  ;;  %v12583_v31 = vpack.c.bf16 %v1288_v23, %v1287_v27  ;;  %v1276_v41 = vld [vmem:[#allocation5 + $0x78] sm:$0xff]  ;;  %v1295_v51 = vld [vmem:[%s15750_s12 + $0x8] sm:$0xff] }
0x5d23   :  { %9402 = vperm.xlu0 %12632, %v9308_v45   ;;  %v12593_v45 = vpack.c.bf16 %v1276_v41, %v1275_v40 }
0x5d27   :  { %9405 = vperm.xlu0 %12632, %v9309_v46   ;;  %v1294_v46 = vld [vmem:[%s15750_s12] sm:$0xff] }
0x5d2b   :  { %9313 = vperm.xlu0 %12632, %v9306_v52   ;;  %v1296_v52 = vld [vmem:[%s15750_s12 + $0x10] sm:$0xff] }
0x5d2c   :  { %v12599_v53 = vpack.c.bf16 %v1297_v44, %v1296_v52 }
0x5d2f   :  { %9316 = vperm.xlu0 %12632, %v9307_v42   ;;  %v12596_v42 = vpack.c.bf16 %v1295_v51, %v1294_v46 }
0x5da2   :  { %v9403_v3 = vpop.permute.xlu0 %9402 }
0x5da3   :  { %v9410_v19 = vrot.slane %v9403_v3, %v13723_v60  ;;  %v1299_v3 = vld [vmem:[%s15750_s12 + $0x28] sm:$0xff] }
0x5da6   :  { %v9406_v8 = vpop.permute.xlu0 %9405 }
0x5da7   :  { %v9414_v26 = vrot.slane %v9406_v8, %v13726_v50  ;;  %v12602_v8 = vpack.c.bf16 %v1299_v3, %v1298_v55 }
0x5da9   :  { %v9415_v36 = vsel %vm1549_vm5, %v9414_v26, %v9410_v19  ;;  %v1300_v19 = vld [vmem:[%s15750_s12 + $0x30] sm:$0xff]  ;;  %v1301_v26 = vld [vmem:[%s15750_s12 + $0x38] sm:$0xff] }
0x5daa   :  { %10318 = vmatmul.mubr.msk.f32.vlgmr.msra.gmra.mrb[76].mxu0 %vm86_vm0, %v9415_v36  ;;  %v9314_v21 = vpop.permute.xlu0 %9313  ;;  %v12605_v36 = vpack.c.bf16 %v1301_v26, %v1300_v19 }
0x5dab   :  { %10352 = vmatprep.mubr.msk.f32.mxu0 %vm13165_vm8, %v16622_v39  ;;  %v9321_v16 = vrot.slane %v9314_v21, %v13723_v60  ;;  %v12569_v39 = vpack.c.bf16 %v1264_v57, %v1263_v43  ;;  %v1284_v60 = vld [vmem:[#allocation5 + $0xb8] sm:$0xff]  ;;  %12597 = vmatpush3.bf16.msra.mxu0 %v12596_v42  ;;  %v1302_v21 = vld [vmem:[%s15750_s12 + $0x40] sm:$0xff] }
0x5dac   :  { %v12575_v58 = vpack.c.bf16 %v1284_v60, %v1283_v33  ;;  %12598 = vmatprep.subr.bf16.mxu0 %v16614_v18  ;;  %v12608_v47 = vpack.c.bf16 %v1303_v37, %v1302_v21 }
0x5dae   :  { %v9317_v0 = vpop.permute.xlu0 %9316 }
0x5daf   :  { %v9325_v20 = vrot.slane %v9317_v0, %v13726_v50  ;;  %v12573_v50 = vpack.c.bf16 %v1266_v14, %v1265_v56  ;;  %12600 = vmatpush3.bf16.msra.mxu0 %v12599_v53  ;;  %v12611_v0 = vpack.c.bf16 %v1305_v63, %v1304_v48  ;;  %v9835_v14 = vld [vmem:[%s15749_s11] ss:$0 sm:$0xff] }
0x5db0   :  { %12601 = vmatprep.subr.bf16.mxu0 %v16614_v18 }
0x5db1   :  { %v9326_v28 = vsel %vm1549_vm5, %v9325_v20, %v9321_v16 }
0x5db2   :  { %10311 = vmatmul.mubr.msk.f32.vlgmr.msra.gmra.mrb[72].mxu1 %vm86_vm0, %v9326_v28  ;;  %v1306_v28 = vld [vmem:[%s15750_s12 + $0x60] sm:$0xff] }
0x5db3   :  { %12566 = vmatpush3.bf16.msra.mxu1 %v12565_v49  ;;  %12603 = vmatpush3.bf16.msra.mxu0 %v12602_v8  ;;  %v12614_v2 = vpack.c.bf16 %v1307_v22, %v1306_v28 }
0x5db4   :  { %12568 = vmatprep.subr.bf16.mxu1 %v12567_v1  ;;  %12604 = vmatprep.subr.bf16.mxu0 %v16614_v18 }
0x5db7   :  { %12570 = vmatpush3.bf16.msra.mxu1 %v12569_v39  ;;  %12606 = vmatpush3.bf16.msra.mxu0 %v12605_v36  ;;  %v1308_v39 = vld [vmem:[%s15750_s12 + $0x70] sm:$0xff] }
0x5db8   :  { %12572 = vmatprep.subr.bf16.mxu1 %v12571_v29  ;;  %12607 = vmatprep.subr.bf16.mxu0 %v16614_v18 }
0x5dbb   :  { %12574 = vmatpush3.bf16.msra.mxu1 %v12573_v50  ;;  %12609 = vmatpush3.bf16.msra.mxu0 %v12608_v47 }
0x5dbc   :  { %12576 = vmatprep.subr.bf16.mxu1 %v12575_v58  ;;  %12610 = vmatprep.subr.bf16.mxu0 %v16614_v18 }
0x5dbf   :  { %12578 = vmatpush3.bf16.msra.mxu1 %v12577_v38  ;;  %12612 = vmatpush3.bf16.msra.mxu0 %v12611_v0 }
0x5dc0   :  { %12580 = vmatprep.subr.bf16.mxu1 %v12579_v32  ;;  %12613 = vmatprep.subr.bf16.mxu0 %v16614_v18 }
0x5dc3   :  { %12582 = vmatpush3.bf16.msra.mxu1 %v12581_v7  ;;  %12615 = vmatpush3.bf16.msra.mxu0 %v12614_v2 }
0x5dc4   :  { %12584 = vmatprep.subr.bf16.mxu1 %v12583_v31  ;;  %12616 = vmatprep.subr.bf16.mxu0 %v16614_v18  ;;  %v9836_v18 = vld [vmem:[%s15751_s13] ss:$0 sm:$0xff] }
0x5dc7   :  { %12586 = vmatpush3.bf16.msra.mxu1 %v12585_v4 }
0x5dc8   :  { %12588 = vmatprep.subr.bf16.mxu1 %v12587_v13 }
0x5dcb   :  { %12590 = vmatpush3.bf16.msra.mxu1 %v12589_v30 }
0x5dcc   :  { %12592 = vmatprep.subr.bf16.mxu1 %v12591_v34 }
0x5dcf   :  { %12594 = vmatpush3.bf16.msra.mxu1 %v12593_v45 }
0x5e7d   :  { %v9484_v16 = vpop.f32.mrb[76].mxu0 }
0x5e7e   :  { %v10319_v20 = vpop.f32.mrb[77].mxu0  ;;  %v9490_v49 = vrot.slane %v9484_v16, 7 }
0x5e85   :  { %v9395_v1 = vpop.f32.mrb[72].mxu1 }
0x5e86   :  { %v10312_v43 = vpop.f32.mrb[73].mxu1  ;;  %v9491_v57 = vsel %vm1560_vm6, %v9490_v49, %v9395_v1 }
0x5e87   :  { %9563 = vmatprep.mubr.f32.mxu1 %v9491_v57 }
0x5e88   :  { %9564 = vmatmul.mubr.f32.vlgmr.msra.gmra.mrb[74].mxu1 %v15621_v25  ;;  %v1309_v25 = vld [vmem:[%s15750_s12 + $0x78] sm:$0xff]  ;;  %s13126_s12 = scalar_lea.vmem %s9655_s1, 32 }
0x5e89   :  { %v12617_v29 = vpack.c.bf16 %v1309_v25, %v1308_v39  ;;  %p13127_p2 = scmp.ne.s32.totalorder %s9655_s1, %s13126_s12  ;;  %p13132_p4 = scmp.lt.s32.totalorder %s13126_s12, %s13126_s12 }
0x5e8b   :  { %12618 = vmatpush3.bf16.msra.mxu0 %v12617_v29  ;;  %p13133_p5 = por %p13132_p4, %p13131_p3 }
0x5e8d   :  { %p13134_p6 = pnand %p13133_p5, %p13127_p2 }
0x5f5b   :  { %v10006_v56 = vpop.f32.mrb[74].mxu1 }
0x5f5c   :  { %v10007_v33 = vpop.f32.mrb[75].mxu1 }
0x5f5d   :  { %v10008_v60 = vadd.f32 %v10007_v33, %v10006_v56 }
0x5f5f   :  { %v9566_v50 = vadd.f32 %v10008_v60, %v9835_v14 }
0x5f61   :  { %v9569_v58 = vmax.f32 %v9566_v50, 0.0 }
0x5f63   :  { %10353 = vmatmul.mubr.f32.vlgmr.msra.gmra.mrb[78].mxu0 %v9569_v58 }
0x6036   :  { %v9642_v54 = vpop.f32.mrb[78].mxu0 }
0x6037   :  { %v9643_v5 = vadd.f32 %v9836_v18, %v9642_v54  ;;  %v10354_v6 = vpop.f32.mrb[79].mxu0 }
0x6039   :  { %9647 = vst.msk [vmem:[#allocation7] sm:$0x3] %vm9646_vm9, %v9643_v5 }
0x603a   :  { %13137 = shalt.err (!%p13134_p6)
}
0x603b   :  { %s13138_s3 = scalar_lea.hbm %s15752_s14, 32 }
0x603c   :  { %p13139_p7 = scmp.ne.s32.totalorder %s15752_s14, %s13138_s3  ;;  %p13142_p8 = scmp.lt.u32.totalorder %s13138_s3, %s15752_s14 }
0x603e   :  { %p13144_p9 = pnand %p13142_p8, %p13139_p7 }
0x6040   :  { %13147 = shalt.err (!%p13144_p9)
}
0x6041   :  { %9657 = dma.vmem_to_hbm [thread:$0]  %s9655_s1, 32, %s15752_s14, [#allocation4]  }
0x6042   :  { %13152 = dma.done.wait [#allocation4], 32  }
0x6043   :  { %13153 = vsyncadd [#allocation4], 4294967264 }
0x6044   :  { %9661 = vsyncpa [#allocation3], 1 }
0x6045   :  { %9662 = vsyncpa [#allocation6], 1 }
0x6046   :  { %9663 = vsyncpa [#allocation4], 1 }

</bundles_post_ra>
